<compile_context>
chip_gen: v7x
topology: tpu7x:2x2x1
jax: 0.10.0
libtpu: 0.0.40
codegen_flags: <defaults>
</compile_context>

<pallas_src>
import functools

import jax
import jax.numpy as jnp
from jax import lax
from jax.experimental import pallas as pl
from jax.experimental.pallas import tpu as pltpu

# Full-f32 matmuls for the plain-JAX pieces (eigh prep / reference), matching kernels.
jax.config.update("jax_default_matmul_precision", "highest")
_PREC = jax.lax.Precision.HIGHEST

_EIG_FLOOR = 1e-30  # clamp eigenvalues before log / power for numerical safety


def _row_block(m, target):
    """Row-block size: `target` or the full extent when the batch is smaller."""
    return target if m >= target else m


# ---------------------------------------------------------------------------
# Kernel 1: lane-dense shared-matrix congruence  A X_b A^T  via the kron trick.
#   out_flat = x_flat @ kron(A, A)^T   with x_flat[b, i*n+j] = X_b[i, j]
# One (bm, n^2) @ (n^2, n^2) MXU matmul per grid step; fully mem-bound regime.
# ---------------------------------------------------------------------------
def _flat_congruence_kernel(x_ref, k_ref, o_ref):
    o_ref[...] = jnp.dot(x_ref[...], k_ref[...],
                         precision=_PREC, preferred_element_type=jnp.float32)


def flat_congruence(x_flat, a, *, block_m=2048):
    """Batched A X A^T on row-major flattened SPD matrices.  x_flat: (M, n^2), a: (n, n)."""
    M, nn = x_flat.shape
    k = jnp.kron(a.astype(jnp.float32), a.astype(jnp.float32)).T   # (n^2, n^2), built in XLA
    bm = _row_block(M, block_m)                    # partial boundary block handled by Pallas
    return pl.pallas_call(
        _flat_congruence_kernel,
        out_shape=jax.ShapeDtypeStruct((M, nn), jnp.float32),
        grid_spec=pltpu.PrefetchScalarGridSpec(
            num_scalar_prefetch=0,
            grid=(pl.cdiv(M, bm),),
            in_specs=[pl.BlockSpec((bm, nn), lambda i: (i, 0)),
                      pl.BlockSpec((nn, nn), lambda i: (0, 0))],   # constant block, stays resident
            out_specs=pl.BlockSpec((bm, nn), lambda i: (i, 0))),
        compiler_params=pltpu.CompilerParams(dimension_semantics=("parallel",)),
    )(x_flat.astype(jnp.float32), k)


# ---------------------------------------------------------------------------
# Kernel 2: fused PowerEig + rotate + bias tail (eval & training).
#   sw   = exp(0.5 * p * log w)            (in-kernel, EUP)
#   Z_b  = (U_b diag(sw_b)) (U_b diag(sw_b))^T  = U_b diag(w_b^p) U_b^T
#   out  = vec_r(A Z_b A^T) = vec_r(Z_b) @ kron(A, A)^T   (lane-dense (bm, n^2) store)
# The kron matmul is split over Z's row index so no value reshape is required:
#   out_flat = sum_i Z[:, i, :] @ K[i*n:(i+1)*n, :]
# Everything is row-local, so partial boundary blocks need no masking.
# ---------------------------------------------------------------------------
def _power_rotate_bias_kernel(u_ref, phl_ref, k_ref, o_ref, *, n):
    sw = jnp.exp(phl_ref[...])                                   # (bm, n) = sqrt(w^p)
    s = u_ref[...] * sw[:, None, :]                              # (bm, n, n)
    z = jnp.einsum("bij,bkj->bik", s, s,
                   precision=_PREC, preferred_element_type=jnp.float32)   # X^p
    acc = jnp.dot(z[:, 0, :], k_ref[0:n, :],
                  precision=_PREC, preferred_element_type=jnp.float32)
    for i in range(1, n):
        acc = acc + jnp.dot(z[:, i, :], k_ref[i * n:(i + 1) * n, :],
                            precision=_PREC, preferred_element_type=jnp.float32)
    o_ref[...] = acc                                             # lane-dense (bm, n^2)


def power_rotate_bias(u, phl, a, *, block_m=256):
    """u: (M, n, n) eigenvectors, phl: (M, n) = 0.5*p*log(w), a: (n, n) -> (M, n^2) flat."""
    M, n, _ = u.shape
    nn = n * n
    k = jnp.kron(a.astype(jnp.float32), a.astype(jnp.float32)).T
    bm = _row_block(M, block_m)
    return pl.pallas_call(
        functools.partial(_power_rotate_bias_kernel, n=n),
        out_shape=jax.ShapeDtypeStruct((M, nn), jnp.float32),
        grid_spec=pltpu.PrefetchScalarGridSpec(
            num_scalar_prefetch=0,
            grid=(pl.cdiv(M, bm),),
            in_specs=[pl.BlockSpec((bm, n, n), lambda i: (i, 0, 0)),
                      pl.BlockSpec((bm, n), lambda i: (i, 0)),
                      pl.BlockSpec((nn, nn), lambda i: (0, 0))],  # constant kron block
            out_specs=pl.BlockSpec((bm, nn), lambda i: (i, 0))),
        compiler_params=pltpu.CompilerParams(dimension_semantics=("parallel",)),
    )(u.astype(jnp.float32), phl.astype(jnp.float32), k)


# ---------------------------------------------------------------------------
# Kernel 3 (training only): fused mean of logm over the batch.
#   sum_b U_b diag(log w_b) U_b^T   accumulated in two partial (n, n) sums
# (leading 'parallel' axis of size 2 -> shared across v7x's two TensorCores; the
# reduction axis is 'arbitrary' with pl.when init).  One compact (bm, 1) row mask
# handles partial/dead boundary blocks via exact-zero selects.
# ---------------------------------------------------------------------------
def _logm_sum_kernel(u_ref, lw_ref, o_ref, *, total_rows, bm, blocks_per_split):
    s_id = pl.program_id(0)
    j = pl.program_id(1)

    @pl.when(j == 0)
    def _():
        o_ref[...] = jnp.zeros_like(o_ref)

    base = (s_id * blocks_per_split + j) * bm
    rows = base + lax.broadcasted_iota(jnp.int32, (bm, 1), 0)
    valid = rows < total_rows                                    # (bm, 1) row mask
    um = jnp.where(valid[:, :, None], u_ref[...], 0.0)           # exact-zero selects: no
    lwm = jnp.where(valid, lw_ref[...], 0.0)                     # garbage reaches the MXU
    uw = um * lwm[:, None, :]
    part = jnp.einsum("bij,bkj->bik", uw, um,
                      precision=_PREC, preferred_element_type=jnp.float32)
    o_ref[...] += jnp.sum(part, axis=0, keepdims=True)


def logm_mean(u, lw, *, block_m=256, splits=2):
    """mean_b U_b diag(lw_b) U_b^T without materializing the per-matrix log tensor."""
    M, n, _ = u.shape
    bm = _row_block(M, block_m)
    n_blocks = pl.cdiv(M, bm)
    per_split = pl.cdiv(n_blocks, splits)
    last = n_blocks - 1

    # Clamp the block index so dead iterations of the 2-way split never DMA out of
    # bounds; their rows fail the mask and contribute exactly zero.
    def in3_map(si, ji):
        return (jnp.minimum(si * per_split + ji, last), 0, 0)

    def in2_map(si, ji):
        return (jnp.minimum(si * per_split + ji, last), 0)

    partial = pl.pallas_call(
        functools.partial(_logm_sum_kernel, total_rows=M, bm=bm,
                          blocks_per_split=per_split),
        out_shape=jax.ShapeDtypeStruct((splits, n, n), jnp.float32),
        grid_spec=pltpu.PrefetchScalarGridSpec(
            num_scalar_prefetch=0,
            grid=(splits, per_split),
            in_specs=[pl.BlockSpec((bm, n, n), in3_map),
                      pl.BlockSpec((bm, n), in2_map)],
            out_specs=pl.BlockSpec((1, n, n), lambda si, ji: (si, 0, 0))),
        compiler_params=pltpu.CompilerParams(
            dimension_semantics=("parallel", "arbitrary")),
    )(u.astype(jnp.float32), lw.astype(jnp.float32))
    return jnp.sum(partial, axis=0) / jnp.float32(M)


# ---------------------------------------------------------------------------
# Plain-JAX glue: symmetric matrix functions.
# TODO(synk): batched 16x16 symmetric eigh stays in XLA (no Pallas eigensolver); it is
# the likely end-to-end bottleneck and a lane-packed Jacobi solver is future work.
# ---------------------------------------------------------------------------
def _sym_fn_eig(G, f):
    w, U = jnp.linalg.eigh(G)
    return (U * f(w)[..., None, :]) @ jnp.swapaxes(U, -1, -2)


def sym_sqrtm(G):    return _sym_fn_eig(G, jnp.sqrt)
def sym_invsqrtm(G): return _sym_fn_eig(G, lambda w: 1.0 / jnp.sqrt(w))
def sym_expm(G):     return _sym_fn_eig(G, jnp.exp)


# ---------------------------------------------------------------------------
# DomainAdaptiveBatchNorm forward
# ---------------------------------------------------------------------------
@functools.partial(jax.jit, static_argnames=("training", "rotate", "bias",
                                              "block_rows", "block_mats"))
def dabn_forward(X, running_mean, running_var, R, B, *,
                 training=False, momentum=0.1, eps=1e-5,
                 rotate=True, bias=True,
                 block_rows=2048,   # rows/step for the lane-dense (M, n^2) kron kernel
                 block_mats=256):   # matrices/step for the per-matrix kernels
    N, q, n, _ = X.shape
    M = N * q
    Xf = X.reshape(M, n * n).astype(jnp.float32)   # lane-dense row-major flats (free reshape)

    if training:
        # fn.BaryGeom: Riemannian barycenter, one Karcher-flow step (arithmetic-mean init).
        G = jnp.mean(Xf, axis=0).reshape(n, n)
        Gneg, Gpos = sym_invsqrtm(G), sym_sqrtm(G)
        C0 = flat_congruence(Xf, Gneg, block_m=block_rows)                    # Pallas
        w0, U0 = jnp.linalg.eigh(C0.reshape(M, n, n))
        lw0 = jnp.log(jnp.maximum(w0, _EIG_FLOOR))
        mean_log = logm_mean(U0, lw0, block_m=block_mats)                     # Pallas (fused mean)
        mean = Gpos @ sym_expm(mean_log) @ Gpos
        # Centre at the batch barycenter; fn.dist_riemann**2 comes from the eigenvalues.
        Mneg = sym_invsqrtm(mean)
        Cm = flat_congruence(Xf, Mneg, block_m=block_rows)                    # Pallas
        wm, Um = jnp.linalg.eigh(Cm.reshape(M, n, n))
        lwm = jnp.log(jnp.maximum(wm, _EIG_FLOOR))
        var = jnp.mean(jnp.sum(lwm ** 2, axis=-1))
        # TODO(synk): running_mean / running_var EMA updates (fn.geodesic) are stateful
        # side effects of the PyTorch module; the returned tensor does not depend on them.
    else:
        var = running_var
        Mneg = sym_invsqrtm(running_mean)
        Cm = flat_congruence(Xf, Mneg, block_m=block_rows)                    # Pallas
        wm, Um = jnp.linalg.eigh(Cm.reshape(M, n, n))
        lwm = jnp.log(jnp.maximum(wm, _EIG_FLOOR))

    # PowerEig + rotate + bias, fused in one Pallas kernel.  The scalar p is folded
    # into the (already fused) XLA elementwise producing log(w); exp runs in-kernel.
    p = jnp.sqrt(1.0 / (var + eps))
    phl = (0.5 * p) * lwm                                          # (M, n)

    A = jnp.eye(n, dtype=jnp.float32)
    if rotate:
        A = R.astype(jnp.float32) @ A                              # fn.bimap(Z, R) = R Z R^T
    if bias:
        A = sym_sqrtm(B.astype(jnp.float32)) @ A                   # fn.CongrG(Z, B, 'pos')
    out = power_rotate_bias(Um, phl, A, block_m=block_mats)                  # Pallas (fused tail)
    return out.reshape(N, q, n, n)


# ---------------------------------------------------------------------------
# Pure-JAX reference (eval mode) for a correctness smoke test.
# ---------------------------------------------------------------------------
def ref_eval_forward(X, running_mean, running_var, R, B, eps=1e-5):
    N, q, n, _ = X.shape
    Xb = X.reshape(-1, n, n)
    p = jnp.sqrt(1.0 / (running_var + eps))
    Gn = sym_invsqrtm(running_mean)
    C = jnp.einsum("ij,bjk,kl->bil", Gn, Xb, Gn, precision=_PREC)
    w, U = jnp.linalg.eigh(C)
    Z = jnp.einsum("bij,bj,bkj->bik", U, w ** p, U, precision=_PREC)
    Z = jnp.einsum("ij,bjk,lk->bil", R, Z, R, precision=_PREC)
    Bs = sym_sqrtm(B)
    Z = jnp.einsum("ij,bjk,kl->bil", Bs, Z, Bs, precision=_PREC)
    return Z.reshape(N, q, n, n)


if __name__ == "__main__":
    key = jax.random.PRNGKey(0)
    kx, kr, kb, km = jax.random.split(key, 4)

    N, q, n = 2, 8, 16          # (batch, channels/q, SPD size)
    eps = 1e-5

    def make_spd(k, shape):
        a = jax.random.normal(k, shape, jnp.float32)
        return a @ jnp.swapaxes(a, -1, -2) / shape[-1] + jnp.eye(shape[-1], dtype=jnp.float32)

    X = make_spd(kx, (N, q, n, n))                                      # input SPD matrices
    R, _ = jnp.linalg.qr(jax.random.normal(kr, (n, n), jnp.float32))    # Stiefel rotation param
    B = make_spd(kb, (n, n))                                            # SPD bias param
    running_mean = make_spd(km, (n, n))
    running_var = jnp.float32(1.5)

    out_eval = dabn_forward(X, running_mean, running_var, R, B, training=False, eps=eps)
    out_train = dabn_forward(X, running_mean, running_var, R, B, training=True, eps=eps)
    jax.block_until_ready((out_eval, out_train))

    ref = ref_eval_forward(X, running_mean, running_var, R, B, eps=eps)
    assert out_eval.shape == (N, q, n, n)
    err = float(jnp.max(jnp.abs(out_eval - ref)))
    assert bool(jnp.allclose(out_eval, ref, rtol=1e-3, atol=1e-3)), err
    assert bool(jnp.all(jnp.isfinite(out_train)))

    print("KERNEL_OK")
</pallas_src>

<mosaic_0001>
module attributes {stable_mosaic.version = 11 : i64} {
  func.func @_flat_congruence_kernel(%arg0: i32, %arg1: memref<16x256xf32, #tpu.memory_space<vmem>>, %arg2: memref<256x256xf32, #tpu.memory_space<vmem>>, %arg3: memref<16x256xf32, #tpu.memory_space<vmem>>) attributes {dimension_semantics = [#tpu.dimension_semantics<parallel>], iteration_bounds = array<i64: 1>, scalar_prefetch = 0 : i64, scratch_operands = 0 : i64, tpu.core_type = #tpu.core_type<tc>, window_params = [{transform_indices = @transform_0, window_bounds = array<i64: 16, 256>}, {pipeline_mode = #tpu.pipeline_mode<synchronous>, transform_indices = @transform_1, window_bounds = array<i64: 256, 256>}, {transform_indices = @transform_2, window_bounds = array<i64: 16, 256>}]} {
    %c0 = arith.constant 0 : index
    %c0_0 = arith.constant 0 : index
    %0 = vector.load %arg1[%c0, %c0_0] : memref<16x256xf32, #tpu.memory_space<vmem>>, vector<16x256xf32>
    %c0_1 = arith.constant 0 : index
    %c0_2 = arith.constant 0 : index
    %1 = vector.load %arg2[%c0_1, %c0_2] : memref<256x256xf32, #tpu.memory_space<vmem>>, vector<256x256xf32>
    %cst = arith.constant dense<0.000000e+00> : vector<16x256xf32>
    %2 = tpu.matmul %0, %1, %cst {dimension_numbers = #tpu.dot_dimension_numbers<[1], [0], [0], [1], [0, 0, 1, 1], [], []>, precision = #tpu.contract_precision<fp32>} : vector<16x256xf32>, vector<256x256xf32>, vector<16x256xf32> -> vector<16x256xf32>
    %c0_3 = arith.constant 0 : index
    %c0_4 = arith.constant 0 : index
    %3 = vector.load %arg3[%c0_3, %c0_4] : memref<16x256xf32, #tpu.memory_space<vmem>>, vector<16x256xf32>
    tpu.vector_store %arg3[%c0_3, %c0_4], %2 {strides = array<i32>} : memref<16x256xf32, #tpu.memory_space<vmem>>, vector<16x256xf32>,
    return
  }
  func.func @transform_0(%arg0: i32) -> (i32, i32) {
    %c0_i32 = arith.constant 0 : i32
    %c0_i32_0 = arith.constant 0 : i32
    return %arg0, %c0_i32 : i32, i32
  }
  func.func @transform_1(%arg0: i32) -> (i32, i32) {
    %c0_i32 = arith.constant 0 : i32
    %c0_i32_0 = arith.constant 0 : i32
    %c0_i32_1 = arith.constant 0 : i32
    return %c0_i32, %c0_i32_0 : i32, i32
  }
  func.func @transform_2(%arg0: i32) -> (i32, i32) {
    %c0_i32 = arith.constant 0 : i32
    %c0_i32_0 = arith.constant 0 : i32
    return %arg0, %c0_i32 : i32, i32
  }
}

module attributes {stable_mosaic.version = 11 : i64} {
  func.func @_power_rotate_bias_kernel(%arg0: i32, %arg1: memref<16x16x16xf32, #tpu.memory_space<vmem>>, %arg2: memref<16x16xf32, #tpu.memory_space<vmem>>, %arg3: memref<256x256xf32, #tpu.memory_space<vmem>>, %arg4: memref<16x256xf32, #tpu.memory_space<vmem>>) attributes {dimension_semantics = [#tpu.dimension_semantics<parallel>], iteration_bounds = array<i64: 1>, scalar_prefetch = 0 : i64, scratch_operands = 0 : i64, tpu.core_type = #tpu.core_type<tc>, window_params = [{transform_indices = @transform_0, window_bounds = array<i64: 16, 16, 16>}, {transform_indices = @transform_1, window_bounds = array<i64: 16, 16>}, {pipeline_mode = #tpu.pipeline_mode<synchronous>, transform_indices = @transform_2, window_bounds = array<i64: 256, 256>}, {transform_indices = @transform_3, window_bounds = array<i64: 16, 256>}]} {
    %c0 = arith.constant 0 : index
    %c0_0 = arith.constant 0 : index
    %0 = vector.load %arg2[%c0, %c0_0] : memref<16x16xf32, #tpu.memory_space<vmem>>, vector<16x16xf32>
    %1 = math.exp %0 : vector<16x16xf32>
    %c0_1 = arith.constant 0 : index
    %c0_2 = arith.constant 0 : index
    %c0_3 = arith.constant 0 : index
    %2 = vector.load %arg1[%c0_1, %c0_2, %c0_3] : memref<16x16x16xf32, #tpu.memory_space<vmem>>, vector<16x16x16xf32>
    %3 = vector.shape_cast %1 : vector<16x16xf32> to vector<16x1x16xf32>
    %4 = vector.broadcast %3 : vector<16x1x16xf32> to vector<16x16x16xf32>
    %5 = arith.mulf %2, %4 : vector<16x16x16xf32>
    "tpu.trace_start"() <{level = 10 : i32, message = "bij,bkj->bik"}> : () -> ()
    %cst = arith.constant dense<0.000000e+00> : vector<16x16x16xf32>
    %6 = tpu.matmul %5, %5, %cst {dimension_numbers = #tpu.dot_dimension_numbers<[2], [2], [1], [1], [0, 0, 0, 1, 1, 1], [0], [0]>, precision = #tpu.contract_precision<fp32>} : vector<16x16x16xf32>, vector<16x16x16xf32>, vector<16x16x16xf32> -> vector<16x16x16xf32>
    "tpu.trace_stop"() : () -> ()
    %7 = vector.extract_strided_slice %6 {offsets = [0, 0, 0], sizes = [16, 1, 16], strides = [1, 1, 1]} : vector<16x16x16xf32> to vector<16x1x16xf32>
    %8 = vector.shape_cast %7 : vector<16x1x16xf32> to vector<16x16xf32>
    %c0_4 = arith.constant 0 : index
    %c0_5 = arith.constant 0 : index
    %9 = vector.load %arg3[%c0_4, %c0_5] : memref<256x256xf32, #tpu.memory_space<vmem>>, vector<16x256xf32>
    %cst_6 = arith.constant dense<0.000000e+00> : vector<16x256xf32>
    %10 = tpu.matmul %8, %9, %cst_6 {dimension_numbers = #tpu.dot_dimension_numbers<[1], [0], [0], [1], [0, 0, 1, 1], [], []>, precision = #tpu.contract_precision<fp32>} : vector<16x16xf32>, vector<16x256xf32>, vector<16x256xf32> -> vector<16x256xf32>
    %11 = vector.extract_strided_slice %6 {offsets = [0, 1, 0], sizes = [16, 1, 16], strides = [1, 1, 1]} : vector<16x16x16xf32> to vector<16x1x16xf32>
    %12 = vector.shape_cast %11 : vector<16x1x16xf32> to vector<16x16xf32>
    %c16 = arith.constant 16 : index
    %c0_7 = arith.constant 0 : index
    %13 = vector.load %arg3[%c16, %c0_7] : memref<256x256xf32, #tpu.memory_space<vmem>>, vector<16x256xf32>
    %cst_8 = arith.constant dense<0.000000e+00> : vector<16x256xf32>
    %14 = tpu.matmul %12, %13, %cst_8 {dimension_numbers = #tpu.dot_dimension_numbers<[1], [0], [0], [1], [0, 0, 1, 1], [], []>, precision = #tpu.contract_precision<fp32>} : vector<16x16xf32>, vector<16x256xf32>, vector<16x256xf32> -> vector<16x256xf32>
    %15 = arith.addf %10, %14 : vector<16x256xf32>
    %16 = vector.extract_strided_slice %6 {offsets = [0, 2, 0], sizes = [16, 1, 16], strides = [1, 1, 1]} : vector<16x16x16xf32> to vector<16x1x16xf32>
    %17 = vector.shape_cast %16 : vector<16x1x16xf32> to vector<16x16xf32>
    %c32 = arith.constant 32 : index
    %c0_9 = arith.constant 0 : index
    %18 = vector.load %arg3[%c32, %c0_9] : memref<256x256xf32, #tpu.memory_space<vmem>>, vector<16x256xf32>
    %cst_10 = arith.constant dense<0.000000e+00> : vector<16x256xf32>
    %19 = tpu.matmul %17, %18, %cst_10 {dimension_numbers = #tpu.dot_dimension_numbers<[1], [0], [0], [1], [0, 0, 1, 1], [], []>, precision = #tpu.contract_precision<fp32>} : vector<16x16xf32>, vector<16x256xf32>, vector<16x256xf32> -> vector<16x256xf32>
    %20 = arith.addf %15, %19 : vector<16x256xf32>
    %21 = vector.extract_strided_slice %6 {offsets = [0, 3, 0], sizes = [16, 1, 16], strides = [1, 1, 1]} : vector<16x16x16xf32> to vector<16x1x16xf32>
    %22 = vector.shape_cast %21 : vector<16x1x16xf32> to vector<16x16xf32>
    %c48 = arith.constant 48 : index
    %c0_11 = arith.constant 0 : index
    %23 = vector.load %arg3[%c48, %c0_11] : memref<256x256xf32, #tpu.memory_space<vmem>>, vector<16x256xf32>
    %cst_12 = arith.constant dense<0.000000e+00> : vector<16x256xf32>
    %24 = tpu.matmul %22, %23, %cst_12 {dimension_numbers = #tpu.dot_dimension_numbers<[1], [0], [0], [1], [0, 0, 1, 1], [], []>, precision = #tpu.contract_precision<fp32>} : vector<16x16xf32>, vector<16x256xf32>, vector<16x256xf32> -> vector<16x256xf32>
    %25 = arith.addf %20, %24 : vector<16x256xf32>
    %26 = vector.extract_strided_slice %6 {offsets = [0, 4, 0], sizes = [16, 1, 16], strides = [1, 1, 1]} : vector<16x16x16xf32> to vector<16x1x16xf32>
    %27 = vector.shape_cast %26 : vector<16x1x16xf32> to vector<16x16xf32>
    %c64 = arith.constant 64 : index
    %c0_13 = arith.constant 0 : index
    %28 = vector.load %arg3[%c64, %c0_13] : memref<256x256xf32, #tpu.memory_space<vmem>>, vector<16x256xf32>
    %cst_14 = arith.constant dense<0.000000e+00> : vector<16x256xf32>
    %29 = tpu.matmul %27, %28, %cst_14 {dimension_numbers = #tpu.dot_dimension_numbers<[1], [0], [0], [1], [0, 0, 1, 1], [], []>, precision = #tpu.contract_precision<fp32>} : vector<16x16xf32>, vector<16x256xf32>, vector<16x256xf32> -> vector<16x256xf32>
    %30 = arith.addf %25, %29 : vector<16x256xf32>
    %31 = vector.extract_strided_slice %6 {offsets = [0, 5, 0], sizes = [16, 1, 16], strides = [1, 1, 1]} : vector<16x16x16xf32> to vector<16x1x16xf32>
    %32 = vector.shape_cast %31 : vector<16x1x16xf32> to vector<16x16xf32>
    %c80 = arith.constant 80 : index
    %c0_15 = arith.constant 0 : index
    %33 = vector.load %arg3[%c80, %c0_15] : memref<256x256xf32, #tpu.memory_space<vmem>>, vector<16x256xf32>
    %cst_16 = arith.constant dense<0.000000e+00> : vector<16x256xf32>
    %34 = tpu.matmul %32, %33, %cst_16 {dimension_numbers = #tpu.dot_dimension_numbers<[1], [0], [0], [1], [0, 0, 1, 1], [], []>, precision = #tpu.contract_precision<fp32>} : vector<16x16xf32>, vector<16x256xf32>, vector<16x256xf32> -> vector<16x256xf32>
    %35 = arith.addf %30, %34 : vector<16x256xf32>
    %36 = vector.extract_strided_slice %6 {offsets = [0, 6, 0], sizes = [16, 1, 16], strides = [1, 1, 1]} : vector<16x16x16xf32> to vector<16x1x16xf32>
    %37 = vector.shape_cast %36 : vector<16x1x16xf32> to vector<16x16xf32>
    %c96 = arith.constant 96 : index
    %c0_17 = arith.constant 0 : index
    %38 = vector.load %arg3[%c96, %c0_17] : memref<256x256xf32, #tpu.memory_space<vmem>>, vector<16x256xf32>
    %cst_18 = arith.constant dense<0.000000e+00> : vector<16x256xf32>
    %39 = tpu.matmul %37, %38, %cst_18 {dimension_numbers = #tpu.dot_dimension_numbers<[1], [0], [0], [1], [0, 0, 1, 1], [], []>, precision = #tpu.contract_precision<fp32>} : vector<16x16xf32>, vector<16x256xf32>, vector<16x256xf32> -> vector<16x256xf32>
    %40 = arith.addf %35, %39 : vector<16x256xf32>
    %41 = vector.extract_strided_slice %6 {offsets = [0, 7, 0], sizes = [16, 1, 16], strides = [1, 1, 1]} : vector<16x16x16xf32> to vector<16x1x16xf32>
    %42 = vector.shape_cast %41 : vector<16x1x16xf32> to vector<16x16xf32>
    %c112 = arith.constant 112 : index
    %c0_19 = arith.constant 0 : index
    %43 = vector.load %arg3[%c112, %c0_19] : memref<256x256xf32, #tpu.memory_space<vmem>>, vector<16x256xf32>
    %cst_20 = arith.constant dense<0.000000e+00> : vector<16x256xf32>
    %44 = tpu.matmul %42, %43, %cst_20 {dimension_numbers = #tpu.dot_dimension_numbers<[1], [0], [0], [1], [0, 0, 1, 1], [], []>, precision = #tpu.contract_precision<fp32>} : vector<16x16xf32>, vector<16x256xf32>, vector<16x256xf32> -> vector<16x256xf32>
    %45 = arith.addf %40, %44 : vector<16x256xf32>
    %46 = vector.extract_strided_slice %6 {offsets = [0, 8, 0], sizes = [16, 1, 16], strides = [1, 1, 1]} : vector<16x16x16xf32> to vector<16x1x16xf32>
    %47 = vector.shape_cast %46 : vector<16x1x16xf32> to vector<16x16xf32>
    %c128 = arith.constant 128 : index
    %c0_21 = arith.constant 0 : index
    %48 = vector.load %arg3[%c128, %c0_21] : memref<256x256xf32, #tpu.memory_space<vmem>>, vector<16x256xf32>
    %cst_22 = arith.constant dense<0.000000e+00> : vector<16x256xf32>
    %49 = tpu.matmul %47, %48, %cst_22 {dimension_numbers = #tpu.dot_dimension_numbers<[1], [0], [0], [1], [0, 0, 1, 1], [], []>, precision = #tpu.contract_precision<fp32>} : vector<16x16xf32>, vector<16x256xf32>, vector<16x256xf32> -> vector<16x256xf32>
    %50 = arith.addf %45, %49 : vector<16x256xf32>
    %51 = vector.extract_strided_slice %6 {offsets = [0, 9, 0], sizes = [16, 1, 16], strides = [1, 1, 1]} : vector<16x16x16xf32> to vector<16x1x16xf32>
    %52 = vector.shape_cast %51 : vector<16x1x16xf32> to vector<16x16xf32>
    %c144 = arith.constant 144 : index
    %c0_23 = arith.constant 0 : index
    %53 = vector.load %arg3[%c144, %c0_23] : memref<256x256xf32, #tpu.memory_space<vmem>>, vector<16x256xf32>
    %cst_24 = arith.constant dense<0.000000e+00> : vector<16x256xf32>
    %54 = tpu.matmul %52, %53, %cst_24 {dimension_numbers = #tpu.dot_dimension_numbers<[1], [0], [0], [1], [0, 0, 1, 1], [], []>, precision = #tpu.contract_precision<fp32>} : vector<16x16xf32>, vector<16x256xf32>, vector<16x256xf32> -> vector<16x256xf32>
    %55 = arith.addf %50, %54 : vector<16x256xf32>
    %56 = vector.extract_strided_slice %6 {offsets = [0, 10, 0], sizes = [16, 1, 16], strides = [1, 1, 1]} : vector<16x16x16xf32> to vector<16x1x16xf32>
    %57 = vector.shape_cast %56 : vector<16x1x16xf32> to vector<16x16xf32>
    %c160 = arith.constant 160 : index
    %c0_25 = arith.constant 0 : index
    %58 = vector.load %arg3[%c160, %c0_25] : memref<256x256xf32, #tpu.memory_space<vmem>>, vector<16x256xf32>
    %cst_26 = arith.constant dense<0.000000e+00> : vector<16x256xf32>
    %59 = tpu.matmul %57, %58, %cst_26 {dimension_numbers = #tpu.dot_dimension_numbers<[1], [0], [0], [1], [0, 0, 1, 1], [], []>, precision = #tpu.contract_precision<fp32>} : vector<16x16xf32>, vector<16x256xf32>, vector<16x256xf32> -> vector<16x256xf32>
    %60 = arith.addf %55, %59 : vector<16x256xf32>
    %61 = vector.extract_strided_slice %6 {offsets = [0, 11, 0], sizes = [16, 1, 16], strides = [1, 1, 1]} : vector<16x16x16xf32> to vector<16x1x16xf32>
    %62 = vector.shape_cast %61 : vector<16x1x16xf32> to vector<16x16xf32>
    %c176 = arith.constant 176 : index
    %c0_27 = arith.constant 0 : index
    %63 = vector.load %arg3[%c176, %c0_27] : memref<256x256xf32, #tpu.memory_space<vmem>>, vector<16x256xf32>
    %cst_28 = arith.constant dense<0.000000e+00> : vector<16x256xf32>
    %64 = tpu.matmul %62, %63, %cst_28 {dimension_numbers = #tpu.dot_dimension_numbers<[1], [0], [0], [1], [0, 0, 1, 1], [], []>, precision = #tpu.contract_precision<fp32>} : vector<16x16xf32>, vector<16x256xf32>, vector<16x256xf32> -> vector<16x256xf32>
    %65 = arith.addf %60, %64 : vector<16x256xf32>
    %66 = vector.extract_strided_slice %6 {offsets = [0, 12, 0], sizes = [16, 1, 16], strides = [1, 1, 1]} : vector<16x16x16xf32> to vector<16x1x16xf32>
    %67 = vector.shape_cast %66 : vector<16x1x16xf32> to vector<16x16xf32>
    %c192 = arith.constant 192 : index
    %c0_29 = arith.constant 0 : index
    %68 = vector.load %arg3[%c192, %c0_29] : memref<256x256xf32, #tpu.memory_space<vmem>>, vector<16x256xf32>
    %cst_30 = arith.constant dense<0.000000e+00> : vector<16x256xf32>
    %69 = tpu.matmul %67, %68, %cst_30 {dimension_numbers = #tpu.dot_dimension_numbers<[1], [0], [0], [1], [0, 0, 1, 1], [], []>, precision = #tpu.contract_precision<fp32>} : vector<16x16xf32>, vector<16x256xf32>, vector<16x256xf32> -> vector<16x256xf32>
    %70 = arith.addf %65, %69 : vector<16x256xf32>
    %71 = vector.extract_strided_slice %6 {offsets = [0, 13, 0], sizes = [16, 1, 16], strides = [1, 1, 1]} : vector<16x16x16xf32> to vector<16x1x16xf32>
    %72 = vector.shape_cast %71 : vector<16x1x16xf32> to vector<16x16xf32>
    %c208 = arith.constant 208 : index
    %c0_31 = arith.constant 0 : index
    %73 = vector.load %arg3[%c208, %c0_31] : memref<256x256xf32, #tpu.memory_space<vmem>>, vector<16x256xf32>
    %cst_32 = arith.constant dense<0.000000e+00> : vector<16x256xf32>
    %74 = tpu.matmul %72, %73, %cst_32 {dimension_numbers = #tpu.dot_dimension_numbers<[1], [0], [0], [1], [0, 0, 1, 1], [], []>, precision = #tpu.contract_precision<fp32>} : vector<16x16xf32>, vector<16x256xf32>, vector<16x256xf32> -> vector<16x256xf32>
    %75 = arith.addf %70, %74 : vector<16x256xf32>
    %76 = vector.extract_strided_slice %6 {offsets = [0, 14, 0], sizes = [16, 1, 16], strides = [1, 1, 1]} : vector<16x16x16xf32> to vector<16x1x16xf32>
    %77 = vector.shape_cast %76 : vector<16x1x16xf32> to vector<16x16xf32>
    %c224 = arith.constant 224 : index
    %c0_33 = arith.constant 0 : index
    %78 = vector.load %arg3[%c224, %c0_33] : memref<256x256xf32, #tpu.memory_space<vmem>>, vector<16x256xf32>
    %cst_34 = arith.constant dense<0.000000e+00> : vector<16x256xf32>
    %79 = tpu.matmul %77, %78, %cst_34 {dimension_numbers = #tpu.dot_dimension_numbers<[1], [0], [0], [1], [0, 0, 1, 1], [], []>, precision = #tpu.contract_precision<fp32>} : vector<16x16xf32>, vector<16x256xf32>, vector<16x256xf32> -> vector<16x256xf32>
    %80 = arith.addf %75, %79 : vector<16x256xf32>
    %81 = vector.extract_strided_slice %6 {offsets = [0, 15, 0], sizes = [16, 1, 16], strides = [1, 1, 1]} : vector<16x16x16xf32> to vector<16x1x16xf32>
    %82 = vector.shape_cast %81 : vector<16x1x16xf32> to vector<16x16xf32>
    %c240 = arith.constant 240 : index
    %c0_35 = arith.constant 0 : index
    %83 = vector.load %arg3[%c240, %c0_35] : memref<256x256xf32, #tpu.memory_space<vmem>>, vector<16x256xf32>
    %cst_36 = arith.constant dense<0.000000e+00> : vector<16x256xf32>
    %84 = tpu.matmul %82, %83, %cst_36 {dimension_numbers = #tpu.dot_dimension_numbers<[1], [0], [0], [1], [0, 0, 1, 1], [], []>, precision = #tpu.contract_precision<fp32>} : vector<16x16xf32>, vector<16x256xf32>, vector<16x256xf32> -> vector<16x256xf32>
    %85 = arith.addf %80, %84 : vector<16x256xf32>
    %c0_37 = arith.constant 0 : index
    %c0_38 = arith.constant 0 : index
    %86 = vector.load %arg4[%c0_37, %c0_38] : memref<16x256xf32, #tpu.memory_space<vmem>>, vector<16x256xf32>
    tpu.vector_store %arg4[%c0_37, %c0_38], %85 {strides = array<i32>} : memref<16x256xf32, #tpu.memory_space<vmem>>, vector<16x256xf32>,
    return
  }
  func.func @transform_0(%arg0: i32) -> (i32, i32, i32) {
    %c0_i32 = arith.constant 0 : i32
    %c0_i32_0 = arith.constant 0 : i32
    %c0_i32_1 = arith.constant 0 : i32
    return %arg0, %c0_i32, %c0_i32_0 : i32, i32, i32
  }
  func.func @transform_1(%arg0: i32) -> (i32, i32) {
    %c0_i32 = arith.constant 0 : i32
    %c0_i32_0 = arith.constant 0 : i32
    return %arg0, %c0_i32 : i32, i32
  }
  func.func @transform_2(%arg0: i32) -> (i32, i32) {
    %c0_i32 = arith.constant 0 : i32
    %c0_i32_0 = arith.constant 0 : i32
    %c0_i32_1 = arith.constant 0 : i32
    return %c0_i32, %c0_i32_0 : i32, i32
  }
  func.func @transform_3(%arg0: i32) -> (i32, i32) {
    %c0_i32 = arith.constant 0 : i32
    %c0_i32_0 = arith.constant 0 : i32
    return %arg0, %c0_i32 : i32, i32
  }
}

</mosaic_0001>

<bundles_post_ra>
// kernel: custom-call.7
= control target key start
LH: loop header
LB: loop body
LE: loop exit
PB: predicated region body
PF: predicated region fallthrough
CT: control target
= control target key end

     0   :  { %s2375_s30 = smov [#allocation0]   ;;  %s2724_s0 = inlined_call_operand.vmem [shape: f32[8,8], index: 0, kind: input, shape index: {}]   ;;  %s2725_s1 = inlined_call_operand.vmem [shape: f32[8,8], index: 1, kind: input, shape index: {}]   ;;  %s2726_s2 = inlined_call_operand.vmem [shape: f32[8,8], index: 2, kind: input, shape index: {}]   ;;  %s2727_s3 = inlined_call_operand.vmem [shape: f32[8,8], index: 3, kind: input, shape index: {}]   ;;  %s2728_s4 = inlined_call_operand.vmem [shape: f32[8], index: 4, kind: output, shape index: {0}]   ;;  %s2729_s5 = inlined_call_operand.vmem [shape: f32[8], index: 5, kind: output, shape index: {1}]   ;;  %s2730_s6 = inlined_call_operand.vmem [shape: f32[8,8], index: 6, kind: output, shape index: {2}]   ;;  %s2731_s7 = inlined_call_operand.vmem [shape: f32[8,8], index: 7, kind: output, shape index: {3}]   ;;  %s2732_s8 = inlined_call_operand.vmem [shape: f32[8,8], index: 8, kind: output, shape index: {4}]   ;;  %s2733_s9 = inlined_call_operand.vmem [shape: f32[8,8], index: 9, kind: output, shape index: {5}]  }
   0x1   :  { %s2379_s12 = smov %s2724_s0  }
   0x2 LB: > { %v58_v0 = vld [vmem:[%s2381_s12] sm:$0xff]  ;;  %s60_s12 = scalar_lea.vmem %s2381_s12, 8   ;;  %s2381_s12 = sphi %s2379_s12, %s60_s12   ;;  %s2377_s30 = sphi %s2375_s30, %s61_s30  }
   0x3   : > { %59 = vst [vmem:[%s2377_s30] sm:$0xff] %v58_v0  ;;  %s61_s30 = scalar_lea.vmem %s2377_s30, 8   ;;  %p55_p0 = scmp.gt.s32.totalorder %s60_s12, %s2724_s0 }
   0x4   :  { %s2383_s15 = smov (%p55_p0), [#allocation1]   ;;  %s2387_s18 = smov (%p55_p0), %s2725_s1  }
   0x5   :  { %57 = sbr.rel (!%p55_p0) target bundleno = 2 (0x2), region = 358 }
   0xc LB: > { %v120_v1 = vld [vmem:[%s2389_s18] sm:$0xff]  ;;  %s122_s18 = scalar_lea.vmem %s2389_s18, 8   ;;  %s2389_s18 = sphi %s2387_s18, %s122_s18   ;;  %s2385_s15 = sphi %s2383_s15, %s123_s15  }
   0xd   : > { %121 = vst [vmem:[%s2385_s15] sm:$0xff] %v120_v1  ;;  %s123_s15 = scalar_lea.vmem %s2385_s15, 8   ;;  %p117_p1 = scmp.gt.s32.totalorder %s122_s18, %s2725_s1 }
   0xe   :  { %s2391_s0 = smov (%p117_p1), [#allocation2]   ;;  %s2395_s23 = smov (%p117_p1), %s2726_s2  }
   0xf   :  { %119 = sbr.rel (!%p117_p1) target bundleno = 12 (0xc), region = 380 }
  0x16 LB: > { %v182_v2 = vld [vmem:[%s2397_s23] sm:$0xff]  ;;  %s184_s23 = scalar_lea.vmem %s2397_s23, 8   ;;  %s2397_s23 = sphi %s2395_s23, %s184_s23   ;;  %s2393_s0 = sphi %s2391_s0, %s185_s0  }
  0x17   : > { %183 = vst [vmem:[%s2393_s0] sm:$0xff] %v182_v2  ;;  %s185_s0 = scalar_lea.vmem %s2393_s0, 8   ;;  %p179_p2 = scmp.gt.s32.totalorder %s184_s23, %s2726_s2 }
  0x18   :  { %s2399_s1 = smov (%p179_p2), [#allocation3]   ;;  %s2403_s28 = smov (%p179_p2), %s2727_s3  }
  0x19   :  { %181 = sbr.rel (!%p179_p2) target bundleno = 22 (0x16), region = 402 }
  0x20 LB: > { %v244_v3 = vld [vmem:[%s2405_s28] sm:$0xff]  ;;  %s246_s28 = scalar_lea.vmem %s2405_s28, 8   ;;  %s2405_s28 = sphi %s2403_s28, %s246_s28   ;;  %s2401_s1 = sphi %s2399_s1, %s247_s1  }
  0x21   : > { %245 = vst [vmem:[%s2401_s1] sm:$0xff] %v244_v3  ;;  %s247_s1 = scalar_lea.vmem %s2401_s1, 8   ;;  %p241_p3 = scmp.gt.s32.totalorder %s246_s28, %s2727_s3 }
  0x22   :  { %s259_s2 = smov (%p241_p3), [#allocation12]  ;;  %v260_v4 = vld [vmem:[#allocation0] sm:$0xff] (%p241_p3)  ;;  %s262_s10 = smov (%p241_p3), [#allocation13]  ;;  %v263_v5 = vld [vmem:[#allocation1] sm:$0xff] (%p241_p3)  ;;  %v266_v6 = vld [vmem:[#allocation2] sm:$0xff] (%p241_p3)  ;;  %v276_v7 = vlaneseq (%p241_p3)  ;;  %v2447_v9 = vmov (%p241_p3), 0.0  }
  0x23   :  { %243 = sbr.rel (!%p241_p3) target bundleno = 32 (0x20), region = 424  ;;  %261 = vst [vmem:[%s259_s2] sm:$0xff] (%p241_p3), %v260_v4  ;;  %264 = vst [vmem:[%s262_s10] sm:$0xff] (%p241_p3), %v263_v5  ;;  %s265_s11 = smov (%p241_p3), [#allocation14] }
  0x24   :  { %s268_s12 = smov (%p241_p3), [#allocation15]  ;;  %271 = vst [vmem:[#allocation8] sm:$0xff] (%p241_p3), %v2447_v9  ;;  %272 = vst [vmem:[#allocation9] sm:$0xff] (%p241_p3), %v2447_v9  ;;  %v2524_v10 = vand.u32 (%p241_p3), 127, %v276_v7  ;;  %v2526_v11 = vshrl.u32 (%p241_p3), %v276_v7, 7  ;;  %s275_s3 = smov (%p241_p3), [#allocation8] }
  0x25   :  { %273 = vst [vmem:[#allocation10] sm:$0xff] (%p241_p3), %v2447_v9  ;;  %274 = vst [vmem:[#allocation11] sm:$0xff] (%p241_p3), %v2447_v9  ;;  %s288_s13 = smov (%p241_p3), [#allocation11]  ;;  %s1401_s14 = smov (%p241_p3), [#allocation12] }
  0x26   :  { %267 = vst [vmem:[%s265_s11] sm:$0xff] (%p241_p3), %v266_v6  ;;  %v278_v10 = vmov (%p241_p3), %v2524_v10  ;;  %v281_v11 = vmov (%p241_p3), %v2526_v11  ;;  %vm1405_vm2 = vcmp.lt.s32.totalorder (%p241_p3), %v2524_v10, 8  ;;  %s1418_s15 = smov (%p241_p3), [#allocation13]  ;;  %s1435_s16 = smov (%p241_p3), [#allocation14] }
  0x27   :  { %v291_v10 = vmov (%p241_p3), %v2524_v10  ;;  %v294_v11 = vmov (%p241_p3), %v2526_v11  ;;  %vm285_vm0 = vcmp.eq.s32.totalorder (%p241_p3), %v281_v11, %v278_v10  ;;  %s1452_s17 = smov (%p241_p3), [#allocation15] }
  0x28   :  { %v269_v8 = vld [vmem:[#allocation3] sm:$0xff] (%p241_p3)  ;;  %vm298_vm1 = vcmp.eq.s32.totalorder (%p241_p3), %v294_v11, %v291_v10  ;;  %v1397_v10 = vmov (%p241_p3), %v2524_v10  ;;  %v1400_v11 = vmov (%p241_p3), %v2526_v11 }
  0x29   :  { %270 = vst [vmem:[%s268_s12] sm:$0xff] (%p241_p3), %v269_v8  ;;  %vm1410_vm3 = vcmp.eq.s32.totalorder (%p241_p3), %v1400_v11, %v1397_v10  ;;  %v1448_v10 = vmov (%p241_p3), %v2524_v10  ;;  %v1417_v11 = vmov (%p241_p3), %v2526_v11 }
  0x2a   :  { %v1407_v16 = vld [vmem:[%s1401_s14] sm:$0xff]  ;;  %v1414_v10 = vmov %v2524_v10  ;;  %v1451_v11 = vmov %v2526_v11 }
  0x2b   :  { %v282_v12 = vld [vmem:[%s275_s3] sm:$0xff]  ;;  %v1408_v18 = vsel %vm1405_vm2, %v1407_v16, 0.0  ;;  %v1431_v10 = vmov %v2524_v10  ;;  %v1434_v11 = vmov %v2526_v11  ;;  %vm1461_vm4 = vcmp.eq.s32.totalorder %v1451_v11, %v1448_v10 }
  0x2c   :  { %v295_v13 = vld [vmem:[%s288_s13] sm:$0xff]  ;;  %v286_v14 = vsel %vm285_vm0, 1.0, %v282_v12  ;;  %v1409_v22 = vmul.f32 %v1408_v18, %v1408_v18 }
  0x2d   :  { %v299_v15 = vsel %vm298_vm1, 1.0, %v295_v13  ;;  %287 = vst [vmem:[%s275_s3] sm:$0xff] %v286_v14  ;;  %v1424_v17 = vld [vmem:[%s1418_s15] sm:$0xff] }
  0x2e   :  { %300 = vst [vmem:[%s288_s13] sm:$0xff] %v299_v15  ;;  %v1425_v19 = vsel %vm1405_vm2, %v1424_v17, 0.0  ;;  %v1441_v20 = vld [vmem:[%s1435_s16] sm:$0xff]  ;;  %v1411_v29 = vsel %vm1410_vm3, 0.0, %v1409_v22 }
  0x2f   :  { %v1426_v23 = vmul.f32 %v1425_v19, %v1425_v19  ;;  %v1442_v24 = vsel %vm1405_vm2, %v1441_v20, 0.0 }
  0x30   :  { %v1458_v21 = vld [vmem:[%s1452_s17] sm:$0xff]  ;;  %v1443_v26 = vmul.f32 %v1442_v24, %v1442_v24 }
  0x31   :  { %v1459_v25 = vsel %vm1405_vm2, %v1458_v21, 0.0  ;;  %v1428_v27 = vadd.f32 %v1426_v23, %v1409_v22  ;;  %v1427_v30 = vadd.f32 %v1426_v23, %v1411_v29 }
  0x32   :  { %v1460_v28 = vmul.f32 %v1459_v25, %v1459_v25 }
  0x33   :  { %v1445_v31 = vadd.f32 %v1443_v26, %v1428_v27  ;;  %v1444_v32 = vadd.f32 %v1443_v26, %v1427_v30 }
  0x34   :  { %v1462_v33 = vsel %vm1461_vm4, 0.0, %v1460_v28 }
  0x35   :  { %v1464_v34 = vadd.f32 %v1460_v28, %v1445_v31  ;;  %v1463_v35 = vadd.f32 %v1462_v33, %v1444_v32 }
  0x37   :  { %1465 = vadd.xlane.f32.xlu0 %v1464_v34 }
  0x3b   :  { %1473 = vadd.xlane.f32.xlu0 %v1463_v35 }
  0xc4   :  { %v1466_v36 = vpop.xlane.xlu0 %1465 }
  0xc5   :  { %v1467_v37 = vrot.slane %v1466_v36, 4 }
  0xc7   :  { %v1468_v38 = vadd.f32 %v1467_v37, %v1466_v36 }
  0xc8   :  { %v1474_v39 = vpop.xlane.xlu0 %1473 }
  0xc9   :  { %v1469_v40 = vrot.slane %v1468_v38, 2  ;;  %v1475_v41 = vrot.slane %v1474_v39, 4 }
  0xcb   :  { %v1476_v42 = vadd.f32 %v1475_v41, %v1474_v39  ;;  %v1470_v43 = vadd.f32 %v1469_v40, %v1468_v38 }
  0xcd   :  { %v1477_v44 = vrot.slane %v1476_v42, 2  ;;  %v1471_v46 = vrot.slane %v1470_v43, 1 }
  0xcf   :  { %v1478_v45 = vadd.f32 %v1477_v44, %v1476_v42  ;;  %v1472_v49 = vadd.f32 %v1471_v46, %v1470_v43 }
  0xd1   :  { %v1479_v47 = vrot.slane %v1478_v45, 1 }
  0xd3   :  { %v1480_v48 = vadd.f32 %v1479_v47, %v1478_v45 }
  0xd5   :  { %1656 = vpush %v1480_v48 }
  0xd6   :  { %1658 = vpush %v1472_v49 }
 0x106   :  { %s1657_s18 = spop %1656 }
 0x107   :  { %s1659_s19 = spop %1658 }
 0x108   :  { %s1483_s20 = smul.f32 1e-10, %s1659_s19 }
 0x10a   :  { %p1484_p4 = scmp.le.f32.partialorder %s1657_s18, %s1483_s20 }
 0x10b   :  { %s2550_s0 = smov (!%p1484_p4), 0  }
 0x10c   :  { %1487 = sbr.rel (%p1484_p4) target bundleno = 950 (0x3b6), region = 440 }
 0x113 LB: > { %s2555_s21 = smov 0   ;;  %s2409_s0 = sphi %s2550_s0, %s2734_s0  }
 0x114 LB: >> { %s405_s22 = smov [#allocation12]  ;;  %v409_v10 = vmov %v2524_v10  ;;  %v412_v11 = vmov %v2526_v11  ;;  %s425_s23 = smov [#allocation13]  ;;  %vm728_vm14 = vcmp.eq.s32.totalorder %v2526_v11, 0  ;;  %vm740_vm15 = vcmp.eq.s32.totalorder %v2526_v11, 7  ;;  %s2413_s21 = sphi %s2555_s21, %s404_s21  }
 0x115   : >> { %v429_v10 = vmov %v2524_v10  ;;  %v432_v11 = vmov %v2526_v11  ;;  %v413_v50 = vld [vmem:[%s405_s22] sm:$0xff]  ;;  %vm416_vm5 = vcmp.eq.s32.totalorder %v412_v11, %v409_v10  ;;  %s445_s24 = smov [#allocation15]  ;;  %s406_s25 = smov [#allocation16] }
 0x116   : >> { %vm436_vm6 = vcmp.eq.s32.totalorder %v432_v11, %v429_v10  ;;  %v449_v10 = vmov %v2524_v10  ;;  %v452_v11 = vmov %v2526_v11  ;;  %v417_v51 = vsel %vm416_vm5, %v413_v50, 0.0  ;;  %v433_v52 = vld [vmem:[%s425_s23] sm:$0xff]  ;;  %s426_s1 = smov [#allocation17]  ;;  %s446_s26 = smov [#allocation18] }
 0x117   : >> { %vm456_vm7 = vcmp.eq.s32.totalorder %v452_v11, %v449_v10  ;;  %v418_v53 = vrot.slane %v417_v51, 4  ;;  %v437_v54 = vsel %vm436_vm6, %v433_v52, 0.0  ;;  %v453_v55 = vld [vmem:[%s445_s24] sm:$0xff]  ;;  %s469_s27 = smov [#allocation17]  ;;  %s467_s28 = smov [#allocation16]  ;;  %v518_v10 = vmov %v2524_v10 }
 0x118   : >> { %v438_v56 = vrot.slane %v437_v54, 4  ;;  %v457_v57 = vsel %vm456_vm7, %v453_v55, 0.0  ;;  %s471_s29 = smov [#allocation18]  ;;  %s506_s30 = smov [#allocation19]  ;;  %v521_v11 = vmov %v2526_v11  ;;  %v533_v10 = vmov %v2524_v10 }
 0x119   : >> { %v419_v58 = vadd.f32 %v418_v53, %v417_v51  ;;  %v458_v59 = vrot.slane %v457_v57, 4  ;;  %s508_s2 = smov [#allocation20]  ;;  %s465_s10 = smov [#allocation21]  ;;  %v536_v11 = vmov %v2526_v11  ;;  %vm523_vm12 = vcmp.eq.s32.totalorder %v521_v11, %v518_v10 }
 0x11a   : >> { %v439_v60 = vadd.f32 %v438_v56, %v437_v54  ;;  %s466_s11 = smov [#allocation22]  ;;  %s510_s10 = smov %s465_s10  ;;  %vm538_vm13 = vcmp.eq.s32.totalorder %v536_v11, %v533_v10  ;;  %v631_v10 = vmov %v2524_v10  ;;  %v634_v11 = vmov %v2526_v11 }
 0x11b   : >> { %v420_v61 = vrot.slane %v419_v58, 2  ;;  %v459_v62 = vadd.f32 %v458_v59, %v457_v57  ;;  %s512_s11 = smov %s466_s11  ;;  %s514_s12 = smov [#allocation21]  ;;  %v604_v10 = vmov %v2524_v10  ;;  %v607_v11 = vmov %v2526_v11 }
 0x11c   : >> { %v440_v63 = vrot.slane %v439_v60, 2  ;;  %s529_s3 = smov [#allocation22]  ;;  %s527_s13 = smov [#allocation23]  ;;  %v645_v10 = vmov %v2524_v10  ;;  %v648_v11 = vmov %v2526_v11  ;;  %vm638_vm0 = vcmp.eq.s32.totalorder %v634_v11, %v631_v10 }
 0x11d   : >> { %v421_v0 = vadd.f32 %v420_v61, %v419_v58  ;;  %v460_v1 = vrot.slane %v459_v62, 2  ;;  %s544_s14 = smov [#allocation23]  ;;  %s2570_s15 = smov [#allocation12]  ;;  %v618_v10 = vmov %v2524_v10  ;;  %v621_v11 = vmov %v2526_v11 }
 0x11e   : >> { %v441_v2 = vadd.f32 %v440_v63, %v439_v60  ;;  %s542_s16 = smov [#allocation24]  ;;  %s2572_s17 = smov [#allocation13]  ;;  %v552_v49 = vld [vmem:[%s2570_s15] sm:$0xff]  ;;  %vm612_vm1 = vcmp.eq.s32.totalorder %v607_v11, %v604_v10  ;;  %vm653_vm3 = vcmp.eq.s32.totalorder %v648_v11, %v645_v10  ;;  %vm625_vm4 = vcmp.eq.s32.totalorder %v621_v11, %v618_v10 }
 0x11f   : >> { %v422_v3 = vrot.slane %v421_v0, 1  ;;  %v461_v4 = vadd.f32 %v460_v1, %v459_v62  ;;  %s2574_s18 = smov [#allocation15]  ;;  %s768_s19 = smov [#allocation23]  ;;  %v553_v50 = vld [vmem:[%s2572_s17] sm:$0xff]  ;;  %vm667_vm5 = vcmp.eq.s32.totalorder %v2524_v10, 0  ;;  %vm671_vm6 = vcmp.eq.s32.totalorder %v2524_v10, 1 }
 0x120   : >> { %v442_v5 = vrot.slane %v441_v2, 1  ;;  %s2576_s20 = smov [#allocation8]  ;;  %s2578_s22 = smov [#allocation9]  ;;  %v555_v51 = vld [vmem:[%s2574_s18] sm:$0xff]  ;;  %vm684_vm7 = vcmp.eq.s32.totalorder %v2524_v10, 7 }
 0x121   : >> { %v423_v6 = vadd.f32 %v422_v3, %v421_v0  ;;  %v462_v7 = vrot.slane %v461_v4, 1  ;;  %s2580_s23 = smov [#allocation10]  ;;  %s2583_s24 = smov [#allocation11]  ;;  %v776_v52 = vld [vmem:[%s2576_s20] sm:$0xff] }
 0x122   : >> { %v443_v8 = vadd.f32 %v442_v5, %v441_v2  ;;  %v777_v53 = vld [vmem:[%s2578_s22] sm:$0xff]  ;;  %s404_s21 = sadd.s32 1, %s2413_s21  }
 0x123   : >> { %424 = vst [vmem:[%s406_s25] sm:$0x1] %v423_v6  ;;  %v463_v9 = vadd.f32 %v462_v7, %v461_v4  ;;  %s2585_s25 = smov [#allocation14]  ;;  %v778_v56 = vld [vmem:[%s2580_s23] sm:$0xff]  ;;  %p401_p5 = scmp.ge.s32.totalorder %s404_s21, 15  }
 0x124   : >> { %444 = vst [vmem:[%s426_s1] sm:$0x1] %v443_v8  ;;  %v779_v57 = vld [vmem:[%s2583_s24] sm:$0xff]  ;;  %s546_s1 = smov [#allocation24]  ;;  %v305_v10 = vmov (%p401_p5), %v2524_v10  ;;  %v308_v11 = vmov (%p401_p5), %v2526_v11 }
 0x125   : >> { %464 = vst [vmem:[%s446_s26] sm:$0x1] %v463_v9  ;;  %s770_s26 = smov [#allocation24]  ;;  %v554_v58 = vld [vmem:[%s2585_s25] sm:$0xff]  ;;  %v358_v10 = vmov (%p401_p5), %v2524_v10 }
 0x12a   : >> { %v468_v14 = vld [vmem:[%s467_s28] sm:$0xff]  ;;  %s797_s28 = smov [#allocation10] }
 0x12b   : >> { %v470_v12 = vld [vmem:[%s469_s27] sm:$0xff]  ;;  %v491_v27 = vand.u32 2147483647, %v468_v14  ;;  %s796_s27 = smov [#allocation8] }
 0x12c   : >> { %v474_v13 = vmul.f32 2.0, %v470_v12  ;;  %v472_v15 = vld [vmem:[%s471_s29] sm:$0xff]  ;;  %v492_v32 = vand.u32 2147483647, %v470_v12  ;;  %s572_s29 = smov [#allocation21] }
 0x12d   : >> { %v473_v16 = vsub.f32 %v472_v15, %v468_v14  ;;  %v493_v28 = vand.u32 2147483647, %v472_v15 }
 0x12e   : >> { %2135 = vrcp.f32 %v474_v13 }
 0x12f   : >> { %v494_v31 = vmin.f32 %v491_v27, %v493_v28 }
 0x131   : >> { %v495_v33 = vmul.f32 1.1920929e-08, %v494_v31 }
 0x133   : >> { %vm496_vm11 = vcmp.le.f32.partialorder %v492_v32, %v495_v33 }
 0x138   : >> { %v2136_v17 = vpop.eup %2135 }
 0x139   : >> { %v476_v18 = vmul.f32 %v2136_v17, %v473_v16 }
 0x13b   : >> { %v478_v19 = vmul.f32 %v476_v18, %v476_v18  ;;  %vm477_vm10 = vcmp.ge.f32.partialorder %v476_v18, 0.0 }
 0x13d   : >> { %v479_v20 = vadd.f32 1.0, %v478_v19 }
 0x13f   : >> { %2137 = vrsqrt.f32 %v479_v20  ;;  %vm482_vm8 = vcmp.eq.f32.partialorder %v479_v20, inf  ;;  %v485_v22 = vand.u32 2147483648, %v479_v20  ;;  %vm484_vm9 = vcmp.eq.f32.partialorder %v479_v20, 0.0 }
 0x149   : >> { %v2138_v21 = vpop.eup %2137 }
 0x14a   : >> { %v481_v23 = vmul.f32 %v2138_v21, %v479_v20 }
 0x14c   : >> { %v483_v24 = vsel %vm482_vm8, %v479_v20, %v481_v23  ;;  %vm320_vm8 = vcmp.eq.s32.totalorder (%p401_p5), %v308_v11, %v305_v10  ;;  %v361_v11 = vmov (%p401_p5), %v2526_v11  ;;  %v324_v10 = vmov (%p401_p5), %v2524_v10 }
 0x14d   : >> { %v486_v25 = vsel %vm484_vm9, %v485_v22, %v483_v24  ;;  %v327_v11 = vmov (%p401_p5), %v2526_v11  ;;  %v341_v10 = vmov (%p401_p5), %v2524_v10  ;;  %vm373_vm9 = vcmp.eq.s32.totalorder (%p401_p5), %v361_v11, %v358_v10 }
 0x14e   : >> { %v487_v26 = vxor.u32 2147483648, %v486_v25  ;;  %v344_v11 = vmov (%p401_p5), %v2526_v11 }
 0x150   : >> { %v488_v29 = vsel %vm477_vm10, %v486_v25, %v487_v26 }
 0x151   : >> { %v489_v30 = vadd.f32 %v488_v29, %v476_v18 }
 0x153   : >> { %2139 = vrcp.f32 %v489_v30 }
 0x15d   : >> { %v2140_v34 = vpop.eup %2139 }
 0x15e   : >> { %v497_v35 = vsel %vm496_vm11, 0.0, %v2140_v34 }
 0x15f   : >> { %v498_v36 = vmul.f32 %v497_v35, %v497_v35  ;;  %v502_v37 = vmul.f32 %v497_v35, %v470_v12 }
 0x161   : >> { %v499_v38 = vadd.f32 1.0, %v498_v36  ;;  %v503_v39 = vsub.f32 %v468_v14, %v502_v37  ;;  %v505_v40 = vadd.f32 %v502_v37, %v472_v15 }
 0x163   : >> { %2141 = vrsqrt.f32 %v499_v38  ;;  %507 = vst [vmem:[%s506_s30] sm:$0xff] %v503_v39  ;;  %509 = vst [vmem:[%s508_s2] sm:$0xff] %v505_v40  ;;  %s574_s30 = smov [#allocation22]  ;;  %s2602_s2 = smov [#allocation9] }
 0x16d   : >> { %v2142_v41 = vpop.eup %2141 }
 0x16e   : >> { %511 = vst [vmem:[%s510_s10] sm:$0xff] %v2142_v41  ;;  %v501_v42 = vmul.f32 %v2142_v41, %v497_v35  ;;  %s2604_s10 = smov [#allocation11] }
 0x170   : >> { %513 = vst [vmem:[%s512_s11] sm:$0xff] %v501_v42  ;;  %s2608_s11 = smov [#allocation14] }
 0x175   : >> { %v515_v43 = vld [vmem:[%s514_s12] ss:$0 sm:$0xff]  ;;  %s2610_s12 = smov [#allocation15] }
 0x176   : >> { %v524_v44 = vsel %vm523_vm12, %v515_v43, 0.0  ;;  %v573_v23 = vld [vmem:[%s572_s29] ss:$0 sm:$0xff]  ;;  %s745_s29 = smov [#allocation15] }
 0x177   : >> { %525 = vadd.xlane.f32.xlu0 %v524_v44  ;;  %v530_v45 = vld [vmem:[%s529_s3] ss:$0 sm:$0xff]  ;;  %s2612_s3 = smov [#allocation12] }
 0x178   : >> { %v539_v46 = vsel %vm538_vm13, %v530_v45, 0.0  ;;  %v575_v24 = vld [vmem:[%s574_s30] ss:$0 sm:$0xff]  ;;  %s844_s30 = sadd.s32 (%p401_p5), 1, %s2409_s0  }
 0x179   : > { %p397_p6 = scmp.ge.s32.totalorder (%p401_p5), %s844_s30, 15  ;;  %s2734_s0 = smov (%p401_p5), %s844_s30 }
 0x17b   : >> { %540 = vadd.xlane.f32.xlu0 %v539_v46 }
 0x204   : >> { %v526_v47 = vpop.xlane.xlu0 %525 }
 0x205   : >> { %528 = vst [vmem:[%s527_s13] sm:$0xff] %v526_v47  ;;  %s2614_s13 = smov [#allocation13] }
 0x208   : >> { %v541_v48 = vpop.xlane.xlu0 %540 }
 0x209   : >> { %543 = vst [vmem:[%s542_s16] sm:$0xff] %v541_v48  ;;  %s628_s16 = smov [#allocation14] }
 0x20c   : >> { %v545_v54 = vld [vmem:[%s544_s14] sm:$0xff]  ;;  %s601_s14 = smov [#allocation19] }
 0x20d   : >> { %v769_v55 = vld [vmem:[%s768_s19] sm:$0xff]  ;;  %v556_v59 = vmul.f32 %v552_v49, %v545_v54  ;;  %v559_v60 = vmul.f32 %v553_v50, %v545_v54  ;;  %v566_v61 = vmul.f32 %v555_v51, %v545_v54  ;;  %v563_v4 = vmul.f32 %v554_v58, %v545_v54  ;;  %s615_s19 = smov [#allocation13] }
 0x20e   : >> { %v780_v62 = vmul.f32 %v776_v52, %v769_v55  ;;  %v783_v63 = vmul.f32 %v777_v53, %v769_v55  ;;  %v787_v0 = vmul.f32 %v778_v56, %v769_v55  ;;  %v790_v1 = vmul.f32 %v779_v57, %v769_v55  ;;  %v608_v55 = vld [vmem:[%s601_s14] ss:$0 sm:$0xff] }
 0x210   : >> { %v547_v2 = vld [vmem:[%s546_s1] sm:$0xff]  ;;  %s2651_s1 = smov [#allocation15] }
 0x211   : >> { %v771_v3 = vld [vmem:[%s770_s26] sm:$0xff]  ;;  %v560_v5 = vmul.f32 %v555_v51, %v547_v2  ;;  %v562_v6 = vmul.f32 %v552_v49, %v547_v2  ;;  %v565_v7 = vmul.f32 %v553_v50, %v547_v2  ;;  %v557_v14 = vmul.f32 %v554_v58, %v547_v2  ;;  %s720_s26 = smov [#allocation12] }
 0x212   : >> { %v781_v8 = vmul.f32 %v778_v56, %v771_v3  ;;  %v784_v9 = vmul.f32 %v779_v57, %v771_v3  ;;  %v786_v12 = vmul.f32 %v776_v52, %v771_v3  ;;  %v789_v13 = vmul.f32 %v777_v53, %v771_v3 }
 0x213   : >> { %v561_v15 = vsub.f32 %v559_v60, %v560_v5  ;;  %v567_v16 = vadd.f32 %v566_v61, %v565_v7  ;;  %v564_v18 = vadd.f32 %v563_v4, %v562_v6  ;;  %v558_v22 = vsub.f32 %v556_v59, %v557_v14 }
 0x214   : >> { %v782_v17 = vsub.f32 %v780_v62, %v781_v8  ;;  %v785_v19 = vsub.f32 %v783_v63, %v784_v9  ;;  %v788_v20 = vadd.f32 %v787_v0, %v786_v12  ;;  %v791_v21 = vadd.f32 %v790_v1, %v789_v13 }
 0x215   : >> { %569 = vst [vmem:[%s2572_s17] sm:$0xff] %v561_v15  ;;  %571 = vst [vmem:[%s2574_s18] sm:$0xff] %v567_v16  ;;  %s600_s17 = smov [#allocation12]  ;;  %s641_s18 = smov [#allocation15] }
 0x216   : >> { %792 = vst [vmem:[%s2576_s20] sm:$0xff] %v782_v17  ;;  %570 = vst [vmem:[%s2585_s25] sm:$0xff] %v564_v18  ;;  %s2648_s20 = smov [#allocation14]  ;;  %s2449_s25 = smov 127  }
 0x217   : >> { %793 = vst [vmem:[%s2578_s22] sm:$0xff] %v785_v19  ;;  %794 = vst [vmem:[%s2580_s23] sm:$0xff] %v788_v20  ;;  %s656_s22 = smov [#allocation12]  ;;  %s2448_s23 = smov 1  }
 0x218   : >> { %795 = vst [vmem:[%s2583_s24] sm:$0xff] %v791_v21  ;;  %568 = vst [vmem:[%s2570_s15] sm:$0xff] %v558_v22  ;;  %s642_s15 = smov [#allocation20]  ;;  %s657_s24 = smov [#allocation13] }
 0x219   : >> { %v649_v56 = vld [vmem:[%s642_s15] ss:$0 sm:$0xff] }
 0x21c   : >> { %v583_v39 = vld [vmem:[%s2610_s12] sm:$0xff] }
 0x21d   : >> { %v798_v25 = vld [vmem:[%s796_s27] ss:$0 sm:$0xff]  ;;  %v1627_v27 = vld [vmem:[%s796_s27 + $0x7] ss:$0 sm:$0xff]  ;;  %v591_v42 = vmul.f32 %v583_v39, %v575_v24  ;;  %v594_v46 = vmul.f32 %v583_v39, %v573_v23 }
 0x21e   : >> { %v1626_v26 = vld [vmem:[%s796_s27 - $0x1] sm:$0xfe]  ;;  %v1631_v34 = vld [vmem:[%s2602_s2 + $0x7] ss:$0 sm:$0xff] }
 0x21f   : >> { %v805_v28 = vsel %vm728_vm14, %v798_v25, %v1626_v26  ;;  %v809_v29 = vld [vmem:[%s797_s28] ss:$0 sm:$0xff]  ;;  %v1629_v30 = vld [vmem:[%s797_s28 + $0x1] sm:$0x7f] }
 0x220   : >> { %v822_v31 = vld [vmem:[%s2602_s2] ss:$0 sm:$0xff]  ;;  %808 = vst [vmem:[%s796_s27] sm:$0xff] %v805_v28  ;;  %v817_v32 = vsel %vm740_vm15, %v1627_v27, %v1629_v30  ;;  %v1633_v37 = vld [vmem:[%s2604_s10 + $0x1] sm:$0x7f] }
 0x221   : >> { %v1630_v33 = vld [vmem:[%s2602_s2 - $0x1] sm:$0xfe]  ;;  %1628 = vst [vmem:[%s796_s27 + $0x1] sm:$0x1] %v809_v29  ;;  %819 = vst [vmem:[%s797_s28] sm:$0xff] %v817_v32  ;;  %v841_v40 = vsel %vm740_vm15, %v1631_v34, %v1633_v37  ;;  %s744_s27 = smov [#allocation13]  ;;  %s721_s28 = smov [#allocation14] }
 0x222   : >> { %v833_v35 = vld [vmem:[%s2604_s10] ss:$0 sm:$0xff]  ;;  %v829_v36 = vsel %vm728_vm14, %v822_v31, %v1630_v33 }
 0x223   : >> { %v582_v38 = vld [vmem:[%s2608_s11] sm:$0xff]  ;;  %832 = vst [vmem:[%s2602_s2] sm:$0xff] %v829_v36  ;;  %843 = vst [vmem:[%s2604_s10] sm:$0xff] %v841_v40  ;;  %s328_s10 = smov (%p401_p5), [#allocation13] }
 0x224   : >> { %v590_v41 = vmul.f32 %v582_v38, %v573_v23  ;;  %v593_v43 = vmul.f32 %v582_v38, %v575_v24  ;;  %v580_v44 = vld [vmem:[%s2612_s3] sm:$0xff]  ;;  %1632 = vst [vmem:[%s2602_s2 + $0x1] sm:$0x1] %v833_v35  ;;  %s309_s2 = smov (%p401_p5), [#allocation12] }
 0x225   : >> { %v581_v45 = vld [vmem:[%s2614_s13] sm:$0xff]  ;;  %v584_v47 = vmul.f32 %v580_v44, %v573_v23  ;;  %v587_v49 = vmul.f32 %v580_v44, %v575_v24 }
 0x226   : >> { %v585_v48 = vmul.f32 %v581_v45, %v575_v24  ;;  %v592_v50 = vsub.f32 %v590_v41, %v591_v42  ;;  %v588_v51 = vmul.f32 %v581_v45, %v573_v23  ;;  %v595_v52 = vadd.f32 %v594_v46, %v593_v43 }
 0x228   : >> { %v586_v53 = vsub.f32 %v584_v47, %v585_v48  ;;  %598 = vst [vmem:[%s2608_s11] sm:$0xff] %v592_v50  ;;  %v589_v54 = vadd.f32 %v588_v51, %v587_v49  ;;  %599 = vst [vmem:[%s2610_s12] sm:$0xff] %v595_v52  ;;  %s345_s11 = smov (%p401_p5), [#allocation14]  ;;  %s362_s12 = smov (%p401_p5), [#allocation15] }
 0x22a   : >> { %596 = vst [vmem:[%s2612_s3] sm:$0xff] %v586_v53  ;;  %597 = vst [vmem:[%s2614_s13] sm:$0xff] %v589_v54 }
 0x22f   : >> { %v635_v57 = vld [vmem:[%s628_s16] sm:$0xff] }
 0x230   : >> { %v639_v58 = vsel %vm638_vm0, 0.0, %v635_v57  ;;  %v650_v60 = vld [vmem:[%s641_s18] sm:$0xff] }
 0x231   : >> { %v609_v59 = vld [vmem:[%s600_s17] sm:$0xff]  ;;  %640 = vst [vmem:[%s628_s16] sm:$0xff] %v639_v58  ;;  %v654_v63 = vsel %vm653_vm3, %v649_v56, %v650_v60 }
 0x232   : >> { %v613_v61 = vsel %vm612_vm1, %v608_v55, %v609_v59  ;;  %v622_v62 = vld [vmem:[%s615_s19] sm:$0xff]  ;;  %655 = vst [vmem:[%s641_s18] sm:$0xff] %v654_v63 }
 0x233   : >> { %614 = vst [vmem:[%s600_s17] sm:$0xff] %v613_v61  ;;  %v626_v0 = vsel %vm625_vm4, 0.0, %v622_v62 }
 0x234   : >> { %627 = vst [vmem:[%s615_s19] sm:$0xff] %v626_v0 }
 0x238   : >> { %v694_v1 = vld [vmem:[%s2648_s20] sm:$0xff] }
 0x239   : >> { %695 = vrot.lane.b32.xlu0 %v694_v1, %s2448_s23  ;;  %v690_v4 = vld [vmem:[%s2651_s1] sm:$0xff] }
 0x23a   : >> { %v662_v2 = vld [vmem:[%s656_s22] sm:$0xff] }
 0x23b   : >> { %663 = vrot.lane.b32.xlu1 %v662_v2, %s2448_s23  ;;  %v658_v3 = vld [vmem:[%s657_s24] sm:$0xff] }
 0x23f   : >> { %659 = vrot.lane.b32.xlu1 %v658_v3, %s2448_s23 }
 0x243   : >> { %680 = vrot.lane.b32.xlu1 %v658_v3, %s2449_s25 }
 0x247   : >> { %691 = vrot.lane.b32.xlu1 %v690_v4, %s2448_s23 }
 0x24b   : >> { %712 = vrot.lane.b32.xlu1 %v690_v4, %s2449_s25 }
 0x2ab   : >> { %v696_v13 = vpop.permute.xlu0 %695 }
 0x2ac   : >> { %v700_v15 = vsel %vm667_vm5, %v694_v1, %v696_v13 }
 0x2ad   : >> { %v664_v5 = vpop.permute.xlu1 %663 }
 0x2ae   : >> { %v668_v6 = vsel %vm667_vm5, %v662_v2, %v664_v5 }
 0x2b1   : >> { %v660_v7 = vpop.permute.xlu1 %659 }
 0x2b2   : >> { %v672_v8 = vsel %vm671_vm6, %v660_v7, %v668_v6 }
 0x2b3   : >> { %v678_v9 = vsel %vm1405_vm2, %v672_v8, 0.0 }
 0x2b4   : >> { %686 = vst [vmem:[%s656_s22] sm:$0xff] %v678_v9 }
 0x2b5   : >> { %v681_v12 = vpop.permute.xlu1 %680 }
 0x2b6   : >> { %v685_v14 = vsel %vm684_vm7, %v662_v2, %v681_v12 }
 0x2b7   : >> { %687 = vst [vmem:[%s657_s24] sm:$0xff] %v685_v14 }
 0x2b9   : >> { %v692_v16 = vpop.permute.xlu1 %691 }
 0x2ba   : >> { %v704_v17 = vsel %vm671_vm6, %v692_v16, %v700_v15 }
 0x2bb   : >> { %v722_v18 = vld [vmem:[%s720_s26] ss:$0 sm:$0xff]  ;;  %v1619_v20 = vld [vmem:[%s720_s26 + $0x7] ss:$0 sm:$0xff]  ;;  %v710_v22 = vsel %vm1405_vm2, %v704_v17, 0.0 }
 0x2bc   : >> { %v1618_v19 = vld [vmem:[%s720_s26 - $0x1] sm:$0xfe]  ;;  %718 = vst [vmem:[%s2648_s20] sm:$0xff] %v710_v22 }
 0x2bd   : >> { %v729_v21 = vsel %vm728_vm14, %v722_v18, %v1618_v19  ;;  %v713_v23 = vpop.permute.xlu1 %712 }
 0x2be   : >> { %732 = vst [vmem:[%s720_s26] sm:$0xff] %v729_v21  ;;  %v746_v24 = vld [vmem:[%s744_s27] ss:$0 sm:$0xff]  ;;  %v1623_v26 = vld [vmem:[%s744_s27 + $0x7] ss:$0 sm:$0xff]  ;;  %v717_v27 = vsel %vm684_vm7, %v694_v1, %v713_v23 }
 0x2bf   : >> { %v1622_v25 = vld [vmem:[%s744_s27 - $0x1] sm:$0xfe]  ;;  %719 = vst [vmem:[%s2651_s1] sm:$0xff] %v717_v27 }
 0x2c0   : >> { %v753_v28 = vsel %vm728_vm14, %v746_v24, %v1622_v25 }
 0x2c1   : >> { %756 = vst [vmem:[%s744_s27] sm:$0xff] %v753_v28 }
 0x2c3   : >> { %v733_v29 = vld [vmem:[%s721_s28] ss:$0 sm:$0xff]  ;;  %v1621_v30 = vld [vmem:[%s721_s28 + $0x1] sm:$0x7f] }
 0x2c4   : >> { %1620 = vst [vmem:[%s720_s26 + $0x1] sm:$0x1] %v733_v29  ;;  %v741_v31 = vsel %vm740_vm15, %v1619_v20, %v1621_v30  ;;  %403 = sbr.rel (!%p401_p5) target bundleno = 276 (0x114), region = 435 }
 0x2c5   : >> { %743 = vst [vmem:[%s721_s28] sm:$0xff] %v741_v31 }
 0x2c6   : >> { %v757_v32 = vld [vmem:[%s745_s29] ss:$0 sm:$0xff]  ;;  %v1625_v33 = vld [vmem:[%s745_s29 + $0x1] sm:$0x7f] }
 0x2c7   : >> { %1624 = vst [vmem:[%s744_s27 + $0x1] sm:$0x1] %v757_v32  ;;  %v765_v34 = vsel %vm740_vm15, %v1623_v26, %v1625_v33 }
 0x2c8   : >> { %767 = vst [vmem:[%s745_s29] sm:$0xff] %v765_v34 }
 0x2cb   : > { %v315_v35 = vld [vmem:[%s309_s2] sm:$0xff] }
 0x2cc   : > { %v316_v37 = vsel %vm1405_vm2, %v315_v35, 0.0  ;;  %v351_v39 = vld [vmem:[%s345_s11] sm:$0xff] }
 0x2cd   : > { %v317_v41 = vmul.f32 %v316_v37, %v316_v37  ;;  %v352_v43 = vsel %vm1405_vm2, %v351_v39, 0.0 }
 0x2ce   : > { %v334_v36 = vld [vmem:[%s328_s10] sm:$0xff]  ;;  %v353_v45 = vmul.f32 %v352_v43, %v352_v43 }
 0x2cf   : > { %v335_v38 = vsel %vm1405_vm2, %v334_v36, 0.0  ;;  %v368_v40 = vld [vmem:[%s362_s12] sm:$0xff]  ;;  %v321_v48 = vsel %vm320_vm8, 0.0, %v317_v41 }
 0x2d0   : > { %v336_v42 = vmul.f32 %v335_v38, %v335_v38  ;;  %v369_v44 = vsel %vm1405_vm2, %v368_v40, 0.0 }
 0x2d1   : > { %v370_v47 = vmul.f32 %v369_v44, %v369_v44 }
 0x2d2   : > { %v338_v46 = vadd.f32 %v336_v42, %v317_v41  ;;  %v337_v49 = vadd.f32 %v336_v42, %v321_v48 }
 0x2d3   : > { %v374_v52 = vsel %vm373_vm9, 0.0, %v370_v47 }
 0x2d4   : > { %v355_v50 = vadd.f32 %v353_v45, %v338_v46  ;;  %v354_v51 = vadd.f32 %v353_v45, %v337_v49 }
 0x2d6   : > { %v376_v53 = vadd.f32 %v370_v47, %v355_v50  ;;  %v375_v54 = vadd.f32 %v374_v52, %v354_v51 }
 0x2d8   : > { %377 = vadd.xlane.f32.xlu0 %v376_v53 }
 0x2dc   : > { %385 = vadd.xlane.f32.xlu0 %v375_v54 }
 0x365   : > { %v378_v55 = vpop.xlane.xlu0 %377 }
 0x366   : > { %v379_v56 = vrot.slane %v378_v55, 4 }
 0x368   : > { %v380_v57 = vadd.f32 %v379_v56, %v378_v55 }
 0x369   : > { %v386_v58 = vpop.xlane.xlu0 %385 }
 0x36a   : > { %v381_v59 = vrot.slane %v380_v57, 2  ;;  %v387_v60 = vrot.slane %v386_v58, 4 }
 0x36c   : > { %v388_v61 = vadd.f32 %v387_v60, %v386_v58  ;;  %v382_v62 = vadd.f32 %v381_v59, %v380_v57 }
 0x36e   : > { %v389_v63 = vrot.slane %v388_v61, 2  ;;  %v383_v1 = vrot.slane %v382_v62, 1 }
 0x370   : > { %v390_v0 = vadd.f32 %v389_v63, %v388_v61  ;;  %v384_v4 = vadd.f32 %v383_v1, %v382_v62 }
 0x372   : > { %v391_v2 = vrot.slane %v390_v0, 1 }
 0x374   : > { %v392_v3 = vadd.f32 %v391_v2, %v390_v0 }
 0x376   : > { %1660 = vpush %v392_v3 }
 0x377   : > { %1662 = vpush %v384_v4 }
 0x3a7   : > { %s1661_s21 = spop %1660 }
 0x3a8   : > { %s1663_s3 = spop %1662 }
 0x3a9   : > { %s395_s13 = smul.f32 1e-10, %s1663_s3 }
 0x3ab   : > { %p396_p7 = scmp.le.f32.partialorder %s1661_s21, %s395_s13 }
 0x3ad   : > { %p398_p8 = por %p397_p6, %p396_p7 }
 0x3af   :  { %846 = sbr.rel (!%p398_p8) target bundleno = 275 (0x113), region = 446 }
 0x3b6 PF:  { %s847_s14 = smov [#allocation12]  ;;  %v851_v10 = vmov %v2524_v10  ;;  %v854_v11 = vmov %v2526_v11  ;;  %s867_s15 = smov [#allocation15] }
 0x3b7   :  { %v871_v10 = vmov %v2524_v10  ;;  %v874_v11 = vmov %v2526_v11  ;;  %v855_v5 = vld [vmem:[%s847_s14] sm:$0xff]  ;;  %vm858_vm10 = vcmp.eq.s32.totalorder %v854_v11, %v851_v10  ;;  %s848_s0 = smov [#allocation4]  ;;  %s868_s16 = smov [#allocation6] }
 0x3b8   :  { %vm878_vm11 = vcmp.eq.s32.totalorder %v874_v11, %v871_v10  ;;  %v859_v6 = vsel %vm858_vm10, %v855_v5, 0.0  ;;  %v875_v7 = vld [vmem:[%s867_s15] sm:$0xff]  ;;  %s2415_s24 = smov %s2730_s6   ;;  %s2419_s25 = smov [#allocation8]  }
 0x3b9   :  { %v860_v8 = vrot.slane %v859_v6, 4  ;;  %v879_v9 = vsel %vm878_vm11, %v875_v7, 0.0 }
 0x3ba   :  { %v880_v12 = vrot.slane %v879_v9, 4 }
 0x3bb   :  { %v861_v13 = vadd.f32 %v860_v8, %v859_v6 }
 0x3bc   :  { %v881_v14 = vadd.f32 %v880_v12, %v879_v9 }
 0x3bd   :  { %v862_v15 = vrot.slane %v861_v13, 2 }
 0x3be   :  { %v882_v16 = vrot.slane %v881_v14, 2 }
 0x3bf   :  { %v863_v17 = vadd.f32 %v862_v15, %v861_v13 }
 0x3c0   :  { %v883_v18 = vadd.f32 %v882_v16, %v881_v14 }
 0x3c1   :  { %v864_v19 = vrot.slane %v863_v17, 1 }
 0x3c2   :  { %v884_v20 = vrot.slane %v883_v18, 1 }
 0x3c3   :  { %v865_v21 = vadd.f32 %v864_v19, %v863_v17 }
 0x3c4   :  { %v885_v22 = vadd.f32 %v884_v20, %v883_v18 }
 0x3c5   :  { %866 = vst [vmem:[%s848_s0] sm:$0x1] %v865_v21 }
 0x3c6   :  { %886 = vst [vmem:[%s868_s16] sm:$0x1] %v885_v22 }
 0x3cc   :  { %v890_v10 = vld [vmem:[#allocation4] sm:$0x1] }
 0x3cd   :  { %892 = vst [vmem:[#allocation5] sm:$0x1] %v890_v10  ;;  %v896_v11 = vld [vmem:[#allocation6] sm:$0x1] }
 0x3ce   :  { %898 = vst [vmem:[#allocation7] sm:$0x1] %v896_v11 }
 0x3d4   :  { %v961_v23 = vld [vmem:[#allocation5] sm:$0x1] }
 0x3d5   :  { %962 = vst [vmem:[%s2728_s4] sm:$0x1] %v961_v23  ;;  %v1025_v24 = vld [vmem:[#allocation7] sm:$0x1] }
 0x3d6   :  { %1026 = vst [vmem:[%s2729_s5] sm:$0x1] %v1025_v24 }
 0x3d7 LB: > { %v1074_v25 = vld [vmem:[%s2421_s25] sm:$0xff]  ;;  %s1076_s25 = scalar_lea.vmem %s2421_s25, 8   ;;  %s2421_s25 = sphi %s2419_s25, %s1076_s25   ;;  %s2417_s24 = sphi %s2415_s24, %s1077_s24  }
 0x3d8   : > { %1075 = vst [vmem:[%s2417_s24] sm:$0xff] %v1074_v25  ;;  %s1077_s24 = scalar_lea.vmem %s2417_s24, 8   ;;  %p1071_p9 = scmp.gt.s32.totalorder %s1076_s25, [#allocation8] }
 0x3d9   :  { %s2423_s5 = smov (%p1071_p9), %s2731_s7   ;;  %s2427_s26 = smov (%p1071_p9), [#allocation9]  }
 0x3da   :  { %1073 = sbr.rel (!%p1071_p9) target bundleno = 983 (0x3d7), region = 512 }
 0x3e1 LB: > { %v1136_v26 = vld [vmem:[%s2429_s26] sm:$0xff]  ;;  %s1138_s26 = scalar_lea.vmem %s2429_s26, 8   ;;  %s2429_s26 = sphi %s2427_s26, %s1138_s26   ;;  %s2425_s5 = sphi %s2423_s5, %s1139_s5  }
 0x3e2   : > { %1137 = vst [vmem:[%s2425_s5] sm:$0xff] %v1136_v26  ;;  %s1139_s5 = scalar_lea.vmem %s2425_s5, 8   ;;  %p1133_p10 = scmp.gt.s32.totalorder %s1138_s26, [#allocation9] }
 0x3e3   :  { %s2431_s28 = smov (%p1133_p10), %s2732_s8   ;;  %s2435_s29 = smov (%p1133_p10), [#allocation10]  }
 0x3e4   :  { %1135 = sbr.rel (!%p1133_p10) target bundleno = 993 (0x3e1), region = 534 }
 0x3eb LB: > { %v1198_v27 = vld [vmem:[%s2437_s29] sm:$0xff]  ;;  %s1200_s29 = scalar_lea.vmem %s2437_s29, 8   ;;  %s2437_s29 = sphi %s2435_s29, %s1200_s29   ;;  %s2433_s28 = sphi %s2431_s28, %s1201_s28  }
 0x3ec   : > { %1199 = vst [vmem:[%s2433_s28] sm:$0xff] %v1198_v27  ;;  %s1201_s28 = scalar_lea.vmem %s2433_s28, 8   ;;  %p1195_p11 = scmp.gt.s32.totalorder %s1200_s29, [#allocation10] }
 0x3ed   :  { %s2439_s2 = smov (%p1195_p11), %s2733_s9   ;;  %s2443_s10 = smov (%p1195_p11), [#allocation11]  }
 0x3ee   :  { %1197 = sbr.rel (!%p1195_p11) target bundleno = 1003 (0x3eb), region = 556 }
 0x3f5 LB: > { %v1260_v28 = vld [vmem:[%s2445_s10] sm:$0xff]  ;;  %s1262_s10 = scalar_lea.vmem %s2445_s10, 8   ;;  %s2445_s10 = sphi %s2443_s10, %s1262_s10   ;;  %s2441_s2 = sphi %s2439_s2, %s1263_s2  }
 0x3f6   : > { %1261 = vst [vmem:[%s2441_s2] sm:$0xff] %v1260_v28  ;;  %s1263_s2 = scalar_lea.vmem %s2441_s2, 8   ;;  %p1257_p12 = scmp.gt.s32.totalorder %s1262_s10, [#allocation11] }
 0x3f8   :  { %1259 = sbr.rel (!%p1257_p12) target bundleno = 1013 (0x3f5), region = 578 }

// kernel: custom-call.4
= control target key start
LH: loop header
LB: loop body
LE: loop exit
PB: predicated region body
PF: predicated region fallthrough
CT: control target
= control target key end

     0   :  { %s1662_s30 = smov 0   ;;  %s1664_s10 = smov 0   ;;  %s1971_s0 = inlined_call_operand.vmem [shape: f32[16,8,8], index: 0, kind: input, shape index: {}]   ;;  %s1972_s1 = inlined_call_operand.vmem [shape: f32[16,8,8], index: 1, kind: input, shape index: {}]   ;;  %s1973_s2 = inlined_call_operand.vmem [shape: f32[16,8,8], index: 2, kind: input, shape index: {}]   ;;  %s1974_s3 = inlined_call_operand.vmem [shape: f32[16,8,8], index: 3, kind: input, shape index: {}]   ;;  %s1975_s4 = inlined_call_operand.vmem [shape: f32[16,8], index: 4, kind: output, shape index: {0}]   ;;  %s1976_s5 = inlined_call_operand.vmem [shape: f32[16,8], index: 5, kind: output, shape index: {1}]   ;;  %s1977_s6 = inlined_call_operand.vmem [shape: f32[16,8,8], index: 6, kind: output, shape index: {2}]   ;;  %s1978_s7 = inlined_call_operand.vmem [shape: f32[16,8,8], index: 7, kind: output, shape index: {3}]   ;;  %s1979_s8 = inlined_call_operand.vmem [shape: f32[16,8,8], index: 8, kind: output, shape index: {4}]   ;;  %s1980_s9 = inlined_call_operand.vmem [shape: f32[16,8,8], index: 9, kind: output, shape index: {5}]  }
   0x1   :  { %s1666_s11 = smov 0  }
   0x2 LB: > { %s1678_s12 = sadd.s32 4294967295, %s1599_s11   ;;  %s1681_s13 = sadd.s32 1, %s1599_s11   ;;  %s1599_s11 = sphi %s1666_s11, %s1989_s11   ;;  %s1595_s10 = sphi %s1664_s10, %s1988_s10   ;;  %s1591_s30 = sphi %s1662_s30, %s1987_s30  }
   0x3   : > { %s20_s14 = sshrl.u32 %s1599_s11, 3  ;;  %s21_s15 = sshrl.u32 %s1681_s13, 3 }
   0x4   : > { %s22_s16 = ssub.s32 %s20_s14, %s21_s15  ;;  %s25_s17 = sadd.s32 1, %s1595_s10 }
   0x5   : > { %p23_p0 = scmp.eq.s32.totalorder %s22_s16, 0  ;;  %p35_p1 = scmp.ne.s32.totalorder %s1595_s10, %s1591_s30 }
   0x6   : > { %p36_p2 = scmp.eq.s32.totalorder %s1678_s12, 15  ;;  %p1460_p4 = scmp.ge.s32.totalorder %s1599_s11, 16 }
   0x7   : > { %s1690_s18 = scalar_select %p23_p0, %s1595_s10, %s25_s17  }
   0x8   : > { %p1692_p3 = por %p36_p2, %p35_p1  ;;  %86 = sbr.rel (%p1460_p4) target bundleno = 17 (0x11), region = 16 }
   0x9   : > { %1981 = sst [smem:[#allocation23_spill]] %s1690_s18  ;;  %s88_s20 = sand.u32 (!%p1460_p4), 1, %s1599_s11  }
   0xa   : > { %s1462_s21 = sshll.u32 (!%p1460_p4), %s1599_s11, 3  ;;  %s1461_s22 = sshll.u32 (!%p1460_p4), %s88_s20, 3 }
   0xb   : > { %s92_s25 = scalar_lea.vmem (!%p1460_p4), %s1971_s0, %s1462_s21  ;;  %s90_s26 = scalar_lea.vmem (!%p1460_p4), [#allocation0], %s1461_s22 }
   0xc   : > { %v120_v0 = vld [vmem:[%s92_s25] sm:$0xff] (!%p1460_p4)  ;;  %s130_s29 = scalar_lea.vmem (!%p1460_p4), %s1972_s1, %s1462_s21  ;;  %s168_s16 = scalar_lea.vmem (!%p1460_p4), %s1973_s2, %s1462_s21 }
   0xd   : > { %121 = vst [vmem:[%s90_s26] sm:$0xff] (!%p1460_p4), %v120_v0  ;;  %v158_v1 = vld [vmem:[%s130_s29] sm:$0xff] (!%p1460_p4)  ;;  %s128_s17 = scalar_lea.vmem (!%p1460_p4), [#allocation1], %s1461_s22  ;;  %s206_s23 = scalar_lea.vmem (!%p1460_p4), %s1974_s3, %s1462_s21 }
   0xe   : > { %159 = vst [vmem:[%s128_s17] sm:$0xff] (!%p1460_p4), %v158_v1  ;;  %v196_v2 = vld [vmem:[%s168_s16] sm:$0xff] (!%p1460_p4)  ;;  %s166_s24 = scalar_lea.vmem (!%p1460_p4), [#allocation2], %s1461_s22  ;;  %s204_s25 = scalar_lea.vmem (!%p1460_p4), [#allocation3], %s1461_s22 }
   0xf   : > { %197 = vst [vmem:[%s166_s24] sm:$0xff] %v196_v2  ;;  %v234_v3 = vld [vmem:[%s206_s23] sm:$0xff] }
  0x10   : > { %235 = vst [vmem:[%s204_s25] sm:$0xff] %v234_v3 }
  0x11 PF: > { %p1469_p5 = scmp.ge.s32.totalorder %s1599_s11, 1  ;;  %p240_p6 = scmp.lt.s32.totalorder %s1599_s11, 17 }
  0x13   : > { %p241_p7 = pnand %p1469_p5, %p240_p6 }
  0x15   : > { %244 = sbr.rel (%p241_p7) target bundleno = 984 (0x3d8), region = 156 }
  0x1c   : > { %s247_s26 = sand.u32 1, %s1678_s12   ;;  %s281_s27 = sand.u32 1, %s1591_s30   ;;  %v325_v4 = vlaneseq  ;;  %v1609_v11 = vmov 0.0  }
  0x1d   : > { %s1470_s28 = sshll.u32 %s247_s26, 3  ;;  %s1715_s18 = sshll.u32 %s281_s27, 3 }
  0x1e   : > { %v1717_v5 = vand.u32 127, %v325_v4  ;;  %v1719_v6 = vshrl.u32 %v325_v4, 7  ;;  %s249_s21 = scalar_lea.vmem [#allocation0], %s1470_s28  ;;  %s253_s22 = scalar_lea.vmem [#allocation1], %s1470_s28 }
  0x1f   : > { %v309_v7 = vld [vmem:[%s249_s21] sm:$0xff]  ;;  %v312_v8 = vld [vmem:[%s253_s22] sm:$0xff]  ;;  %s257_s29 = scalar_lea.vmem [#allocation2], %s1470_s28  ;;  %s261_s11 = scalar_lea.vmem [#allocation3], %s1470_s28 }
  0x20   : > { %v315_v9 = vld [vmem:[%s257_s29] sm:$0xff]  ;;  %v318_v10 = vld [vmem:[%s261_s11] sm:$0xff]  ;;  %s1721_s14 = scalar_lea.vmem [#allocation6], %s1470_s28  ;;  %s1724_s30 = scalar_lea.vmem [#allocation7], %s1470_s28  ;;  %v327_v5 = vmov %v1717_v5  ;;  %v330_v6 = vmov %v1719_v6  ;;  %vm1349_vm2 = vcmp.lt.s32.totalorder %v1717_v5, 8 }
  0x21   : > { %320 = vst [vmem:[%s1721_s14] sm:$0xff] %v1609_v11  ;;  %321 = vst [vmem:[%s1724_s30] sm:$0xff] %v1609_v11  ;;  %s308_s15 = smov [#allocation10]  ;;  %s311_s16 = smov [#allocation11]  ;;  %v340_v5 = vmov %v1717_v5  ;;  %v343_v6 = vmov %v1719_v6  ;;  %vm334_vm0 = vcmp.eq.s32.totalorder %v330_v6, %v327_v5 }
  0x22   : > { %s1727_s17 = scalar_lea.vmem [#allocation8], %s1470_s28  ;;  %s1730_s20 = scalar_lea.vmem [#allocation9], %s1470_s28  ;;  %310 = vst [vmem:[%s308_s15] sm:$0xff] %v309_v7  ;;  %313 = vst [vmem:[%s311_s16] sm:$0xff] %v312_v8  ;;  %vm347_vm1 = vcmp.eq.s32.totalorder %v343_v6, %v340_v5  ;;  %v1341_v5 = vmov %v1717_v5  ;;  %v1344_v6 = vmov %v1719_v6 }
  0x23   : > { %322 = vst [vmem:[%s1727_s17] sm:$0xff] %v1609_v11  ;;  %323 = vst [vmem:[%s1730_s20] sm:$0xff] %v1609_v11  ;;  %s314_s23 = smov [#allocation12]  ;;  %s317_s24 = smov [#allocation13]  ;;  %vm1354_vm3 = vcmp.eq.s32.totalorder %v1344_v6, %v1341_v5  ;;  %v1392_v5 = vmov %v1717_v5  ;;  %v1361_v6 = vmov %v1719_v6 }
  0x24   : > { %316 = vst [vmem:[%s314_s23] sm:$0xff] %v315_v9  ;;  %319 = vst [vmem:[%s317_s24] sm:$0xff] %v318_v10  ;;  %s324_s14 = smov %s1721_s14  ;;  %s337_s20 = smov %s1730_s20  ;;  %v1358_v5 = vmov %v1717_v5  ;;  %v1395_v6 = vmov %v1719_v6 }
  0x25   : > { %s283_s25 = scalar_lea.vmem [#allocation4], %s1715_s18  ;;  %s1345_s27 = smov [#allocation10]  ;;  %v1375_v5 = vmov %v1717_v5  ;;  %v1378_v6 = vmov %v1719_v6  ;;  %vm1405_vm4 = vcmp.eq.s32.totalorder %v1395_v6, %v1392_v5 }
  0x26   : > { %s1362_s28 = smov [#allocation11]  ;;  %s1379_s21 = smov [#allocation12] }
  0x27   : > { %s1396_s22 = smov [#allocation13] }
  0x28   : > { %v331_v12 = vld [vmem:[%s324_s14] sm:$0xff] }
  0x29   : > { %v335_v13 = vsel %vm334_vm0, 1.0, %v331_v12  ;;  %v1351_v16 = vld [vmem:[%s1345_s27] sm:$0xff] }
  0x2a   : > { %v344_v14 = vld [vmem:[%s337_s20] sm:$0xff]  ;;  %336 = vst [vmem:[%s324_s14] sm:$0xff] %v335_v13  ;;  %v1352_v18 = vsel %vm1349_vm2, %v1351_v16, 0.0 }
  0x2b   : > { %v348_v15 = vsel %vm347_vm1, 1.0, %v344_v14  ;;  %v1368_v17 = vld [vmem:[%s1362_s28] sm:$0xff]  ;;  %v1353_v22 = vmul.f32 %v1352_v18, %v1352_v18 }
  0x2c   : > { %349 = vst [vmem:[%s337_s20] sm:$0xff] %v348_v15  ;;  %v1369_v19 = vsel %vm1349_vm2, %v1368_v17, 0.0  ;;  %v1385_v20 = vld [vmem:[%s1379_s21] sm:$0xff] }
  0x2d   : > { %v1402_v21 = vld [vmem:[%s1396_s22] sm:$0xff]  ;;  %v1370_v23 = vmul.f32 %v1369_v19, %v1369_v19  ;;  %v1386_v24 = vsel %vm1349_vm2, %v1385_v20, 0.0  ;;  %v1355_v29 = vsel %vm1354_vm3, 0.0, %v1353_v22 }
  0x2e   : > { %v1403_v25 = vsel %vm1349_vm2, %v1402_v21, 0.0  ;;  %v1387_v26 = vmul.f32 %v1386_v24, %v1386_v24 }
  0x2f   : > { %v1372_v27 = vadd.f32 %v1370_v23, %v1353_v22  ;;  %v1404_v28 = vmul.f32 %v1403_v25, %v1403_v25  ;;  %v1371_v30 = vadd.f32 %v1370_v23, %v1355_v29 }
  0x31   : > { %v1389_v31 = vadd.f32 %v1387_v26, %v1372_v27  ;;  %v1388_v32 = vadd.f32 %v1387_v26, %v1371_v30  ;;  %v1406_v33 = vsel %vm1405_vm4, 0.0, %v1404_v28 }
  0x33   : > { %v1408_v34 = vadd.f32 %v1404_v28, %v1389_v31  ;;  %v1407_v35 = vadd.f32 %v1406_v33, %v1388_v32 }
  0x35   : > { %1409 = vadd.xlane.f32.xlu0 %v1408_v34 }
  0x39   : > { %1417 = vadd.xlane.f32.xlu0 %v1407_v35 }
  0xc2   : > { %v1410_v36 = vpop.xlane.xlu0 %1409 }
  0xc3   : > { %v1411_v37 = vrot.slane %v1410_v36, 4 }
  0xc5   : > { %v1412_v38 = vadd.f32 %v1411_v37, %v1410_v36 }
  0xc6   : > { %v1418_v39 = vpop.xlane.xlu0 %1417 }
  0xc7   : > { %v1413_v40 = vrot.slane %v1412_v38, 2  ;;  %v1419_v41 = vrot.slane %v1418_v39, 4 }
  0xc9   : > { %v1420_v42 = vadd.f32 %v1419_v41, %v1418_v39  ;;  %v1414_v43 = vadd.f32 %v1413_v40, %v1412_v38 }
  0xcb   : > { %v1421_v44 = vrot.slane %v1420_v42, 2  ;;  %v1415_v46 = vrot.slane %v1414_v43, 1 }
  0xcd   : > { %v1422_v45 = vadd.f32 %v1421_v44, %v1420_v42  ;;  %v1416_v49 = vadd.f32 %v1415_v46, %v1414_v43 }
  0xcf   : > { %v1423_v47 = vrot.slane %v1422_v45, 1 }
  0xd1   : > { %v1424_v48 = vadd.f32 %v1423_v47, %v1422_v45 }
  0xd3   : > { %1510 = vpush %v1424_v48 }
  0xd4   : > { %1512 = vpush %v1416_v49 }
 0x104   : > { %s1511_s29 = spop %1510 }
 0x105   : > { %s1513_s11 = spop %1512 }
 0x106   : > { %s1427_s15 = smul.f32 1e-10, %s1513_s11 }
 0x108   : > { %p1428_p8 = scmp.le.f32.partialorder %s1511_s29, %s1427_s15 }
 0x109   : > { %s1759_s16 = smov (!%p1428_p8), 0  }
 0x10a   : > { %1431 = sbr.rel (%p1428_p8) target bundleno = 948 (0x3b4), region = 507 }
 0x111 LB: >> { %s1764_s23 = smov 0   ;;  %s1603_s16 = sphi %s1759_s16, %s1983_s16  }
 0x112 LB: >>> { %s454_s24 = smov [#allocation10]  ;;  %v458_v5 = vmov %v1717_v5  ;;  %v461_v6 = vmov %v1719_v6  ;;  %s474_s27 = smov [#allocation11]  ;;  %vm777_vm14 = vcmp.eq.s32.totalorder %v1719_v6, 0  ;;  %vm789_vm15 = vcmp.eq.s32.totalorder %v1719_v6, 7  ;;  %s1607_s23 = sphi %s1764_s23, %s453_s23  }
 0x113   : >>> { %v478_v5 = vmov %v1717_v5  ;;  %v481_v6 = vmov %v1719_v6  ;;  %v462_v50 = vld [vmem:[%s454_s24] sm:$0xff]  ;;  %vm465_vm5 = vcmp.eq.s32.totalorder %v461_v6, %v458_v5  ;;  %s494_s28 = smov [#allocation13]  ;;  %s455_s21 = smov [#allocation14] }
 0x114   : >>> { %vm485_vm6 = vcmp.eq.s32.totalorder %v481_v6, %v478_v5  ;;  %v498_v5 = vmov %v1717_v5  ;;  %v501_v6 = vmov %v1719_v6  ;;  %v466_v51 = vsel %vm465_vm5, %v462_v50, 0.0  ;;  %v482_v52 = vld [vmem:[%s474_s27] sm:$0xff]  ;;  %s475_s22 = smov [#allocation15]  ;;  %s495_s29 = smov [#allocation16] }
 0x115   : >>> { %vm505_vm7 = vcmp.eq.s32.totalorder %v501_v6, %v498_v5  ;;  %v467_v53 = vrot.slane %v466_v51, 4  ;;  %v486_v54 = vsel %vm485_vm6, %v482_v52, 0.0  ;;  %v502_v55 = vld [vmem:[%s494_s28] sm:$0xff]  ;;  %s518_s11 = smov [#allocation15]  ;;  %s516_s15 = smov [#allocation14]  ;;  %v567_v5 = vmov %v1717_v5 }
 0x116   : >>> { %v487_v56 = vrot.slane %v486_v54, 4  ;;  %v506_v57 = vsel %vm505_vm7, %v502_v55, 0.0  ;;  %s520_s24 = smov [#allocation16]  ;;  %s555_s27 = smov [#allocation17]  ;;  %v570_v6 = vmov %v1719_v6  ;;  %v582_v5 = vmov %v1717_v5 }
 0x117   : >>> { %v468_v58 = vadd.f32 %v467_v53, %v466_v51  ;;  %v507_v59 = vrot.slane %v506_v57, 4  ;;  %s557_s28 = smov [#allocation18]  ;;  %v585_v6 = vmov %v1719_v6  ;;  %vm572_vm12 = vcmp.eq.s32.totalorder %v570_v6, %v567_v5  ;;  %s1786_s14 = smov %s1721_s14 }
 0x118   : >>> { %v488_v60 = vadd.f32 %v487_v56, %v486_v54  ;;  %vm587_vm13 = vcmp.eq.s32.totalorder %v585_v6, %v582_v5  ;;  %s1789_s30 = smov %s1724_s30  ;;  %s1792_s17 = smov %s1727_s17  ;;  %v825_v52 = vld [vmem:[%s1786_s14] sm:$0xff]  ;;  %v680_v5 = vmov %v1717_v5  ;;  %v683_v6 = vmov %v1719_v6 }
 0x119   : >>> { %v469_v61 = vrot.slane %v468_v58, 2  ;;  %v508_v62 = vadd.f32 %v507_v59, %v506_v57  ;;  %s1796_s20 = smov %s1730_s20  ;;  %v826_v53 = vld [vmem:[%s1789_s30] sm:$0xff]  ;;  %s819_s26 = smov [#allocation22]  ;;  %v653_v5 = vmov %v1717_v5  ;;  %v656_v6 = vmov %v1719_v6 }
 0x11a   : >>> { %v489_v63 = vrot.slane %v488_v60, 2  ;;  %v827_v56 = vld [vmem:[%s1792_s17] sm:$0xff]  ;;  %v694_v5 = vmov %v1717_v5  ;;  %v697_v6 = vmov %v1719_v6  ;;  %vm687_vm0 = vcmp.eq.s32.totalorder %v683_v6, %v680_v5  ;;  %s453_s23 = sadd.s32 1, %s1607_s23  }
 0x11b   : >>> { %v470_v0 = vadd.f32 %v469_v61, %v468_v58  ;;  %v509_v1 = vrot.slane %v508_v62, 2  ;;  %v828_v57 = vld [vmem:[%s1796_s20] sm:$0xff]  ;;  %v667_v5 = vmov %v1717_v5  ;;  %v670_v6 = vmov %v1719_v6  ;;  %p450_p9 = scmp.ge.s32.totalorder %s453_s23, 15  }
 0x11c   : >>> { %v490_v2 = vadd.f32 %v489_v63, %v488_v60  ;;  %vm661_vm1 = vcmp.eq.s32.totalorder %v656_v6, %v653_v5  ;;  %vm702_vm3 = vcmp.eq.s32.totalorder %v697_v6, %v694_v5  ;;  %vm674_vm4 = vcmp.eq.s32.totalorder %v670_v6, %v667_v5 }
 0x11d   : >>> { %v471_v3 = vrot.slane %v470_v0, 1  ;;  %v510_v4 = vadd.f32 %v509_v1, %v508_v62  ;;  %vm716_vm5 = vcmp.eq.s32.totalorder %v1717_v5, 0  ;;  %vm720_vm6 = vcmp.eq.s32.totalorder %v1717_v5, 1 }
 0x11e   : >>> { %v491_v7 = vrot.slane %v490_v2, 1  ;;  %vm733_vm7 = vcmp.eq.s32.totalorder %v1717_v5, 7  ;;  %v354_v5 = vmov (%p450_p9), %v1717_v5  ;;  %v357_v6 = vmov (%p450_p9), %v1719_v6 }
 0x11f   : >>> { %v472_v8 = vadd.f32 %v471_v3, %v470_v0  ;;  %v511_v9 = vrot.slane %v510_v4, 1  ;;  %v407_v5 = vmov (%p450_p9), %v1717_v5 }
 0x120   : >>> { %v492_v10 = vadd.f32 %v491_v7, %v490_v2 }
 0x121   : >>> { %473 = vst [vmem:[%s455_s21] sm:$0x1] %v472_v8  ;;  %v512_v11 = vadd.f32 %v511_v9, %v510_v4  ;;  %s514_s21 = smov [#allocation19] }
 0x122   : >>> { %493 = vst [vmem:[%s475_s22] sm:$0x1] %v492_v10  ;;  %s515_s22 = smov [#allocation20]  ;;  %s559_s21 = smov %s514_s21 }
 0x123   : >>> { %513 = vst [vmem:[%s495_s29] sm:$0x1] %v512_v11  ;;  %s561_s22 = smov %s515_s22  ;;  %s563_s29 = smov [#allocation19] }
 0x128   : >>> { %v517_v14 = vld [vmem:[%s516_s15] sm:$0xff]  ;;  %s576_s15 = smov [#allocation21] }
 0x129   : >>> { %v519_v12 = vld [vmem:[%s518_s11] sm:$0xff]  ;;  %v540_v27 = vand.u32 2147483647, %v517_v14  ;;  %s578_s11 = smov [#allocation20] }
 0x12a   : >>> { %v523_v13 = vmul.f32 2.0, %v519_v12  ;;  %v521_v15 = vld [vmem:[%s520_s24] sm:$0xff]  ;;  %v541_v32 = vand.u32 2147483647, %v519_v12  ;;  %s593_s24 = smov [#allocation21] }
 0x12b   : >>> { %v522_v16 = vsub.f32 %v521_v15, %v517_v14  ;;  %v542_v28 = vand.u32 2147483647, %v521_v15 }
 0x12c   : >>> { %1561 = vrcp.f32 %v523_v13 }
 0x12d   : >>> { %v543_v31 = vmin.f32 %v540_v27, %v542_v28 }
 0x12f   : >>> { %v544_v33 = vmul.f32 1.1920929e-08, %v543_v31 }
 0x131   : >>> { %vm545_vm11 = vcmp.le.f32.partialorder %v541_v32, %v544_v33 }
 0x136   : >>> { %v1562_v17 = vpop.eup %1561 }
 0x137   : >>> { %v525_v18 = vmul.f32 %v1562_v17, %v522_v16 }
 0x139   : >>> { %v527_v19 = vmul.f32 %v525_v18, %v525_v18  ;;  %vm526_vm10 = vcmp.ge.f32.partialorder %v525_v18, 0.0 }
 0x13b   : >>> { %v528_v20 = vadd.f32 1.0, %v527_v19 }
 0x13d   : >>> { %1563 = vrsqrt.f32 %v528_v20  ;;  %vm531_vm8 = vcmp.eq.f32.partialorder %v528_v20, inf  ;;  %v534_v22 = vand.u32 2147483648, %v528_v20  ;;  %vm533_vm9 = vcmp.eq.f32.partialorder %v528_v20, 0.0 }
 0x147   : >>> { %v1564_v21 = vpop.eup %1563 }
 0x148   : >>> { %v530_v23 = vmul.f32 %v1564_v21, %v528_v20 }
 0x14a   : >>> { %v532_v24 = vsel %vm531_vm8, %v528_v20, %v530_v23  ;;  %vm369_vm8 = vcmp.eq.s32.totalorder (%p450_p9), %v357_v6, %v354_v5  ;;  %v410_v6 = vmov (%p450_p9), %v1719_v6  ;;  %v373_v5 = vmov (%p450_p9), %v1717_v5 }
 0x14b   : >>> { %v535_v25 = vsel %vm533_vm9, %v534_v22, %v532_v24  ;;  %v376_v6 = vmov (%p450_p9), %v1719_v6  ;;  %v390_v5 = vmov (%p450_p9), %v1717_v5  ;;  %vm422_vm9 = vcmp.eq.s32.totalorder (%p450_p9), %v410_v6, %v407_v5 }
 0x14c   : >>> { %v536_v26 = vxor.u32 2147483648, %v535_v25  ;;  %v393_v6 = vmov (%p450_p9), %v1719_v6 }
 0x14e   : >>> { %v537_v29 = vsel %vm526_vm10, %v535_v25, %v536_v26 }
 0x14f   : >>> { %v538_v30 = vadd.f32 %v537_v29, %v525_v18 }
 0x151   : >>> { %1565 = vrcp.f32 %v538_v30 }
 0x15b   : >>> { %v1566_v34 = vpop.eup %1565 }
 0x15c   : >>> { %v546_v35 = vsel %vm545_vm11, 0.0, %v1566_v34 }
 0x15d   : >>> { %v547_v36 = vmul.f32 %v546_v35, %v546_v35  ;;  %v551_v37 = vmul.f32 %v546_v35, %v519_v12 }
 0x15f   : >>> { %v548_v38 = vadd.f32 1.0, %v547_v36  ;;  %v552_v39 = vsub.f32 %v517_v14, %v551_v37  ;;  %v554_v40 = vadd.f32 %v551_v37, %v521_v15 }
 0x161   : >>> { %1567 = vrsqrt.f32 %v548_v38  ;;  %556 = vst [vmem:[%s555_s27] sm:$0xff] %v552_v39  ;;  %558 = vst [vmem:[%s557_s28] sm:$0xff] %v554_v40  ;;  %s1779_s27 = smov [#allocation10]  ;;  %s591_s28 = smov [#allocation22] }
 0x162   : >>> { %v601_v49 = vld [vmem:[%s1779_s27] sm:$0xff] }
 0x16b   : >>> { %v1568_v41 = vpop.eup %1567 }
 0x16c   : >>> { %560 = vst [vmem:[%s559_s21] sm:$0xff] %v1568_v41  ;;  %v550_v42 = vmul.f32 %v1568_v41, %v546_v35  ;;  %s1781_s21 = smov [#allocation11] }
 0x16d   : >>> { %v602_v50 = vld [vmem:[%s1781_s21] sm:$0xff] }
 0x16e   : >>> { %562 = vst [vmem:[%s561_s22] sm:$0xff] %v550_v42  ;;  %s1783_s22 = smov [#allocation13] }
 0x16f   : >>> { %v604_v51 = vld [vmem:[%s1783_s22] sm:$0xff] }
 0x173   : >>> { %v564_v43 = vld [vmem:[%s563_s29] ss:$0 sm:$0xff]  ;;  %s817_s29 = smov [#allocation21] }
 0x174   : >>> { %v573_v44 = vsel %vm572_vm12, %v564_v43, 0.0 }
 0x175   : >>> { %574 = vadd.xlane.f32.xlu0 %v573_v44  ;;  %v579_v45 = vld [vmem:[%s578_s11] ss:$0 sm:$0xff]  ;;  %s1798_s11 = smov [#allocation12] }
 0x176   : >>> { %v588_v46 = vsel %vm587_vm13, %v579_v45, 0.0  ;;  %v603_v58 = vld [vmem:[%s1798_s11] sm:$0xff] }
 0x179   : >>> { %589 = vadd.xlane.f32.xlu0 %v588_v46 }
 0x202   : >>> { %v575_v47 = vpop.xlane.xlu0 %574 }
 0x203   : >>> { %577 = vst [vmem:[%s576_s15] sm:$0xff] %v575_v47  ;;  %s595_s15 = smov [#allocation22] }
 0x206   : >>> { %v590_v48 = vpop.xlane.xlu0 %589 }
 0x207   : >>> { %592 = vst [vmem:[%s591_s28] sm:$0xff] %v590_v48  ;;  %s1825_s28 = smov [#allocation12] }
 0x20a   : >>> { %v594_v54 = vld [vmem:[%s593_s24] sm:$0xff]  ;;  %s623_s24 = smov [#allocation20] }
 0x20b   : >>> { %v818_v55 = vld [vmem:[%s817_s29] sm:$0xff]  ;;  %v605_v59 = vmul.f32 %v601_v49, %v594_v54  ;;  %v608_v60 = vmul.f32 %v602_v50, %v594_v54  ;;  %v615_v61 = vmul.f32 %v604_v51, %v594_v54  ;;  %v612_v4 = vmul.f32 %v603_v58, %v594_v54  ;;  %s650_s29 = smov [#allocation17] }
 0x20c   : >>> { %v829_v62 = vmul.f32 %v825_v52, %v818_v55  ;;  %v832_v63 = vmul.f32 %v826_v53, %v818_v55  ;;  %v836_v0 = vmul.f32 %v827_v56, %v818_v55  ;;  %v839_v1 = vmul.f32 %v828_v57, %v818_v55  ;;  %v624_v24 = vld [vmem:[%s623_s24] ss:$0 sm:$0xff]  ;;  %s690_s24 = smov [#allocation13] }
 0x20d   : >>> { %v657_v55 = vld [vmem:[%s650_s29] ss:$0 sm:$0xff]  ;;  %s706_s29 = smov [#allocation11] }
 0x20e   : >>> { %v596_v2 = vld [vmem:[%s595_s15] sm:$0xff]  ;;  %s677_s15 = smov [#allocation12] }
 0x20f   : >>> { %v820_v3 = vld [vmem:[%s819_s26] sm:$0xff]  ;;  %v609_v7 = vmul.f32 %v604_v51, %v596_v2  ;;  %v611_v8 = vmul.f32 %v601_v49, %v596_v2  ;;  %v614_v9 = vmul.f32 %v602_v50, %v596_v2  ;;  %v606_v14 = vmul.f32 %v603_v58, %v596_v2  ;;  %s621_s26 = smov [#allocation19] }
 0x210   : >>> { %v830_v10 = vmul.f32 %v827_v56, %v820_v3  ;;  %v833_v11 = vmul.f32 %v828_v57, %v820_v3  ;;  %v835_v12 = vmul.f32 %v825_v52, %v820_v3  ;;  %v838_v13 = vmul.f32 %v826_v53, %v820_v3  ;;  %v622_v23 = vld [vmem:[%s621_s26] ss:$0 sm:$0xff]  ;;  %s649_s26 = smov [#allocation10] }
 0x211   : >>> { %v610_v15 = vsub.f32 %v608_v60, %v609_v7  ;;  %v616_v16 = vadd.f32 %v615_v61, %v614_v9  ;;  %v613_v18 = vadd.f32 %v612_v4, %v611_v8  ;;  %v607_v22 = vsub.f32 %v605_v59, %v606_v14 }
 0x212   : >>> { %v831_v17 = vsub.f32 %v829_v62, %v830_v10  ;;  %v834_v19 = vsub.f32 %v832_v63, %v833_v11  ;;  %v837_v20 = vadd.f32 %v836_v0, %v835_v12  ;;  %v840_v21 = vadd.f32 %v839_v1, %v838_v13 }
 0x213   : >>> { %618 = vst [vmem:[%s1781_s21] sm:$0xff] %v610_v15  ;;  %620 = vst [vmem:[%s1783_s22] sm:$0xff] %v616_v16  ;;  %s1827_s21 = smov [#allocation13]  ;;  %s1831_s22 = smov [#allocation11] }
 0x214   : >>> { %841 = vst [vmem:[%s1786_s14] sm:$0xff] %v831_v17  ;;  %619 = vst [vmem:[%s1798_s11] sm:$0xff] %v613_v18  ;;  %s845_s14 = smov %s1721_s14  ;;  %s691_s11 = smov [#allocation18] }
 0x215   : >>> { %842 = vst [vmem:[%s1789_s30] sm:$0xff] %v834_v19  ;;  %843 = vst [vmem:[%s1792_s17] sm:$0xff] %v837_v20  ;;  %s846_s17 = smov %s1727_s17  ;;  %s1818_s30 = smov %s1724_s30  ;;  %v698_v56 = vld [vmem:[%s691_s11] ss:$0 sm:$0xff] }
 0x216   : >>> { %844 = vst [vmem:[%s1796_s20] sm:$0xff] %v840_v21  ;;  %617 = vst [vmem:[%s1779_s27] sm:$0xff] %v607_v22  ;;  %s1821_s20 = smov %s1730_s20  ;;  %s1829_s27 = smov [#allocation10] }
 0x217   : >>> { %s1611_s11 = smov 127  }
 0x21a   : >>> { %v632_v39 = vld [vmem:[%s1827_s21] sm:$0xff] }
 0x21b   : >>> { %v847_v25 = vld [vmem:[%s845_s14] ss:$0 sm:$0xff]  ;;  %v1489_v27 = vld [vmem:[%s845_s14 + $0x7] ss:$0 sm:$0xff]  ;;  %v640_v42 = vmul.f32 %v632_v39, %v624_v24  ;;  %v643_v46 = vmul.f32 %v632_v39, %v622_v23 }
 0x21c   : >>> { %v1488_v26 = vld [vmem:[%s845_s14 - $0x1] sm:$0xfe]  ;;  %v1493_v34 = vld [vmem:[%s1818_s30 + $0x7] ss:$0 sm:$0xff] }
 0x21d   : >>> { %v854_v28 = vsel %vm777_vm14, %v847_v25, %v1488_v26  ;;  %v858_v29 = vld [vmem:[%s846_s17] ss:$0 sm:$0xff]  ;;  %v1491_v30 = vld [vmem:[%s846_s17 + $0x1] sm:$0x7f] }
 0x21e   : >>> { %v871_v31 = vld [vmem:[%s1818_s30] ss:$0 sm:$0xff]  ;;  %857 = vst [vmem:[%s845_s14] sm:$0xff] %v854_v28  ;;  %v866_v32 = vsel %vm789_vm15, %v1489_v27, %v1491_v30  ;;  %v1495_v37 = vld [vmem:[%s1821_s20 + $0x1] sm:$0x7f] }
 0x21f   : >>> { %v1492_v33 = vld [vmem:[%s1818_s30 - $0x1] sm:$0xfe]  ;;  %1490 = vst [vmem:[%s845_s14 + $0x1] sm:$0x1] %v858_v29  ;;  %868 = vst [vmem:[%s846_s17] sm:$0xff] %v866_v32  ;;  %v890_v40 = vsel %vm789_vm15, %v1493_v34, %v1495_v37 }
 0x220   : >>> { %v882_v35 = vld [vmem:[%s1821_s20] ss:$0 sm:$0xff]  ;;  %v878_v36 = vsel %vm777_vm14, %v871_v31, %v1492_v33 }
 0x221   : >>> { %v631_v38 = vld [vmem:[%s1825_s28] sm:$0xff]  ;;  %881 = vst [vmem:[%s1818_s30] sm:$0xff] %v878_v36  ;;  %892 = vst [vmem:[%s1821_s20] sm:$0xff] %v890_v40 }
 0x222   : >>> { %v639_v41 = vmul.f32 %v631_v38, %v622_v23  ;;  %v642_v43 = vmul.f32 %v631_v38, %v624_v24  ;;  %v629_v44 = vld [vmem:[%s1829_s27] sm:$0xff]  ;;  %1494 = vst [vmem:[%s1818_s30 + $0x1] sm:$0x1] %v882_v35 }
 0x223   : >>> { %v630_v45 = vld [vmem:[%s1831_s22] sm:$0xff]  ;;  %v633_v47 = vmul.f32 %v629_v44, %v622_v23  ;;  %v636_v49 = vmul.f32 %v629_v44, %v624_v24 }
 0x224   : >>> { %v634_v48 = vmul.f32 %v630_v45, %v624_v24  ;;  %v641_v50 = vsub.f32 %v639_v41, %v640_v42  ;;  %v637_v51 = vmul.f32 %v630_v45, %v622_v23  ;;  %v644_v52 = vadd.f32 %v643_v46, %v642_v43 }
 0x226   : >>> { %v635_v53 = vsub.f32 %v633_v47, %v634_v48  ;;  %647 = vst [vmem:[%s1825_s28] sm:$0xff] %v641_v50  ;;  %v638_v54 = vadd.f32 %v637_v51, %v636_v49  ;;  %648 = vst [vmem:[%s1827_s21] sm:$0xff] %v644_v52  ;;  %s664_s28 = smov [#allocation11]  ;;  %s1865_s21 = smov [#allocation12] }
 0x228   : >>> { %645 = vst [vmem:[%s1829_s27] sm:$0xff] %v635_v53  ;;  %646 = vst [vmem:[%s1831_s22] sm:$0xff] %v638_v54  ;;  %s705_s27 = smov [#allocation10]  ;;  %s1610_s22 = smov 1  }
 0x22d   : >>> { %v684_v57 = vld [vmem:[%s677_s15] sm:$0xff] }
 0x22e   : >>> { %v688_v58 = vsel %vm687_vm0, 0.0, %v684_v57  ;;  %v699_v60 = vld [vmem:[%s690_s24] sm:$0xff] }
 0x22f   : >>> { %v658_v59 = vld [vmem:[%s649_s26] sm:$0xff]  ;;  %689 = vst [vmem:[%s677_s15] sm:$0xff] %v688_v58  ;;  %v703_v63 = vsel %vm702_vm3, %v698_v56, %v699_v60  ;;  %s1868_s15 = smov [#allocation13] }
 0x230   : >>> { %v662_v61 = vsel %vm661_vm1, %v657_v55, %v658_v59  ;;  %v671_v62 = vld [vmem:[%s664_s28] sm:$0xff]  ;;  %704 = vst [vmem:[%s690_s24] sm:$0xff] %v703_v63  ;;  %s793_s24 = smov [#allocation11] }
 0x231   : >>> { %663 = vst [vmem:[%s649_s26] sm:$0xff] %v662_v61  ;;  %v675_v0 = vsel %vm674_vm4, 0.0, %v671_v62  ;;  %s769_s26 = smov [#allocation10] }
 0x232   : >>> { %676 = vst [vmem:[%s664_s28] sm:$0xff] %v675_v0  ;;  %s770_s28 = smov [#allocation12] }
 0x236   : >>> { %v743_v1 = vld [vmem:[%s1865_s21] sm:$0xff] }
 0x237   : >>> { %744 = vrot.lane.b32.xlu0 %v743_v1, %s1610_s22  ;;  %v739_v4 = vld [vmem:[%s1868_s15] sm:$0xff] }
 0x238   : >>> { %v711_v2 = vld [vmem:[%s705_s27] sm:$0xff] }
 0x239   : >>> { %712 = vrot.lane.b32.xlu1 %v711_v2, %s1610_s22  ;;  %v707_v3 = vld [vmem:[%s706_s29] sm:$0xff] }
 0x23d   : >>> { %708 = vrot.lane.b32.xlu1 %v707_v3, %s1610_s22 }
 0x241   : >>> { %729 = vrot.lane.b32.xlu1 %v707_v3, %s1611_s11 }
 0x245   : >>> { %740 = vrot.lane.b32.xlu1 %v739_v4, %s1610_s22  ;;  %s358_s22 = smov (%p450_p9), [#allocation10] }
 0x249   : >>> { %761 = vrot.lane.b32.xlu1 %v739_v4, %s1611_s11  ;;  %s394_s11 = smov (%p450_p9), [#allocation12] }
 0x2a9   : >>> { %v745_v13 = vpop.permute.xlu0 %744 }
 0x2aa   : >>> { %v749_v15 = vsel %vm716_vm5, %v743_v1, %v745_v13 }
 0x2ab   : >>> { %v713_v7 = vpop.permute.xlu1 %712 }
 0x2ac   : >>> { %v717_v8 = vsel %vm716_vm5, %v711_v2, %v713_v7 }
 0x2af   : >>> { %v709_v9 = vpop.permute.xlu1 %708 }
 0x2b0   : >>> { %v721_v10 = vsel %vm720_vm6, %v709_v9, %v717_v8 }
 0x2b1   : >>> { %v727_v11 = vsel %vm1349_vm2, %v721_v10, 0.0 }
 0x2b2   : >>> { %735 = vst [vmem:[%s705_s27] sm:$0xff] %v727_v11  ;;  %s794_s27 = smov [#allocation13] }
 0x2b3   : >>> { %v730_v12 = vpop.permute.xlu1 %729 }
 0x2b4   : >>> { %v734_v14 = vsel %vm733_vm7, %v711_v2, %v730_v12 }
 0x2b5   : >>> { %736 = vst [vmem:[%s706_s29] sm:$0xff] %v734_v14  ;;  %s377_s29 = smov (%p450_p9), [#allocation11] }
 0x2b7   : >>> { %v741_v16 = vpop.permute.xlu1 %740 }
 0x2b8   : >>> { %v753_v17 = vsel %vm720_vm6, %v741_v16, %v749_v15 }
 0x2b9   : >>> { %v771_v18 = vld [vmem:[%s769_s26] ss:$0 sm:$0xff]  ;;  %v1481_v20 = vld [vmem:[%s769_s26 + $0x7] ss:$0 sm:$0xff]  ;;  %v759_v22 = vsel %vm1349_vm2, %v753_v17, 0.0 }
 0x2ba   : >>> { %v1480_v19 = vld [vmem:[%s769_s26 - $0x1] sm:$0xfe]  ;;  %767 = vst [vmem:[%s1865_s21] sm:$0xff] %v759_v22  ;;  %s893_s21 = sadd.s32 (%p450_p9), 1, %s1603_s16  }
 0x2bb   : >>> { %v778_v21 = vsel %vm777_vm14, %v771_v18, %v1480_v19  ;;  %v762_v23 = vpop.permute.xlu1 %761  ;;  %p446_p10 = scmp.ge.s32.totalorder (%p450_p9), %s893_s21, 15  ;;  %s1983_s16 = smov (%p450_p9), %s893_s21 }
 0x2bc   : >>> { %781 = vst [vmem:[%s769_s26] sm:$0xff] %v778_v21  ;;  %v795_v24 = vld [vmem:[%s793_s24] ss:$0 sm:$0xff]  ;;  %v1485_v26 = vld [vmem:[%s793_s24 + $0x7] ss:$0 sm:$0xff]  ;;  %v766_v27 = vsel %vm733_vm7, %v743_v1, %v762_v23 }
 0x2bd   : >>> { %v1484_v25 = vld [vmem:[%s793_s24 - $0x1] sm:$0xfe]  ;;  %768 = vst [vmem:[%s1868_s15] sm:$0xff] %v766_v27  ;;  %s411_s15 = smov (%p450_p9), [#allocation13] }
 0x2be   : >>> { %v802_v28 = vsel %vm777_vm14, %v795_v24, %v1484_v25 }
 0x2bf   : >>> { %805 = vst [vmem:[%s793_s24] sm:$0xff] %v802_v28 }
 0x2c1   : >>> { %v782_v29 = vld [vmem:[%s770_s28] ss:$0 sm:$0xff]  ;;  %v1483_v30 = vld [vmem:[%s770_s28 + $0x1] sm:$0x7f] }
 0x2c2   : >>> { %1482 = vst [vmem:[%s769_s26 + $0x1] sm:$0x1] %v782_v29  ;;  %v790_v31 = vsel %vm789_vm15, %v1481_v20, %v1483_v30  ;;  %452 = sbr.rel (!%p450_p9) target bundleno = 274 (0x112), region = 502 }
 0x2c3   : >>> { %792 = vst [vmem:[%s770_s28] sm:$0xff] %v790_v31 }
 0x2c4   : >>> { %v806_v32 = vld [vmem:[%s794_s27] ss:$0 sm:$0xff]  ;;  %v1487_v33 = vld [vmem:[%s794_s27 + $0x1] sm:$0x7f] }
 0x2c5   : >>> { %1486 = vst [vmem:[%s793_s24 + $0x1] sm:$0x1] %v806_v32  ;;  %v814_v34 = vsel %vm789_vm15, %v1485_v26, %v1487_v33 }
 0x2c6   : >>> { %816 = vst [vmem:[%s794_s27] sm:$0xff] %v814_v34 }
 0x2c9   : >> { %v364_v35 = vld [vmem:[%s358_s22] sm:$0xff] }
 0x2ca   : >> { %v365_v37 = vsel %vm1349_vm2, %v364_v35, 0.0  ;;  %v400_v39 = vld [vmem:[%s394_s11] sm:$0xff] }
 0x2cb   : >> { %v366_v41 = vmul.f32 %v365_v37, %v365_v37  ;;  %v401_v43 = vsel %vm1349_vm2, %v400_v39, 0.0 }
 0x2cc   : >> { %v383_v36 = vld [vmem:[%s377_s29] sm:$0xff]  ;;  %v402_v45 = vmul.f32 %v401_v43, %v401_v43 }
 0x2cd   : >> { %v384_v38 = vsel %vm1349_vm2, %v383_v36, 0.0  ;;  %v417_v40 = vld [vmem:[%s411_s15] sm:$0xff]  ;;  %v370_v48 = vsel %vm369_vm8, 0.0, %v366_v41 }
 0x2ce   : >> { %v385_v42 = vmul.f32 %v384_v38, %v384_v38  ;;  %v418_v44 = vsel %vm1349_vm2, %v417_v40, 0.0 }
 0x2cf   : >> { %v419_v47 = vmul.f32 %v418_v44, %v418_v44 }
 0x2d0   : >> { %v387_v46 = vadd.f32 %v385_v42, %v366_v41  ;;  %v386_v49 = vadd.f32 %v385_v42, %v370_v48 }
 0x2d1   : >> { %v423_v52 = vsel %vm422_vm9, 0.0, %v419_v47 }
 0x2d2   : >> { %v404_v50 = vadd.f32 %v402_v45, %v387_v46  ;;  %v403_v51 = vadd.f32 %v402_v45, %v386_v49 }
 0x2d4   : >> { %v425_v53 = vadd.f32 %v419_v47, %v404_v50  ;;  %v424_v54 = vadd.f32 %v423_v52, %v403_v51 }
 0x2d6   : >> { %426 = vadd.xlane.f32.xlu0 %v425_v53 }
 0x2da   : >> { %434 = vadd.xlane.f32.xlu0 %v424_v54 }
 0x363   : >> { %v427_v55 = vpop.xlane.xlu0 %426 }
 0x364   : >> { %v428_v56 = vrot.slane %v427_v55, 4 }
 0x366   : >> { %v429_v57 = vadd.f32 %v428_v56, %v427_v55 }
 0x367   : >> { %v435_v58 = vpop.xlane.xlu0 %434 }
 0x368   : >> { %v430_v59 = vrot.slane %v429_v57, 2  ;;  %v436_v60 = vrot.slane %v435_v58, 4 }
 0x36a   : >> { %v437_v61 = vadd.f32 %v436_v60, %v435_v58  ;;  %v431_v62 = vadd.f32 %v430_v59, %v429_v57 }
 0x36c   : >> { %v438_v63 = vrot.slane %v437_v61, 2  ;;  %v432_v1 = vrot.slane %v431_v62, 1 }
 0x36e   : >> { %v439_v0 = vadd.f32 %v438_v63, %v437_v61  ;;  %v433_v4 = vadd.f32 %v432_v1, %v431_v62 }
 0x370   : >> { %v440_v2 = vrot.slane %v439_v0, 1 }
 0x372   : >> { %v441_v3 = vadd.f32 %v440_v2, %v439_v0 }
 0x374   : >> { %1514 = vpush %v441_v3 }
 0x375   : >> { %1516 = vpush %v433_v4 }
 0x3a5   : >> { %s1515_s23 = spop %1514 }
 0x3a6   : >> { %s1517_s26 = spop %1516 }
 0x3a7   : >> { %s444_s24 = smul.f32 1e-10, %s1517_s26 }
 0x3a9   : >> { %p445_p11 = scmp.le.f32.partialorder %s1515_s23, %s444_s24 }
 0x3ab   : >> { %p447_p12 = por %p446_p10, %p445_p11 }
 0x3ad   : > { %895 = sbr.rel (!%p447_p12) target bundleno = 273 (0x111), region = 513 }
 0x3b4 PF: > { %s900_s28 = smov [#allocation10]  ;;  %v904_v5 = vmov %v1717_v5  ;;  %v907_v6 = vmov %v1719_v6  ;;  %s920_s16 = smov [#allocation13] }
 0x3b5   : > { %v924_v5 = vmov %v1717_v5  ;;  %v927_v6 = vmov %v1719_v6  ;;  %v908_v7 = vld [vmem:[%s900_s28] sm:$0xff]  ;;  %vm911_vm10 = vcmp.eq.s32.totalorder %v907_v6, %v904_v5  ;;  %s896_s27 = sand.u32 7, %s1678_s12   ;;  %s1984_s22 = scalar_lea.vmem [#allocation5], %s1715_s18 }
 0x3b6   : > { %vm931_vm11 = vcmp.eq.s32.totalorder %v927_v6, %v924_v5  ;;  %v912_v8 = vsel %vm911_vm10, %v908_v7, 0.0  ;;  %v928_v10 = vld [vmem:[%s920_s16] sm:$0xff]  ;;  %s897_s21 = scalar_lea.vmem %s283_s25, %s896_s27 [#allocation4]  ;;  %s899_s29 = scalar_lea.vmem %s1984_s22, %s896_s27 [#allocation5] }
 0x3b7   : > { %v913_v9 = vrot.slane %v912_v8, 4  ;;  %v932_v11 = vsel %vm931_vm11, %v928_v10, 0.0  ;;  %s901_s21 = smov %s897_s21  ;;  %s921_s29 = smov %s899_s29 }
 0x3b8   : > { %v933_v13 = vrot.slane %v932_v11, 4  ;;  %s967_s11 = sshrl.u32 (%p1692_p3), %s1678_s12, 3 }
 0x3b9   : > { %v914_v12 = vadd.f32 %v913_v9, %v912_v8  ;;  %s1502_s15 = sshll.u32 (%p1692_p3), %s967_s11, 3 }
 0x3ba   : > { %v934_v15 = vadd.f32 %v933_v13, %v932_v11  ;;  %s969_s24 = scalar_lea.vmem (%p1692_p3), %s1975_s4, %s1502_s15 }
 0x3bb   : > { %v915_v14 = vrot.slane %v914_v12, 2 }
 0x3bc   : > { %v935_v17 = vrot.slane %v934_v15, 2 }
 0x3bd   : > { %v916_v16 = vadd.f32 %v915_v14, %v914_v12 }
 0x3be   : > { %v936_v19 = vadd.f32 %v935_v17, %v934_v15  ;;  %966 = sbr.rel (!%p1692_p3) target bundleno = 972 (0x3cc), region = 174 }
 0x3bf   : > { %v917_v18 = vrot.slane %v916_v16, 1 }
 0x3c0   : > { %v937_v6 = vrot.slane %v936_v19, 1 }
 0x3c1   : > { %v918_v5 = vadd.f32 %v917_v18, %v916_v16 }
 0x3c2   : > { %v938_v20 = vadd.f32 %v937_v6, %v936_v19 }
 0x3c3   : > { %919 = vst [vmem:[%s901_s21] sm:$0x1] %v918_v5 }
 0x3c4   : > { %939 = vst [vmem:[%s921_s29] sm:$0x1] %v938_v20 }
 0x3ca   : > { %v997_v21 = vld [vmem:[%s283_s25] sm:$0xff] }
 0x3cb   : > { %998 = vst [vmem:[%s969_s24] sm:$0xff] %v997_v21 }
 0x3cc PF: > { %1004 = sbr.rel (!%p1692_p3) target bundleno = 980 (0x3d4), region = 212  ;;  %s1005_s28 = sshrl.u32 (%p1692_p3), %s1678_s12, 3 }
 0x3cd   : > { %s1985_s16 = scalar_lea.vmem (%p1692_p3), [#allocation5], %s1715_s18  ;;  %s1503_s27 = sshll.u32 (%p1692_p3), %s1005_s28, 3 }
 0x3ce   : > { %s1007_s25 = scalar_lea.vmem (%p1692_p3), %s1976_s5, %s1503_s27 }
 0x3d2   : > { %v1035_v22 = vld [vmem:[%s1985_s16] sm:$0xff] (%p1692_p3) }
 0x3d3   : > { %1036 = vst [vmem:[%s1007_s25] sm:$0xff] %v1035_v22 }
 0x3d4 PF: > { %s1504_s29 = sshll.u32 %s1678_s12, 3  ;;  %v1069_v23 = vld [vmem:[%s1721_s14] sm:$0xff]  ;;  %v1103_v24 = vld [vmem:[%s1724_s30] sm:$0xff] }
 0x3d5   : > { %v1137_v25 = vld [vmem:[%s1727_s17] sm:$0xff]  ;;  %s1041_s18 = scalar_lea.vmem %s1977_s6, %s1504_s29  ;;  %s1075_s26 = scalar_lea.vmem %s1978_s7, %s1504_s29  ;;  %v1171_v26 = vld [vmem:[%s1730_s20] sm:$0xff] }
 0x3d6   : > { %1070 = vst [vmem:[%s1041_s18] sm:$0xff] %v1069_v23  ;;  %1104 = vst [vmem:[%s1075_s26] sm:$0xff] %v1103_v24  ;;  %s1109_s16 = scalar_lea.vmem %s1979_s8, %s1504_s29  ;;  %s1143_s14 = scalar_lea.vmem %s1980_s9, %s1504_s29 }
 0x3d7   : > { %1138 = vst [vmem:[%s1109_s16] sm:$0xff] %v1137_v25  ;;  %1172 = vst [vmem:[%s1143_s14] sm:$0xff] %v1171_v26 }
 0x3d8 PF: > { %s1986_s17 = sld [smem:[#allocation23_spill]]  ;;  %p13_p13 = scmp.ge.s32.totalorder %s1681_s13, 18  }
 0x3d9   : > { %s1987_s30 = smov %s1595_s10  ;;  %s1989_s11 = smov %s1681_s13 }
 0x3da   :  { %15 = sbr.rel (!%p13_p13) target bundleno = 2 (0x2), region = 524 }
 0x3de   : > { %s1988_s10 = smov %s1986_s17 }

// kernel: dabn_forward.2
= control target key start
LH: loop header
LB: loop body
LE: loop exit
PB: predicated region body
PF: predicated region fallthrough
CT: control target
= control target key end

     0   :  { %s2880_s1 = inlined_call_operand.vmem [shape: f32[256,256], index: 1, kind: input, shape index: {}]   ;;  %s2881_s0 = inlined_call_operand.vmem [shape: f32[16,256], index: 0, kind: input, shape index: {}]   ;;  %s2882_s2 = inlined_call_operand.vmem [shape: f32[16,256], index: 2, kind: output, shape index: {}]  }
   0x1   :  { %v16_v0 = vld [vmem:[%s2880_s1 + $0x8] sm:$0xff]  ;;  %v18_v1 = vld [vmem:[%s2880_s1 + $0x18] sm:$0xff]  ;;  %v15_v2 = vld [vmem:[%s2880_s1] sm:$0xff] }
   0x2   :  { %v79_v3 = vand.u32 4294901760, %v16_v0  ;;  %v83_v4 = vand.u32 4294901760, %v18_v1  ;;  %v17_v5 = vld [vmem:[%s2880_s1 + $0x10] sm:$0xff]  ;;  %v81_v6 = vand.u32 4294901760, %v15_v2  ;;  %v20_v7 = vld [vmem:[%s2880_s1 + $0x28] sm:$0xff]  ;;  %v22_v8 = vld [vmem:[%s2880_s1 + $0x38] sm:$0xff] }
   0x3   :  { %v85_v9 = vand.u32 4294901760, %v17_v5  ;;  %v87_v10 = vand.u32 4294901760, %v20_v7  ;;  %v91_v11 = vand.u32 4294901760, %v22_v8  ;;  %v19_v12 = vld [vmem:[%s2880_s1 + $0x20] sm:$0xff]  ;;  %v21_v13 = vld [vmem:[%s2880_s1 + $0x30] sm:$0xff]  ;;  %v24_v14 = vld [vmem:[%s2880_s1 + $0x48] sm:$0xff] }
   0x4   :  { %v1879_v15 = vpack.c.bf16 %v83_v4, %v79_v3  ;;  %v26_v16 = vld [vmem:[%s2880_s1 + $0x58] sm:$0xff]  ;;  %v23_v17 = vld [vmem:[%s2880_s1 + $0x40] sm:$0xff]  ;;  %v25_v18 = vld [vmem:[%s2880_s1 + $0x50] sm:$0xff]  ;;  %v89_v23 = vand.u32 4294901760, %v19_v12  ;;  %v93_v24 = vand.u32 4294901760, %v21_v13  ;;  %v95_v25 = vand.u32 4294901760, %v24_v14 }
   0x5   :  { %v1890_v19 = vpack.c.bf16 %v85_v9, %v81_v6  ;;  %v1892_v20 = vpack.c.bf16 %v91_v11, %v87_v10  ;;  %v28_v21 = vld [vmem:[%s2880_s1 + $0x68] sm:$0xff]  ;;  %v30_v22 = vld [vmem:[%s2880_s1 + $0x78] sm:$0xff]  ;;  %v1902_v26 = vsub.f32 %v16_v0, %v79_v3  ;;  %v99_v27 = vand.u32 4294901760, %v26_v16  ;;  %v27_v34 = vld [vmem:[%s2880_s1 + $0x60] sm:$0xff] }
   0x6   :  { %3019 = vst [vmem:[#allocation2_spill] sm:$0xff] %v1879_v15  ;;  %1434 = vmatprep.subr.bf16.mxu1 %v1879_v15  ;;  %1626 = vmatprep.subr.bf16.mxu0 %v1879_v15  ;;  %v97_v28 = vand.u32 4294901760, %v23_v17  ;;  %v101_v29 = vand.u32 4294901760, %v25_v18  ;;  %v1906_v30 = vsub.f32 %v18_v1, %v83_v4  ;;  %v1910_v31 = vpack.c.bf16 %v93_v24, %v89_v23  ;;  %v29_v35 = vld [vmem:[%s2880_s1 + $0x70] sm:$0xff]  ;;  %v32_v36 = vld [vmem:[%s2880_s1 + $0x88] sm:$0xff]  ;;  %v34_v41 = vld [vmem:[%s2880_s1 + $0x98] sm:$0xff] }
   0x7   :  { %3020 = vst [vmem:[#allocation3_spill] sm:$0xff] %v1890_v19  ;;  %3021 = vst [vmem:[#allocation4_spill] sm:$0xff] %v1892_v20  ;;  %1436 = vmatpush1.bf16.msra.mxu1 %v1890_v19  ;;  %1628 = vmatpush1.bf16.msra.mxu0 %v1890_v19  ;;  %v103_v32 = vand.u32 4294901760, %v28_v21  ;;  %v107_v33 = vand.u32 4294901760, %v30_v22  ;;  %v1921_v37 = vsub.f32 %v15_v2, %v81_v6  ;;  %v31_v42 = vld [vmem:[%s2880_s1 + $0x80] sm:$0xff]  ;;  %v33_v43 = vld [vmem:[%s2880_s1 + $0x90] sm:$0xff] }
   0x8   :  { %3022 = vst [vmem:[#allocation5_spill] sm:$0xff] %v1902_v26  ;;  %3023 = vst [vmem:[#allocation6_spill] sm:$0xff] %v1906_v30  ;;  %1438 = vmatprep.subr.bf16.mxu1 %v1892_v20  ;;  %1630 = vmatprep.subr.bf16.mxu0 %v1892_v20  ;;  %v1923_v38 = vsub.f32 %v17_v5, %v85_v9  ;;  %v1925_v39 = vsub.f32 %v20_v7, %v87_v10  ;;  %v105_v49 = vand.u32 4294901760, %v27_v34  ;;  %v36_v52 = vld [vmem:[%s2880_s1 + $0xa8] sm:$0xff]  ;;  %v38_v57 = vld [vmem:[%s2880_s1 + $0xb8] sm:$0xff] }
   0x9   :  { %3024 = vst [vmem:[#allocation7_spill] sm:$0xff] %v1910_v31  ;;  %3025 = vst [vmem:[#allocation8_spill] sm:$0xff] %v1921_v37  ;;  %v1927_v40 = vpack.c.bf16 %v99_v27, %v95_v25  ;;  %v1938_v44 = vsub.f32 %v22_v8, %v91_v11  ;;  %v1940_v45 = vsub.f32 %v19_v12, %v89_v23  ;;  %v109_v50 = vand.u32 4294901760, %v29_v35  ;;  %v35_v62 = vld [vmem:[%s2880_s1 + $0xa0] sm:$0xff]  ;;  %v37_v3 = vld [vmem:[%s2880_s1 + $0xb0] sm:$0xff] }
   0xa   :  { %3026 = vst [vmem:[#allocation9_spill] sm:$0xff] %v1923_v38  ;;  %3027 = vst [vmem:[#allocation10_spill] sm:$0xff] %v1925_v39  ;;  %v1942_v46 = vsub.f32 %v21_v13, %v93_v24  ;;  %v1944_v47 = vsub.f32 %v24_v14, %v95_v25  ;;  %v1948_v48 = vpack.c.bf16 %v101_v29, %v97_v28  ;;  %v111_v51 = vand.u32 4294901760, %v32_v36  ;;  %v40_v4 = vld [vmem:[%s2880_s1 + $0xc8] sm:$0xff]  ;;  %v42_v5 = vld [vmem:[%s2880_s1 + $0xd8] sm:$0xff] }
   0xb   :  { %3028 = vst [vmem:[#allocation11_spill] sm:$0xff] %v1927_v40  ;;  %3029 = vst [vmem:[#allocation12_spill] sm:$0xff] %v1938_v44  ;;  %1440 = vmatpush1.bf16.msra.mxu1 %v1910_v31  ;;  %1632 = vmatpush1.bf16.msra.mxu0 %v1910_v31  ;;  %v1955_v53 = vpack.c.bf16 %v107_v33, %v103_v32  ;;  %v115_v54 = vand.u32 4294901760, %v34_v41  ;;  %v113_v55 = vand.u32 4294901760, %v31_v42  ;;  %v117_v56 = vand.u32 4294901760, %v33_v43  ;;  %v39_v10 = vld [vmem:[%s2880_s1 + $0xc0] sm:$0xff] }
   0xc   :  { %3030 = vst [vmem:[#allocation13_spill] sm:$0xff] %v1948_v48  ;;  %1442 = vmatprep.subr.bf16.mxu1 %v1927_v40  ;;  %1634 = vmatprep.subr.bf16.mxu0 %v1927_v40  ;;  %v1960_v58 = vsub.f32 %v26_v16, %v99_v27  ;;  %v1962_v59 = vsub.f32 %v23_v17, %v97_v28  ;;  %v119_v2 = vand.u32 4294901760, %v36_v52  ;;  %v123_v9 = vand.u32 4294901760, %v38_v57  ;;  %v41_v11 = vld [vmem:[%s2880_s1 + $0xd0] sm:$0xff]  ;;  %v44_v16 = vld [vmem:[%s2880_s1 + $0xe8] sm:$0xff]  ;;  %v46_v17 = vld [vmem:[%s2880_s1 + $0xf8] sm:$0xff] }
   0xd   :  { %3031 = vst [vmem:[#allocation14_spill] sm:$0xff] %v1955_v53  ;;  %v1964_v60 = vsub.f32 %v25_v18, %v101_v29  ;;  %v1966_v61 = vsub.f32 %v28_v21, %v103_v32  ;;  %v1971_v63 = vsub.f32 %v30_v22, %v107_v33  ;;  %v1973_v0 = vpack.c.bf16 %v109_v50, %v105_v49  ;;  %v43_v24 = vld [vmem:[%s2880_s1 + $0xe0] sm:$0xff]  ;;  %v45_v25 = vld [vmem:[%s2880_s1 + $0xf0] sm:$0xff] }
   0xe   :  { %3032 = vst [vmem:[#allocation15_spill] sm:$0xff] %v1960_v58  ;;  %v1975_v1 = vsub.f32 %v27_v34, %v105_v49  ;;  %v1988_v6 = vsub.f32 %v29_v35, %v109_v50  ;;  %v1990_v7 = vpack.c.bf16 %v115_v54, %v111_v51  ;;  %v1992_v8 = vsub.f32 %v32_v36, %v111_v51  ;;  %v48_v36 = vld [vmem:[%s2880_s1 + $0x108] sm:$0xff]  ;;  %v47_v51 = vld [vmem:[%s2880_s1 + $0x100] sm:$0xff] }
   0xf   :  { %3033 = vst [vmem:[#allocation16_spill] sm:$0xff] %v1964_v60  ;;  %3034 = vst [vmem:[#allocation17_spill] sm:$0xff] %v1966_v61  ;;  %1444 = vmatpush1.bf16.msra.mxu1 %v1948_v48  ;;  %1636 = vmatpush1.bf16.msra.mxu0 %v1948_v48  ;;  %v2002_v12 = vsub.f32 %v34_v41, %v115_v54  ;;  %v2004_v13 = vpack.c.bf16 %v117_v56, %v113_v55  ;;  %v121_v18 = vand.u32 4294901760, %v35_v62  ;;  %v50_v41 = vld [vmem:[%s2880_s1 + $0x118] sm:$0xff] }
  0x10   :  { %3035 = vst [vmem:[#allocation18_spill] sm:$0xff] %v1971_v63  ;;  %3036 = vst [vmem:[#allocation19_spill] sm:$0xff] %v1973_v0  ;;  %1446 = vmatprep.subr.bf16.mxu1 %v1955_v53  ;;  %1638 = vmatprep.subr.bf16.mxu0 %v1955_v53  ;;  %v2006_v14 = vsub.f32 %v31_v42, %v113_v55  ;;  %v125_v21 = vand.u32 4294901760, %v37_v3  ;;  %v127_v22 = vand.u32 4294901760, %v40_v4  ;;  %v131_v23 = vand.u32 4294901760, %v42_v5 }
  0x11   :  { %3037 = vst [vmem:[#allocation20_spill] sm:$0xff] %v1990_v7  ;;  %3038 = vst [vmem:[#allocation21_spill] sm:$0xff] %v1992_v8  ;;  %v2020_v27 = vsub.f32 %v33_v43, %v117_v56  ;;  %v2022_v28 = vsub.f32 %v36_v52, %v119_v2  ;;  %v129_v29 = vand.u32 4294901760, %v39_v10  ;;  %v133_v32 = vand.u32 4294901760, %v41_v11 }
  0x12   :  { %3039 = vst [vmem:[#allocation22_spill] sm:$0xff] %v2002_v12  ;;  %3040 = vst [vmem:[#allocation23_spill] sm:$0xff] %v2004_v13  ;;  %v2026_v33 = vpack.c.bf16 %v123_v9, %v119_v2  ;;  %v2028_v34 = vsub.f32 %v38_v57, %v123_v9  ;;  %v2030_v35 = vsub.f32 %v35_v62, %v121_v18  ;;  %v135_v42 = vand.u32 4294901760, %v44_v16  ;;  %v49_v57 = vld [vmem:[%s2880_s1 + $0x110] sm:$0xff] }
  0x13   :  { %3041 = vst [vmem:[#allocation24_spill] sm:$0xff] %v2006_v14  ;;  %3042 = vst [vmem:[#allocation25_spill] sm:$0xff] %v2020_v27  ;;  %1448 = vmatpush1.bf16.msra.mxu1 %v1973_v0  ;;  %1640 = vmatpush1.bf16.msra.mxu0 %v1973_v0  ;;  %v139_v43 = vand.u32 4294901760, %v46_v17  ;;  %v137_v49 = vand.u32 4294901760, %v43_v24  ;;  %v141_v50 = vand.u32 4294901760, %v45_v25  ;;  %v2043_v52 = vpack.c.bf16 %v125_v21, %v121_v18  ;;  %v52_v18 = vld [vmem:[%s2880_s1 + $0x128] sm:$0xff] }
  0x14   :  { %3043 = vst [vmem:[#allocation26_spill] sm:$0xff] %v2022_v28  ;;  %3044 = vst [vmem:[#allocation27_spill] sm:$0xff] %v2026_v33  ;;  %1450 = vmatprep.subr.bf16.mxu1 %v1990_v7  ;;  %1642 = vmatprep.subr.bf16.mxu0 %v1990_v7  ;;  %v2045_v54 = vsub.f32 %v37_v3, %v125_v21  ;;  %v2047_v55 = vpack.c.bf16 %v131_v23, %v127_v22  ;;  %v143_v9 = vand.u32 4294901760, %v48_v36  ;;  %v54_v3 = vld [vmem:[%s2880_s1 + $0x138] sm:$0xff]  ;;  %v53_v0 = vld [vmem:[%s2880_s1 + $0x130] sm:$0xff] }
  0x15   :  { %3045 = vst [vmem:[#allocation28_spill] sm:$0xff] %v2028_v34  ;;  %3046 = vst [vmem:[#allocation29_spill] sm:$0xff] %v2030_v35  ;;  %v2049_v56 = vsub.f32 %v40_v4, %v127_v22  ;;  %v2054_v62 = vsub.f32 %v42_v5, %v131_v23  ;;  %v2056_v2 = vpack.c.bf16 %v133_v32, %v129_v29  ;;  %v147_v7 = vand.u32 4294901760, %v50_v41  ;;  %v51_v23 = vld [vmem:[%s2880_s1 + $0x120] sm:$0xff] }
  0x16   :  { %3047 = vst [vmem:[#allocation30_spill] sm:$0xff] %v2043_v52  ;;  %3048 = vst [vmem:[#allocation31_spill] sm:$0xff] %v2045_v54  ;;  %v2066_v4 = vsub.f32 %v39_v10, %v129_v29  ;;  %v2068_v5 = vsub.f32 %v41_v11, %v133_v32  ;;  %v2070_v21 = vsub.f32 %v44_v16, %v135_v42  ;;  %v145_v22 = vand.u32 4294901760, %v47_v51  ;;  %v56_v29 = vld [vmem:[%s2880_s1 + $0x148] sm:$0xff]  ;;  %v58_v32 = vld [vmem:[%s2880_s1 + $0x158] sm:$0xff] }
  0x17   :  { %3049 = vst [vmem:[#allocation32_spill] sm:$0xff] %v2047_v55  ;;  %3050 = vst [vmem:[#allocation33_spill] sm:$0xff] %v2049_v56  ;;  %1452 = vmatpush1.bf16.msra.mxu1 %v2004_v13  ;;  %1644 = vmatpush1.bf16.msra.mxu0 %v2004_v13  ;;  %v2080_v13 = vpack.c.bf16 %v139_v43, %v135_v42  ;;  %v2082_v10 = vsub.f32 %v46_v17, %v139_v43  ;;  %v149_v16 = vand.u32 4294901760, %v49_v57  ;;  %v55_v17 = vld [vmem:[%s2880_s1 + $0x140] sm:$0xff]  ;;  %v57_v43 = vld [vmem:[%s2880_s1 + $0x150] sm:$0xff] }
  0x18   :  { %3051 = vst [vmem:[#allocation34_spill] sm:$0xff] %v2054_v62  ;;  %3052 = vst [vmem:[#allocation35_spill] sm:$0xff] %v2056_v2  ;;  %1454 = vmatprep.subr.bf16.mxu1 %v2026_v33  ;;  %1646 = vmatprep.subr.bf16.mxu0 %v2026_v33  ;;  %v2084_v11 = vpack.c.bf16 %v141_v50, %v137_v49  ;;  %v2092_v53 = vsub.f32 %v43_v24, %v137_v49  ;;  %v151_v33 = vand.u32 4294901760, %v52_v18  ;;  %v60_v24 = vld [vmem:[%s2880_s1 + $0x168] sm:$0xff] }
  0x19   :  { %3053 = vst [vmem:[#allocation36_spill] sm:$0xff] %v2066_v4  ;;  %3054 = vst [vmem:[#allocation37_spill] sm:$0xff] %v2068_v5  ;;  %v2094_v48 = vsub.f32 %v45_v25, %v141_v50  ;;  %v155_v42 = vand.u32 4294901760, %v54_v3  ;;  %v2102_v40 = vpack.c.bf16 %v147_v7, %v143_v9  ;;  %v2104_v31 = vsub.f32 %v48_v36, %v143_v9  ;;  %v62_v25 = vld [vmem:[%s2880_s1 + $0x178] sm:$0xff] }
  0x1a   :  { %3055 = vst [vmem:[#allocation38_spill] sm:$0xff] %v2070_v21  ;;  %3056 = vst [vmem:[#allocation39_spill] sm:$0xff] %v2080_v13  ;;  %v153_v20 = vand.u32 4294901760, %v51_v23  ;;  %v157_v19 = vand.u32 4294901760, %v53_v0  ;;  %v2114_v49 = vsub.f32 %v50_v41, %v147_v7  ;;  %v2116_v50 = vsub.f32 %v47_v51, %v145_v22  ;;  %v61_v7 = vld [vmem:[%s2880_s1 + $0x170] sm:$0xff]  ;;  %v67_v21 = vld [vmem:[%s2880_s1 + $0x1a0] sm:$0xff] }
  0x1b   :  { %3057 = vst [vmem:[#allocation40_spill] sm:$0xff] %v2082_v10  ;;  %3058 = vst [vmem:[#allocation41_spill] sm:$0xff] %v2084_v11  ;;  %1456 = vmatpush1.bf16.msra.mxu1 %v2043_v52  ;;  %1648 = vmatpush1.bf16.msra.mxu0 %v2043_v52  ;;  %v159_v36 = vand.u32 4294901760, %v56_v29  ;;  %v163_v9 = vand.u32 4294901760, %v58_v32  ;;  %v2120_v15 = vpack.c.bf16 %v149_v16, %v145_v22  ;;  %v59_v52 = vld [vmem:[%s2880_s1 + $0x160] sm:$0xff]  ;;  %v66_v22 = vld [vmem:[%s2880_s1 + $0x198] sm:$0xff] }
  0x1c   :  { %3059 = vst [vmem:[#allocation42_spill] sm:$0xff] %v2092_v53  ;;  %3060 = vst [vmem:[#allocation43_spill] sm:$0xff] %v2094_v48  ;;  %1458 = vmatprep.subr.bf16.mxu1 %v2047_v55  ;;  %1650 = vmatprep.subr.bf16.mxu0 %v2047_v55  ;;  %v161_v48 = vand.u32 4294901760, %v55_v17  ;;  %v165_v53 = vand.u32 4294901760, %v57_v43  ;;  %v2130_v41 = vpack.c.bf16 %v155_v42, %v151_v33  ;;  %v171_v55 = vand.u32 4294901760, %v62_v25 }
  0x1d   :  { %3061 = vst [vmem:[#allocation44_spill] sm:$0xff] %v2102_v40  ;;  %3062 = vst [vmem:[#allocation45_spill] sm:$0xff] %v2104_v31  ;;  %v2122_v31 = vsub.f32 %v49_v57, %v149_v16  ;;  %v2132_v51 = vsub.f32 %v52_v18, %v151_v33  ;;  %v64_v57 = vld [vmem:[%s2880_s1 + $0x188] sm:$0xff]  ;;  %v2140_v16 = vsub.f32 %v54_v3, %v155_v42  ;;  %v63_v33 = vld [vmem:[%s2880_s1 + $0x180] sm:$0xff]  ;;  %v169_v3 = vand.u32 4294901760, %v59_v52 }
  0x1e   :  { %3063 = vst [vmem:[#allocation46_spill] sm:$0xff] %v2114_v49  ;;  %3064 = vst [vmem:[#allocation47_spill] sm:$0xff] %v2116_v50  ;;  %v167_v50 = vand.u32 4294901760, %v60_v24  ;;  %v2144_v49 = vsub.f32 %v51_v23, %v153_v20  ;;  %v2146_v10 = vsub.f32 %v53_v0, %v157_v19  ;;  %v2153_v18 = vpack.c.bf16 %v163_v9, %v159_v36  ;;  %v70_v0 = vld [vmem:[%s2880_s1 + $0x1b8] sm:$0xff] }
  0x1f   :  { %3065 = vst [vmem:[#allocation48_spill] sm:$0xff] %v2120_v15  ;;  %3066 = vst [vmem:[#allocation49_spill] sm:$0xff] %v2122_v31  ;;  %v2142_v31 = vpack.c.bf16 %v157_v19, %v153_v20  ;;  %1460 = vmatpush1.bf16.msra.mxu1 %v2056_v2  ;;  %1652 = vmatpush1.bf16.msra.mxu0 %v2056_v2  ;;  %v173_v42 = vand.u32 4294901760, %v61_v7  ;;  %v65_v20 = vld [vmem:[%s2880_s1 + $0x190] sm:$0xff]  ;;  %v68_v19 = vld [vmem:[%s2880_s1 + $0x1a8] sm:$0xff]  ;;  %v2168_v23 = vsub.f32 %v58_v32, %v163_v9 }
  0x20   :  { %3067 = vst [vmem:[#allocation50_spill] sm:$0xff] %v2130_v41  ;;  %3068 = vst [vmem:[#allocation51_spill] sm:$0xff] %v2132_v51  ;;  %v2155_v51 = vsub.f32 %v56_v29, %v159_v36  ;;  %1462 = vmatprep.subr.bf16.mxu1 %v2080_v13  ;;  %1654 = vmatprep.subr.bf16.mxu0 %v2080_v13  ;;  %v2170_v29 = vpack.c.bf16 %v165_v53, %v161_v48  ;;  %v175_v36 = vand.u32 4294901760, %v64_v57  ;;  %v69_v32 = vld [vmem:[%s2880_s1 + $0x1b0] sm:$0xff] }
  0x21   :  { %3069 = vst [vmem:[#allocation52_spill] sm:$0xff] %v2140_v16  ;;  %3070 = vst [vmem:[#allocation53_spill] sm:$0xff] %v2142_v31  ;;  %v179_v2 = vand.u32 4294901760, %v66_v22  ;;  %v2178_v16 = vsub.f32 %v60_v24, %v167_v50  ;;  %v177_v9 = vand.u32 4294901760, %v63_v33  ;;  %v181_v13 = vand.u32 4294901760, %v65_v20 }
  0x22   :  { %3071 = vst [vmem:[#allocation54_spill] sm:$0xff] %v2144_v49  ;;  %3072 = vst [vmem:[#allocation55_spill] sm:$0xff] %v2146_v10  ;;  %v2174_v10 = vsub.f32 %v57_v43, %v165_v53  ;;  %v2176_v49 = vpack.c.bf16 %v171_v55, %v167_v50  ;;  %v187_v5 = vand.u32 4294901760, %v70_v0  ;;  %v74_v53 = vld [vmem:[%s2880_s1 + $0x1d8] sm:$0xff]  ;;  %v2196_v43 = vpack.c.bf16 %v173_v42, %v169_v3 }
  0x23   :  { %3073 = vst [vmem:[#allocation56_spill] sm:$0xff] %v2153_v18  ;;  %3074 = vst [vmem:[#allocation57_spill] sm:$0xff] %v2155_v51  ;;  %v2172_v51 = vsub.f32 %v55_v17, %v161_v48  ;;  %v72_v48 = vld [vmem:[%s2880_s1 + $0x1c8] sm:$0xff]  ;;  %1464 = vmatpush1.bf16.msra.mxu1 %v2084_v11  ;;  %1656 = vmatpush1.bf16.msra.mxu0 %v2084_v11  ;;  %v2194_v17 = vsub.f32 %v62_v25, %v171_v55  ;;  %v71_v11 = vld [vmem:[%s2880_s1 + $0x1c0] sm:$0xff] }
  0x24   :  { %3075 = vst [vmem:[#allocation58_spill] sm:$0xff] %v2168_v23  ;;  %3076 = vst [vmem:[#allocation59_spill] sm:$0xff] %v2170_v29  ;;  %v183_v23 = vand.u32 4294901760, %v68_v19  ;;  %v2198_v24 = vsub.f32 %v59_v52, %v169_v3  ;;  %1466 = vmatprep.subr.bf16.mxu1 %v2102_v40  ;;  %1658 = vmatprep.subr.bf16.mxu0 %v2102_v40  ;;  %v2202_v50 = vsub.f32 %v61_v7, %v173_v42  ;;  %v73_v55 = vld [vmem:[%s2880_s1 + $0x1d0] sm:$0xff] }
  0x25   :  { %3077 = vst [vmem:[#allocation60_spill] sm:$0xff] %v2172_v51  ;;  %3078 = vst [vmem:[#allocation61_spill] sm:$0xff] %v2174_v10  ;;  %v185_v10 = vand.u32 4294901760, %v67_v21  ;;  %v189_v51 = vand.u32 4294901760, %v69_v32  ;;  %v2212_v52 = vsub.f32 %v64_v57, %v175_v36  ;;  %v2214_v25 = vsub.f32 %v66_v22, %v179_v2  ;;  %v12_v57 = vld [vmem:[%s2881_s0 + $0x8] sm:$0xff] }
  0x26   :  { %3079 = vst [vmem:[#allocation62_spill] sm:$0xff] %v2176_v49  ;;  %3080 = vst [vmem:[#allocation63_spill] sm:$0xff] %v2178_v16  ;;  %v2204_v16 = vpack.c.bf16 %v179_v2, %v175_v36  ;;  %v191_v3 = vand.u32 4294901760, %v72_v48  ;;  %v195_v40 = vand.u32 4294901760, %v74_v53  ;;  %v2216_v7 = vpack.c.bf16 %v181_v13, %v177_v9 }
  0x27   :  { %3081 = vst [vmem:[#allocation64_spill] sm:$0xff] %v2194_v17  ;;  %3082 = vst [vmem:[#allocation65_spill] sm:$0xff] %v2196_v43  ;;  %v2218_v42 = vsub.f32 %v63_v33, %v177_v9  ;;  %v76_v17 = vld [vmem:[%s2880_s1 + $0x1e8] sm:$0xff]  ;;  %1468 = vmatpush1.bf16.msra.mxu1 %v2120_v15  ;;  %1660 = vmatpush1.bf16.msra.mxu0 %v2120_v15  ;;  %v2232_v2 = vsub.f32 %v68_v19, %v183_v23  ;;  %v197_v33 = vand.u32 4294901760, %v73_v55 }
  0x28   :  { %3083 = vst [vmem:[#allocation66_spill] sm:$0xff] %v2198_v24  ;;  %3084 = vst [vmem:[#allocation67_spill] sm:$0xff] %v2202_v50  ;;  %v2220_v50 = vsub.f32 %v65_v20, %v181_v13  ;;  %v2222_v24 = vpack.c.bf16 %v187_v5, %v183_v23  ;;  %v2234_v22 = vsub.f32 %v70_v0, %v187_v5  ;;  %v193_v13 = vand.u32 4294901760, %v71_v11  ;;  %v11_v20 = vld [vmem:[%s2881_s0] sm:$0xff]  ;;  %v78_v5 = vld [vmem:[%s2880_s1 + $0x1f8] sm:$0xff] }
  0x29   :  { %3085 = vst [vmem:[#allocation68_spill] sm:$0xff] %v2204_v16  ;;  %3086 = vst [vmem:[#allocation69_spill] sm:$0xff] %v2212_v52  ;;  %1470 = vmatprep.subr.bf16.mxu1 %v2130_v41  ;;  %1662 = vmatprep.subr.bf16.mxu0 %v2130_v41  ;;  %v2241_v36 = vpack.c.bf16 %v189_v51, %v185_v10  ;;  %v2243_v9 = vsub.f32 %v67_v21, %v185_v10  ;;  %v199_v23 = vand.u32 4294901760, %v76_v17 }
  0x2a   :  { %3087 = vst [vmem:[#allocation70_spill] sm:$0xff] %v2214_v25  ;;  %3088 = vst [vmem:[#allocation71_spill] sm:$0xff] %v2216_v7  ;;  %v2250_v19 = vpack.c.bf16 %v195_v40, %v191_v3  ;;  %v2252_v0 = vsub.f32 %v72_v48, %v191_v3  ;;  %v2254_v15 = vand.u32 4294901760, %v12_v57  ;;  %v242_v41 = vand.u32 4294901760, %v1902_v26  ;;  %v75_v48 = vld [vmem:[%s2880_s1 + $0x1e0] sm:$0xff] }
  0x2b   :  { %3089 = vst [vmem:[#allocation72_spill] sm:$0xff] %v2218_v42  ;;  %3090 = vst [vmem:[#allocation73_spill] sm:$0xff] %v2220_v50  ;;  %v2245_v50 = vsub.f32 %v69_v32, %v189_v51  ;;  %v254_v21 = vand.u32 4294901760, %v1906_v30  ;;  %v2260_v10 = vand.u32 4294901760, %v11_v20  ;;  %1472 = vmatpush1.bf16.msra.mxu1 %v2142_v31  ;;  %1664 = vmatpush1.bf16.msra.mxu0 %v2142_v31  ;;  %v203_v32 = vand.u32 4294901760, %v78_v5 }
  0x2c   :  { %3091 = vst [vmem:[#allocation74_spill] sm:$0xff] %v2222_v24  ;;  %3092 = vst [vmem:[#allocation75_spill] sm:$0xff] %v2232_v2  ;;  %v2264_v51 = vpack.c.bf16 %v197_v33, %v193_v13  ;;  %v248_v3 = vand.u32 4294901760, %v1921_v37  ;;  %1474 = vmatprep.subr.bf16.mxu1 %v2153_v18  ;;  %1666 = vmatprep.subr.bf16.mxu0 %v2153_v18  ;;  %v2278_v31 = vsub.f32 %v71_v11, %v193_v13 }
  0x2d   :  { %3093 = vst [vmem:[#allocation76_spill] sm:$0xff] %v2234_v22  ;;  %3094 = vst [vmem:[#allocation77_spill] sm:$0xff] %v2241_v36  ;;  %v2256_v22 = vsub.f32 %v74_v53, %v195_v40  ;;  %v77_v40 = vld [vmem:[%s2880_s1 + $0x1f0] sm:$0xff]  ;;  %v2273_v53 = vsub.f32 %v12_v57, %v2254_v15  ;;  %v243_v2 = vsub.f32 %v1902_v26, %v242_v41  ;;  %v201_v42 = vand.u32 4294901760, %v75_v48 }
  0x2e   :  { %3095 = vst [vmem:[#allocation78_spill] sm:$0xff] %v2243_v9  ;;  %3096 = vst [vmem:[#allocation79_spill] sm:$0xff] %v2245_v50  ;;  %v260_v50 = vand.u32 4294901760, %v1923_v38  ;;  %v255_v57 = vsub.f32 %v1906_v30, %v254_v21  ;;  %v205_v25 = vand.u32 4294901760, %v77_v40  ;;  %v249_v11 = vsub.f32 %v1921_v37, %v248_v3 }
  0x2f   :  { %3097 = vst [vmem:[#allocation80_spill] sm:$0xff] %v2250_v19  ;;  %3098 = vst [vmem:[#allocation81_spill] sm:$0xff] %v2252_v0  ;;  %v2282_v0 = vsub.f32 %v76_v17, %v199_v23  ;;  %v209_v9 = vand.u32 4294901760, %v2273_v53  ;;  %1476 = vmatpush1.bf16.msra.mxu1 %v2170_v29  ;;  %1668 = vmatpush1.bf16.msra.mxu0 %v2170_v29  ;;  %v2295_v17 = vpack.c.bf16 %v203_v32, %v199_v23 }
  0x30   :  { %3099 = vst [vmem:[#allocation82_spill] sm:$0xff] %v2254_v15  ;;  %3100 = vst [vmem:[#allocation83_spill] sm:$0xff] %v2256_v22  ;;  %v2280_v22 = vsub.f32 %v73_v55, %v197_v33  ;;  %v2289_v15 = vsub.f32 %v11_v20, %v2260_v10  ;;  %v266_v55 = vand.u32 4294901760, %v1925_v39  ;;  %v261_v18 = vsub.f32 %v1923_v38, %v260_v50 }
  0x31   :  { %3101 = vst [vmem:[#allocation84_spill] sm:$0xff] %v2260_v10  ;;  %3102 = vst [vmem:[#allocation85_spill] sm:$0xff] %v2264_v51  ;;  %v210_v13 = vsub.f32 %v2273_v53, %v209_v9  ;;  %1478 = vmatprep.subr.bf16.mxu1 %v2176_v49  ;;  %1670 = vmatprep.subr.bf16.mxu0 %v2176_v49  ;;  %v2302_v20 = vsub.f32 %v78_v5, %v203_v32  ;;  %v278_v37 = vand.u32 4294901760, %v1938_v44 }
  0x32   :  { %3103 = vst [vmem:[#allocation86_spill] sm:$0xff] %v2273_v53  ;;  %3104 = vst [vmem:[#allocation87_spill] sm:$0xff] %v2282_v0  ;;  %v2304_v10 = vsub.f32 %v75_v48, %v201_v42  ;;  %v272_v29 = vand.u32 4294901760, %v1940_v45  ;;  %v244_v30 = vand.u32 4294901760, %v243_v2  ;;  %v256_v26 = vand.u32 4294901760, %v255_v57  ;;  %985 = vmatprep.mubr.f32.mxu0 %v209_v9 }
  0x33   :  { %3105 = vst [vmem:[#allocation88_spill] sm:$0xff] %v2289_v15  ;;  %3106 = vst [vmem:[#allocation89_spill] sm:$0xff] %v2295_v17  ;;  %v211_v23 = vand.u32 4294901760, %v210_v13  ;;  %v284_v33 = vand.u32 4294901760, %v1942_v46  ;;  %v2309_v53 = vpack.c.bf16 %v205_v25, %v201_v42  ;;  %v2311_v38 = vsub.f32 %v77_v40, %v205_v25  ;;  %1480 = vmatpush1.bf16.msra.mxu1 %v2196_v43 }
  0x34   :  { %v250_v0 = vand.u32 4294901760, %v249_v11  ;;  %v267_v5 = vsub.f32 %v1925_v39, %v266_v55  ;;  %1672 = vmatpush1.bf16.msra.mxu0 %v2196_v43  ;;  %v3108_v32 = vand.u32 4294901760, %v2289_v15  ;;  %v262_v2 = vand.u32 4294901760, %v261_v18  ;;  %1482 = vmatprep.subr.bf16.mxu1 %v2204_v16 }
  0x35   :  { %3107 = vst [vmem:[#allocation90_spill] sm:$0xff] %v2309_v53  ;;  %v279_v9 = vsub.f32 %v1938_v44, %v278_v37  ;;  %v290_v42 = vand.u32 4294901760, %v1944_v47  ;;  %1674 = vmatprep.subr.bf16.mxu0 %v2204_v16  ;;  %v2325_v25 = vpack.c.bf16 %v254_v21, %v242_v41  ;;  %v273_v40 = vsub.f32 %v1940_v45, %v272_v29 }
  0x36   :  { %v2319_v48 = vsub.f32 %v2289_v15, %v3108_v32  ;;  %v302_v57 = vand.u32 4294901760, %v1960_v58  ;;  %v296_v11 = vand.u32 4294901760, %v1962_v59  ;;  %212 = vmatprep.mubr.f32.mxu1 %v211_v23  ;;  %v2330_v13 = vpack.c.bf16 %v256_v26, %v244_v30 }
  0x37   :  { %v2332_v18 = vpack.c.bf16 %v260_v50, %v248_v3  ;;  %v285_v32 = vsub.f32 %v1942_v46, %v284_v33  ;;  %v308_v43 = vand.u32 4294901760, %v1964_v60  ;;  %v268_v49 = vand.u32 4294901760, %v267_v5  ;;  %1484 = vmatpush1.bf16.msra.mxu1 %v2216_v7 }
  0x38   :  { %v291_v16 = vsub.f32 %v1944_v47, %v290_v42  ;;  %v303_v41 = vsub.f32 %v1960_v58, %v302_v57  ;;  %v314_v21 = vand.u32 4294901760, %v1966_v61  ;;  %1676 = vmatpush1.bf16.msra.mxu0 %v2216_v7  ;;  %v2342_v30 = vpack.c.bf16 %v262_v2, %v250_v0  ;;  %1486 = vmatprep.subr.bf16.mxu1 %v2222_v24 }
  0x39   :  { %v280_v50 = vand.u32 4294901760, %v279_v9  ;;  %v2344_v3 = vpack.c.bf16 %v278_v37, %v266_v55  ;;  %1678 = vmatprep.subr.bf16.mxu0 %v2222_v24  ;;  %v274_v23 = vand.u32 4294901760, %v273_v40  ;;  %v297_v5 = vsub.f32 %v1962_v59, %v296_v11 }
  0x3a   :  { %v309_v44 = vsub.f32 %v1964_v60, %v308_v43  ;;  %v326_v39 = vand.u32 4294901760, %v1971_v63  ;;  %v286_v58 = vand.u32 4294901760, %v285_v32  ;;  %v320_v7 = vand.u32 4294901760, %v1975_v1 }
  0x3b   :  { %v332_v0 = vand.u32 4294901760, %v1988_v6  ;;  %v338_v2 = vand.u32 4294901760, %v1992_v8  ;;  %v2354_v37 = vpack.c.bf16 %v284_v33, %v272_v29  ;;  %v292_v55 = vand.u32 4294901760, %v291_v16  ;;  %1488 = vmatpush1.bf16.msra.mxu1 %v2241_v36 }
  0x3c   :  { %v304_v9 = vand.u32 4294901760, %v303_v41  ;;  %v315_v26 = vsub.f32 %v1966_v61, %v314_v21  ;;  %1680 = vmatpush1.bf16.msra.mxu0 %v2241_v36  ;;  %v2359_v40 = vpack.c.bf16 %v280_v50, %v268_v49  ;;  %v2361_v24 = vpack.c.bf16 %v302_v57, %v290_v42  ;;  %1490 = vmatprep.subr.bf16.mxu1 %v2250_v19 }
  0x3d   :  { %v327_v32 = vsub.f32 %v1971_v63, %v326_v39  ;;  %v350_v60 = vand.u32 4294901760, %v2002_v12  ;;  %1682 = vmatprep.subr.bf16.mxu0 %v2250_v19  ;;  %v298_v16 = vand.u32 4294901760, %v297_v5  ;;  %v310_v29 = vand.u32 4294901760, %v309_v44 }
  0x3e   :  { %v321_v33 = vsub.f32 %v1975_v1, %v320_v7  ;;  %v333_v41 = vsub.f32 %v1988_v6, %v332_v0  ;;  %v2369_v61 = vpack.c.bf16 %v286_v58, %v274_v23  ;;  %v2371_v49 = vpack.c.bf16 %v308_v43, %v296_v11 }
  0x3f   :  { %v339_v42 = vsub.f32 %v1992_v8, %v338_v2  ;;  %v344_v57 = vand.u32 4294901760, %v2006_v14  ;;  %v2375_v50 = vpack.c.bf16 %v304_v9, %v292_v55  ;;  %v316_v36 = vand.u32 4294901760, %v315_v26  ;;  %1492 = vmatpush1.bf16.msra.mxu1 %v2264_v51 }
  0x40   :  { %v351_v63 = vsub.f32 %v2002_v12, %v350_v60  ;;  %v356_v5 = vand.u32 4294901760, %v2020_v27  ;;  %1684 = vmatpush1.bf16.msra.mxu0 %v2264_v51  ;;  %v328_v44 = vand.u32 4294901760, %v327_v32  ;;  %v2381_v58 = vpack.c.bf16 %v326_v39, %v314_v21  ;;  %1494 = vmatprep.subr.bf16.mxu1 %v2295_v17 }
  0x41   :  { %v362_v43 = vand.u32 4294901760, %v2022_v28  ;;  %v374_v11 = vand.u32 4294901760, %v2028_v34  ;;  %1686 = vmatprep.subr.bf16.mxu0 %v2295_v17  ;;  %v2387_v26 = vpack.c.bf16 %v310_v29, %v298_v16  ;;  %v322_v23 = vand.u32 4294901760, %v321_v33 }
  0x42   :  { %v334_v55 = vand.u32 4294901760, %v333_v41  ;;  %v368_v9 = vand.u32 4294901760, %v2030_v35  ;;  %v2390_v19 = vpack.c.bf16 %v332_v0, %v320_v7  ;;  %v340_v51 = vand.u32 4294901760, %v339_v42 }
  0x43   :  { %v345_v39 = vsub.f32 %v2006_v14, %v344_v57  ;;  %v357_v21 = vsub.f32 %v2020_v27, %v356_v5  ;;  %v352_v32 = vand.u32 4294901760, %v351_v63  ;;  %v363_v12 = vsub.f32 %v2022_v28, %v362_v43  ;;  %1496 = vmatpush1.bf16.msra.mxu1 %v2309_v53  ;;  %v3175_v14 = vld [vmem:[#allocation66_spill] sm:$0xff] }
  0x44   :  { %v375_v8 = vsub.f32 %v2028_v34, %v374_v11  ;;  %v380_v17 = vand.u32 4294901760, %v2045_v54  ;;  %1688 = vmatpush1.bf16.msra.mxu0 %v2309_v53  ;;  %v1509_v16 = vpack.c.bf16 %v328_v44, %v316_v36  ;;  %v2399_v29 = vpack.c.bf16 %v350_v60, %v338_v2  ;;  %1498 = vmatprep.subr.bf16.mxu1 %v2330_v13 }
  0x45   :  { %v386_v7 = vand.u32 4294901760, %v2049_v56  ;;  %v398_v0 = vand.u32 4294901760, %v2054_v62  ;;  %1690 = vmatprep.subr.bf16.mxu0 %v2325_v25  ;;  %v2405_v63 = vpack.c.bf16 %v334_v55, %v322_v23  ;;  %v369_v33 = vsub.f32 %v2030_v35, %v368_v9  ;;  %v3111_v23 = vld [vmem:[#allocation37_spill] sm:$0xff]  ;;  %v3123_v35 = vld [vmem:[#allocation55_spill] sm:$0xff] }
  0x46   :  { %v381_v41 = vsub.f32 %v2045_v54, %v380_v17  ;;  %v346_v42 = vand.u32 4294901760, %v345_v39  ;;  %v358_v34 = vand.u32 4294901760, %v357_v21  ;;  %v2409_v53 = vpack.c.bf16 %v356_v5, %v344_v57  ;;  %v3113_v21 = vld [vmem:[#allocation40_spill] sm:$0xff] }
  0x47   :  { %v392_v60 = vand.u32 4294901760, %v2066_v4  ;;  %v3109_v36 = vand.u32 4294901760, %v2319_v48  ;;  %v3110_v2 = vand.u32 4294901760, %v2289_v15  ;;  %v2416_v13 = vpack.c.bf16 %v352_v32, %v340_v51 }
  0x48   :  { %v364_v25 = vand.u32 4294901760, %v363_v12  ;;  %v376_v44 = vand.u32 4294901760, %v375_v8  ;;  %v404_v55 = vand.u32 4294901760, %v3111_v23  ;;  %v2421_v57 = vpack.c.bf16 %v374_v11, %v362_v43  ;;  %v3112_v12 = vld [vmem:[#allocation38_spill] sm:$0xff] }
  0x49   :  { %218 = vmatmul.mubr.f32.vlgmr.msra.gmra.mrb[0].mxu1 %v3109_v36  ;;  %989 = vmatmul.mubr.f32.vlgmr.msra.gmra.mrb[0].mxu0 %v3110_v2  ;;  %v387_v5 = vsub.f32 %v2049_v56, %v386_v7  ;;  %v399_v48 = vsub.f32 %v2054_v62, %v398_v0  ;;  %v370_v51 = vand.u32 4294901760, %v369_v33  ;;  %v382_v39 = vand.u32 4294901760, %v381_v41  ;;  %v3114_v43 = vld [vmem:[#allocation42_spill] sm:$0xff]  ;;  %v3116_v33 = vld [vmem:[#allocation45_spill] sm:$0xff] }
  0x4a   :  { %1500 = vmatpush1.bf16.msra.mxu1 %v2342_v30  ;;  %1692 = vmatpush1.bf16.msra.mxu0 %v2332_v18  ;;  %v410_v8 = vand.u32 4294901760, %v3112_v12  ;;  %v422_v32 = vand.u32 4294901760, %v3113_v21  ;;  %v2429_v36 = vpack.c.bf16 %v358_v34, %v346_v42  ;;  %v393_v18 = vsub.f32 %v2066_v4, %v392_v60  ;;  %v3117_v4 = vld [vmem:[#allocation46_spill] sm:$0xff]  ;;  %v3119_v56 = vld [vmem:[#allocation49_spill] sm:$0xff] }
  0x4b   :  { %1502 = vmatprep.subr.bf16.mxu1 %v2359_v40  ;;  %1694 = vmatprep.subr.bf16.mxu0 %v2344_v3  ;;  %v405_v30 = vsub.f32 %v3111_v23, %v404_v55  ;;  %v416_v11 = vand.u32 4294901760, %v3114_v43  ;;  %v2434_v2 = vpack.c.bf16 %v376_v44, %v364_v25  ;;  %v2436_v15 = vpack.c.bf16 %v380_v17, %v368_v9  ;;  %v3115_v40 = vld [vmem:[#allocation43_spill] sm:$0xff] }
  0x4c   :  { %v428_v3 = vand.u32 4294901760, %v3115_v40  ;;  %v434_v41 = vand.u32 4294901760, %v3116_v33  ;;  %v388_v34 = vand.u32 4294901760, %v387_v5  ;;  %v400_v42 = vand.u32 4294901760, %v399_v48  ;;  %v3118_v5 = vld [vmem:[#allocation47_spill] sm:$0xff] }
  0x4d   :  { %v2442_v62 = vpack.c.bf16 %v398_v0, %v386_v7  ;;  %v446_v23 = vand.u32 4294901760, %v3117_v4  ;;  %v2447_v17 = vpack.c.bf16 %v382_v39, %v370_v51  ;;  %v411_v9 = vsub.f32 %v3112_v12, %v410_v8 }
  0x4e   :  { %1504 = vmatpush1.bf16.msra.mxu1 %v2369_v61  ;;  %1696 = vmatpush1.bf16.msra.mxu0 %v2354_v37  ;;  %v423_v25 = vsub.f32 %v3113_v21, %v422_v32  ;;  %v394_v44 = vand.u32 4294901760, %v393_v18  ;;  %v406_v61 = vand.u32 4294901760, %v405_v30  ;;  %v417_v37 = vsub.f32 %v3114_v43, %v416_v11  ;;  %v3120_v18 = vld [vmem:[#allocation51_spill] sm:$0xff]  ;;  %v3121_v43 = vld [vmem:[#allocation52_spill] sm:$0xff] }
  0x4f   :  { %1506 = vmatprep.subr.bf16.mxu1 %v2375_v50  ;;  %1698 = vmatprep.subr.bf16.mxu0 %v2361_v24  ;;  %v440_v48 = vand.u32 4294901760, %v3118_v5  ;;  %v2453_v7 = vpack.c.bf16 %v404_v55, %v392_v60  ;;  %v429_v0 = vsub.f32 %v3115_v40, %v428_v3  ;;  %v435_v50 = vsub.f32 %v3116_v33, %v434_v41  ;;  %v3122_v40 = vld [vmem:[#allocation54_spill] sm:$0xff] }
  0x50   :  { %v452_v24 = vand.u32 4294901760, %v3119_v56  ;;  %v2460_v51 = vpack.c.bf16 %v400_v42, %v388_v34  ;;  %v447_v39 = vsub.f32 %v3117_v4, %v446_v23  ;;  %v458_v30 = vand.u32 4294901760, %v3120_v18 }
  0x51   :  { %v470_v21 = vand.u32 4294901760, %v3121_v43  ;;  %v412_v60 = vand.u32 4294901760, %v411_v9  ;;  %v424_v55 = vand.u32 4294901760, %v423_v25  ;;  %v2466_v33 = vpack.c.bf16 %v422_v32, %v410_v8  ;;  %v3125_v9 = vld [vmem:[#allocation58_spill] sm:$0xff] }
  0x52   :  { %1508 = vmatpush1.bf16.msra.mxu1 %v2387_v26  ;;  %1700 = vmatpush1.bf16.msra.mxu0 %v2371_v49  ;;  %v464_v12 = vand.u32 4294901760, %v3122_v40  ;;  %v2469_v26 = vpack.c.bf16 %v406_v61, %v394_v44  ;;  %v418_v49 = vand.u32 4294901760, %v417_v37  ;;  %v441_v34 = vsub.f32 %v3118_v5, %v440_v48  ;;  %v3127_v5 = vld [vmem:[#allocation61_spill] sm:$0xff] }
  0x53   :  { %1510 = vmatprep.subr.bf16.mxu1 %v1509_v16  ;;  %1702 = vmatprep.subr.bf16.mxu0 %v2381_v58  ;;  %v453_v42 = vsub.f32 %v3119_v56, %v452_v24  ;;  %v430_v4 = vand.u32 4294901760, %v429_v0  ;;  %v436_v54 = vand.u32 4294901760, %v435_v50  ;;  %v476_v28 = vand.u32 4294901760, %v3123_v35  ;;  %v3124_v16 = vld [vmem:[#allocation57_spill] sm:$0xff] }
  0x54   :  { %v482_v27 = vand.u32 4294901760, %v3124_v16  ;;  %v448_v58 = vand.u32 4294901760, %v447_v39  ;;  %v459_v8 = vsub.f32 %v3120_v18, %v458_v30  ;;  %v471_v32 = vsub.f32 %v3121_v43, %v470_v21 }
  0x55   :  { %v494_v25 = vand.u32 4294901760, %v3125_v9  ;;  %v2482_v44 = vpack.c.bf16 %v428_v3, %v416_v11  ;;  %v465_v61 = vsub.f32 %v3122_v40, %v464_v12  ;;  %v477_v37 = vsub.f32 %v3123_v35, %v476_v28 }
  0x56   :  { %1512 = vmatpush1.bf16.msra.mxu1 %v2405_v63  ;;  %1704 = vmatpush1.bf16.msra.mxu0 %v2390_v19  ;;  %v3126_v63 = vld [vmem:[#allocation60_spill] sm:$0xff]  ;;  %v1525_v19 = vpack.c.bf16 %v424_v55, %v412_v60  ;;  %v2487_v50 = vpack.c.bf16 %v446_v23, %v434_v41  ;;  %v442_v39 = vand.u32 4294901760, %v441_v34  ;;  %v454_v18 = vand.u32 4294901760, %v453_v42 }
  0x57   :  { %1514 = vmatprep.subr.bf16.mxu1 %v2416_v13  ;;  %1706 = vmatprep.subr.bf16.mxu0 %v2399_v29  ;;  %v488_v0 = vand.u32 4294901760, %v3126_v63  ;;  %v1527_v43 = vpack.c.bf16 %v430_v4, %v418_v49  ;;  %v483_v56 = vsub.f32 %v3124_v16, %v482_v27  ;;  %v495_v13 = vsub.f32 %v3125_v9, %v494_v25  ;;  %v3140_v9 = vld [vmem:[#allocation83_spill] sm:$0xff]  ;;  %v3180_v16 = vld [vmem:[#allocation73_spill] sm:$0xff] }
  0x58   :  { %v500_v29 = vand.u32 4294901760, %v3127_v5  ;;  %v2494_v11 = vpack.c.bf16 %v448_v58, %v436_v54  ;;  %v2496_v3 = vpack.c.bf16 %v452_v24, %v440_v48  ;;  %v460_v60 = vand.u32 4294901760, %v459_v8  ;;  %v3128_v54 = vld [vmem:[#allocation63_spill] sm:$0xff]  ;;  %v3129_v48 = vld [vmem:[#allocation64_spill] sm:$0xff]  ;;  %v3130_v8 = vld [vmem:[#allocation66_spill] sm:$0xff] }
  0x59   :  { %v472_v23 = vand.u32 4294901760, %v471_v32  ;;  %v2500_v4 = vpack.c.bf16 %v470_v21, %v458_v30  ;;  %v466_v41 = vand.u32 4294901760, %v465_v61  ;;  %v478_v55 = vand.u32 4294901760, %v477_v37  ;;  %v3131_v32 = vld [vmem:[#allocation67_spill] sm:$0xff]  ;;  %v3132_v61 = vld [vmem:[#allocation70_spill] sm:$0xff] }
  0x5a   :  { %1516 = vmatpush1.bf16.msra.mxu1 %v2429_v36  ;;  %1708 = vmatpush1.bf16.msra.mxu0 %v2409_v53  ;;  %v489_v49 = vsub.f32 %v3126_v63, %v488_v0  ;;  %v2503_v34 = vpack.c.bf16 %v454_v18, %v442_v39  ;;  %v501_v53 = vsub.f32 %v3127_v5, %v500_v29  ;;  %v506_v36 = vand.u32 4294901760, %v3128_v54 }
  0x5b   :  { %1518 = vmatprep.subr.bf16.mxu1 %v2434_v2  ;;  %1710 = vmatprep.subr.bf16.mxu0 %v2421_v57  ;;  %v518_v24 = vand.u32 4294901760, %v3129_v48  ;;  %v484_v42 = vand.u32 4294901760, %v483_v56  ;;  %v496_v58 = vand.u32 4294901760, %v495_v13  ;;  %v512_v2 = vand.u32 4294901760, %v3130_v8 }
  0x5c   :  { %v524_v57 = vand.u32 4294901760, %v3131_v32  ;;  %v2512_v21 = vpack.c.bf16 %v472_v23, %v460_v60  ;;  %v2514_v18 = vpack.c.bf16 %v476_v28, %v464_v12  ;;  %v530_v30 = vand.u32 4294901760, %v2212_v52 }
  0x5d   :  { %v542_v37 = vand.u32 4294901760, %v3132_v61  ;;  %v2520_v56 = vpack.c.bf16 %v478_v55, %v466_v41  ;;  %v2522_v39 = vpack.c.bf16 %v494_v25, %v482_v27  ;;  %v490_v13 = vand.u32 4294901760, %v489_v49  ;;  %v3134_v41 = vld [vmem:[#allocation73_spill] sm:$0xff] }
  0x5e   :  { %1520 = vmatpush1.bf16.msra.mxu1 %v2447_v17  ;;  %1712 = vmatpush1.bf16.msra.mxu0 %v2436_v15  ;;  %v3133_v17 = vld [vmem:[#allocation72_spill] sm:$0xff]  ;;  %v502_v15 = vand.u32 4294901760, %v501_v53  ;;  %v2525_v60 = vpack.c.bf16 %v500_v29, %v488_v0  ;;  %v507_v28 = vsub.f32 %v3128_v54, %v506_v36  ;;  %v519_v12 = vsub.f32 %v3129_v48, %v518_v24  ;;  %v3135_v53 = vld [vmem:[#allocation75_spill] sm:$0xff]  ;;  %v3139_v54 = vld [vmem:[#allocation81_spill] sm:$0xff] }
  0x5f   :  { %1522 = vmatprep.subr.bf16.mxu1 %v2460_v51  ;;  %1714 = vmatprep.subr.bf16.mxu0 %v2442_v62  ;;  %v536_v5 = vand.u32 4294901760, %v3133_v17  ;;  %v2529_v23 = vpack.c.bf16 %v496_v58, %v484_v42  ;;  %v513_v51 = vsub.f32 %v3130_v8, %v512_v2  ;;  %v525_v62 = vsub.f32 %v3131_v32, %v524_v57  ;;  %v3136_v58 = vld [vmem:[#allocation76_spill] sm:$0xff] }
  0x60   :  { %v548_v55 = vand.u32 4294901760, %v3134_v41  ;;  %v2536_v27 = vpack.c.bf16 %v518_v24, %v506_v36  ;;  %v531_v25 = vsub.f32 %v2212_v52, %v530_v30  ;;  %v543_v0 = vsub.f32 %v3132_v61, %v542_v37  ;;  %v3137_v24 = vld [vmem:[#allocation78_spill] sm:$0xff]  ;;  %v3138_v61 = vld [vmem:[#allocation79_spill] sm:$0xff] }
  0x61   :  { %v537_v29 = vsub.f32 %v3133_v17, %v536_v5  ;;  %v554_v42 = vand.u32 4294901760, %v3135_v53  ;;  %v566_v32 = vand.u32 4294901760, %v3136_v58  ;;  %v520_v36 = vand.u32 4294901760, %v519_v12 }
  0x62   :  { %1524 = vmatpush1.bf16.msra.mxu1 %v2469_v26  ;;  %1716 = vmatpush1.bf16.msra.mxu0 %v2453_v7  ;;  %v549_v49 = vsub.f32 %v3134_v41, %v548_v55  ;;  %v2545_v26 = vpack.c.bf16 %v502_v15, %v490_v13  ;;  %v508_v7 = vand.u32 4294901760, %v507_v28  ;;  %v560_v8 = vand.u32 4294901760, %v3137_v24  ;;  %v14_v15 = vld [vmem:[%s2881_s0 + $0x18] sm:$0xff] }
  0x63   :  { %1526 = vmatprep.subr.bf16.mxu1 %v1525_v19  ;;  %1718 = vmatprep.subr.bf16.mxu0 %v2466_v33  ;;  %v514_v52 = vand.u32 4294901760, %v513_v51  ;;  %v526_v48 = vand.u32 4294901760, %v525_v62  ;;  %v572_v19 = vand.u32 4294901760, %v3138_v61  ;;  %v578_v33 = vand.u32 4294901760, %v3139_v54 }
  0x64   :  { %v2551_v41 = vpack.c.bf16 %v524_v57, %v512_v2  ;;  %v532_v17 = vand.u32 4294901760, %v531_v25  ;;  %v544_v63 = vand.u32 4294901760, %v543_v0  ;;  %v590_v13 = vand.u32 4294901760, %v3140_v9 }
  0x65   :  { %v538_v28 = vand.u32 4294901760, %v537_v29  ;;  %v550_v12 = vand.u32 4294901760, %v549_v49  ;;  %v1541_v2 = vpack.c.bf16 %v520_v36, %v508_v7  ;;  %v2561_v57 = vpack.c.bf16 %v542_v37, %v530_v30  ;;  %v3142_v7 = vld [vmem:[#allocation87_spill] sm:$0xff] }
  0x66   :  { %1528 = vmatpush1.bf16.msra.mxu1 %v1527_v43  ;;  %1720 = vmatpush1.bf16.msra.mxu0 %v2482_v44  ;;  %v555_v43 = vsub.f32 %v3135_v53, %v554_v42  ;;  %v567_v44 = vsub.f32 %v3136_v58, %v566_v32  ;;  %v561_v51 = vsub.f32 %v3137_v24, %v560_v8  ;;  %v3011_v36 = vand.u32 4294901760, %v3142_v7 }
  0x67   :  { %1530 = vmatprep.subr.bf16.mxu1 %v2494_v11  ;;  %1722 = vmatprep.subr.bf16.mxu0 %v2487_v50  ;;  %v573_v62 = vsub.f32 %v3138_v61, %v572_v19  ;;  %v2565_v25 = vpack.c.bf16 %v526_v48, %v514_v52  ;;  %v579_v0 = vsub.f32 %v3139_v54, %v578_v33  ;;  %v2569_v50 = vand.u32 4294901760, %v14_v15  ;;  %v13_v52 = vld [vmem:[%s2881_s0 + $0x10] sm:$0xff] }
  0x68   :  { %v591_v11 = vsub.f32 %v3140_v9, %v590_v13  ;;  %v2573_v29 = vpack.c.bf16 %v544_v63, %v532_v17  ;;  %v2575_v30 = vpack.c.bf16 %v548_v55, %v536_v5  ;;  %v2577_v37 = vpack.c.bf16 %v566_v32, %v554_v42 }
  0x69   :  { %v2584_v48 = vpack.c.bf16 %v550_v12, %v538_v28  ;;  %v556_v49 = vand.u32 4294901760, %v555_v43  ;;  %v562_v63 = vand.u32 4294901760, %v561_v51  ;;  %v574_v17 = vand.u32 4294901760, %v573_v62 }
  0x6a   :  { %1532 = vmatpush1.bf16.msra.mxu1 %v2503_v34  ;;  %1724 = vmatpush1.bf16.msra.mxu0 %v2496_v3  ;;  %v568_v34 = vand.u32 4294901760, %v567_v44  ;;  %v3014_v3 = vand.u32 4294901760, %v2278_v31  ;;  %v3012_v5 = vand.u32 4294901760, %v2280_v22  ;;  %v2589_v32 = vsub.f32 %v14_v15, %v2569_v50 }
  0x6b   :  { %1534 = vmatprep.subr.bf16.mxu1 %v2512_v21  ;;  %1726 = vmatprep.subr.bf16.mxu0 %v2500_v4  ;;  %v580_v55 = vand.u32 4294901760, %v579_v0  ;;  %v592_v42 = vand.u32 4294901760, %v591_v11  ;;  %v2592_v21 = vand.u32 4294901760, %v13_v52  ;;  %v2596_v4 = vpack.c.bf16 %v572_v19, %v560_v8 }
  0x6c   :  { %3141 = vst [vmem:[#allocation54_spill] sm:$0xff] %v2589_v32  ;;  %v225_v28 = vand.u32 4294901760, %v2589_v32  ;;  %v3010_v12 = vand.u32 4294901760, %v2302_v20  ;;  %v3009_v43 = vand.u32 4294901760, %v2304_v10  ;;  %v1549_v15 = vpack.c.bf16 %v568_v34, %v556_v49  ;;  %v3145_v34 = vld [vmem:[#allocation16_spill] sm:$0xff]  ;;  %v3150_v49 = vld [vmem:[#allocation22_spill] sm:$0xff] }
  0x6d   :  { %v2603_v44 = vpack.c.bf16 %v590_v13, %v578_v33  ;;  %v2606_v51 = vsub.f32 %v13_v52, %v2592_v21  ;;  %v2613_v8 = vsub.f32 %v2278_v31, %v3014_v3  ;;  %v2617_v19 = vpack.c.bf16 %v592_v42, %v580_v55  ;;  %v3146_v55 = vld [vmem:[#allocation17_spill] sm:$0xff]  ;;  %v3147_v42 = vld [vmem:[#allocation18_spill] sm:$0xff]  ;;  %v3168_v3 = vld [vmem:[#allocation51_spill] sm:$0xff] }
  0x6e   :  { %1536 = vmatpush1.bf16.msra.mxu1 %v2520_v56  ;;  %1728 = vmatpush1.bf16.msra.mxu0 %v2514_v18  ;;  %v2608_v56 = vpack.c.bf16 %v574_v17, %v562_v63  ;;  %v226_v18 = vsub.f32 %v2589_v32, %v225_v28  ;;  %v2625_v33 = vsub.f32 %v3142_v7, %v3011_v36  ;;  %v3169_v52 = vld [vmem:[#allocation52_spill] sm:$0xff]  ;;  %v3173_v36 = vld [vmem:[#allocation63_spill] sm:$0xff] }
  0x6f   :  { %1538 = vmatprep.subr.bf16.mxu1 %v2529_v23  ;;  %1730 = vmatprep.subr.bf16.mxu0 %v2522_v39  ;;  %3143 = vst [vmem:[#allocation55_spill] sm:$0xff] %v2606_v51  ;;  %v3013_v23 = vand.u32 4294901760, %v2311_v38  ;;  %v597_v39 = vsub.f32 %v2280_v22, %v3012_v5  ;;  %v231_v13 = vand.u32 4294901760, %v2606_v51  ;;  %v615_v0 = vsub.f32 %v2302_v20, %v3010_v12  ;;  %v3171_v12 = vld [vmem:[#allocation60_spill] sm:$0xff]  ;;  %v3176_v63 = vld [vmem:[#allocation67_spill] sm:$0xff] }
  0x70   :  { %997 = vmatprep.mubr.f32.mxu0 %v225_v28  ;;  %v227_v62 = vand.u32 4294901760, %v226_v18  ;;  %v2636_v11 = vsub.f32 %v2304_v10, %v3009_v43  ;;  %v3148_v18 = vld [vmem:[#allocation82_spill] sm:$0xff]  ;;  %v3159_v43 = vld [vmem:[#allocation37_spill] sm:$0xff] }
  0x71   :  { %v621_v17 = vsub.f32 %v2311_v38, %v3013_v23  ;;  %1001 = vmatmul.mubr.f32.gmra.mrb[2].mxu0 %v231_v13  ;;  %v598_v5 = vand.u32 4294901760, %v597_v39  ;;  %v3177_v28 = vld [vmem:[#allocation69_spill] sm:$0xff]  ;;  %v604_v39 = vand.u32 4294901760, %v2625_v33  ;;  %v616_v23 = vand.u32 4294901760, %v615_v0 }
  0x72   :  { %1540 = vmatpush1.bf16.msra.mxu1 %v2545_v26  ;;  %1732 = vmatpush1.bf16.msra.mxu0 %v2525_v60  ;;  %v232_v26 = vsub.f32 %v2606_v51, %v231_v13  ;;  %v3144_v60 = vld [vmem:[#allocation15_spill] sm:$0xff]  ;;  %v586_v13 = vand.u32 4294901760, %v2613_v8  ;;  %v3172_v8 = vld [vmem:[#allocation61_spill] sm:$0xff]  ;;  %v3178_v51 = vld [vmem:[#allocation70_spill] sm:$0xff]  ;;  %v3182_v0 = vand.u32 4294901760, %v2280_v22 }
  0x73   :  { %1542 = vmatprep.subr.bf16.mxu1 %v1541_v2  ;;  %1734 = vmatprep.subr.bf16.mxu0 %v2536_v27  ;;  %v3155_v27 = vld [vmem:[#allocation31_spill] sm:$0xff]  ;;  %v1609_v32 = vpack.c.bf16 %v3178_v51, %v3177_v28  ;;  %v1557_v33 = vpack.c.bf16 %v616_v23, %v604_v39  ;;  %v3190_v23 = vld [vmem:[#allocation9_spill] sm:$0xff]  ;;  %v3266_v28 = vpack.c.bf16 %v2280_v22, %v2278_v31 }
  0x74   :  { %228 = vmatprep.mubr.f32.mxu1 %v227_v62  ;;  %v233_v2 = vand.u32 4294901760, %v232_v26  ;;  %1264 = vmatprep.mubr.f32.mxu0 %v3148_v18  ;;  %v3160_v62 = vld [vmem:[#allocation38_spill] sm:$0xff]  ;;  %v3174_v26 = vld [vmem:[#allocation64_spill] sm:$0xff]  ;;  %v3263_v51 = vld [vmem:[#allocation77_spill] sm:$0xff] }
  0x76   :  { %1544 = vmatpush1.bf16.msra.mxu1 %v2565_v25  ;;  %1736 = vmatpush1.bf16.msra.mxu0 %v2551_v41  ;;  %v3161_v25 = vld [vmem:[#allocation40_spill] sm:$0xff]  ;;  %v622_v41 = vand.u32 4294901760, %v621_v17  ;;  %v3274_v22 = vld [vmem:[#allocation55_spill] sm:$0xff] }
  0x77   :  { %1546 = vmatprep.subr.bf16.mxu1 %v2573_v29  ;;  %1738 = vmatprep.subr.bf16.mxu0 %v2561_v57  ;;  %v3179_v57 = vld [vmem:[#allocation72_spill] sm:$0xff]  ;;  %v3183_v29 = vand.u32 4294901760, %v3142_v7 }
  0x78   :  { %234 = vmatmul.mubr.f32.gmra.mrb[2].mxu1 %v233_v2 }
  0x79   :  { %625 = vmatprep.mubr.f32.mxu1 %v3148_v18 }
  0x7a   :  { %1548 = vmatpush1.bf16.msra.mxu1 %v2584_v48  ;;  %1740 = vmatpush1.bf16.msra.mxu0 %v2575_v30  ;;  %v610_v48 = vand.u32 4294901760, %v2636_v11  ;;  %v3187_v11 = vld [vmem:[#allocation5_spill] sm:$0xff] }
  0x7b   :  { %1550 = vmatprep.subr.bf16.mxu1 %v1549_v15  ;;  %1742 = vmatprep.subr.bf16.mxu0 %v2577_v37  ;;  %v1555_v15 = vpack.c.bf16 %v598_v5, %v586_v13  ;;  %v3181_v37 = vand.u32 4294901760, %v2278_v31  ;;  %v3186_v13 = vand.u32 4294901760, %v2311_v38  ;;  %v3273_v31 = vld [vmem:[#allocation54_spill] sm:$0xff] }
  0x7c   :  { %v1559_v5 = vpack.c.bf16 %v622_v41, %v610_v48  ;;  %v3193_v41 = vld [vmem:[#allocation12_spill] sm:$0xff] }
  0x7d   :  { %v1747_v2 = vpack.c.bf16 %v3182_v0, %v3181_v37  ;;  %v3197_v0 = vpack.c.bf16 %v1942_v46, %v1940_v45  ;;  %v3204_v45 = vpack.c.bf16 %v3147_v42, %v3146_v55  ;;  %v3205_v46 = vld [vmem:[#allocation14_spill] sm:$0xff]  ;;  %v3214_v55 = vld [vmem:[#allocation23_spill] sm:$0xff]  ;;  %v3215_v42 = vld [vmem:[#allocation28_spill] sm:$0xff] }
  0x7e   :  { %1552 = vmatpush1.bf16.msra.mxu1 %v2608_v56  ;;  %1744 = vmatpush1.bf16.msra.mxu0 %v2596_v4  ;;  %v3184_v56 = vand.u32 4294901760, %v2302_v20  ;;  %v3185_v4 = vand.u32 4294901760, %v2304_v10 }
  0x7f   :  { %1554 = vmatprep.subr.bf16.mxu1 %v2617_v19  ;;  %1746 = vmatprep.subr.bf16.mxu0 %v2603_v44  ;;  %v3188_v19 = vld [vmem:[#allocation6_spill] sm:$0xff]  ;;  %v3189_v44 = vld [vmem:[#allocation8_spill] sm:$0xff] }
  0x80   :  { %v1749_v30 = vpack.c.bf16 %v3184_v56, %v3183_v29  ;;  %v1751_v37 = vpack.c.bf16 %v3186_v13, %v3185_v4  ;;  %v1561_v17 = vpack.c.bf16 %v3188_v19, %v3187_v11  ;;  %v1563_v39 = vpack.c.bf16 %v3190_v23, %v3189_v44  ;;  %v3191_v29 = vld [vmem:[#allocation2_spill] sm:$0xff]  ;;  %v3198_v56 = vld [vmem:[#allocation7_spill] sm:$0xff]  ;;  %v3203_v11 = vld [vmem:[#allocation13_spill] sm:$0xff] }
  0x81   :  { %v3200_v4 = vld [vmem:[#allocation11_spill] sm:$0xff]  ;;  %v3201_v13 = vld [vmem:[#allocation86_spill] sm:$0xff] }
  0x82   :  { %1556 = vmatpush1.bf16.msra.mxu1 %v1555_v15  ;;  %1748 = vmatpush1.bf16.msra.mxu0 %v1747_v2  ;;  %v3192_v2 = vld [vmem:[#allocation10_spill] sm:$0xff]  ;;  %v3194_v15 = vld [vmem:[#allocation84_spill] sm:$0xff] }
  0x83   :  { %1558 = vmatprep.subr.bf16.mxu1 %v1557_v33  ;;  %1750 = vmatprep.subr.bf16.mxu0 %v1749_v30  ;;  %v1565_v48 = vpack.c.bf16 %v3193_v41, %v3192_v2  ;;  %v3195_v30 = vld [vmem:[#allocation3_spill] sm:$0xff]  ;;  %v3196_v33 = vld [vmem:[#allocation4_spill] sm:$0xff]  ;;  %v3216_v23 = vld [vmem:[#allocation26_spill] sm:$0xff] }
  0x84   :  { %v3222_v2 = vld [vmem:[#allocation34_spill] sm:$0xff]  ;;  %v3223_v41 = vld [vmem:[#allocation33_spill] sm:$0xff] }
  0x86   :  { %1560 = vmatpush1.bf16.msra.mxu1 %v1559_v5  ;;  %1752 = vmatpush1.bf16.msra.mxu0 %v1751_v37  ;;  %v3199_v5 = vpack.c.bf16 %v3144_v60, %v1944_v47  ;;  %v3202_v37 = vpack.c.bf16 %v3145_v34, %v1962_v59  ;;  %v3206_v47 = vpack.c.bf16 %v1988_v6, %v1975_v1  ;;  %v3207_v60 = vld [vmem:[#allocation19_spill] sm:$0xff]  ;;  %v3210_v59 = vld [vmem:[#allocation20_spill] sm:$0xff]  ;;  %v3211_v34 = vld [vmem:[#allocation25_spill] sm:$0xff] }
  0x87   :  { %1562 = vmatprep.subr.bf16.mxu1 %v1561_v17  ;;  %1754 = vmatprep.subr.bf16.mxu0 %v3191_v29  ;;  %v3212_v17 = vld [vmem:[#allocation24_spill] sm:$0xff]  ;;  %v3218_v1 = vld [vmem:[#allocation27_spill] sm:$0xff]  ;;  %v3219_v6 = vld [vmem:[#allocation29_spill] sm:$0xff] }
  0x88   :  { %v3213_v44 = vpack.c.bf16 %v3211_v34, %v3212_v17  ;;  %v3220_v29 = vpack.c.bf16 %v3155_v27, %v3219_v6  ;;  %v3230_v27 = vld [vmem:[#allocation39_spill] sm:$0xff]  ;;  %v3245_v34 = vpack.c.bf16 %v3123_v35, %v3122_v40  ;;  %v3246_v17 = vld [vmem:[#allocation53_spill] sm:$0xff]  ;;  %v3254_v35 = vld [vmem:[#allocation62_spill] sm:$0xff]  ;;  %v3255_v40 = vpack.c.bf16 %v3176_v63, %v3175_v14 }
  0x89   :  { %627 = vmatmul.mubr.f32.vlgmr.msra.gmra.mrb[0].mxu1 %v3194_v15  ;;  %1266 = vmatmul.mubr.f32.vlgmr.msra.gmra.mrb[0].mxu0 %v3194_v15  ;;  %v3261_v14 = vld [vmem:[#allocation74_spill] sm:$0xff]  ;;  %v3262_v63 = vpack.c.bf16 %v3138_v61, %v3137_v24  ;;  %v3269_v61 = vld [vmem:[#allocation89_spill] sm:$0xff]  ;;  %v3270_v24 = vpack.c.bf16 %v2311_v38, %v2304_v10 }
  0x8a   :  { %1564 = vmatpush1.bf16.msra.mxu1 %v1563_v39  ;;  %1756 = vmatpush1.bf16.msra.mxu0 %v3195_v30  ;;  %v3217_v39 = vpack.c.bf16 %v3215_v42, %v3216_v23  ;;  %v3225_v30 = vld [vmem:[#allocation32_spill] sm:$0xff] }
  0x8b   :  { %1566 = vmatprep.subr.bf16.mxu1 %v1565_v48  ;;  %1758 = vmatprep.subr.bf16.mxu0 %v3196_v33  ;;  %v3224_v48 = vpack.c.bf16 %v3222_v2, %v3223_v41  ;;  %v3226_v33 = vld [vmem:[#allocation36_spill] sm:$0xff] }
  0x8c   :  { %633 = vmatprep.mubr.f32.mxu1 %v2569_v50  ;;  %1272 = vmatprep.mubr.f32.mxu0 %v2569_v50  ;;  %v3250_v23 = vld [vmem:[#allocation56_spill] sm:$0xff] }
  0x8d   :  { %635 = vmatmul.mubr.f32.gmra.mrb[2].mxu1 %v2592_v21  ;;  %1274 = vmatmul.mubr.f32.gmra.mrb[2].mxu0 %v2592_v21 }
  0x8e   :  { %1568 = vmatpush1.bf16.msra.mxu1 %v3197_v0  ;;  %1760 = vmatpush1.bf16.msra.mxu0 %v3198_v56  ;;  %v3227_v0 = vpack.c.bf16 %v3159_v43, %v3226_v33  ;;  %v3228_v56 = vld [vmem:[#allocation35_spill] sm:$0xff]  ;;  %v3238_v43 = vld [vmem:[#allocation44_spill] sm:$0xff] }
  0x8f   :  { %1570 = vmatprep.subr.bf16.mxu1 %v3199_v5  ;;  %1762 = vmatprep.subr.bf16.mxu0 %v3200_v4  ;;  %v3229_v5 = vpack.c.bf16 %v3161_v25, %v3160_v62  ;;  %v3231_v4 = vld [vmem:[#allocation43_spill] sm:$0xff]  ;;  %v3242_v62 = vld [vmem:[#allocation48_spill] sm:$0xff]  ;;  %v3243_v25 = vpack.c.bf16 %v3169_v52, %v3168_v3  ;;  %v3253_v52 = vpack.c.bf16 %v3174_v26, %v3173_v36 }
  0x90   :  { %835 = vmatprep.mubr.f32.mxu1 %v3201_v13  ;;  %1409 = vmatprep.mubr.f32.mxu0 %v3148_v18  ;;  %v3208_v18 = vld [vmem:[#allocation21_spill] sm:$0xff]  ;;  %v3232_v13 = vld [vmem:[#allocation42_spill] sm:$0xff]  ;;  %v3252_v3 = vld [vmem:[#allocation59_spill] sm:$0xff]  ;;  %v3260_v26 = vpack.c.bf16 %v3136_v58, %v3135_v53  ;;  %v3268_v58 = vpack.c.bf16 %v2302_v20, %v3142_v7 }
  0x91   :  { %v3209_v19 = vpack.c.bf16 %v3150_v49, %v3208_v18  ;;  %v3221_v49 = vld [vmem:[#allocation30_spill] sm:$0xff]  ;;  %v3240_v18 = vld [vmem:[#allocation47_spill] sm:$0xff]  ;;  %v3267_v53 = vld [vmem:[#allocation85_spill] sm:$0xff] }
  0x92   :  { %1572 = vmatpush1.bf16.msra.mxu1 %v3202_v37  ;;  %1764 = vmatpush1.bf16.msra.mxu0 %v3203_v11  ;;  %v3233_v37 = vpack.c.bf16 %v3231_v4, %v3232_v13  ;;  %v3234_v11 = vld [vmem:[#allocation41_spill] sm:$0xff]  ;;  %v3259_v36 = vld [vmem:[#allocation71_spill] sm:$0xff] }
  0x93   :  { %1574 = vmatprep.subr.bf16.mxu1 %v3204_v45  ;;  %1766 = vmatprep.subr.bf16.mxu0 %v3205_v46  ;;  %v3235_v45 = vld [vmem:[#allocation46_spill] sm:$0xff]  ;;  %v3236_v46 = vld [vmem:[#allocation45_spill] sm:$0xff] }
  0x96   :  { %1576 = vmatpush1.bf16.msra.mxu1 %v3206_v47  ;;  %1768 = vmatpush1.bf16.msra.mxu0 %v3207_v60  ;;  %v3237_v47 = vpack.c.bf16 %v3235_v45, %v3236_v46  ;;  %v3239_v60 = vld [vmem:[#allocation49_spill] sm:$0xff] }
  0x97   :  { %1578 = vmatprep.subr.bf16.mxu1 %v3209_v19  ;;  %1770 = vmatprep.subr.bf16.mxu0 %v3210_v59  ;;  %v3241_v19 = vpack.c.bf16 %v3239_v60, %v3240_v18  ;;  %v3244_v59 = vld [vmem:[#allocation50_spill] sm:$0xff] }
  0x9a   :  { %1580 = vmatpush1.bf16.msra.mxu1 %v3213_v44  ;;  %1772 = vmatpush1.bf16.msra.mxu0 %v3214_v55  ;;  %v3247_v44 = vld [vmem:[#allocation58_spill] sm:$0xff]  ;;  %v3248_v55 = vld [vmem:[#allocation57_spill] sm:$0xff] }
  0x9b   :  { %1582 = vmatprep.subr.bf16.mxu1 %v3217_v39  ;;  %1774 = vmatprep.subr.bf16.mxu0 %v3218_v1  ;;  %v3249_v42 = vpack.c.bf16 %v3247_v44, %v3248_v55  ;;  %v3251_v39 = vpack.c.bf16 %v3172_v8, %v3171_v12  ;;  %v3256_v1 = vld [vmem:[#allocation65_spill] sm:$0xff]  ;;  %v3257_v12 = vld [vmem:[#allocation68_spill] sm:$0xff]  ;;  %v3258_v8 = vpack.c.bf16 %v3180_v16, %v3179_v57 }
  0x9c   :  { %v3265_v16 = vld [vmem:[#allocation80_spill] sm:$0xff] }
  0x9e   :  { %1584 = vmatpush1.bf16.msra.mxu1 %v3220_v29  ;;  %1776 = vmatpush1.bf16.msra.mxu0 %v3221_v49 }
  0x9f   :  { %1586 = vmatprep.subr.bf16.mxu1 %v3224_v48  ;;  %1778 = vmatprep.subr.bf16.mxu0 %v3225_v30 }
  0xa2   :  { %1588 = vmatpush1.bf16.msra.mxu1 %v3227_v0  ;;  %1780 = vmatpush1.bf16.msra.mxu0 %v3228_v56 }
  0xa3   :  { %1590 = vmatprep.subr.bf16.mxu1 %v3229_v5  ;;  %1782 = vmatprep.subr.bf16.mxu0 %v3230_v27 }
  0xa6   :  { %1592 = vmatpush1.bf16.msra.mxu1 %v3233_v37  ;;  %1784 = vmatpush1.bf16.msra.mxu0 %v3234_v11 }
  0xa7   :  { %1594 = vmatprep.subr.bf16.mxu1 %v3237_v47  ;;  %1786 = vmatprep.subr.bf16.mxu0 %v3238_v43 }
  0xaa   :  { %1596 = vmatpush1.bf16.msra.mxu1 %v3241_v19  ;;  %1788 = vmatpush1.bf16.msra.mxu0 %v3242_v62 }
  0xab   :  { %1598 = vmatprep.subr.bf16.mxu1 %v3243_v25  ;;  %1790 = vmatprep.subr.bf16.mxu0 %v3244_v59 }
  0xae   :  { %1600 = vmatpush1.bf16.msra.mxu1 %v3245_v34  ;;  %1792 = vmatpush1.bf16.msra.mxu0 %v3246_v17 }
  0xaf   :  { %1602 = vmatprep.subr.bf16.mxu1 %v3249_v42  ;;  %1794 = vmatprep.subr.bf16.mxu0 %v3250_v23 }
  0xb2   :  { %1604 = vmatpush1.bf16.msra.mxu1 %v3251_v39  ;;  %1796 = vmatpush1.bf16.msra.mxu0 %v3252_v3 }
  0xb3   :  { %1606 = vmatprep.subr.bf16.mxu1 %v3253_v52  ;;  %1798 = vmatprep.subr.bf16.mxu0 %v3254_v35 }
  0xb6   :  { %1608 = vmatpush1.bf16.msra.mxu1 %v3255_v40  ;;  %1800 = vmatpush1.bf16.msra.mxu0 %v3256_v1 }
  0xb7   :  { %1610 = vmatprep.subr.bf16.mxu1 %v1609_v32  ;;  %1802 = vmatprep.subr.bf16.mxu0 %v3257_v12  ;;  %v3264_v32 = vpack.c.bf16 %v3140_v9, %v3139_v54  ;;  %v3271_v9 = vld [vmem:[#allocation90_spill] sm:$0xff]  ;;  %v3272_v54 = vld [vmem:[#allocation88_spill] sm:$0xff] }
  0xba   :  { %1612 = vmatpush1.bf16.msra.mxu1 %v3258_v8  ;;  %1804 = vmatpush1.bf16.msra.mxu0 %v3259_v36 }
  0xbb   :  { %1614 = vmatprep.subr.bf16.mxu1 %v3260_v26  ;;  %1806 = vmatprep.subr.bf16.mxu0 %v3261_v14 }
  0xbe   :  { %1616 = vmatpush1.bf16.msra.mxu1 %v3262_v63  ;;  %1808 = vmatpush1.bf16.msra.mxu0 %v3263_v51 }
  0xbf   :  { %1618 = vmatprep.subr.bf16.mxu1 %v3264_v32  ;;  %1810 = vmatprep.subr.bf16.mxu0 %v3265_v16 }
  0xc2   :  { %1620 = vmatpush1.bf16.msra.mxu1 %v3266_v28  ;;  %1812 = vmatpush1.bf16.msra.mxu0 %v3267_v53 }
  0xc3   :  { %1622 = vmatprep.subr.bf16.mxu1 %v3268_v58  ;;  %1814 = vmatprep.subr.bf16.mxu0 %v3269_v61 }
  0xc6   :  { %1624 = vmatpush1.bf16.msra.mxu1 %v3270_v24  ;;  %1816 = vmatpush1.bf16.msra.mxu0 %v3271_v9 }
  0xc9   :  { %838 = vmatmul.mubr.f32.vlgmr.msra.gmra.mrb[0].mxu1 %v3272_v54  ;;  %1411 = vmatmul.mubr.f32.vlgmr.msra.gmra.mrb[0].mxu0 %v3194_v15 }
  0xca   :  { %845 = vmatprep.mubr.f32.mxu1 %v3273_v31  ;;  %1417 = vmatprep.mubr.f32.mxu0 %v2569_v50 }
  0xcd   :  { %848 = vmatmul.mubr.f32.gmra.mrb[2].mxu1 %v3274_v22  ;;  %1419 = vmatmul.mubr.f32.gmra.mrb[2].mxu0 %v2592_v21 }
 0x19c   :  { %v839_v20 = vpop.f32.mrb[0].mxu1  ;;  %v1412_v7 = vpop.f32.mrb[0].mxu0 }
 0x19d   :  { %v1817_v57 = vadd.f32 %v1412_v7, %v839_v20  ;;  %v841_v6 = vpop.f32.mrb[1].mxu1  ;;  %v1414_v38 = vpop.f32.mrb[1].mxu0 }
 0x19e   :  { %v1818_v10 = vadd.f32 %v1414_v38, %v841_v6 }
 0x19f   :  { %1425 = vst [vmem:[%s2882_s2] sm:$0xff] %v1817_v57 }
 0x1a0   :  { %1426 = vst [vmem:[%s2882_s2 + $0x8] sm:$0xff] %v1818_v10  ;;  %v849_v15 = vpop.f32.mrb[2].mxu1  ;;  %v1420_v50 = vpop.f32.mrb[2].mxu0 }
 0x1a1   :  { %v1819_v29 = vadd.f32 %v1420_v50, %v849_v15  ;;  %v851_v49 = vpop.f32.mrb[3].mxu1  ;;  %v1422_v2 = vpop.f32.mrb[3].mxu0 }
 0x1a2   :  { %v1820_v21 = vadd.f32 %v1422_v2, %v851_v49 }
 0x1a3   :  { %1427 = vst [vmem:[%s2882_s2 + $0x10] sm:$0xff] %v1819_v29 }
 0x1a4   :  { %1428 = vst [vmem:[%s2882_s2 + $0x18] sm:$0xff] %v1820_v21 }

// kernel: dabn_forward.3
= control target key start
LH: loop header
LB: loop body
LE: loop exit
PB: predicated region body
PF: predicated region fallthrough
CT: control target
= control target key end

     0   :  { %v20082_v2 = vmov 1966171168   ;;  %v58_v4 = vlaneseq  ;;  %vm264_vm0 = vcmask 130048   ;;  %vm8418_vm1 = vcmask 1041409   ;;  %s22460_s1 = inlined_call_operand.vmem [shape: f32[16,16], index: 1, kind: input, shape index: {}]   ;;  %s22461_s0 = inlined_call_operand.vmem [shape: f32[16,16,16], index: 0, kind: input, shape index: {}]   ;;  %s22462_s2 = inlined_call_operand.vmem [shape: f32[256,256], index: 2, kind: input, shape index: {}]   ;;  %s22463_s3 = inlined_call_operand.vmem [shape: f32[16,256], index: 3, kind: output, shape index: {}]  }
   0x1   :  { %v14_v0 = vld [vmem:[%s22460_s1] sm:$0xff]  ;;  %v56_v3 = vunpack.c.l.s4 %v20082_v2  ;;  %v21_v13 = vld [vmem:[%s22461_s0 + $0x8] sm:$0xff]  ;;  %v22_v35 = vld [vmem:[%s22461_s0 + $0x10] sm:$0xff]  ;;  %vm8421_vm2 = vcmask 1042434   ;;  %vm8424_vm3 = vcmask 1043459   ;;  %vm8427_vm4 = vcmask 1044484  }
   0x2   :  { %v16_v1 = vmul.f32 1.442695, %v14_v0  ;;  %v59_v6 = vshrl.u32 %v58_v4, 7  ;;  %v20_v12 = vld [vmem:[%s22461_s0] sm:$0xff]  ;;  %v23_v36 = vld [vmem:[%s22461_s0 + $0x18] sm:$0xff]  ;;  %v25_v58 = vld [vmem:[%s22461_s0 + $0x28] sm:$0xff] }
   0x3   :  { %v57_v5 = vunpack.c.0.s8 %v56_v3  ;;  %v24_v57 = vld [vmem:[%s22461_s0 + $0x20] sm:$0xff]  ;;  %vm8430_vm5 = vcmask 1045509   ;;  %vm8433_vm6 = vcmask 1046534   ;;  %vm8436_vm7 = vcmask 1047559  }
   0x4   :  { %20078 = vpow2.f32 %v16_v1  ;;  %v20113_v10 = vsub.s32 0, %v59_v6 }
   0x5   :  { %v20107_v7 = vsub.s32 %v57_v5, %v59_v6 }
   0xe   :  { %v20109_v8 = vpop.eup %20078 }
   0xf   :  { %v61_v9 = vrot.slane %v20109_v8, %v20107_v7 }
  0x11   :  { %v20116_v11 = vrot.slane %v61_v9, %v20107_v7  ;;  %v69_v32 = vcombine.high %v61_v9, %v61_v9 }
  0x13   :  { %v155_v14 = vrot.slane %v20116_v11, %v20113_v10  ;;  %v20129_v33 = vrot.slane %v69_v32, %v20107_v7  ;;  %v99_v55 = vcombine.high %v20116_v11, %v20116_v11 }
  0x15   :  { %v232_v15 = vmul.f32 %v155_v14, %v20_v12  ;;  %v233_v16 = vmul.f32 %v155_v14, %v21_v13  ;;  %v159_v34 = vrot.slane %v20129_v33, %v20113_v10  ;;  %v163_v56 = vrot.slane %v99_v55, %v20113_v10 }
  0x17   :  { %v266_v17 = vsel %vm264_vm0, %v232_v15, 0  ;;  %v269_v18 = vsel %vm264_vm0, %v233_v16, 0  ;;  %v234_v37 = vmul.f32 %v159_v34, %v22_v35  ;;  %v235_v38 = vmul.f32 %v159_v34, %v23_v36 }
  0x18   :  { %v272_v19 = vand.u32 4294901760, %v266_v17  ;;  %v275_v20 = vand.u32 4294901760, %v269_v18  ;;  %v236_v59 = vmul.f32 %v163_v56, %v24_v57  ;;  %v237_v60 = vmul.f32 %v163_v56, %v25_v58 }
  0x19   :  { %v774_v40 = vsel %vm264_vm0, %v234_v37, 0  ;;  %v777_v41 = vsel %vm264_vm0, %v235_v38, 0  ;;  %v101_v16 = vcombine.high %v20129_v33, %v20129_v33  ;;  %v54_v37 = vcombine.high %v20109_v8, %v20109_v8  ;;  %v29_v8 = vld [vmem:[%s22461_s0 + $0x48] sm:$0xff] }
  0x1a   :  { %v18768_v21 = vpack.c.bf16 %v275_v20, %v272_v19  ;;  %v339_v22 = vsub.f32 %v266_v17, %v272_v19  ;;  %v349_v23 = vsub.f32 %v269_v18, %v275_v20  ;;  %v780_v42 = vand.u32 4294901760, %v774_v40  ;;  %v26_v18 = vld [vmem:[%s22461_s0 + $0x30] sm:$0xff] }
  0x1b   :  { %v20141_v43 = vand.u32 4294901760, %v777_v41  ;;  %v1282_v62 = vsel %vm264_vm0, %v236_v59, 0  ;;  %v1285_v63 = vsel %vm264_vm0, %v237_v60, 0  ;;  %v167_v17 = vrot.slane %v101_v16, %v20113_v10 }
  0x1c   :  { %18769 = vmatprep.subr.bf16.mxu1 %v18768_v21  ;;  %v340_v24 = vand.u32 4294901760, %v339_v22  ;;  %v350_v25 = vand.u32 4294901760, %v349_v23  ;;  %v18776_v31 = vpack.c.bf16 %v349_v23, %v339_v22  ;;  %v847_v44 = vsub.f32 %v774_v40, %v780_v42 }
  0x1d   :  { %18771 = vmatpush3.bf16.xpose.msra.mxu1 %v18768_v21  ;;  %v857_v45 = vsub.f32 %v777_v41, %v20141_v43  ;;  %v18792_v48 = vpack.c.bf16 %v20141_v43, %v780_v42  ;;  %v1288_v0 = vand.u32 4294901760, %v1282_v62  ;;  %v20157_v1 = vand.u32 4294901760, %v1285_v63 }
  0x1e   :  { %v341_v26 = vsub.f32 %v339_v22, %v340_v24  ;;  %v351_v27 = vsub.f32 %v349_v23, %v350_v25  ;;  %v18784_v39 = vpack.c.bf16 %v350_v25, %v340_v24  ;;  %v848_v46 = vand.u32 4294901760, %v847_v44 }
  0x1f   :  { %v858_v47 = vand.u32 4294901760, %v857_v45  ;;  %v18800_v54 = vpack.c.bf16 %v857_v45, %v847_v44  ;;  %v1355_v2 = vsub.f32 %v1282_v62, %v1288_v0  ;;  %v1365_v3 = vsub.f32 %v1285_v63, %v20157_v1 }
  0x20   :  { %v342_v28 = vand.u32 4294901760, %v341_v26  ;;  %v352_v29 = vand.u32 4294901760, %v351_v27  ;;  %v849_v49 = vsub.f32 %v847_v44, %v848_v46  ;;  %v18816_v6 = vpack.c.bf16 %v20157_v1, %v1288_v0 }
  0x21   :  { %v859_v50 = vsub.f32 %v857_v45, %v858_v47  ;;  %v18808_v61 = vpack.c.bf16 %v858_v47, %v848_v46  ;;  %v1356_v4 = vand.u32 4294901760, %v1355_v2  ;;  %v1366_v5 = vand.u32 4294901760, %v1365_v3 }
  0x22   :  { %18100 = vmatprep.mubr.f32.mxu1 %v342_v28  ;;  %v18772_v30 = vpack.c.bf16 %v352_v29, %v342_v28  ;;  %v850_v51 = vand.u32 4294901760, %v849_v49  ;;  %v18824_v15 = vpack.c.bf16 %v1365_v3, %v1355_v2 }
  0x23   :  { %v860_v52 = vand.u32 4294901760, %v859_v50  ;;  %v1357_v9 = vsub.f32 %v1355_v2, %v1356_v4  ;;  %v1367_v11 = vsub.f32 %v1365_v3, %v1366_v5 }
  0x24   :  { %18101 = vmatmul.mubr.f32.vlgmr.msra.gmra.mrb[0].mxu1 %v352_v29  ;;  %18773 = vmatprep.subr.bf16.mxu1 %v18772_v30 }
  0x25   :  { %18775 = vmatpush3.bf16.xpose.msra.mxu1 %v18772_v30  ;;  %18107 = vmatprep.mubr.f32.mxu1 %v272_v19  ;;  %v18796_v53 = vpack.c.bf16 %v860_v52, %v850_v51  ;;  %v1358_v12 = vand.u32 4294901760, %v1357_v9  ;;  %v1368_v13 = vand.u32 4294901760, %v1367_v11 }
  0x26   :  { %18777 = vmatprep.subr.bf16.mxu1 %v18776_v31 }
  0x27   :  { %v18820_v14 = vpack.c.bf16 %v1368_v13, %v1358_v12 }
  0x2c   :  { %18108 = vmatmul.mubr.f32.vlgmr.msra.gmra.mrb[0].mxu1 %v275_v20 }
  0x2d   :  { %18779 = vmatpush3.bf16.xpose.msra.mxu1 %v18776_v31  ;;  %18114 = vmatprep.mubr.f32.mxu1 %v339_v22  ;;  %v18832_v22 = vpack.c.bf16 %v1366_v5, %v1356_v4 }
  0x2e   :  { %18781 = vmatprep.subr.bf16.mxu1 %v18768_v21 }
  0x34   :  { %18115 = vmatmul.mubr.f32.vlgmr.msra.gmra.mrb[0].mxu1 %v349_v23 }
  0x35   :  { %18783 = vmatpush3.bf16.xpose.msra.mxu1 %v18768_v21  ;;  %18121 = vmatprep.mubr.f32.mxu1 %v340_v24 }
  0x36   :  { %18785 = vmatprep.subr.bf16.mxu1 %v18784_v39 }
  0x3c   :  { %18122 = vmatmul.mubr.f32.vlgmr.msra.gmra.mrb[0].mxu1 %v350_v25 }
  0x3d   :  { %18787 = vmatpush3.bf16.xpose.msra.mxu1 %v18784_v39  ;;  %18128 = vmatprep.mubr.f32.mxu1 %v272_v19  ;;  %v68_v39 = vrot.slane %v54_v37, %v20107_v7 }
  0x3e   :  { %18789 = vmatprep.subr.bf16.mxu1 %v18768_v21 }
  0x3f   :  { %v20185_v40 = vrot.slane %v68_v39, %v20107_v7 }
  0x41   :  { %v171_v41 = vrot.slane %v20185_v40, %v20113_v10 }
  0x44   :  { %18129 = vmatmul.mubr.f32.vlgmr.msra.gmra.mrb[0].mxu1 %v275_v20 }
  0x45   :  { %18791 = vmatpush3.bf16.xpose.msra.mxu1 %v18768_v21  ;;  %18135 = vmatprep.mubr.f32.mxu1 %v272_v19  ;;  %v27_v19 = vld [vmem:[%s22461_s0 + $0x38] sm:$0xff] }
  0x46   :  { %18793 = vmatprep.subr.bf16.mxu1 %v18792_v48  ;;  %v239_v21 = vmul.f32 %v167_v17, %v27_v19 }
  0x48   :  { %v1793_v24 = vsel %vm264_vm0, %v239_v21, 0 }
  0x49   :  { %v20175_v26 = vand.u32 4294901760, %v1793_v24 }
  0x4b   :  { %v1873_v28 = vsub.f32 %v1793_v24, %v20175_v26 }
  0x4c   :  { %18136 = vmatmul.mubr.f32.vlgmr.msra.gmra.mrb[0].mxu1 %v275_v20  ;;  %v238_v20 = vmul.f32 %v167_v17, %v26_v18 }
  0x4d   :  { %18795 = vmatpush3.bf16.xpose.msra.mxu1 %v18792_v48  ;;  %18142 = vmatprep.mubr.f32.mxu1 %v850_v51  ;;  %v1874_v30 = vand.u32 4294901760, %v1873_v28 }
  0x4e   :  { %18797 = vmatprep.subr.bf16.mxu1 %v18796_v53  ;;  %v1790_v23 = vsel %vm264_vm0, %v238_v20, 0 }
  0x4f   :  { %v1796_v25 = vand.u32 4294901760, %v1790_v23  ;;  %v1875_v33 = vsub.f32 %v1873_v28, %v1874_v30 }
  0x51   :  { %v1863_v27 = vsub.f32 %v1790_v23, %v1796_v25  ;;  %v18840_v31 = vpack.c.bf16 %v20175_v26, %v1796_v25  ;;  %v1876_v35 = vand.u32 4294901760, %v1875_v33  ;;  %v100_v23 = vcombine.high %v20185_v40, %v20185_v40 }
  0x53   :  { %v1864_v29 = vand.u32 4294901760, %v1863_v27  ;;  %v18848_v38 = vpack.c.bf16 %v1873_v28, %v1863_v27  ;;  %v179_v24 = vrot.slane %v100_v23, %v20113_v10 }
  0x54   :  { %18143 = vmatmul.mubr.f32.vlgmr.msra.gmra.mrb[2].mxu1 %v860_v52 }
  0x55   :  { %18799 = vmatpush3.bf16.xpose.msra.mxu1 %v18796_v53  ;;  %18149 = vmatprep.mubr.f32.mxu1 %v780_v42  ;;  %v1865_v32 = vsub.f32 %v1863_v27, %v1864_v29 }
  0x56   :  { %18801 = vmatprep.subr.bf16.mxu1 %v18800_v54 }
  0x57   :  { %v1866_v34 = vand.u32 4294901760, %v1865_v32 }
  0x59   :  { %v18844_v36 = vpack.c.bf16 %v1876_v35, %v1866_v34 }
  0x5c   :  { %18150 = vmatmul.mubr.f32.vlgmr.msra.gmra.mrb[2].mxu1 %v20141_v43 }
  0x5d   :  { %18803 = vmatpush3.bf16.xpose.msra.mxu1 %v18800_v54  ;;  %18156 = vmatprep.mubr.f32.mxu1 %v847_v44  ;;  %v241_v44 = vmul.f32 %v171_v41, %v29_v8 }
  0x5e   :  { %18805 = vmatprep.subr.bf16.mxu1 %v18792_v48 }
  0x64   :  { %18157 = vmatmul.mubr.f32.vlgmr.msra.gmra.mrb[2].mxu1 %v857_v45  ;;  %v18856_v45 = vpack.c.bf16 %v1874_v30, %v1864_v29 }
  0x65   :  { %18807 = vmatpush3.bf16.xpose.msra.mxu1 %v18792_v48  ;;  %18163 = vmatprep.mubr.f32.mxu1 %v848_v46 }
  0x66   :  { %18809 = vmatprep.subr.bf16.mxu1 %v18808_v61 }
  0x6c   :  { %18164 = vmatmul.mubr.f32.vlgmr.msra.gmra.mrb[2].mxu1 %v858_v47  ;;  %v2301_v47 = vsel %vm264_vm0, %v241_v44, 0 }
  0x6d   :  { %18811 = vmatpush3.bf16.xpose.msra.mxu1 %v18808_v61  ;;  %18170 = vmatprep.mubr.f32.mxu1 %v780_v42  ;;  %v20198_v49 = vand.u32 4294901760, %v2301_v47  ;;  %v70_v61 = vcombine.high %v68_v39, %v68_v39 }
  0x6e   :  { %18813 = vmatprep.subr.bf16.mxu1 %v18792_v48 }
  0x6f   :  { %v2381_v51 = vsub.f32 %v2301_v47, %v20198_v49  ;;  %v20205_v62 = vrot.slane %v70_v61, %v20107_v7 }
  0x71   :  { %v2382_v53 = vand.u32 4294901760, %v2381_v51  ;;  %v175_v63 = vrot.slane %v20205_v62, %v20113_v10 }
  0x73   :  { %v2383_v56 = vsub.f32 %v2381_v51, %v2382_v53 }
  0x74   :  { %18171 = vmatmul.mubr.f32.vlgmr.msra.gmra.mrb[2].mxu1 %v20141_v43 }
  0x75   :  { %18815 = vmatpush3.bf16.xpose.msra.mxu1 %v18792_v48  ;;  %18177 = vmatprep.mubr.f32.mxu1 %v780_v42  ;;  %v28_v42 = vld [vmem:[%s22461_s0 + $0x40] sm:$0xff]  ;;  %v2384_v58 = vand.u32 4294901760, %v2383_v56 }
  0x76   :  { %18817 = vmatprep.subr.bf16.mxu1 %v18816_v6 }
  0x7c   :  { %18178 = vmatmul.mubr.f32.vlgmr.msra.gmra.mrb[2].mxu1 %v20141_v43  ;;  %v240_v43 = vmul.f32 %v171_v41, %v28_v42 }
  0x7d   :  { %18819 = vmatpush3.bf16.xpose.msra.mxu1 %v18816_v6  ;;  %18184 = vmatprep.mubr.f32.mxu1 %v1358_v12 }
  0x7e   :  { %18821 = vmatprep.subr.bf16.mxu1 %v18820_v14  ;;  %v2298_v46 = vsel %vm264_vm0, %v240_v43, 0 }
  0x7f   :  { %v2304_v48 = vand.u32 4294901760, %v2298_v46 }
  0x81   :  { %v2371_v50 = vsub.f32 %v2298_v46, %v2304_v48  ;;  %v18864_v54 = vpack.c.bf16 %v20198_v49, %v2304_v48 }
  0x83   :  { %v2372_v52 = vand.u32 4294901760, %v2371_v50  ;;  %v18872_v60 = vpack.c.bf16 %v2381_v51, %v2371_v50 }
  0x84   :  { %18185 = vmatmul.mubr.f32.vlgmr.msra.gmra.mrb[4].mxu1 %v1368_v13 }
  0x85   :  { %18823 = vmatpush3.bf16.xpose.msra.mxu1 %v18820_v14  ;;  %18191 = vmatprep.mubr.f32.mxu1 %v1288_v0  ;;  %v2373_v55 = vsub.f32 %v2371_v50, %v2372_v52 }
  0x86   :  { %18825 = vmatprep.subr.bf16.mxu1 %v18824_v15 }
  0x87   :  { %v2374_v57 = vand.u32 4294901760, %v2373_v55 }
  0x89   :  { %v18868_v59 = vpack.c.bf16 %v2384_v58, %v2374_v57 }
  0x8c   :  { %18192 = vmatmul.mubr.f32.vlgmr.msra.gmra.mrb[4].mxu1 %v20157_v1 }
  0x8d   :  { %18827 = vmatpush3.bf16.xpose.msra.mxu1 %v18824_v15  ;;  %18198 = vmatprep.mubr.f32.mxu1 %v1355_v2 }
  0x8e   :  { %18829 = vmatprep.subr.bf16.mxu1 %v18816_v6 }
  0x94   :  { %18199 = vmatmul.mubr.f32.vlgmr.msra.gmra.mrb[4].mxu1 %v1365_v3 }
  0x95   :  { %18831 = vmatpush3.bf16.xpose.msra.mxu1 %v18816_v6  ;;  %18205 = vmatprep.mubr.f32.mxu1 %v1356_v4  ;;  %v18880_v4 = vpack.c.bf16 %v2382_v53, %v2372_v52 }
  0x96   :  { %18833 = vmatprep.subr.bf16.mxu1 %v18832_v22 }
  0x9c   :  { %18206 = vmatmul.mubr.f32.vlgmr.msra.gmra.mrb[4].mxu1 %v1366_v5 }
  0x9d   :  { %18835 = vmatpush3.bf16.xpose.msra.mxu1 %v18832_v22  ;;  %18212 = vmatprep.mubr.f32.mxu1 %v1288_v0 }
  0x9e   :  { %18837 = vmatprep.subr.bf16.mxu1 %v18816_v6 }
  0xa4   :  { %18213 = vmatmul.mubr.f32.vlgmr.msra.gmra.mrb[4].mxu1 %v20157_v1 }
  0xa5   :  { %18839 = vmatpush3.bf16.xpose.msra.mxu1 %v18816_v6  ;;  %18219 = vmatprep.mubr.f32.mxu1 %v1288_v0  ;;  %v30_v0 = vld [vmem:[%s22461_s0 + $0x50] sm:$0xff] }
  0xa6   :  { %18841 = vmatprep.subr.bf16.mxu1 %v18840_v31  ;;  %v242_v2 = vmul.f32 %v175_v63, %v30_v0 }
  0xa8   :  { %v2806_v5 = vsel %vm264_vm0, %v242_v2, 0 }
  0xa9   :  { %v2812_v9 = vand.u32 4294901760, %v2806_v5 }
  0xab   :  { %v2879_v12 = vsub.f32 %v2806_v5, %v2812_v9 }
  0xac   :  { %18220 = vmatmul.mubr.f32.vlgmr.msra.gmra.mrb[4].mxu1 %v20157_v1  ;;  %v31_v1 = vld [vmem:[%s22461_s0 + $0x58] sm:$0xff] }
  0xad   :  { %18843 = vmatpush3.bf16.xpose.msra.mxu1 %v18840_v31  ;;  %18226 = vmatprep.mubr.f32.mxu1 %v1866_v34  ;;  %v243_v3 = vmul.f32 %v175_v63, %v31_v1  ;;  %v2880_v14 = vand.u32 4294901760, %v2879_v12 }
  0xae   :  { %18845 = vmatprep.subr.bf16.mxu1 %v18844_v36 }
  0xaf   :  { %v2809_v6 = vsel %vm264_vm0, %v243_v3, 0  ;;  %v2881_v17 = vsub.f32 %v2879_v12, %v2880_v14 }
  0xb0   :  { %v20218_v11 = vand.u32 4294901760, %v2809_v6 }
  0xb1   :  { %v2882_v19 = vand.u32 4294901760, %v2881_v17 }
  0xb2   :  { %v2889_v13 = vsub.f32 %v2809_v6, %v20218_v11  ;;  %v18888_v16 = vpack.c.bf16 %v20218_v11, %v2812_v9 }
  0xb4   :  { %18227 = vmatmul.mubr.f32.vlgmr.msra.gmra.mrb[6].mxu1 %v1876_v35  ;;  %v2890_v15 = vand.u32 4294901760, %v2889_v13  ;;  %v18896_v22 = vpack.c.bf16 %v2889_v13, %v2879_v12 }
  0xb5   :  { %18847 = vmatpush3.bf16.xpose.msra.mxu1 %v18844_v36  ;;  %18233 = vmatprep.mubr.f32.mxu1 %v1796_v25 }
  0xb6   :  { %18849 = vmatprep.subr.bf16.mxu1 %v18848_v38  ;;  %v2891_v18 = vsub.f32 %v2889_v13, %v2890_v15 }
  0xb8   :  { %v2892_v20 = vand.u32 4294901760, %v2891_v18 }
  0xba   :  { %v18892_v21 = vpack.c.bf16 %v2892_v20, %v2882_v19 }
  0xbc   :  { %18234 = vmatmul.mubr.f32.vlgmr.msra.gmra.mrb[6].mxu1 %v20175_v26 }
  0xbd   :  { %18851 = vmatpush3.bf16.xpose.msra.mxu1 %v18848_v38  ;;  %18240 = vmatprep.mubr.f32.mxu1 %v1863_v27 }
  0xbe   :  { %18853 = vmatprep.subr.bf16.mxu1 %v18840_v31 }
  0xc4   :  { %18241 = vmatmul.mubr.f32.vlgmr.msra.gmra.mrb[6].mxu1 %v1873_v28 }
  0xc5   :  { %18855 = vmatpush3.bf16.xpose.msra.mxu1 %v18840_v31  ;;  %18247 = vmatprep.mubr.f32.mxu1 %v1864_v29 }
  0xc6   :  { %18857 = vmatprep.subr.bf16.mxu1 %v18856_v45 }
  0xcc   :  { %18248 = vmatmul.mubr.f32.vlgmr.msra.gmra.mrb[6].mxu1 %v1874_v30 }
  0xcd   :  { %18859 = vmatpush3.bf16.xpose.msra.mxu1 %v18856_v45  ;;  %18254 = vmatprep.mubr.f32.mxu1 %v1796_v25  ;;  %v102_v45 = vcombine.high %v20205_v62, %v20205_v62 }
  0xce   :  { %18861 = vmatprep.subr.bf16.mxu1 %v18840_v31 }
  0xcf   :  { %v183_v46 = vrot.slane %v102_v45, %v20113_v10  ;;  %v15_v45 = vld [vmem:[%s22460_s1 + $0x8] sm:$0xff] }
  0xd4   :  { %18255 = vmatmul.mubr.f32.vlgmr.msra.gmra.mrb[6].mxu1 %v20175_v26 }
  0xd5   :  { %18863 = vmatpush3.bf16.xpose.msra.mxu1 %v18840_v31  ;;  %18261 = vmatprep.mubr.f32.mxu1 %v1796_v25  ;;  %v32_v25 = vld [vmem:[%s22461_s0 + $0x60] sm:$0xff]  ;;  %v18904_v31 = vpack.c.bf16 %v2890_v15, %v2880_v14 }
  0xd6   :  { %18865 = vmatprep.subr.bf16.mxu1 %v18864_v54  ;;  %v244_v28 = vmul.f32 %v179_v24, %v32_v25 }
  0xd8   :  { %v3314_v32 = vsel %vm264_vm0, %v244_v28, 0 }
  0xd9   :  { %v20240_v34 = vand.u32 4294901760, %v3314_v32 }
  0xdb   :  { %v3387_v36 = vsub.f32 %v3314_v32, %v20240_v34 }
  0xdc   :  { %18262 = vmatmul.mubr.f32.vlgmr.msra.gmra.mrb[6].mxu1 %v20175_v26  ;;  %v33_v26 = vld [vmem:[%s22461_s0 + $0x68] sm:$0xff] }
  0xdd   :  { %18867 = vmatpush3.bf16.xpose.msra.mxu1 %v18864_v54  ;;  %18268 = vmatprep.mubr.f32.mxu1 %v2374_v57  ;;  %v245_v29 = vmul.f32 %v179_v24, %v33_v26  ;;  %v20248_v38 = vand.u32 4294901760, %v3387_v36 }
  0xde   :  { %18869 = vmatprep.subr.bf16.mxu1 %v18868_v59 }
  0xdf   :  { %v3317_v33 = vsel %vm264_vm0, %v245_v29, 0  ;;  %v3389_v41 = vsub.f32 %v3387_v36, %v20248_v38 }
  0xe0   :  { %v20242_v35 = vand.u32 4294901760, %v3317_v33 }
  0xe1   :  { %v3390_v8 = vand.u32 4294901760, %v3389_v41 }
  0xe2   :  { %v20246_v37 = vsub.f32 %v3317_v33, %v20242_v35  ;;  %v20255_v40 = vpack.c.bf16 %v20242_v35, %v20240_v34 }
  0xe4   :  { %18269 = vmatmul.mubr.f32.vlgmr.msra.gmra.mrb[8].mxu1 %v2384_v58  ;;  %v20251_v39 = vand.u32 4294901760, %v20246_v37  ;;  %v18920_v47 = vpack.c.bf16 %v20246_v37, %v3387_v36 }
  0xe5   :  { %18871 = vmatpush3.bf16.xpose.msra.mxu1 %v18868_v59  ;;  %18275 = vmatprep.mubr.f32.mxu1 %v2304_v48 }
  0xe6   :  { %18873 = vmatprep.subr.bf16.mxu1 %v18872_v60  ;;  %v3399_v42 = vsub.f32 %v20246_v37, %v20251_v39 }
  0xe8   :  { %v3400_v43 = vand.u32 4294901760, %v3399_v42 }
  0xea   :  { %v18916_v44 = vpack.c.bf16 %v3400_v43, %v3390_v8 }
  0xec   :  { %18276 = vmatmul.mubr.f32.vlgmr.msra.gmra.mrb[8].mxu1 %v20198_v49 }
  0xed   :  { %18875 = vmatpush3.bf16.xpose.msra.mxu1 %v18872_v60  ;;  %18282 = vmatprep.mubr.f32.mxu1 %v2371_v50 }
  0xee   :  { %18877 = vmatprep.subr.bf16.mxu1 %v18864_v54 }
  0xf4   :  { %18283 = vmatmul.mubr.f32.vlgmr.msra.gmra.mrb[8].mxu1 %v2381_v51 }
  0xf5   :  { %18879 = vmatpush3.bf16.xpose.msra.mxu1 %v18864_v54  ;;  %18289 = vmatprep.mubr.f32.mxu1 %v2372_v52 }
  0xf6   :  { %18881 = vmatprep.subr.bf16.mxu1 %v18880_v4 }
  0xfc   :  { %18290 = vmatmul.mubr.f32.vlgmr.msra.gmra.mrb[8].mxu1 %v2382_v53 }
  0xfd   :  { %18883 = vmatpush3.bf16.xpose.msra.mxu1 %v18880_v4  ;;  %18296 = vmatprep.mubr.f32.mxu1 %v2304_v48 }
  0xfe   :  { %18885 = vmatprep.subr.bf16.mxu1 %v18864_v54 }
 0x104   :  { %18297 = vmatmul.mubr.f32.vlgmr.msra.gmra.mrb[8].mxu1 %v20198_v49 }
 0x105   :  { %18887 = vmatpush3.bf16.xpose.msra.mxu1 %v18864_v54  ;;  %18303 = vmatprep.mubr.f32.mxu1 %v2304_v48  ;;  %v34_v48 = vld [vmem:[%s22461_s0 + $0x70] sm:$0xff]  ;;  %v18928_v54 = vpack.c.bf16 %v20251_v39, %v20248_v38 }
 0x106   :  { %18889 = vmatprep.subr.bf16.mxu1 %v18888_v16  ;;  %v246_v50 = vmul.f32 %v183_v46, %v34_v48  ;;  %v18_v48 = vmul.f32 1.442695, %v15_v45 }
 0x108   :  { %v3822_v52 = vsel %vm264_vm0, %v246_v50, 0  ;;  %20080 = vpow2.f32 %v18_v48 }
 0x109   :  { %v20282_v57 = vand.u32 4294901760, %v3822_v52 }
 0x10c   :  { %18304 = vmatmul.mubr.f32.vlgmr.msra.gmra.mrb[8].mxu1 %v20198_v49  ;;  %v35_v49 = vld [vmem:[%s22461_s0 + $0x78] sm:$0xff] }
 0x10d   :  { %18891 = vmatpush3.bf16.xpose.msra.mxu1 %v18888_v16  ;;  %18310 = vmatprep.mubr.f32.mxu1 %v2882_v19  ;;  %v247_v51 = vmul.f32 %v183_v46, %v35_v49  ;;  %v3895_v46 = vsub.f32 %v3822_v52, %v20282_v57 }
 0x10e   :  { %18893 = vmatprep.subr.bf16.mxu1 %v18892_v21 }
 0x10f   :  { %v3825_v53 = vsel %vm264_vm0, %v247_v51, 0  ;;  %v20360_v49 = vand.u32 4294901760, %v3895_v46 }
 0x110   :  { %v20284_v58 = vand.u32 4294901760, %v3825_v53 }
 0x111   :  { %v3897_v52 = vsub.f32 %v3895_v46, %v20360_v49 }
 0x112   :  { %v20367_v51 = vpack.c.bf16 %v20284_v58, %v20282_v57 }
 0x114   :  { %18311 = vmatmul.mubr.f32.vlgmr.msra.gmra.mrb[10].mxu1 %v2892_v20 }
 0x115   :  { %18895 = vmatpush3.bf16.xpose.msra.mxu1 %v18892_v21  ;;  %18317 = vmatprep.mubr.f32.mxu1 %v2812_v9 }
 0x116   :  { %18897 = vmatprep.subr.bf16.mxu1 %v18896_v22 }
 0x11c   :  { %18318 = vmatmul.mubr.f32.vlgmr.msra.gmra.mrb[10].mxu1 %v20218_v11 }
 0x11d   :  { %18899 = vmatpush3.bf16.xpose.msra.mxu1 %v18896_v22  ;;  %18324 = vmatprep.mubr.f32.mxu1 %v2879_v12 }
 0x11e   :  { %18901 = vmatprep.subr.bf16.mxu1 %v18888_v16 }
 0x11f   :  { %v20234_v27 = vpop.f32.mrb[0].mxu1 }
 0x120   :  { %v20236_v30 = vpop.f32.mrb[1].mxu1  ;;  %v13648_v55 = vrot.slane %v20234_v27, 1  ;;  %v14228_v56 = vrot.slane %v20234_v27, 2  ;;  %v14808_v59 = vrot.slane %v20234_v27, 3  ;;  %v15388_v60 = vrot.slane %v20234_v27, 4 }
 0x121   :  { %v15968_v61 = vrot.slane %v20234_v27, 5  ;;  %v16548_v62 = vrot.slane %v20234_v27, 6  ;;  %v17128_v63 = vrot.slane %v20234_v27, 7  ;;  %v8417_v0 = vrot.slane %v20236_v30, 1 }
 0x122   :  { %v9572_v1 = vrot.slane %v20236_v30, 2  ;;  %v10152_v2 = vrot.slane %v20236_v30, 3  ;;  %v10732_v3 = vrot.slane %v20236_v30, 4  ;;  %v11312_v4 = vrot.slane %v20236_v30, 5 }
 0x123   :  { %v11892_v5 = vrot.slane %v20236_v30, 6  ;;  %v12472_v6 = vrot.slane %v20236_v30, 7 }
 0x124   :  { %18325 = vmatmul.mubr.f32.vlgmr.msra.gmra.mrb[10].mxu1 %v2889_v13 }
 0x125   :  { %18903 = vmatpush3.bf16.xpose.msra.mxu1 %v18888_v16  ;;  %18331 = vmatprep.mubr.f32.mxu1 %v2880_v14 }
 0x126   :  { %18905 = vmatprep.subr.bf16.mxu1 %v18904_v31 }
 0x12c   :  { %18332 = vmatmul.mubr.f32.vlgmr.msra.gmra.mrb[10].mxu1 %v2890_v15 }
 0x12d   :  { %18907 = vmatpush3.bf16.xpose.msra.mxu1 %v18904_v31  ;;  %18338 = vmatprep.mubr.f32.mxu1 %v2812_v9 }
 0x12e   :  { %18909 = vmatprep.subr.bf16.mxu1 %v18888_v16 }
 0x134   :  { %18339 = vmatmul.mubr.f32.vlgmr.msra.gmra.mrb[10].mxu1 %v20218_v11 }
 0x135   :  { %18911 = vmatpush3.bf16.xpose.msra.mxu1 %v18888_v16  ;;  %18345 = vmatprep.mubr.f32.mxu1 %v2812_v9 }
 0x136   :  { %18913 = vmatprep.subr.bf16.mxu1 %v20255_v40 }
 0x13c   :  { %18346 = vmatmul.mubr.f32.vlgmr.msra.gmra.mrb[10].mxu1 %v20218_v11 }
 0x13d   :  { %18915 = vmatpush3.bf16.xpose.msra.mxu1 %v20255_v40  ;;  %18352 = vmatprep.mubr.f32.mxu1 %v3390_v8 }
 0x13e   :  { %18917 = vmatprep.subr.bf16.mxu1 %v18916_v44 }
 0x144   :  { %18353 = vmatmul.mubr.f32.vlgmr.msra.gmra.mrb[12].mxu1 %v3400_v43 }
 0x145   :  { %18919 = vmatpush3.bf16.xpose.msra.mxu1 %v18916_v44  ;;  %18359 = vmatprep.mubr.f32.mxu1 %v20240_v34 }
 0x146   :  { %18921 = vmatprep.subr.bf16.mxu1 %v18920_v47 }
 0x14c   :  { %18360 = vmatmul.mubr.f32.vlgmr.msra.gmra.mrb[12].mxu1 %v20242_v35 }
 0x14d   :  { %18923 = vmatpush3.bf16.xpose.msra.mxu1 %v18920_v47  ;;  %18366 = vmatprep.mubr.f32.mxu1 %v3387_v36  ;;  %v20355_v47 = vsub.f32 %v3825_v53, %v20284_v58  ;;  %v3898_v53 = vand.u32 4294901760, %v3897_v52 }
 0x14e   :  { %18925 = vmatprep.subr.bf16.mxu1 %v20255_v40 }
 0x14f   :  { %v18179_v9 = vpop.f32.mrb[2].mxu1  ;;  %v20363_v50 = vand.u32 4294901760, %v20355_v47 }
 0x150   :  { %v13068_v11 = vrot.slane %v18179_v9, 7  ;;  %v20300_v12 = vsel %vm8418_vm1, %v18179_v9, %v13648_v55  ;;  %v14229_v13 = vrot.slane %v18179_v9, 1  ;;  %v14809_v14 = vrot.slane %v18179_v9, 2  ;;  %v1271_v15 = vpop.f32.mrb[3].mxu1  ;;  %v20376_v55 = vpop.eup %20080 }
 0x151   :  { %v15389_v16 = vrot.slane %v18179_v9, 3  ;;  %v15969_v17 = vrot.slane %v18179_v9, 4  ;;  %v16549_v18 = vrot.slane %v18179_v9, 5  ;;  %v17129_v19 = vrot.slane %v18179_v9, 6 }
 0x152   :  { %v20304_v20 = vsel %vm8418_vm1, %v13068_v11, %v20234_v27  ;;  %v20307_v21 = vsel %vm8418_vm1, %v1271_v15, %v8417_v0  ;;  %v8996_v22 = vrot.slane %v1271_v15, 7  ;;  %v9573_v23 = vrot.slane %v1271_v15, 1 }
 0x153   :  { %v20310_v24 = vsel %vm8418_vm1, %v15389_v16, %v15388_v60  ;;  %v20313_v25 = vsel %vm8418_vm1, %v15969_v17, %v15968_v61  ;;  %v20316_v26 = vsel %vm8418_vm1, %v16549_v18, %v16548_v62  ;;  %v20319_v28 = vsel %vm8418_vm1, %v17129_v19, %v17128_v63  ;;  %v37_v61 = vld [vmem:[%s22461_s0 + $0x88] sm:$0xff] }
 0x154   :  { %v20323_v27 = vsel %vm8418_vm1, %v8996_v22, %v20236_v30  ;;  %v10153_v29 = vrot.slane %v1271_v15, 2  ;;  %v10733_v31 = vrot.slane %v1271_v15, 3  ;;  %v11313_v32 = vrot.slane %v1271_v15, 4  ;;  %18367 = vmatmul.mubr.f32.vlgmr.msra.gmra.mrb[12].mxu1 %v20246_v37 }
 0x155   :  { %v11893_v33 = vrot.slane %v1271_v15, 5  ;;  %v12473_v36 = vrot.slane %v1271_v15, 6  ;;  %18927 = vmatpush3.bf16.xpose.msra.mxu1 %v20255_v40  ;;  %18373 = vmatprep.mubr.f32.mxu1 %v20248_v38  ;;  %v14230_v41 = vsel %vm8418_vm1, %v14229_v13, %v14228_v56  ;;  %v20330_v42 = vsel %vm8418_vm1, %v9573_v23, %v9572_v1 }
 0x156   :  { %v20333_v8 = vsel %vm8418_vm1, %v10733_v31, %v10732_v3  ;;  %v20336_v30 = vsel %vm8418_vm1, %v11313_v32, %v11312_v4  ;;  %18929 = vmatprep.subr.bf16.mxu1 %v18928_v54  ;;  %v20339_v37 = vsel %vm8418_vm1, %v14809_v14, %v14808_v59  ;;  %v20342_v43 = vsel %vm8418_vm1, %v10153_v29, %v10152_v2 }
 0x157   :  { %v20345_v38 = vsel %vm8418_vm1, %v11893_v33, %v11892_v5  ;;  %v20348_v44 = vsel %vm8418_vm1, %v12473_v36, %v12472_v6  ;;  %v20381_v59 = vrot.slane %v20376_v55, %v20107_v7  ;;  %v18952_v2 = vpack.c.bf16 %v20363_v50, %v20360_v49 }
 0x15c   :  { %18374 = vmatmul.mubr.f32.vlgmr.msra.gmra.mrb[12].mxu1 %v20251_v39  ;;  %v3907_v39 = vsub.f32 %v20355_v47, %v20363_v50 }
 0x15d   :  { %18931 = vmatpush3.bf16.xpose.msra.mxu1 %v18928_v54  ;;  %18380 = vmatprep.mubr.f32.mxu1 %v20240_v34 }
 0x15e   :  { %18933 = vmatprep.subr.bf16.mxu1 %v20255_v40  ;;  %v3908_v54 = vand.u32 4294901760, %v3907_v39 }
 0x160   :  { %v18940_v56 = vpack.c.bf16 %v3908_v54, %v3898_v53 }
 0x164   :  { %18381 = vmatmul.mubr.f32.vlgmr.msra.gmra.mrb[12].mxu1 %v20242_v35 }
 0x165   :  { %18935 = vmatpush3.bf16.xpose.msra.mxu1 %v20255_v40  ;;  %18387 = vmatprep.mubr.f32.mxu1 %v20240_v34  ;;  %v20386_v34 = vrot.slane %v20381_v59, %v20107_v7  ;;  %v18944_v40 = vpack.c.bf16 %v20355_v47, %v3895_v46 }
 0x166   :  { %18937 = vmatprep.subr.bf16.mxu1 %v20367_v51 }
 0x167   :  { %v187_v60 = vrot.slane %v20386_v34, %v20113_v10 }
 0x169   :  { %v249_v63 = vmul.f32 %v187_v60, %v37_v61 }
 0x16b   :  { %v4333_v3 = vsel %vm264_vm0, %v249_v63, 0 }
 0x16c   :  { %18388 = vmatmul.mubr.f32.vlgmr.msra.gmra.mrb[12].mxu1 %v20242_v35  ;;  %v36_v35 = vld [vmem:[%s22461_s0 + $0x80] sm:$0xff]  ;;  %v20450_v45 = vand.u32 4294901760, %v4333_v3 }
 0x16d   :  { %18939 = vmatpush3.bf16.xpose.msra.mxu1 %v20367_v51  ;;  %18394 = vmatprep.mubr.f32.mxu1 %v3898_v53  ;;  %v248_v62 = vmul.f32 %v187_v60, %v36_v35  ;;  %v118_v53 = vcombine.high %v20381_v59, %v20381_v59 }
 0x16e   :  { %18941 = vmatprep.subr.bf16.mxu1 %v18940_v56 }
 0x16f   :  { %v4330_v0 = vsel %vm264_vm0, %v248_v62, 0 }
 0x170   :  { %v20404_v4 = vand.u32 4294901760, %v4330_v0 }
 0x172   :  { %v4403_v48 = vsub.f32 %v4330_v0, %v20404_v4 }
 0x174   :  { %18395 = vmatmul.mubr.f32.vlgmr.msra.gmra.mrb[14].mxu1 %v3908_v54  ;;  %v20500_v54 = vrot.slane %v118_v53, %v20107_v7 }
 0x175   :  { %18943 = vmatpush3.bf16.xpose.msra.mxu1 %v18940_v56  ;;  %18401 = vmatprep.mubr.f32.mxu1 %v20282_v57  ;;  %v39_v56 = vld [vmem:[%s22461_s0 + $0x98] sm:$0xff] }
 0x176   :  { %18945 = vmatprep.subr.bf16.mxu1 %v18944_v40 }
 0x17c   :  { %18402 = vmatmul.mubr.f32.vlgmr.msra.gmra.mrb[14].mxu1 %v20284_v58 }
 0x17d   :  { %18947 = vmatpush3.bf16.xpose.msra.mxu1 %v18944_v40  ;;  %18408 = vmatprep.mubr.f32.mxu1 %v3895_v46 }
 0x17e   :  { %18949 = vmatprep.subr.bf16.mxu1 %v20367_v51 }
 0x17f   :  { %v18221_v1 = vpop.f32.mrb[4].mxu1 }
 0x180   :  { %v13070_v5 = vrot.slane %v18221_v1, 6  ;;  %v13650_v6 = vrot.slane %v18221_v1, 7  ;;  %v20407_v9 = vsel %vm8421_vm2, %v18221_v1, %v14230_v41  ;;  %v14811_v11 = vrot.slane %v18221_v1, 1  ;;  %v1779_v13 = vpop.f32.mrb[5].mxu1 }
 0x181   :  { %v15391_v14 = vrot.slane %v18221_v1, 2  ;;  %v15971_v15 = vrot.slane %v18221_v1, 3  ;;  %v16551_v16 = vrot.slane %v18221_v1, 4  ;;  %v17131_v17 = vrot.slane %v18221_v1, 5 }
 0x182   :  { %v20411_v18 = vsel %vm8421_vm2, %v13070_v5, %v20304_v20  ;;  %v20415_v19 = vsel %vm8421_vm2, %v13650_v6, %v20300_v12  ;;  %v8420_v22 = vrot.slane %v1779_v13, 7  ;;  %v8998_v23 = vrot.slane %v1779_v13, 6 }
 0x183   :  { %v20419_v29 = vsel %vm8421_vm2, %v15971_v15, %v20313_v25  ;;  %v20423_v31 = vsel %vm8421_vm2, %v16551_v16, %v20316_v26  ;;  %v20427_v32 = vsel %vm8421_vm2, %v17131_v17, %v20319_v28  ;;  %v20431_v20 = vsel %vm8421_vm2, %v1779_v13, %v20330_v42 }
 0x184   :  { %v20435_v12 = vsel %vm8421_vm2, %v8998_v23, %v20323_v27  ;;  %v10155_v33 = vrot.slane %v1779_v13, 1  ;;  %v10735_v36 = vrot.slane %v1779_v13, 2  ;;  %v11315_v25 = vrot.slane %v1779_v13, 3  ;;  %18409 = vmatmul.mubr.f32.vlgmr.msra.gmra.mrb[14].mxu1 %v20355_v47 }
 0x185   :  { %v11895_v41 = vrot.slane %v1779_v13, 4  ;;  %v12475_v26 = vrot.slane %v1779_v13, 5  ;;  %18951 = vmatpush3.bf16.xpose.msra.mxu1 %v20367_v51  ;;  %18415 = vmatprep.mubr.f32.mxu1 %v20360_v49  ;;  %v14812_v28 = vsel %vm8421_vm2, %v14811_v11, %v20339_v37  ;;  %v20444_v42 = vsel %vm8421_vm2, %v15391_v14, %v20310_v24 }
 0x186   :  { %v20448_v27 = vsel %vm8421_vm2, %v11315_v25, %v20336_v30  ;;  %18953 = vmatprep.subr.bf16.mxu1 %v18952_v2  ;;  %v20454_v46 = vsel %vm8421_vm2, %v10155_v33, %v20342_v43  ;;  %v20458_v47 = vsel %vm8421_vm2, %v10735_v36, %v20333_v8  ;;  %v20470_v30 = vsel %vm8421_vm2, %v8420_v22, %v20307_v21 }
 0x187   :  { %v20462_v37 = vsel %vm8421_vm2, %v11895_v41, %v20345_v38  ;;  %v20466_v24 = vsel %vm8421_vm2, %v12475_v26, %v20348_v44  ;;  %v20474_v43 = vsub.f32 %v4333_v3, %v20450_v45  ;;  %v20479_v8 = vand.u32 4294901760, %v4403_v48 }
 0x188   :  { %v20486_v21 = vpack.c.bf16 %v20450_v45, %v20404_v4 }
 0x189   :  { %v20482_v38 = vand.u32 4294901760, %v20474_v43  ;;  %v4405_v44 = vsub.f32 %v4403_v48, %v20479_v8 }
 0x18b   :  { %v4415_v49 = vsub.f32 %v20474_v43, %v20482_v38  ;;  %v18976_v62 = vpack.c.bf16 %v20482_v38, %v20479_v8 }
 0x18c   :  { %18416 = vmatmul.mubr.f32.vlgmr.msra.gmra.mrb[14].mxu1 %v20363_v50  ;;  %v4406_v50 = vand.u32 4294901760, %v4405_v44 }
 0x18d   :  { %18955 = vmatpush3.bf16.xpose.msra.mxu1 %v18952_v2  ;;  %18422 = vmatprep.mubr.f32.mxu1 %v20282_v57  ;;  %v4416_v52 = vand.u32 4294901760, %v4415_v49 }
 0x18e   :  { %18957 = vmatprep.subr.bf16.mxu1 %v20367_v51 }
 0x18f   :  { %v18964_v39 = vpack.c.bf16 %v4416_v52, %v4406_v50 }
 0x194   :  { %18423 = vmatmul.mubr.f32.vlgmr.msra.gmra.mrb[14].mxu1 %v20284_v58 }
 0x195   :  { %18959 = vmatpush3.bf16.xpose.msra.mxu1 %v20367_v51  ;;  %18429 = vmatprep.mubr.f32.mxu1 %v20282_v57  ;;  %v18968_v51 = vpack.c.bf16 %v20474_v43, %v4403_v48  ;;  %v191_v57 = vrot.slane %v20500_v54, %v20113_v10 }
 0x196   :  { %18961 = vmatprep.subr.bf16.mxu1 %v20486_v21 }
 0x197   :  { %v251_v40 = vmul.f32 %v191_v57, %v39_v56 }
 0x199   :  { %v4841_v35 = vsel %vm264_vm0, %v251_v40, 0 }
 0x19a   :  { %v20520_v0 = vand.u32 4294901760, %v4841_v35 }
 0x19c   :  { %18430 = vmatmul.mubr.f32.vlgmr.msra.gmra.mrb[14].mxu1 %v20284_v58  ;;  %v38_v58 = vld [vmem:[%s22461_s0 + $0x90] sm:$0xff] }
 0x19d   :  { %18963 = vmatpush3.bf16.xpose.msra.mxu1 %v20486_v21  ;;  %18436 = vmatprep.mubr.f32.mxu1 %v4406_v50  ;;  %v250_v59 = vmul.f32 %v191_v57, %v38_v58 }
 0x19e   :  { %18965 = vmatprep.subr.bf16.mxu1 %v18964_v39 }
 0x19f   :  { %v4838_v60 = vsel %vm264_vm0, %v250_v59, 0 }
 0x1a0   :  { %v20518_v63 = vand.u32 4294901760, %v4838_v60 }
 0x1a4   :  { %18437 = vmatmul.mubr.f32.vlgmr.msra.gmra.mrb[16].mxu1 %v4416_v52  ;;  %v148_v52 = vcombine.high %v20386_v34, %v20386_v34 }
 0x1a5   :  { %18967 = vmatpush3.bf16.xpose.msra.mxu1 %v18964_v39  ;;  %18443 = vmatprep.mubr.f32.mxu1 %v20404_v4 }
 0x1a6   :  { %18969 = vmatprep.subr.bf16.mxu1 %v18968_v51 }
 0x1ac   :  { %18444 = vmatmul.mubr.f32.vlgmr.msra.gmra.mrb[16].mxu1 %v20450_v45 }
 0x1ad   :  { %18971 = vmatpush3.bf16.xpose.msra.mxu1 %v18968_v51  ;;  %18450 = vmatprep.mubr.f32.mxu1 %v4403_v48 }
 0x1ae   :  { %18973 = vmatprep.subr.bf16.mxu1 %v20486_v21 }
 0x1af   :  { %v18263_v61 = vpop.f32.mrb[6].mxu1 }
 0x1b0   :  { %v13072_v1 = vrot.slane %v18263_v61, 5  ;;  %v13652_v2 = vrot.slane %v18263_v61, 6  ;;  %v14232_v3 = vrot.slane %v18263_v61, 7  ;;  %v20523_v5 = vsel %vm8424_vm3, %v18263_v61, %v14812_v28  ;;  %v2287_v6 = vpop.f32.mrb[7].mxu1 }
 0x1b1   :  { %v15393_v11 = vrot.slane %v18263_v61, 1  ;;  %v15973_v13 = vrot.slane %v18263_v61, 2  ;;  %v16553_v14 = vrot.slane %v18263_v61, 3  ;;  %v17133_v15 = vrot.slane %v18263_v61, 4 }
 0x1b2   :  { %v20527_v16 = vsel %vm8424_vm3, %v13072_v1, %v20411_v18  ;;  %v20531_v17 = vsel %vm8424_vm3, %v13652_v2, %v20415_v19  ;;  %v20535_v22 = vsel %vm8424_vm3, %v14232_v3, %v20407_v9  ;;  %v8423_v23 = vrot.slane %v2287_v6, 6 }
 0x1b3   :  { %v20539_v33 = vsel %vm8424_vm3, %v16553_v14, %v20423_v31  ;;  %v20543_v36 = vsel %vm8424_vm3, %v17133_v15, %v20427_v32  ;;  %v9000_v25 = vrot.slane %v2287_v6, 5  ;;  %v9576_v18 = vrot.slane %v2287_v6, 7 }
 0x1b4   :  { %v20547_v41 = vsel %vm8424_vm3, %v2287_v6, %v20454_v46  ;;  %v10737_v19 = vrot.slane %v2287_v6, 1  ;;  %v11317_v26 = vrot.slane %v2287_v6, 2  ;;  %v11897_v28 = vrot.slane %v2287_v6, 3  ;;  %18451 = vmatmul.mubr.f32.vlgmr.msra.gmra.mrb[16].mxu1 %v20474_v43 }
 0x1b5   :  { %v20552_v9 = vsel %vm8424_vm3, %v9000_v25, %v20435_v12  ;;  %v20556_v31 = vsel %vm8424_vm3, %v9576_v18, %v20431_v20  ;;  %v12477_v32 = vrot.slane %v2287_v6, 4  ;;  %18975 = vmatpush3.bf16.xpose.msra.mxu1 %v20486_v21  ;;  %18457 = vmatprep.mubr.f32.mxu1 %v20479_v8  ;;  %v15394_v46 = vsel %vm8424_vm3, %v15393_v11, %v20444_v42 }
 0x1b6   :  { %v20564_v48 = vsel %vm8424_vm3, %v11897_v28, %v20462_v37  ;;  %18977 = vmatprep.subr.bf16.mxu1 %v18976_v62  ;;  %v20568_v12 = vsel %vm8424_vm3, %v10737_v19, %v20458_v47  ;;  %v20572_v20 = vsel %vm8424_vm3, %v15973_v13, %v20419_v29  ;;  %v20576_v43 = vsel %vm8424_vm3, %v11317_v26, %v20448_v27 }
 0x1b7   :  { %v20580_v42 = vsel %vm8424_vm3, %v12477_v32, %v20466_v24  ;;  %v20584_v37 = vsel %vm8424_vm3, %v8423_v23, %v20470_v30  ;;  %v4911_v8 = vsub.f32 %v4838_v60, %v20518_v63  ;;  %v20588_v47 = vsub.f32 %v4841_v35, %v20520_v0 }
 0x1b8   :  { %v20600_v24 = vpack.c.bf16 %v20520_v0, %v20518_v63 }
 0x1b9   :  { %v20593_v29 = vand.u32 4294901760, %v4911_v8  ;;  %v20596_v27 = vand.u32 4294901760, %v20588_v47  ;;  %v18992_v39 = vpack.c.bf16 %v20588_v47, %v4911_v8 }
 0x1bb   :  { %v4913_v30 = vsub.f32 %v4911_v8, %v20593_v29  ;;  %v4923_v44 = vsub.f32 %v20588_v47, %v20596_v27  ;;  %v19000_v56 = vpack.c.bf16 %v20596_v27, %v20593_v29 }
 0x1bc   :  { %18458 = vmatmul.mubr.f32.vlgmr.msra.gmra.mrb[16].mxu1 %v20482_v38 }
 0x1bd   :  { %18979 = vmatpush3.bf16.xpose.msra.mxu1 %v18976_v62  ;;  %18464 = vmatprep.mubr.f32.mxu1 %v20404_v4  ;;  %v4914_v38 = vand.u32 4294901760, %v4913_v30  ;;  %v4924_v49 = vand.u32 4294901760, %v4923_v44  ;;  %v8398_v44 = vld [vmem:[%s22462_s2 + $0x28] sm:$0xff] }
 0x1be   :  { %18981 = vmatprep.subr.bf16.mxu1 %v20486_v21 }
 0x1bf   :  { %v18988_v50 = vpack.c.bf16 %v4924_v49, %v4914_v38 }
 0x1c4   :  { %18465 = vmatmul.mubr.f32.vlgmr.msra.gmra.mrb[16].mxu1 %v20450_v45 }
 0x1c5   :  { %18983 = vmatpush3.bf16.xpose.msra.mxu1 %v20486_v21  ;;  %18471 = vmatprep.mubr.f32.mxu1 %v20404_v4  ;;  %v195_v21 = vrot.slane %v148_v52, %v20113_v10  ;;  %v40_v4 = vld [vmem:[%s22461_s0 + $0xa0] sm:$0xff] }
 0x1c6   :  { %18985 = vmatprep.subr.bf16.mxu1 %v20600_v24 }
 0x1c7   :  { %v252_v53 = vmul.f32 %v195_v21, %v40_v4  ;;  %v8399_v4 = vld [vmem:[%s22462_s2 + $0x30] sm:$0xff] }
 0x1c9   :  { %v5346_v34 = vsel %vm264_vm0, %v252_v53, 0  ;;  %v8462_v53 = vand.u32 4294901760, %v8399_v4 }
 0x1ca   :  { %v20628_v59 = vand.u32 4294901760, %v5346_v34 }
 0x1cc   :  { %18472 = vmatmul.mubr.f32.vlgmr.msra.gmra.mrb[16].mxu1 %v20450_v45  ;;  %v41_v45 = vld [vmem:[%s22461_s0 + $0xa8] sm:$0xff] }
 0x1cd   :  { %18987 = vmatpush3.bf16.xpose.msra.mxu1 %v20600_v24  ;;  %18478 = vmatprep.mubr.f32.mxu1 %v4914_v38  ;;  %v253_v51 = vmul.f32 %v195_v21, %v41_v45  ;;  %v8400_v38 = vld [vmem:[%s22462_s2 + $0x38] sm:$0xff]  ;;  %v8397_v21 = vld [vmem:[%s22462_s2 + $0x20] sm:$0xff] }
 0x1ce   :  { %18989 = vmatprep.subr.bf16.mxu1 %v18988_v50  ;;  %v8458_v45 = vand.u32 4294901760, %v8397_v21 }
 0x1cf   :  { %v5349_v57 = vsel %vm264_vm0, %v253_v51, 0 }
 0x1d0   :  { %v20630_v40 = vand.u32 4294901760, %v5349_v57  ;;  %v20742_v51 = vpack.c.bf16 %v8462_v53, %v8458_v45 }
 0x1d4   :  { %18479 = vmatmul.mubr.f32.vlgmr.msra.gmra.mrb[18].mxu1 %v4924_v49  ;;  %v8456_v49 = vand.u32 4294901760, %v8398_v44 }
 0x1d5   :  { %18991 = vmatpush3.bf16.xpose.msra.mxu1 %v18988_v50  ;;  %18485 = vmatprep.mubr.f32.mxu1 %v20518_v63  ;;  %v8460_v50 = vand.u32 4294901760, %v8400_v38 }
 0x1d6   :  { %18993 = vmatprep.subr.bf16.mxu1 %v18992_v39 }
 0x1d7   :  { %v20727_v52 = vpack.c.bf16 %v8460_v50, %v8456_v49 }
 0x1d9   :  { %19153 = vmatprep.subr.bf16.mxu0 %v20727_v52 }
 0x1da   :  { %19155 = vmatpush1.bf16.msra.mxu0 %v20742_v51 }
 0x1dc   :  { %18486 = vmatmul.mubr.f32.vlgmr.msra.gmra.mrb[18].mxu1 %v20520_v0 }
 0x1dd   :  { %18995 = vmatpush3.bf16.xpose.msra.mxu1 %v18992_v39  ;;  %18492 = vmatprep.mubr.f32.mxu1 %v4911_v8  ;;  %v20729_v39 = vsub.f32 %v8398_v44, %v8456_v49 }
 0x1de   :  { %18997 = vmatprep.subr.bf16.mxu1 %v20600_v24 }
 0x1df   :  { %v18305_v58 = vpop.f32.mrb[8].mxu1 }
 0x1e0   :  { %v13074_v60 = vrot.slane %v18305_v58, 4  ;;  %v13654_v35 = vrot.slane %v18305_v58, 5  ;;  %v14234_v61 = vrot.slane %v18305_v58, 6  ;;  %v14814_v62 = vrot.slane %v18305_v58, 7  ;;  %v2795_v1 = vpop.f32.mrb[9].mxu1 }
 0x1e1   :  { %v20633_v2 = vsel %vm8427_vm4, %v18305_v58, %v15394_v46  ;;  %v15975_v3 = vrot.slane %v18305_v58, 1  ;;  %v16555_v6 = vrot.slane %v18305_v58, 2  ;;  %v17135_v11 = vrot.slane %v18305_v58, 3 }
 0x1e2   :  { %v20637_v13 = vsel %vm8427_vm4, %v13074_v60, %v20527_v16  ;;  %v20641_v14 = vsel %vm8427_vm4, %v13654_v35, %v20531_v17  ;;  %v20645_v15 = vsel %vm8427_vm4, %v14234_v61, %v20535_v22  ;;  %v20649_v23 = vsel %vm8427_vm4, %v14814_v62, %v20523_v5  ;;  %v42_v35 = vld [vmem:[%s22461_s0 + $0xb0] sm:$0xff]  ;;  %v43_v61 = vld [vmem:[%s22461_s0 + $0xb8] sm:$0xff] }
 0x1e3   :  { %v20653_v25 = vsel %vm8427_vm4, %v17135_v11, %v20543_v36  ;;  %v8426_v18 = vrot.slane %v2795_v1, 5  ;;  %v9002_v19 = vrot.slane %v2795_v1, 4  ;;  %v9578_v16 = vrot.slane %v2795_v1, 6 }
 0x1e4   :  { %v10158_v26 = vrot.slane %v2795_v1, 7  ;;  %v20657_v17 = vsel %vm8427_vm4, %v2795_v1, %v20568_v12  ;;  %v11319_v28 = vrot.slane %v2795_v1, 1  ;;  %v11899_v32 = vrot.slane %v2795_v1, 2  ;;  %18493 = vmatmul.mubr.f32.vlgmr.msra.gmra.mrb[18].mxu1 %v20588_v47 }
 0x1e5   :  { %v20662_v5 = vsel %vm8427_vm4, %v9002_v19, %v20552_v9  ;;  %v20666_v22 = vsel %vm8427_vm4, %v9578_v16, %v20556_v31  ;;  %v12479_v36 = vrot.slane %v2795_v1, 3  ;;  %18999 = vmatpush3.bf16.xpose.msra.mxu1 %v20600_v24  ;;  %18499 = vmatprep.mubr.f32.mxu1 %v20593_v29  ;;  %v20672_v46 = vsel %vm8427_vm4, %v15975_v3, %v20572_v20 }
 0x1e6   :  { %v20676_v12 = vsel %vm8427_vm4, %v10158_v26, %v20547_v41  ;;  %19001 = vmatprep.subr.bf16.mxu1 %v19000_v56  ;;  %v20680_v9 = vsel %vm8427_vm4, %v11319_v28, %v20576_v43  ;;  %v20684_v31 = vsel %vm8427_vm4, %v16555_v6, %v20539_v33  ;;  %v20688_v8 = vsel %vm8427_vm4, %v11899_v32, %v20564_v48 }
 0x1e7   :  { %v20692_v20 = vsel %vm8427_vm4, %v12479_v36, %v20580_v42  ;;  %v20696_v41 = vsel %vm8427_vm4, %v8426_v18, %v20584_v37  ;;  %v5419_v47 = vsub.f32 %v5346_v34, %v20628_v59  ;;  %v20700_v43 = vsub.f32 %v5349_v57, %v20630_v40 }
 0x1e8   :  { %v20712_v42 = vpack.c.bf16 %v20630_v40, %v20628_v59  ;;  %v20744_v34 = vsub.f32 %v8397_v21, %v8458_v45  ;;  %v20746_v57 = vsub.f32 %v8399_v4, %v8462_v53  ;;  %v22465_v58 = vmov 0.0  }
 0x1e9   :  { %v20705_v33 = vand.u32 4294901760, %v5419_v47  ;;  %v20708_v48 = vand.u32 4294901760, %v20700_v43  ;;  %8524 = vmatprep.mubr.f32.mxu0 %v22465_v58 }
 0x1eb   :  { %v5421_v37 = vsub.f32 %v5419_v47, %v20705_v33  ;;  %v5431_v29 = vsub.f32 %v20700_v43, %v20708_v48  ;;  %v19024_v11 = vpack.c.bf16 %v20708_v48, %v20705_v33 }
 0x1ec   :  { %18500 = vmatmul.mubr.f32.vlgmr.msra.gmra.mrb[18].mxu1 %v20596_v27 }
 0x1ed   :  { %19003 = vmatpush3.bf16.xpose.msra.mxu1 %v19000_v56  ;;  %18506 = vmatprep.mubr.f32.mxu1 %v20518_v63  ;;  %v5422_v27 = vand.u32 4294901760, %v5421_v37  ;;  %v5432_v30 = vand.u32 4294901760, %v5431_v29  ;;  %v19016_v56 = vpack.c.bf16 %v20700_v43, %v5419_v47 }
 0x1ee   :  { %19005 = vmatprep.subr.bf16.mxu1 %v20600_v24 }
 0x1f4   :  { %18507 = vmatmul.mubr.f32.vlgmr.msra.gmra.mrb[18].mxu1 %v20520_v0 }
 0x1f5   :  { %19007 = vmatpush3.bf16.xpose.msra.mxu1 %v20600_v24  ;;  %18513 = vmatprep.mubr.f32.mxu1 %v20518_v63  ;;  %v20731_v24 = vsub.f32 %v8400_v38, %v8460_v50  ;;  %v19012_v63 = vpack.c.bf16 %v5432_v30, %v5422_v27 }
 0x1f6   :  { %19009 = vmatprep.subr.bf16.mxu1 %v20712_v42 }
 0x1fc   :  { %18514 = vmatmul.mubr.f32.vlgmr.msra.gmra.mrb[18].mxu1 %v20520_v0  ;;  %v150_v0 = vcombine.high %v20500_v54, %v20500_v54 }
 0x1fd   :  { %19011 = vmatpush3.bf16.xpose.msra.mxu1 %v20712_v42  ;;  %18520 = vmatprep.mubr.f32.mxu1 %v5422_v27 }
 0x1fe   :  { %19013 = vmatprep.subr.bf16.mxu1 %v19012_v63  ;;  %v199_v60 = vrot.slane %v150_v0, %v20113_v10 }
 0x200   :  { %v254_v62 = vmul.f32 %v199_v60, %v42_v35  ;;  %v255_v1 = vmul.f32 %v199_v60, %v43_v61  ;;  %v103_v35 = vcombine.high %v20376_v55, %v20376_v55 }
 0x202   :  { %v5854_v18 = vsel %vm264_vm0, %v254_v62, 0  ;;  %v5857_v19 = vsel %vm264_vm0, %v255_v1, 0  ;;  %v20859_v61 = vrot.slane %v103_v35, %v20107_v7  ;;  %v45_v62 = vld [vmem:[%s22461_s0 + $0xc8] sm:$0xff] }
 0x203   :  { %v20800_v4 = vand.u32 4294901760, %v5857_v19 }
 0x204   :  { %18521 = vmatmul.mubr.f32.vlgmr.msra.gmra.mrb[20].mxu1 %v5432_v30 }
 0x205   :  { %19015 = vmatpush3.bf16.xpose.msra.mxu1 %v19012_v63  ;;  %18527 = vmatprep.mubr.f32.mxu1 %v20628_v59 }
 0x206   :  { %19017 = vmatprep.subr.bf16.mxu1 %v19016_v56 }
 0x20c   :  { %18528 = vmatmul.mubr.f32.vlgmr.msra.gmra.mrb[20].mxu1 %v20630_v40 }
 0x20d   :  { %19019 = vmatpush3.bf16.xpose.msra.mxu1 %v19016_v56  ;;  %18534 = vmatprep.mubr.f32.mxu1 %v5419_v47 }
 0x20e   :  { %19021 = vmatprep.subr.bf16.mxu1 %v20712_v42 }
 0x20f   :  { %v18347_v54 = vpop.f32.mrb[10].mxu1 }
 0x210   :  { %v13076_v3 = vrot.slane %v18347_v54, 3  ;;  %v3303_v6 = vpop.f32.mrb[11].mxu1  ;;  %v13656_v16 = vrot.slane %v18347_v54, 4  ;;  %v14236_v26 = vrot.slane %v18347_v54, 5  ;;  %v20769_v28 = vsel %vm8430_vm5, %v18347_v54, %v20672_v46 }
 0x211   :  { %v16557_v32 = vrot.slane %v18347_v54, 1  ;;  %v8429_v36 = vrot.slane %v3303_v6, 4  ;;  %v9004_v47 = vrot.slane %v3303_v6, 3  ;;  %v9580_v37 = vrot.slane %v3303_v6, 5 }
 0x212   :  { %v10160_v29 = vrot.slane %v3303_v6, 6  ;;  %v10740_v27 = vrot.slane %v3303_v6, 7  ;;  %v20773_v30 = vsel %vm8430_vm5, %v3303_v6, %v20680_v9  ;;  %v11901_v44 = vrot.slane %v3303_v6, 1 }
 0x213   :  { %v12481_v38 = vrot.slane %v3303_v6, 2  ;;  %v14816_v49 = vrot.slane %v18347_v54, 6  ;;  %v15396_v50 = vrot.slane %v18347_v54, 7  ;;  %v20778_v46 = vsel %vm8430_vm5, %v16557_v32, %v20684_v31 }
 0x214   :  { %18535 = vmatmul.mubr.f32.vlgmr.msra.gmra.mrb[20].mxu1 %v20700_v43  ;;  %v20782_v63 = vsel %vm8430_vm5, %v8429_v36, %v20696_v41  ;;  %v17137_v21 = vrot.slane %v18347_v54, 2  ;;  %v20788_v9 = vsel %vm8430_vm5, %v11901_v44, %v20688_v8  ;;  %v20792_v43 = vsel %vm8430_vm5, %v9004_v47, %v20662_v5 }
 0x215   :  { %19023 = vmatpush3.bf16.xpose.msra.mxu1 %v20712_v42  ;;  %18541 = vmatprep.mubr.f32.mxu1 %v20705_v33  ;;  %v20796_v31 = vsel %vm8430_vm5, %v9580_v37, %v20666_v22  ;;  %v20798_v41 = vand.u32 4294901760, %v5854_v18  ;;  %v20804_v33 = vsel %vm8430_vm5, %v10160_v29, %v20676_v12  ;;  %v20808_v8 = vsel %vm8430_vm5, %v10740_v27, %v20657_v17 }
 0x216   :  { %19025 = vmatprep.subr.bf16.mxu1 %v19024_v11  ;;  %v20812_v5 = vsel %vm8430_vm5, %v12481_v38, %v20692_v20  ;;  %v20816_v22 = vsel %vm8430_vm5, %v13076_v3, %v20637_v13  ;;  %v20820_v45 = vsel %vm8430_vm5, %v13656_v16, %v20641_v14  ;;  %v20824_v12 = vsel %vm8430_vm5, %v14236_v26, %v20645_v15 }
 0x217   :  { %v20828_v17 = vsel %vm8430_vm5, %v14816_v49, %v20649_v23  ;;  %v20832_v20 = vsel %vm8430_vm5, %v15396_v50, %v20633_v2  ;;  %v20836_v13 = vsel %vm8430_vm5, %v17137_v21, %v20653_v25  ;;  %v5927_v53 = vsub.f32 %v5854_v18, %v20798_v41 }
 0x218   :  { %v5937_v14 = vsub.f32 %v5857_v19, %v20800_v4  ;;  %v20847_v2 = vpack.c.bf16 %v20800_v4, %v20798_v41 }
 0x219   :  { %v5928_v15 = vand.u32 4294901760, %v5927_v53 }
 0x21a   :  { %v20843_v23 = vand.u32 4294901760, %v5937_v14 }
 0x21b   :  { %v5929_v25 = vsub.f32 %v5927_v53, %v5928_v15 }
 0x21c   :  { %18542 = vmatmul.mubr.f32.vlgmr.msra.gmra.mrb[20].mxu1 %v20708_v48  ;;  %v5939_v56 = vsub.f32 %v5937_v14, %v20843_v23  ;;  %v19048_v18 = vpack.c.bf16 %v20843_v23, %v5928_v15 }
 0x21d   :  { %19027 = vmatpush3.bf16.xpose.msra.mxu1 %v19024_v11  ;;  %18548 = vmatprep.mubr.f32.mxu1 %v20628_v59  ;;  %v5930_v48 = vand.u32 4294901760, %v5929_v25 }
 0x21e   :  { %19029 = vmatprep.subr.bf16.mxu1 %v20712_v42  ;;  %v5940_v0 = vand.u32 4294901760, %v5939_v56 }
 0x220   :  { %v19036_v60 = vpack.c.bf16 %v5940_v0, %v5930_v48 }
 0x224   :  { %18549 = vmatmul.mubr.f32.vlgmr.msra.gmra.mrb[20].mxu1 %v20630_v40 }
 0x225   :  { %19031 = vmatpush3.bf16.xpose.msra.mxu1 %v20712_v42  ;;  %18555 = vmatprep.mubr.f32.mxu1 %v20628_v59  ;;  %v19040_v42 = vpack.c.bf16 %v5937_v14, %v5927_v53  ;;  %v20863_v59 = vrot.slane %v20859_v61, %v20107_v7 }
 0x226   :  { %19033 = vmatprep.subr.bf16.mxu1 %v20847_v2 }
 0x227   :  { %v203_v55 = vrot.slane %v20863_v59, %v20113_v10 }
 0x229   :  { %v257_v54 = vmul.f32 %v203_v55, %v45_v62 }
 0x22b   :  { %v6365_v16 = vsel %vm264_vm0, %v257_v54, 0 }
 0x22c   :  { %18556 = vmatmul.mubr.f32.vlgmr.msra.gmra.mrb[20].mxu1 %v20630_v40  ;;  %v44_v40 = vld [vmem:[%s22461_s0 + $0xc0] sm:$0xff] }
 0x22d   :  { %19035 = vmatpush3.bf16.xpose.msra.mxu1 %v20847_v2  ;;  %18562 = vmatprep.mubr.f32.mxu1 %v5930_v48  ;;  %v256_v1 = vmul.f32 %v203_v55, %v44_v40 }
 0x22e   :  { %19037 = vmatprep.subr.bf16.mxu1 %v19036_v60 }
 0x22f   :  { %v6362_v19 = vsel %vm264_vm0, %v256_v1, 0  ;;  %v119_v1 = vcombine.high %v20859_v61, %v20859_v61  ;;  %v47_v61 = vld [vmem:[%s22461_s0 + $0xd8] sm:$0xff] }
 0x234   :  { %18563 = vmatmul.mubr.f32.vlgmr.msra.gmra.mrb[22].mxu1 %v5940_v0 }
 0x235   :  { %19039 = vmatpush3.bf16.xpose.msra.mxu1 %v19036_v60  ;;  %18569 = vmatprep.mubr.f32.mxu1 %v20798_v41 }
 0x236   :  { %19041 = vmatprep.subr.bf16.mxu1 %v19040_v42 }
 0x23c   :  { %18570 = vmatmul.mubr.f32.vlgmr.msra.gmra.mrb[22].mxu1 %v20800_v4 }
 0x23d   :  { %19043 = vmatpush3.bf16.xpose.msra.mxu1 %v19040_v42  ;;  %18576 = vmatprep.mubr.f32.mxu1 %v5927_v53 }
 0x23e   :  { %19045 = vmatprep.subr.bf16.mxu1 %v20847_v2 }
 0x23f   :  { %v18389_v3 = vpop.f32.mrb[12].mxu1 }
 0x240   :  { %v13078_v6 = vrot.slane %v18389_v3, 2  ;;  %v3811_v11 = vpop.f32.mrb[13].mxu1  ;;  %v13658_v26 = vrot.slane %v18389_v3, 3  ;;  %v14238_v32 = vrot.slane %v18389_v3, 4  ;;  %v14818_v36 = vrot.slane %v18389_v3, 5 }
 0x241   :  { %v20881_v47 = vsel %vm8433_vm6, %v18389_v3, %v20778_v46  ;;  %v9006_v37 = vrot.slane %v3811_v11, 2  ;;  %v9582_v29 = vrot.slane %v3811_v11, 4  ;;  %v10162_v27 = vrot.slane %v3811_v11, 5 }
 0x242   :  { %v10742_v44 = vrot.slane %v3811_v11, 6  ;;  %v11322_v38 = vrot.slane %v3811_v11, 7  ;;  %v20885_v49 = vsel %vm8433_vm6, %v3811_v11, %v20788_v9  ;;  %v12483_v50 = vrot.slane %v3811_v11, 1 }
 0x243   :  { %v8432_v21 = vrot.slane %v3811_v11, 3  ;;  %v15398_v53 = vrot.slane %v18389_v3, 6  ;;  %v15978_v25 = vrot.slane %v18389_v3, 7  ;;  %v20889_v56 = vsel %vm8433_vm6, %v9006_v37, %v20792_v43 }
 0x244   :  { %18577 = vmatmul.mubr.f32.vlgmr.msra.gmra.mrb[22].mxu1 %v5937_v14  ;;  %v20893_v46 = vsel %vm8433_vm6, %v9582_v29, %v20796_v31  ;;  %v17139_v48 = vrot.slane %v18389_v3, 1  ;;  %v20902_v0 = vsel %vm8433_vm6, %v10162_v27, %v20804_v33  ;;  %v20906_v43 = vsel %vm8433_vm6, %v10742_v44, %v20808_v8 }
 0x245   :  { %19047 = vmatpush3.bf16.xpose.msra.mxu1 %v20847_v2  ;;  %18583 = vmatprep.mubr.f32.mxu1 %v5928_v15  ;;  %v20898_v9 = vsel %vm8433_vm6, %v8432_v21, %v20782_v63  ;;  %v20908_v14 = vand.u32 4294901760, %v6362_v19  ;;  %v20910_v31 = vand.u32 4294901760, %v6365_v16  ;;  %v20914_v15 = vsel %vm8433_vm6, %v11322_v38, %v20773_v30 }
 0x246   :  { %19049 = vmatprep.subr.bf16.mxu1 %v19048_v18  ;;  %v20918_v63 = vsel %vm8433_vm6, %v12483_v50, %v20812_v5  ;;  %v20922_v33 = vsel %vm8433_vm6, %v13078_v6, %v20816_v22  ;;  %v20926_v8 = vsel %vm8433_vm6, %v13658_v26, %v20820_v45  ;;  %v20930_v60 = vsel %vm8433_vm6, %v14238_v32, %v20824_v12 }
 0x247   :  { %v20934_v30 = vsel %vm8433_vm6, %v14818_v36, %v20828_v17  ;;  %v20938_v5 = vsel %vm8433_vm6, %v15398_v53, %v20832_v20  ;;  %v20942_v22 = vsel %vm8433_vm6, %v15978_v25, %v20769_v28  ;;  %v20946_v45 = vsel %vm8433_vm6, %v17139_v48, %v20836_v13 }
 0x248   :  { %v6435_v35 = vsub.f32 %v6362_v19, %v20908_v14  ;;  %v6445_v12 = vsub.f32 %v6365_v16, %v20910_v31  ;;  %v20957_v28 = vpack.c.bf16 %v20910_v31, %v20908_v14 }
 0x24a   :  { %v6436_v17 = vand.u32 4294901760, %v6435_v35  ;;  %v20953_v20 = vand.u32 4294901760, %v6445_v12  ;;  %v19064_v62 = vpack.c.bf16 %v6445_v12, %v6435_v35 }
 0x24c   :  { %18584 = vmatmul.mubr.f32.vlgmr.msra.gmra.mrb[22].mxu1 %v20843_v23  ;;  %v6437_v13 = vsub.f32 %v6435_v35, %v6436_v17  ;;  %v6447_v42 = vsub.f32 %v6445_v12, %v20953_v20 }
 0x24d   :  { %19051 = vmatpush3.bf16.xpose.msra.mxu1 %v19048_v18  ;;  %18590 = vmatprep.mubr.f32.mxu1 %v20798_v41  ;;  %v19072_v18 = vpack.c.bf16 %v20953_v20, %v6436_v17 }
 0x24e   :  { %19053 = vmatprep.subr.bf16.mxu1 %v20847_v2  ;;  %v6438_v23 = vand.u32 4294901760, %v6437_v13  ;;  %v6448_v55 = vand.u32 4294901760, %v6447_v42 }
 0x250   :  { %v19060_v40 = vpack.c.bf16 %v6448_v55, %v6438_v23 }
 0x254   :  { %18591 = vmatmul.mubr.f32.vlgmr.msra.gmra.mrb[22].mxu1 %v20800_v4 }
 0x255   :  { %19055 = vmatpush3.bf16.xpose.msra.mxu1 %v20847_v2  ;;  %18597 = vmatprep.mubr.f32.mxu1 %v20798_v41  ;;  %v20970_v41 = vrot.slane %v119_v1, %v20107_v7 }
 0x256   :  { %19057 = vmatprep.subr.bf16.mxu1 %v20957_v28 }
 0x257   :  { %v207_v2 = vrot.slane %v20970_v41, %v20113_v10 }
 0x259   :  { %v259_v3 = vmul.f32 %v207_v2, %v47_v61 }
 0x25b   :  { %v6873_v29 = vsel %vm264_vm0, %v259_v3, 0 }
 0x25c   :  { %18598 = vmatmul.mubr.f32.vlgmr.msra.gmra.mrb[22].mxu1 %v20800_v4  ;;  %v46_v4 = vld [vmem:[%s22461_s0 + $0xd0] sm:$0xff] }
 0x25d   :  { %19059 = vmatpush3.bf16.xpose.msra.mxu1 %v20957_v28  ;;  %18604 = vmatprep.mubr.f32.mxu1 %v6438_v23  ;;  %v258_v54 = vmul.f32 %v207_v2, %v46_v4 }
 0x25e   :  { %19061 = vmatprep.subr.bf16.mxu1 %v19060_v40 }
 0x25f   :  { %v6870_v32 = vsel %vm264_vm0, %v258_v54, 0 }
 0x260   :  { %v21006_v53 = vand.u32 4294901760, %v6870_v32 }
 0x264   :  { %18605 = vmatmul.mubr.f32.vlgmr.msra.gmra.mrb[24].mxu1 %v6448_v55 }
 0x265   :  { %19063 = vmatpush3.bf16.xpose.msra.mxu1 %v19060_v40  ;;  %18611 = vmatprep.mubr.f32.mxu1 %v20908_v14 }
 0x266   :  { %19065 = vmatprep.subr.bf16.mxu1 %v19064_v62 }
 0x26c   :  { %18612 = vmatmul.mubr.f32.vlgmr.msra.gmra.mrb[24].mxu1 %v20910_v31 }
 0x26d   :  { %19067 = vmatpush3.bf16.xpose.msra.mxu1 %v19064_v62  ;;  %18618 = vmatprep.mubr.f32.mxu1 %v6435_v35  ;;  %v6943_v35 = vsub.f32 %v6870_v32, %v21006_v53 }
 0x26e   :  { %19069 = vmatprep.subr.bf16.mxu1 %v20957_v28 }
 0x26f   :  { %v20982_v7 = vpop.f32.mrb[14].mxu1  ;;  %v6944_v42 = vand.u32 4294901760, %v6943_v35 }
 0x270   :  { %v4319_v6 = vpop.f32.mrb[15].mxu1  ;;  %v13080_v13 = vrot.slane %v20982_v7, 1  ;;  %v13660_v23 = vrot.slane %v20982_v7, 2  ;;  %v14240_v55 = vrot.slane %v20982_v7, 3  ;;  %v14820_v1 = vrot.slane %v20982_v7, 4 }
 0x271   :  { %v9008_v11 = vrot.slane %v4319_v6, 1  ;;  %v9584_v19 = vrot.slane %v4319_v6, 3  ;;  %v10164_v16 = vrot.slane %v4319_v6, 4  ;;  %v10744_v26 = vrot.slane %v4319_v6, 5 }
 0x272   :  { %v11324_v36 = vrot.slane %v4319_v6, 6  ;;  %v8435_v37 = vrot.slane %v4319_v6, 2  ;;  %v11904_v25 = vrot.slane %v4319_v6, 7  ;;  %v21041_v40 = vsel %vm8436_vm7, %v4319_v6, %v20918_v63 }
 0x273   :  { %v20989_v27 = vsel %vm8436_vm7, %v9008_v11, %v20889_v56  ;;  %v20993_v44 = vsel %vm8436_vm7, %v9584_v19, %v20893_v46  ;;  %v20997_v38 = vsel %vm8436_vm7, %v10164_v16, %v20902_v0  ;;  %v21001_v50 = vsel %vm8436_vm7, %v10744_v26, %v20906_v43 }
 0x274   :  { %18619 = vmatmul.mubr.f32.vlgmr.msra.gmra.mrb[24].mxu1 %v6445_v12  ;;  %v8437_v21 = vsel %vm8436_vm7, %v8435_v37, %v20898_v9  ;;  %v21009_v46 = vand.u32 4294901760, %v6873_v29  ;;  %v21015_v0 = vsel %vm8436_vm7, %v11324_v36, %v20914_v15  ;;  %v21026_v12 = vsel %vm8436_vm7, %v11904_v25, %v20885_v49 }
 0x275   :  { %19071 = vmatpush3.bf16.xpose.msra.mxu1 %v20957_v28  ;;  %18625 = vmatprep.mubr.f32.mxu1 %v6436_v17  ;;  %v8452_v56 = vsel %vm264_vm0, %v8437_v21, 0  ;;  %v21045_v62 = vsel %vm8436_vm7, %v13080_v13, %v20922_v33  ;;  %v15400_v2 = vrot.slane %v20982_v7, 5  ;;  %v15980_v4 = vrot.slane %v20982_v7, 6 }
 0x276   :  { %19073 = vmatprep.subr.bf16.mxu1 %v19072_v18  ;;  %v21011_v48 = vand.u32 4294901760, %v8452_v56  ;;  %v21022_v9 = vsub.f32 %v6873_v29, %v21009_v46  ;;  %v19080_v61 = vpack.c.bf16 %v21009_v46, %v21006_v53  ;;  %v6945_v54 = vsub.f32 %v6943_v35, %v6944_v42 }
 0x277   :  { %v21056_v63 = vsel %vm8436_vm7, %v13660_v23, %v20926_v8  ;;  %v21060_v33 = vsel %vm8436_vm7, %v14240_v55, %v20930_v60  ;;  %v16560_v6 = vrot.slane %v20982_v7, 7  ;;  %v21068_v11 = vsel %vm8436_vm7, %v14820_v1, %v20934_v30 }
 0x278   :  { %v21018_v43 = vsub.f32 %v8452_v56, %v21011_v48  ;;  %v6954_v49 = vand.u32 4294901760, %v21022_v9  ;;  %v21072_v8 = vsel %vm8436_vm7, %v15400_v2, %v20938_v5  ;;  %v21076_v60 = vsel %vm8436_vm7, %v15980_v4, %v20942_v22  ;;  %v51_v4 = vld [vmem:[%s22461_s0 + $0xf8] sm:$0xff] }
 0x279   :  { %22467 = vst [vmem:[#allocation2_spill] sm:$0xff] %v21076_v60  ;;  %v21085_v30 = vsel %vm8436_vm7, %v20982_v7, %v20946_v45  ;;  %v19088_v5 = vpack.c.bf16 %v21022_v9, %v6943_v35  ;;  %v49_v45 = vld [vmem:[%s22461_s0 + $0xe8] sm:$0xff] }
 0x27a   :  { %v22464_v17 = vand.u32 4294901760, %v21018_v43  ;;  %v6955_v3 = vsub.f32 %v21022_v9, %v6954_v49  ;;  %22469 = vst [vmem:[#allocation4_spill] sm:$0xff] %v21085_v30  ;;  %v19096_v32 = vpack.c.bf16 %v6954_v49, %v6944_v42 }
 0x27c   :  { %18626 = vmatmul.mubr.f32.vlgmr.msra.gmra.mrb[24].mxu1 %v20953_v20  ;;  %v8528_v15 = vsub.f32 %v21018_v43, %v22464_v17  ;;  %v6956_v19 = vand.u32 4294901760, %v6955_v3 }
 0x27d   :  { %19075 = vmatpush3.bf16.xpose.msra.mxu1 %v19072_v18  ;;  %18632 = vmatprep.mubr.f32.mxu1 %v20908_v14  ;;  %v6946_v18 = vand.u32 4294901760, %v6945_v54 }
 0x27e   :  { %19077 = vmatprep.subr.bf16.mxu1 %v20957_v28  ;;  %v8529_v20 = vand.u32 4294901760, %v8528_v15 }
 0x280   :  { %8530 = vmatmul.mubr.f32.vlgmr.msra.gmra.mrb[0].mxu0 %v8529_v20  ;;  %v151_v20 = vcombine.high %v20970_v41, %v20970_v41 }
 0x281   :  { %8535 = vmatprep.mubr.f32.mxu0 %v22465_v58 }
 0x282   :  { %v215_v1 = vrot.slane %v151_v20, %v20113_v10 }
 0x284   :  { %18633 = vmatmul.mubr.f32.vlgmr.msra.gmra.mrb[24].mxu1 %v20910_v31 }
 0x285   :  { %19079 = vmatpush3.bf16.xpose.msra.mxu1 %v20957_v28  ;;  %18639 = vmatprep.mubr.f32.mxu1 %v20908_v14  ;;  %v21080_v28 = vsel %vm8436_vm7, %v16560_v6, %v20881_v47  ;;  %v19084_v14 = vpack.c.bf16 %v6956_v19, %v6946_v18  ;;  %v149_v47 = vcombine.high %v20863_v59, %v20863_v59 }
 0x286   :  { %19081 = vmatprep.subr.bf16.mxu1 %v19080_v61  ;;  %22468 = vst [vmem:[#allocation3_spill] sm:$0xff] %v21080_v28 }
 0x287   :  { %v211_v22 = vrot.slane %v149_v47, %v20113_v10 }
 0x289   :  { %v261_v26 = vmul.f32 %v211_v22, %v49_v45 }
 0x28b   :  { %v7381_v37 = vsel %vm264_vm0, %v261_v26, 0 }
 0x28c   :  { %18640 = vmatmul.mubr.f32.vlgmr.msra.gmra.mrb[24].mxu1 %v20910_v31  ;;  %v48_v31 = vld [vmem:[%s22461_s0 + $0xe0] sm:$0xff]  ;;  %v21109_v21 = vand.u32 4294901760, %v7381_v37 }
 0x28d   :  { %19083 = vmatpush3.bf16.xpose.msra.mxu1 %v19080_v61  ;;  %18646 = vmatprep.mubr.f32.mxu1 %v6946_v18  ;;  %v260_v16 = vmul.f32 %v211_v22, %v48_v31 }
 0x28e   :  { %19085 = vmatprep.subr.bf16.mxu1 %v19084_v14  ;;  %v21113_v56 = vsub.f32 %v7381_v37, %v21109_v21 }
 0x28f   :  { %v7378_v36 = vsel %vm264_vm0, %v260_v16, 0 }
 0x290   :  { %v21107_v29 = vand.u32 4294901760, %v7378_v36 }
 0x292   :  { %v7451_v25 = vsub.f32 %v7378_v36, %v21107_v29  ;;  %v21123_v13 = vpack.c.bf16 %v21109_v21, %v21107_v29 }
 0x294   :  { %18647 = vmatmul.mubr.f32.vlgmr.msra.gmra.mrb[26].mxu1 %v6956_v19  ;;  %v19112_v2 = vpack.c.bf16 %v21113_v56, %v7451_v25 }
 0x295   :  { %19087 = vmatpush3.bf16.xpose.msra.mxu1 %v19084_v14  ;;  %18653 = vmatprep.mubr.f32.mxu1 %v21006_v53 }
 0x296   :  { %19089 = vmatprep.subr.bf16.mxu1 %v19088_v5 }
 0x29c   :  { %18654 = vmatmul.mubr.f32.vlgmr.msra.gmra.mrb[26].mxu1 %v21009_v46 }
 0x29d   :  { %19091 = vmatpush3.bf16.xpose.msra.mxu1 %v19088_v5  ;;  %18660 = vmatprep.mubr.f32.mxu1 %v6943_v35  ;;  %v21116_v35 = vand.u32 4294901760, %v7451_v25 }
 0x29e   :  { %19093 = vmatprep.subr.bf16.mxu1 %v19080_v61 }
 0x29f   :  { %v21100_v7 = vpop.f32.mrb[16].mxu1  ;;  %v7453_v15 = vsub.f32 %v7451_v25, %v21116_v35 }
 0x2a0   :  { %v21102_v59 = vpop.f32.mrb[17].mxu1  ;;  %v13662_v3 = vrot.slane %v21100_v7, 1  ;;  %v14242_v6 = vrot.slane %v21100_v7, 2  ;;  %v14822_v14 = vrot.slane %v21100_v7, 3  ;;  %v15402_v5 = vrot.slane %v21100_v7, 4 }
 0x2a1   :  { %v7454_v23 = vand.u32 4294901760, %v7453_v15  ;;  %v15982_v47 = vrot.slane %v21100_v7, 5  ;;  %v16562_v22 = vrot.slane %v21100_v7, 6  ;;  %v17142_v31 = vrot.slane %v21100_v7, 7 }
 0x2a2   :  { %v8438_v45 = vrot.slane %v21102_v59, 1  ;;  %v9586_v16 = vrot.slane %v21102_v59, 2  ;;  %v10166_v26 = vrot.slane %v21102_v59, 3  ;;  %v11326_v36 = vrot.slane %v21102_v59, 5 }
 0x2a3   :  { %v11906_v37 = vrot.slane %v21102_v59, 6  ;;  %v12486_v15 = vrot.slane %v21102_v59, 7 }
 0x2a4   :  { %18661 = vmatmul.mubr.f32.vlgmr.msra.gmra.mrb[26].mxu1 %v21022_v9  ;;  %v21119_v9 = vand.u32 4294901760, %v21113_v56 }
 0x2a5   :  { %19095 = vmatpush3.bf16.xpose.msra.mxu1 %v19080_v61  ;;  %18667 = vmatprep.mubr.f32.mxu1 %v6944_v42 }
 0x2a6   :  { %19097 = vmatprep.subr.bf16.mxu1 %v19096_v32  ;;  %v7463_v42 = vsub.f32 %v21113_v56, %v21119_v9  ;;  %v19120_v54 = vpack.c.bf16 %v21119_v9, %v21116_v35 }
 0x2a8   :  { %v7464_v55 = vand.u32 4294901760, %v7463_v42 }
 0x2ac   :  { %18668 = vmatmul.mubr.f32.vlgmr.msra.gmra.mrb[26].mxu1 %v6954_v49  ;;  %v19108_v49 = vpack.c.bf16 %v7464_v55, %v7454_v23 }
 0x2ad   :  { %19099 = vmatpush3.bf16.xpose.msra.mxu1 %v19096_v32  ;;  %18674 = vmatprep.mubr.f32.mxu1 %v21006_v53  ;;  %v10746_v32 = vrot.slane %v21102_v59, 4 }
 0x2ae   :  { %19101 = vmatprep.subr.bf16.mxu1 %v19080_v61 }
 0x2b4   :  { %18675 = vmatmul.mubr.f32.vlgmr.msra.gmra.mrb[26].mxu1 %v21009_v46 }
 0x2b5   :  { %19103 = vmatpush3.bf16.xpose.msra.mxu1 %v19080_v61  ;;  %18681 = vmatprep.mubr.f32.mxu1 %v21006_v53  ;;  %v50_v53 = vld [vmem:[%s22461_s0 + $0xf0] sm:$0xff]  ;;  %v263_v61 = vmul.f32 %v215_v1, %v51_v4 }
 0x2b6   :  { %19105 = vmatprep.subr.bf16.mxu1 %v21123_v13 }
 0x2b7   :  { %v7889_v10 = vsel %vm264_vm0, %v263_v61, 0 }
 0x2b8   :  { %v21153_v19 = vand.u32 4294901760, %v7889_v10 }
 0x2bc   :  { %18682 = vmatmul.mubr.f32.vlgmr.msra.gmra.mrb[26].mxu1 %v21009_v46  ;;  %v262_v46 = vmul.f32 %v215_v1, %v50_v53 }
 0x2bd   :  { %19107 = vmatpush3.bf16.xpose.msra.mxu1 %v21123_v13  ;;  %18688 = vmatprep.mubr.f32.mxu1 %v7454_v23 }
 0x2be   :  { %19109 = vmatprep.subr.bf16.mxu1 %v19108_v49  ;;  %v7886_v41 = vsel %vm264_vm0, %v262_v46, 0 }
 0x2bf   :  { %v21151_v18 = vand.u32 4294901760, %v7886_v41 }
 0x2c4   :  { %18689 = vmatmul.mubr.f32.vlgmr.msra.gmra.mrb[28].mxu1 %v7464_v55 }
 0x2c5   :  { %19111 = vmatpush3.bf16.xpose.msra.mxu1 %v19108_v49  ;;  %18695 = vmatprep.mubr.f32.mxu1 %v21107_v29 }
 0x2c6   :  { %19113 = vmatprep.subr.bf16.mxu1 %v19112_v2 }
 0x2cc   :  { %18696 = vmatmul.mubr.f32.vlgmr.msra.gmra.mrb[28].mxu1 %v21109_v21 }
 0x2cd   :  { %19115 = vmatpush3.bf16.xpose.msra.mxu1 %v19112_v2  ;;  %18702 = vmatprep.mubr.f32.mxu1 %v7451_v25 }
 0x2ce   :  { %19117 = vmatprep.subr.bf16.mxu1 %v21123_v13 }
 0x2cf   :  { %v18515_v42 = vpop.f32.mrb[18].mxu1 }
 0x2d0   :  { %v13082_v25 = vrot.slane %v18515_v42, 7  ;;  %v21169_v23 = vsel %vm8418_vm1, %v18515_v42, %v13662_v3  ;;  %v14243_v55 = vrot.slane %v18515_v42, 1  ;;  %v14823_v49 = vrot.slane %v18515_v42, 2  ;;  %v5335_v20 = vpop.f32.mrb[19].mxu1 }
 0x2d1   :  { %v15403_v1 = vrot.slane %v18515_v42, 3  ;;  %v15983_v2 = vrot.slane %v18515_v42, 4  ;;  %v16563_v53 = vrot.slane %v18515_v42, 5  ;;  %v17143_v4 = vrot.slane %v18515_v42, 6 }
 0x2d2   :  { %v21173_v46 = vsel %vm8418_vm1, %v13082_v25, %v21100_v7  ;;  %v21176_v61 = vsel %vm8418_vm1, %v5335_v20, %v8438_v45  ;;  %v9010_v17 = vrot.slane %v5335_v20, 7  ;;  %v9587_v58 = vrot.slane %v5335_v20, 1 }
 0x2d3   :  { %v21179_v30 = vsel %vm8418_vm1, %v15403_v1, %v15402_v5  ;;  %v21182_v3 = vsel %vm8418_vm1, %v15983_v2, %v15982_v47  ;;  %v21185_v28 = vsel %vm8418_vm1, %v16563_v53, %v16562_v22  ;;  %v21188_v42 = vsel %vm8418_vm1, %v17143_v4, %v17142_v31 }
 0x2d4   :  { %v21192_v7 = vsel %vm8418_vm1, %v9010_v17, %v21102_v59  ;;  %v10167_v45 = vrot.slane %v5335_v20, 2  ;;  %v10747_v25 = vrot.slane %v5335_v20, 3  ;;  %v11327_v60 = vrot.slane %v5335_v20, 4  ;;  %18703 = vmatmul.mubr.f32.vlgmr.msra.gmra.mrb[28].mxu1 %v21113_v56 }
 0x2d5   :  { %v11907_v5 = vrot.slane %v5335_v20, 5  ;;  %v12487_v1 = vrot.slane %v5335_v20, 6  ;;  %19119 = vmatpush3.bf16.xpose.msra.mxu1 %v21123_v13  ;;  %18709 = vmatprep.mubr.f32.mxu1 %v21116_v35  ;;  %v14244_v47 = vsel %vm8418_vm1, %v14243_v55, %v14242_v6  ;;  %v9588_v22 = vsel %vm8418_vm1, %v9587_v58, %v9586_v16 }
 0x2d6   :  { %v21200_v31 = vsel %vm8418_vm1, %v10747_v25, %v10746_v32  ;;  %v21203_v17 = vsel %vm8418_vm1, %v11327_v60, %v11326_v36  ;;  %19121 = vmatprep.subr.bf16.mxu1 %v19120_v54  ;;  %v14824_v59 = vsel %vm8418_vm1, %v14823_v49, %v14822_v14  ;;  %v10168_v56 = vsel %vm8418_vm1, %v10167_v45, %v10166_v26 }
 0x2d7   :  { %v11908_v20 = vsel %vm8418_vm1, %v11907_v5, %v11906_v37  ;;  %v21209_v2 = vsel %vm8418_vm1, %v12487_v1, %v12486_v15  ;;  %v7959_v35 = vsub.f32 %v7886_v41, %v21151_v18  ;;  %v7969_v58 = vsub.f32 %v7889_v10, %v21153_v19 }
 0x2d8   :  { %v21218_v14 = vpack.c.bf16 %v21153_v19, %v21151_v18 }
 0x2d9   :  { %v7960_v60 = vand.u32 4294901760, %v7959_v35  ;;  %v7970_v6 = vand.u32 4294901760, %v7969_v58 }
 0x2db   :  { %v7961_v16 = vsub.f32 %v7959_v35, %v7960_v60  ;;  %v7971_v26 = vsub.f32 %v7969_v58, %v7970_v6 }
 0x2dc   :  { %18710 = vmatmul.mubr.f32.vlgmr.msra.gmra.mrb[28].mxu1 %v21119_v9 }
 0x2dd   :  { %19123 = vmatpush3.bf16.xpose.msra.mxu1 %v19120_v54  ;;  %18716 = vmatprep.mubr.f32.mxu1 %v21107_v29  ;;  %v7962_v9 = vand.u32 4294901760, %v7961_v16  ;;  %v7972_v41 = vand.u32 4294901760, %v7971_v26  ;;  %v19136_v54 = vpack.c.bf16 %v7969_v58, %v7959_v35 }
 0x2de   :  { %19125 = vmatprep.subr.bf16.mxu1 %v21123_v13 }
 0x2df   :  { %v19132_v10 = vpack.c.bf16 %v7972_v41, %v7962_v9 }
 0x2e4   :  { %18717 = vmatmul.mubr.f32.vlgmr.msra.gmra.mrb[28].mxu1 %v21109_v21 }
 0x2e5   :  { %19127 = vmatpush3.bf16.xpose.msra.mxu1 %v21123_v13  ;;  %18723 = vmatprep.mubr.f32.mxu1 %v21107_v29  ;;  %v19144_v13 = vpack.c.bf16 %v7970_v6, %v7960_v60 }
 0x2e6   :  { %19129 = vmatprep.subr.bf16.mxu1 %v21218_v14 }
 0x2ec   :  { %18724 = vmatmul.mubr.f32.vlgmr.msra.gmra.mrb[28].mxu1 %v21109_v21 }
 0x2ed   :  { %19131 = vmatpush3.bf16.xpose.msra.mxu1 %v21218_v14  ;;  %18730 = vmatprep.mubr.f32.mxu1 %v7962_v9 }
 0x2ee   :  { %19133 = vmatprep.subr.bf16.mxu1 %v19132_v10 }
 0x2f4   :  { %18731 = vmatmul.mubr.f32.vlgmr.msra.gmra.mrb[30].mxu1 %v7972_v41 }
 0x2f5   :  { %19135 = vmatpush3.bf16.xpose.msra.mxu1 %v19132_v10  ;;  %18737 = vmatprep.mubr.f32.mxu1 %v21151_v18 }
 0x2f6   :  { %19137 = vmatprep.subr.bf16.mxu1 %v19136_v54 }
 0x2fc   :  { %18738 = vmatmul.mubr.f32.vlgmr.msra.gmra.mrb[30].mxu1 %v21153_v19 }
 0x2fd   :  { %19139 = vmatpush3.bf16.xpose.msra.mxu1 %v19136_v54  ;;  %18744 = vmatprep.mubr.f32.mxu1 %v7959_v35 }
 0x2fe   :  { %19141 = vmatprep.subr.bf16.mxu1 %v21218_v14 }
 0x2ff   :  { %v18557_v29 = vpop.f32.mrb[20].mxu1 }
 0x300   :  { %v13084_v32 = vrot.slane %v18557_v29, 6  ;;  %v13664_v21 = vrot.slane %v18557_v29, 7  ;;  %v21230_v36 = vsel %vm8421_vm2, %v18557_v29, %v14244_v47  ;;  %v14825_v37 = vrot.slane %v18557_v29, 1  ;;  %v5843_v15 = vpop.f32.mrb[21].mxu1 }
 0x301   :  { %v15405_v55 = vrot.slane %v18557_v29, 2  ;;  %v15985_v49 = vrot.slane %v18557_v29, 3  ;;  %v16565_v53 = vrot.slane %v18557_v29, 4  ;;  %v17145_v4 = vrot.slane %v18557_v29, 5 }
 0x302   :  { %v8440_v45 = vrot.slane %v5843_v15, 7  ;;  %v9012_v25 = vrot.slane %v5843_v15, 6  ;;  %v9589_v5 = vsel %vm8421_vm2, %v5843_v15, %v9588_v22  ;;  %v10169_v1 = vrot.slane %v5843_v15, 1 }
 0x303   :  { %v10749_v35 = vrot.slane %v5843_v15, 2  ;;  %v11329_v16 = vrot.slane %v5843_v15, 3  ;;  %v11909_v26 = vrot.slane %v5843_v15, 4  ;;  %v12489_v9 = vrot.slane %v5843_v15, 5 }
 0x304   :  { %18745 = vmatmul.mubr.f32.vlgmr.msra.gmra.mrb[30].mxu1 %v7969_v58  ;;  %v14826_v41 = vsel %vm8421_vm2, %v14825_v37, %v14824_v59  ;;  %v10170_v47 = vsel %vm8421_vm2, %v10169_v1, %v10168_v56  ;;  %v8441_v10 = vsel %vm8421_vm2, %v8440_v45, %v21176_v61  ;;  %v9013_v54 = vsel %vm8421_vm2, %v9012_v25, %v21192_v7 }
 0x305   :  { %19143 = vmatpush3.bf16.xpose.msra.mxu1 %v21218_v14  ;;  %18751 = vmatprep.mubr.f32.mxu1 %v7960_v60  ;;  %v10750_v22 = vsel %vm8421_vm2, %v10749_v35, %v21200_v31  ;;  %v11330_v29 = vsel %vm8421_vm2, %v11329_v16, %v21203_v17  ;;  %v11910_v58 = vsel %vm8421_vm2, %v11909_v26, %v11908_v20 }
 0x306   :  { %19145 = vmatprep.subr.bf16.mxu1 %v19144_v13  ;;  %v12490_v59 = vsel %vm8421_vm2, %v12489_v9, %v21209_v2  ;;  %v13085_v61 = vsel %vm8421_vm2, %v13084_v32, %v21173_v46  ;;  %v13665_v7 = vsel %vm8421_vm2, %v13664_v21, %v21169_v23  ;;  %v15406_v56 = vsel %vm8421_vm2, %v15405_v55, %v21179_v30 }
 0x307   :  { %v15986_v31 = vsel %vm8421_vm2, %v15985_v49, %v21182_v3  ;;  %v16566_v17 = vsel %vm8421_vm2, %v16565_v53, %v21185_v28  ;;  %v17146_v20 = vsel %vm8421_vm2, %v17145_v4, %v21188_v42 }
 0x30c   :  { %18752 = vmatmul.mubr.f32.vlgmr.msra.gmra.mrb[30].mxu1 %v7970_v6 }
 0x30d   :  { %19147 = vmatpush3.bf16.xpose.msra.mxu1 %v19144_v13  ;;  %18758 = vmatprep.mubr.f32.mxu1 %v21151_v18 }
 0x30e   :  { %19149 = vmatprep.subr.bf16.mxu1 %v21218_v14 }
 0x314   :  { %18759 = vmatmul.mubr.f32.vlgmr.msra.gmra.mrb[30].mxu1 %v21153_v19 }
 0x315   :  { %19151 = vmatpush3.bf16.xpose.msra.mxu1 %v21218_v14  ;;  %18765 = vmatprep.mubr.f32.mxu1 %v21151_v18 }
 0x31c   :  { %18766 = vmatmul.mubr.f32.vlgmr.msra.gmra.mrb[30].mxu1 %v21153_v19 }
 0x32f   :  { %v18599_v30 = vpop.f32.mrb[22].mxu1 }
 0x330   :  { %v13086_v23 = vrot.slane %v18599_v30, 5  ;;  %v13666_v28 = vrot.slane %v18599_v30, 6  ;;  %v14246_v46 = vrot.slane %v18599_v30, 7  ;;  %v14827_v3 = vsel %vm8424_vm3, %v18599_v30, %v14826_v41  ;;  %v6351_v42 = vpop.f32.mrb[23].mxu1 }
 0x331   :  { %v15407_v2 = vrot.slane %v18599_v30, 1  ;;  %v15987_v60 = vrot.slane %v18599_v30, 2  ;;  %v16567_v6 = vrot.slane %v18599_v30, 3  ;;  %v17147_v13 = vrot.slane %v18599_v30, 4 }
 0x332   :  { %v8442_v32 = vrot.slane %v6351_v42, 6  ;;  %v9014_v21 = vrot.slane %v6351_v42, 5  ;;  %v9590_v37 = vrot.slane %v6351_v42, 7  ;;  %v10171_v14 = vsel %vm8424_vm3, %v6351_v42, %v10170_v47 }
 0x333   :  { %v10751_v15 = vrot.slane %v6351_v42, 1  ;;  %v11331_v18 = vrot.slane %v6351_v42, 2  ;;  %v11911_v55 = vrot.slane %v6351_v42, 3  ;;  %v12491_v19 = vrot.slane %v6351_v42, 4 }
 0x334   :  { %v8443_v49 = vsel %vm8424_vm3, %v8442_v32, %v8441_v10  ;;  %v9015_v53 = vsel %vm8424_vm3, %v9014_v21, %v9013_v54  ;;  %v9591_v4 = vsel %vm8424_vm3, %v9590_v37, %v9589_v5  ;;  %v13087_v45 = vsel %vm8424_vm3, %v13086_v23, %v13085_v61 }
 0x335   :  { %v10752_v25 = vsel %vm8424_vm3, %v10751_v15, %v10750_v22  ;;  %v11332_v1 = vsel %vm8424_vm3, %v11331_v18, %v11330_v29  ;;  %v11912_v35 = vsel %vm8424_vm3, %v11911_v55, %v11910_v58  ;;  %v12492_v16 = vsel %vm8424_vm3, %v12491_v19, %v12490_v59 }
 0x336   :  { %v13667_v26 = vsel %vm8424_vm3, %v13666_v28, %v13665_v7  ;;  %v14247_v9 = vsel %vm8424_vm3, %v14246_v46, %v21230_v36  ;;  %v15408_v41 = vsel %vm8424_vm3, %v15407_v2, %v15406_v56  ;;  %v15988_v47 = vsel %vm8424_vm3, %v15987_v60, %v15986_v31 }
 0x337   :  { %v16568_v5 = vsel %vm8424_vm3, %v16567_v6, %v16566_v17  ;;  %v17148_v10 = vsel %vm8424_vm3, %v17147_v13, %v17146_v20 }
 0x35f   :  { %v18641_v54 = vpop.f32.mrb[24].mxu1 }
 0x360   :  { %v13088_v22 = vrot.slane %v18641_v54, 4  ;;  %v13668_v29 = vrot.slane %v18641_v54, 5  ;;  %v14248_v61 = vrot.slane %v18641_v54, 6  ;;  %v14828_v58 = vrot.slane %v18641_v54, 7  ;;  %v6859_v30 = vpop.f32.mrb[25].mxu1 }
 0x361   :  { %v15989_v59 = vrot.slane %v18641_v54, 1  ;;  %v16569_v23 = vrot.slane %v18641_v54, 2  ;;  %v17149_v7 = vrot.slane %v18641_v54, 3  ;;  %v8444_v28 = vrot.slane %v6859_v30, 5 }
 0x362   :  { %v9016_v42 = vrot.slane %v6859_v30, 4  ;;  %v9592_v36 = vrot.slane %v6859_v30, 6  ;;  %v10172_v46 = vrot.slane %v6859_v30, 7  ;;  %v11333_v56 = vrot.slane %v6859_v30, 1 }
 0x363   :  { %v11913_v2 = vrot.slane %v6859_v30, 2  ;;  %v12493_v31 = vrot.slane %v6859_v30, 3  ;;  %v8445_v17 = vsel %vm8427_vm4, %v8444_v28, %v8443_v49  ;;  %v10753_v20 = vsel %vm8427_vm4, %v6859_v30, %v10752_v25 }
 0x364   :  { %v9017_v60 = vsel %vm8427_vm4, %v9016_v42, %v9015_v53  ;;  %v9593_v6 = vsel %vm8427_vm4, %v9592_v36, %v9591_v4  ;;  %v10173_v13 = vsel %vm8427_vm4, %v10172_v46, %v10171_v14  ;;  %v11334_v32 = vsel %vm8427_vm4, %v11333_v56, %v11332_v1 }
 0x365   :  { %v11914_v21 = vsel %vm8427_vm4, %v11913_v2, %v11912_v35  ;;  %v12494_v37 = vsel %vm8427_vm4, %v12493_v31, %v12492_v16  ;;  %v13089_v15 = vsel %vm8427_vm4, %v13088_v22, %v13087_v45  ;;  %v13669_v18 = vsel %vm8427_vm4, %v13668_v29, %v13667_v26 }
 0x366   :  { %v14249_v55 = vsel %vm8427_vm4, %v14248_v61, %v14247_v9  ;;  %v14829_v19 = vsel %vm8427_vm4, %v14828_v58, %v14827_v3  ;;  %v15409_v49 = vsel %vm8427_vm4, %v18641_v54, %v15408_v41  ;;  %v15990_v53 = vsel %vm8427_vm4, %v15989_v59, %v15988_v47 }
 0x367   :  { %v16570_v14 = vsel %vm8427_vm4, %v16569_v23, %v16568_v5  ;;  %v17150_v4 = vsel %vm8427_vm4, %v17149_v7, %v17148_v10  ;;  %v8549_v25 = vand.u32 4294901760, %v20729_v39  ;;  %v8561_v1 = vand.u32 4294901760, %v20731_v24 }
 0x368   :  { %v8555_v45 = vand.u32 4294901760, %v20744_v34  ;;  %v8567_v35 = vand.u32 4294901760, %v20746_v57  ;;  %v19160_v29 = vpack.c.bf16 %v20731_v24, %v20729_v39 }
 0x369   :  { %v8550_v16 = vsub.f32 %v20729_v39, %v8549_v25  ;;  %v8562_v3 = vsub.f32 %v20731_v24, %v8561_v1 }
 0x36a   :  { %v8556_v26 = vsub.f32 %v20744_v34, %v8555_v45  ;;  %v8568_v9 = vsub.f32 %v20746_v57, %v8567_v35 }
 0x36b   :  { %v8551_v41 = vand.u32 4294901760, %v8550_v16  ;;  %v8563_v47 = vand.u32 4294901760, %v8562_v3 }
 0x36c   :  { %v8557_v5 = vand.u32 4294901760, %v8556_v26  ;;  %v8569_v10 = vand.u32 4294901760, %v8568_v9  ;;  %v21311_v9 = vpack.c.bf16 %v8561_v1, %v8549_v25 }
 0x36d   :  { %v19156_v54 = vpack.c.bf16 %v8563_v47, %v8551_v41  ;;  %v21313_v41 = vpack.c.bf16 %v8567_v35, %v8555_v45 }
 0x36e   :  { %v19158_v22 = vpack.c.bf16 %v8569_v10, %v8557_v5 }
 0x36f   :  { %19157 = vmatprep.subr.bf16.mxu0 %v19156_v54 }
 0x370   :  { %19159 = vmatpush1.bf16.msra.mxu0 %v19158_v22 }
 0x371   :  { %19161 = vmatprep.subr.bf16.mxu0 %v19160_v29 }
 0x38f   :  { %v18683_v58 = vpop.f32.mrb[26].mxu1 }
 0x390   :  { %v13090_v30 = vrot.slane %v18683_v58, 3  ;;  %v13670_v59 = vrot.slane %v18683_v58, 4  ;;  %v14250_v23 = vrot.slane %v18683_v58, 5  ;;  %v14830_v7 = vrot.slane %v18683_v58, 6  ;;  %v7367_v28 = vpop.f32.mrb[27].mxu1 }
 0x391   :  { %v15410_v42 = vrot.slane %v18683_v58, 7  ;;  %v16571_v36 = vrot.slane %v18683_v58, 1  ;;  %v17151_v46 = vrot.slane %v18683_v58, 2  ;;  %v8446_v56 = vrot.slane %v7367_v28, 4 }
 0x392   :  { %v9018_v2 = vrot.slane %v7367_v28, 3  ;;  %v9594_v31 = vrot.slane %v7367_v28, 5  ;;  %v10174_v16 = vrot.slane %v7367_v28, 6  ;;  %v10754_v3 = vrot.slane %v7367_v28, 7 }
 0x393   :  { %v11915_v26 = vrot.slane %v7367_v28, 1  ;;  %v12495_v39 = vrot.slane %v7367_v28, 2  ;;  %v8447_v24 = vsel %vm8430_vm5, %v8446_v56, %v8445_v17  ;;  %v11335_v22 = vsel %vm8430_vm5, %v7367_v28, %v11334_v32 }
 0x394   :  { %v9019_v47 = vsel %vm8430_vm5, %v9018_v2, %v9017_v60  ;;  %v9595_v5 = vsel %vm8430_vm5, %v9594_v31, %v9593_v6  ;;  %v10175_v10 = vsel %vm8430_vm5, %v10174_v16, %v10173_v13  ;;  %v10755_v54 = vsel %vm8430_vm5, %v10754_v3, %v10753_v20 }
 0x395   :  { %v11916_v29 = vsel %vm8430_vm5, %v11915_v26, %v11914_v21  ;;  %v12496_v61 = vsel %vm8430_vm5, %v12495_v39, %v12494_v37  ;;  %v13091_v17 = vsel %vm8430_vm5, %v13090_v30, %v13089_v15  ;;  %v13671_v25 = vsel %vm8430_vm5, %v13670_v59, %v13669_v18 }
 0x396   :  { %v14251_v1 = vsel %vm8430_vm5, %v14250_v23, %v14249_v55  ;;  %v14831_v60 = vsel %vm8430_vm5, %v14830_v7, %v14829_v19  ;;  %v15411_v6 = vsel %vm8430_vm5, %v15410_v42, %v15409_v49  ;;  %v15991_v13 = vsel %vm8430_vm5, %v18683_v58, %v15990_v53 }
 0x397   :  { %v16572_v20 = vsel %vm8430_vm5, %v16571_v36, %v16570_v14  ;;  %v17152_v32 = vsel %vm8430_vm5, %v17151_v46, %v17150_v4 }
 0x3bf   :  { %v18725_v45 = vpop.f32.mrb[28].mxu1 }
 0x3c0   :  { %v7875_v21 = vpop.f32.mrb[29].mxu1  ;;  %v13092_v35 = vrot.slane %v18725_v45, 2  ;;  %v13672_v37 = vrot.slane %v18725_v45, 3  ;;  %v14252_v28 = vrot.slane %v18725_v45, 4  ;;  %v14832_v15 = vrot.slane %v18725_v45, 5 }
 0x3c1   :  { %v8448_v30 = vrot.slane %v7875_v21, 3  ;;  %v9020_v18 = vrot.slane %v7875_v21, 2  ;;  %v9596_v59 = vrot.slane %v7875_v21, 4  ;;  %v10176_v55 = vrot.slane %v7875_v21, 5 }
 0x3c2   :  { %v10756_v23 = vrot.slane %v7875_v21, 6  ;;  %v11336_v19 = vrot.slane %v7875_v21, 7  ;;  %v11917_v49 = vsel %vm8433_vm6, %v7875_v21, %v11916_v29  ;;  %v12497_v7 = vrot.slane %v7875_v21, 1 }
 0x3c3   :  { %v8449_v53 = vsel %vm8433_vm6, %v8448_v30, %v8447_v24  ;;  %v9021_v14 = vsel %vm8433_vm6, %v9020_v18, %v9019_v47  ;;  %v9597_v4 = vsel %vm8433_vm6, %v9596_v59, %v9595_v5  ;;  %v10177_v58 = vsel %vm8433_vm6, %v10176_v55, %v10175_v10 }
 0x3c4   :  { %v10757_v42 = vsel %vm8433_vm6, %v10756_v23, %v10755_v54  ;;  %v11337_v36 = vsel %vm8433_vm6, %v11336_v19, %v11335_v22  ;;  %v12498_v46 = vsel %vm8433_vm6, %v12497_v7, %v12496_v61  ;;  %v13093_v56 = vsel %vm8433_vm6, %v13092_v35, %v13091_v17 }
 0x3c5   :  { %v13673_v2 = vsel %vm8433_vm6, %v13672_v37, %v13671_v25  ;;  %v14253_v31 = vsel %vm8433_vm6, %v14252_v28, %v14251_v1  ;;  %v14833_v16 = vsel %vm8433_vm6, %v14832_v15, %v14831_v60  ;;  %v15412_v3 = vrot.slane %v18725_v45, 6 }
 0x3c6   :  { %v15992_v26 = vrot.slane %v18725_v45, 7  ;;  %v16573_v39 = vsel %vm8433_vm6, %v18725_v45, %v16572_v20  ;;  %v17153_v24 = vrot.slane %v18725_v45, 1 }
 0x3c7   :  { %v15413_v47 = vsel %vm8433_vm6, %v15412_v3, %v15411_v6  ;;  %v8396_v3 = vld [vmem:[%s22462_s2 + $0x18] sm:$0xff] }
 0x3c8   :  { %v15993_v5 = vsel %vm8433_vm6, %v15992_v26, %v15991_v13  ;;  %v17154_v10 = vsel %vm8433_vm6, %v17153_v24, %v17152_v32 }
 0x3ef   :  { %v18767_v61 = vpop.f32.mrb[30].mxu1 }
 0x3f0   :  { %v8383_v54 = vpop.f32.mrb[31].mxu1  ;;  %v13094_v23 = vrot.slane %v18767_v61, 1  ;;  %v13674_v19 = vrot.slane %v18767_v61, 2  ;;  %v14254_v7 = vrot.slane %v18767_v61, 3  ;;  %v16574_v26 = vrot.slane %v18767_v61, 7 }
 0x3f1   :  { %v8450_v22 = vrot.slane %v8383_v54, 2  ;;  %v9022_v29 = vrot.slane %v8383_v54, 1  ;;  %v9598_v17 = vrot.slane %v8383_v54, 3  ;;  %v10178_v25 = vrot.slane %v8383_v54, 4 }
 0x3f2   :  { %v10758_v1 = vrot.slane %v8383_v54, 5  ;;  %v11338_v21 = vrot.slane %v8383_v54, 6  ;;  %v11918_v60 = vrot.slane %v8383_v54, 7  ;;  %v21347_v35 = vsel %vm8436_vm7, %v8383_v54, %v12498_v46 }
 0x3f3   :  { %v8451_v20 = vsel %vm8436_vm7, %v8450_v22, %v8449_v53  ;;  %v21351_v6 = vsel %vm8436_vm7, %v9022_v29, %v9021_v14  ;;  %v21354_v13 = vsel %vm8436_vm7, %v9598_v17, %v9597_v4  ;;  %v21360_v37 = vsel %vm8436_vm7, %v10178_v25, %v10177_v58 }
 0x3f4   :  { %v8454_v32 = vsel %vm264_vm0, %v8451_v20, 0  ;;  %v21363_v28 = vsel %vm8436_vm7, %v10758_v1, %v10757_v42  ;;  %v21366_v15 = vsel %vm8436_vm7, %v11338_v21, %v11337_v36  ;;  %v21369_v30 = vsel %vm8436_vm7, %v11918_v60, %v11917_v49 }
 0x3f5   :  { %v21357_v45 = vand.u32 4294901760, %v8454_v32  ;;  %v14834_v14 = vrot.slane %v18767_v61, 4  ;;  %v21373_v4 = vsel %vm8436_vm7, %v13094_v23, %v13093_v56  ;;  %v21376_v58 = vsel %vm8436_vm7, %v13674_v19, %v13673_v2 }
 0x3f6   :  { %v21379_v42 = vsel %vm8436_vm7, %v14254_v7, %v14253_v31  ;;  %v22470_v49 = vmov 0.0   ;;  %v21387_v46 = vsel %vm8436_vm7, %v18767_v61, %v17154_v10  ;;  %v22471_v56 = vpack.c.bf16 %v20746_v57, %v20744_v34 }
 0x3f7   :  { %v8537_v18 = vsub.f32 %v8454_v32, %v21357_v45  ;;  %v21383_v36 = vsel %vm8436_vm7, %v14834_v14, %v14833_v16  ;;  %v15414_v2 = vrot.slane %v18767_v61, 5  ;;  %v15994_v31 = vrot.slane %v18767_v61, 6  ;;  %v8394_v16 = vld [vmem:[%s22462_s2 + $0x8] sm:$0xff]  ;;  %v8393_v61 = vld [vmem:[%s22462_s2] sm:$0xff] }
 0x3f8   :  { %v9028_v24 = vand.u32 4294901760, %v8394_v16  ;;  %v9032_v10 = vand.u32 4294901760, %v8396_v3  ;;  %v21413_v54 = vsel %vm8436_vm7, %v16574_v26, %v16573_v39  ;;  %v22472_v22 = vand.u32 4294901760, %v21018_v43 }
 0x3f9   :  { %v8538_v59 = vand.u32 4294901760, %v8537_v18  ;;  %v21403_v34 = vsel %vm8436_vm7, %v15414_v2, %v15413_v47  ;;  %v21406_v57 = vsel %vm8436_vm7, %v15994_v31, %v15993_v5  ;;  %v9030_v39 = vand.u32 4294901760, %v8393_v61 }
 0x3fa   :  { %v21416_v47 = vsub.f32 %v8394_v16, %v9028_v24  ;;  %v21418_v5 = vsub.f32 %v8396_v3, %v9032_v10  ;;  %v9024_v1 = vsel %vm264_vm0, %v20989_v27, 0  ;;  %v9026_v32 = vsel %vm264_vm0, %v21351_v6, 0 }
 0x3fb   :  { %v8539_v55 = vsub.f32 %v8537_v18, %v8538_v59  ;;  %v21442_v60 = vand.u32 4294901760, %v9024_v1  ;;  %v21455_v19 = vand.u32 4294901760, %v9026_v32 }
 0x3fc   :  { %v9121_v17 = vand.u32 4294901760, %v21416_v47  ;;  %v9133_v25 = vand.u32 4294901760, %v21418_v5 }
 0x3fd   :  { %v8540_v53 = vand.u32 4294901760, %v8539_v55 }
 0x3fe   :  { %v9134_v20 = vsub.f32 %v21418_v5, %v9133_v25 }
 0x3ff   :  { %8541 = vmatmul.mubr.f32.gmra.mrb[2].mxu0 %v8540_v53 }
 0x400   :  { %8631 = vmatprep.mubr.f32.mxu0 %v22470_v49  ;;  %v9135_v23 = vand.u32 4294901760, %v9134_v20 }
 0x403   :  { %8633 = vmatmul.mubr.f32.vlgmr.msra.gmra.mrb[0].mxu0 %v21011_v48 }
 0x404   :  { %19163 = vmatpush1.bf16.msra.mxu0 %v22471_v56  ;;  %8638 = vmatprep.mubr.f32.mxu0 %v22470_v49  ;;  %v9109_v56 = vsub.f32 %v9026_v32, %v21455_v19 }
 0x405   :  { %19165 = vmatprep.subr.bf16.mxu0 %v20727_v52 }
 0x406   :  { %v9110_v3 = vand.u32 4294901760, %v9109_v56 }
 0x407   :  { %8640 = vmatmul.mubr.f32.gmra.mrb[2].mxu0 %v21357_v45 }
 0x408   :  { %8718 = vmatprep.mubr.f32.mxu0 %v22470_v49 }
 0x40b   :  { %8721 = vmatmul.mubr.f32.vlgmr.msra.gmra.mrb[0].mxu0 %v21018_v43  ;;  %v21436_v43 = vsub.f32 %v8393_v61, %v9030_v39  ;;  %v19184_v61 = vpack.c.bf16 %v21418_v5, %v21416_v47  ;;  %v9569_v5 = vld [vmem:[%s22462_s2 + $0x48] sm:$0xff] }
 0x40c   :  { %19167 = vmatpush1.bf16.msra.mxu0 %v20742_v51  ;;  %8726 = vmatprep.mubr.f32.mxu0 %v22470_v49 }
 0x40d   :  { %19169 = vmatprep.subr.bf16.mxu0 %v21311_v9  ;;  %v8395_v9 = vld [vmem:[%s22462_s2 + $0x10] sm:$0xff]  ;;  %v9127_v27 = vand.u32 4294901760, %v21436_v43 }
 0x40e   :  { %v9034_v29 = vand.u32 4294901760, %v8395_v9 }
 0x40f   :  { %8729 = vmatmul.mubr.f32.gmra.mrb[2].mxu0 %v8537_v18 }
 0x410   :  { %8803 = vmatprep.mubr.f32.mxu0 %v22470_v49  ;;  %v21438_v21 = vsub.f32 %v8395_v9, %v9034_v29  ;;  %v21459_v6 = vpack.c.bf16 %v9034_v29, %v9030_v39  ;;  %v9571_v9 = vld [vmem:[%s22462_s2 + $0x58] sm:$0xff] }
 0x411   :  { %v9608_v39 = vand.u32 4294901760, %v9571_v9 }
 0x412   :  { %v9139_v18 = vand.u32 4294901760, %v21438_v21 }
 0x413   :  { %8807 = vmatmul.mubr.f32.vlgmr.msra.gmra.mrb[0].mxu0 %v22472_v22  ;;  %v9604_v22 = vand.u32 4294901760, %v9569_v5 }
 0x414   :  { %19171 = vmatpush1.bf16.msra.mxu0 %v21313_v41  ;;  %8812 = vmatprep.mubr.f32.mxu0 %v22470_v49  ;;  %v21440_v41 = vpack.c.bf16 %v9032_v10, %v9028_v24  ;;  %v9140_v7 = vsub.f32 %v21438_v21, %v9139_v18  ;;  %v9111_v10 = vsub.f32 %v9109_v56, %v9110_v3 }
 0x415   :  { %19173 = vmatprep.subr.bf16.mxu0 %v20727_v52  ;;  %v9122_v52 = vsub.f32 %v21416_v47, %v9121_v17  ;;  %v19192_v47 = vpack.c.bf16 %v9133_v25, %v9121_v17  ;;  %v19194_v29 = vpack.c.bf16 %v9139_v18, %v9127_v27  ;;  %v21489_v17 = vsub.f32 %v9569_v5, %v9604_v22 }
 0x416   :  { %v9141_v31 = vand.u32 4294901760, %v9140_v7  ;;  %v21491_v25 = vsub.f32 %v9571_v9, %v9608_v39  ;;  %v9602_v7 = vsel %vm264_vm0, %v21354_v13, 0 }
 0x417   :  { %8816 = vmatmul.mubr.f32.gmra.mrb[2].mxu0 %v8538_v59  ;;  %v9098_v59 = vsub.f32 %v9024_v1, %v21442_v60  ;;  %v9123_v55 = vand.u32 4294901760, %v9122_v52  ;;  %v9568_v1 = vld [vmem:[%s22462_s2 + $0x40] sm:$0xff]  ;;  %v9697_v20 = vand.u32 4294901760, %v21489_v17 }
 0x418   :  { %8898 = vmatprep.mubr.f32.mxu0 %v22470_v49  ;;  %v9709_v32 = vand.u32 4294901760, %v21491_v25 }
 0x419   :  { %v9099_v53 = vand.u32 4294901760, %v9098_v59  ;;  %v19180_v14 = vpack.c.bf16 %v9135_v23, %v9123_v55  ;;  %v21510_v55 = vpack.c.bf16 %v9608_v39, %v9604_v22  ;;  %v19208_v22 = vpack.c.bf16 %v21491_v25, %v21489_v17 }
 0x41a   :  { %v19216_v39 = vpack.c.bf16 %v9709_v32, %v9697_v20 }
 0x41b   :  { %8900 = vmatmul.mubr.f32.vlgmr.msra.gmra.mrb[0].mxu0 %v21011_v48  ;;  %v9100_v16 = vsub.f32 %v9098_v59, %v9099_v53 }
 0x41c   :  { %19175 = vmatpush1.bf16.msra.mxu0 %v20742_v51  ;;  %8905 = vmatprep.mubr.f32.mxu0 %v22470_v49  ;;  %v9128_v51 = vsub.f32 %v21436_v43, %v9127_v27  ;;  %v9600_v27 = vsel %vm264_vm0, %v20993_v44, 0 }
 0x41d   :  { %19177 = vmatprep.subr.bf16.mxu0 %v21440_v41  ;;  %v9101_v24 = vand.u32 4294901760, %v9100_v16  ;;  %v21512_v23 = vand.u32 4294901760, %v9600_v27 }
 0x41e   :  { %v9129_v2 = vand.u32 4294901760, %v9128_v51  ;;  %v9710_v51 = vsub.f32 %v21491_v25, %v9709_v32  ;;  %v10150_v32 = vld [vmem:[%s22462_s2 + $0x70] sm:$0xff] }
 0x41f   :  { %8907 = vmatmul.mubr.f32.gmra.mrb[2].mxu0 %v21357_v45 }
 0x420   :  { %8981 = vmatprep.mubr.f32.mxu0 %v22470_v49  ;;  %v19182_v26 = vpack.c.bf16 %v9141_v31, %v9129_v2  ;;  %v9711_v2 = vand.u32 4294901760, %v9710_v51  ;;  %v21525_v31 = vand.u32 4294901760, %v9602_v7  ;;  %v10180_v51 = vsel %vm264_vm0, %v20997_v38, 0 }
 0x423   :  { %8983 = vmatmul.mubr.f32.vlgmr.msra.gmra.mrb[0].mxu0 %v21011_v48  ;;  %v9112_v48 = vand.u32 4294901760, %v9111_v10 }
 0x424   :  { %19179 = vmatpush1.bf16.msra.mxu0 %v21459_v6  ;;  %8988 = vmatprep.mubr.f32.mxu0 %v22470_v49 }
 0x425   :  { %19181 = vmatprep.subr.bf16.mxu0 %v19180_v14  ;;  %v9674_v14 = vsub.f32 %v9600_v27, %v21512_v23 }
 0x427   :  { %8990 = vmatmul.mubr.f32.gmra.mrb[2].mxu0 %v21357_v45  ;;  %v19186_v45 = vpack.c.bf16 %v21438_v21, %v21436_v43  ;;  %v9570_v43 = vld [vmem:[%s22462_s2 + $0x50] sm:$0xff]  ;;  %v9606_v21 = vand.u32 4294901760, %v9568_v1 }
 0x428   :  { %9096 = vmatprep.mubr.f32.mxu0 %v22470_v49  ;;  %v9610_v52 = vand.u32 4294901760, %v9570_v43 }
 0x429   :  { %v21506_v18 = vsub.f32 %v9568_v1, %v9606_v21 }
 0x42a   :  { %v21529_v13 = vpack.c.bf16 %v9610_v52, %v9606_v21 }
 0x42b   :  { %9102 = vmatmul.mubr.f32.vlgmr.msra.gmra.mrb[0].mxu0 %v9101_v24  ;;  %v9703_v44 = vand.u32 4294901760, %v21506_v18  ;;  %v9685_v24 = vsub.f32 %v9602_v7, %v21525_v31 }
 0x42c   :  { %19183 = vmatpush1.bf16.msra.mxu0 %v19182_v26  ;;  %9107 = vmatprep.mubr.f32.mxu0 %v22470_v49 }
 0x42d   :  { %19185 = vmatprep.subr.bf16.mxu0 %v19184_v61 }
 0x42f   :  { %9113 = vmatmul.mubr.f32.gmra.mrb[2].mxu0 %v9112_v48 }
 0x430   :  { %9203 = vmatprep.mubr.f32.mxu0 %v22470_v49 }
 0x433   :  { %9205 = vmatmul.mubr.f32.vlgmr.msra.gmra.mrb[0].mxu0 %v21442_v60 }
 0x434   :  { %19187 = vmatpush1.bf16.msra.mxu0 %v19186_v45  ;;  %9210 = vmatprep.mubr.f32.mxu0 %v22470_v49  ;;  %v9686_v45 = vand.u32 4294901760, %v9685_v24 }
 0x435   :  { %19189 = vmatprep.subr.bf16.mxu0 %v21440_v41 }
 0x436   :  { %v9687_v9 = vsub.f32 %v9685_v24, %v9686_v45 }
 0x437   :  { %9212 = vmatmul.mubr.f32.gmra.mrb[2].mxu0 %v21455_v19 }
 0x438   :  { %9290 = vmatprep.mubr.f32.mxu0 %v22470_v49 }
 0x43b   :  { %9293 = vmatmul.mubr.f32.vlgmr.msra.gmra.mrb[0].mxu0 %v9098_v59  ;;  %v21508_v59 = vsub.f32 %v9570_v43, %v9610_v52 }
 0x43c   :  { %19191 = vmatpush1.bf16.msra.mxu0 %v21459_v6  ;;  %9298 = vmatprep.mubr.f32.mxu0 %v22470_v49 }
 0x43d   :  { %19193 = vmatprep.subr.bf16.mxu0 %v19192_v47 }
 0x43f   :  { %9301 = vmatmul.mubr.f32.gmra.mrb[2].mxu0 %v9109_v56 }
 0x440   :  { %9375 = vmatprep.mubr.f32.mxu0 %v22470_v49 }
 0x443   :  { %9379 = vmatmul.mubr.f32.vlgmr.msra.gmra.mrb[0].mxu0 %v9099_v53  ;;  %v9715_v53 = vand.u32 4294901760, %v21508_v59 }
 0x444   :  { %19195 = vmatpush1.bf16.msra.mxu0 %v19194_v29  ;;  %9384 = vmatprep.mubr.f32.mxu0 %v22470_v49  ;;  %v10149_v29 = vld [vmem:[%s22462_s2 + $0x68] sm:$0xff] }
 0x445   :  { %19197 = vmatprep.subr.bf16.mxu0 %v21440_v41  ;;  %v9698_v41 = vsub.f32 %v21489_v17, %v9697_v20  ;;  %v9716_v16 = vsub.f32 %v21508_v59, %v9715_v53  ;;  %v10151_v17 = vld [vmem:[%s22462_s2 + $0x78] sm:$0xff]  ;;  %v10184_v25 = vand.u32 4294901760, %v10149_v29  ;;  %v19218_v43 = vpack.c.bf16 %v9715_v53, %v9703_v44  ;;  %v10148_v20 = vld [vmem:[%s22462_s2 + $0x60] sm:$0xff] }
 0x446   :  { %v10188_v1 = vand.u32 4294901760, %v10151_v17  ;;  %v10186_v27 = vand.u32 4294901760, %v10148_v20 }
 0x447   :  { %9388 = vmatmul.mubr.f32.gmra.mrb[2].mxu0 %v9110_v3  ;;  %v9699_v56 = vand.u32 4294901760, %v9698_v41  ;;  %v9675_v3 = vand.u32 4294901760, %v9674_v14  ;;  %v9717_v61 = vand.u32 4294901760, %v9716_v16  ;;  %v21559_v21 = vsub.f32 %v10149_v29, %v10184_v25 }
 0x448   :  { %9470 = vmatprep.mubr.f32.mxu0 %v22470_v49  ;;  %v21561_v52 = vsub.f32 %v10151_v17, %v10188_v1  ;;  %v21576_v7 = vsub.f32 %v10148_v20, %v10186_v27  ;;  %v21580_v53 = vpack.c.bf16 %v10188_v1, %v10184_v25  ;;  %v10729_v25 = vld [vmem:[%s22462_s2 + $0x88] sm:$0xff]  ;;  %v10731_v1 = vld [vmem:[%s22462_s2 + $0x98] sm:$0xff] }
 0x449   :  { %v19204_v26 = vpack.c.bf16 %v9711_v2, %v9699_v56  ;;  %v9676_v48 = vsub.f32 %v9674_v14, %v9675_v3  ;;  %v10182_v2 = vsel %vm264_vm0, %v21360_v37, 0 }
 0x44a   :  { %v10289_v41 = vand.u32 4294901760, %v21561_v52  ;;  %v10283_v38 = vand.u32 4294901760, %v21576_v7  ;;  %v19232_v29 = vpack.c.bf16 %v21561_v52, %v21559_v21 }
 0x44b   :  { %9472 = vmatmul.mubr.f32.vlgmr.msra.gmra.mrb[0].mxu0 %v21442_v60  ;;  %v9677_v5 = vand.u32 4294901760, %v9676_v48 }
 0x44c   :  { %19199 = vmatpush1.bf16.msra.mxu0 %v21459_v6  ;;  %9477 = vmatprep.mubr.f32.mxu0 %v22470_v49  ;;  %v9704_v6 = vsub.f32 %v21506_v18, %v9703_v44  ;;  %v10290_v56 = vsub.f32 %v21561_v52, %v10289_v41 }
 0x44d   :  { %19201 = vmatprep.subr.bf16.mxu0 %v21510_v55 }
 0x44e   :  { %v9705_v10 = vand.u32 4294901760, %v9704_v6 }
 0x44f   :  { %9479 = vmatmul.mubr.f32.gmra.mrb[2].mxu0 %v21455_v19 }
 0x450   :  { %9553 = vmatprep.mubr.f32.mxu0 %v22470_v49  ;;  %v19206_v47 = vpack.c.bf16 %v9717_v61, %v9705_v10 }
 0x453   :  { %9555 = vmatmul.mubr.f32.vlgmr.msra.gmra.mrb[0].mxu0 %v21442_v60  ;;  %v9688_v60 = vand.u32 4294901760, %v9687_v9 }
 0x454   :  { %19203 = vmatpush1.bf16.msra.mxu0 %v21529_v13  ;;  %9560 = vmatprep.mubr.f32.mxu0 %v22470_v49 }
 0x455   :  { %19205 = vmatprep.subr.bf16.mxu0 %v19204_v26  ;;  %v10291_v26 = vand.u32 4294901760, %v10290_v56 }
 0x457   :  { %9562 = vmatmul.mubr.f32.gmra.mrb[2].mxu0 %v21455_v19  ;;  %v19210_v19 = vpack.c.bf16 %v21508_v59, %v21506_v18  ;;  %v10190_v18 = vand.u32 4294901760, %v10150_v32  ;;  %v10277_v59 = vand.u32 4294901760, %v21559_v21 }
 0x458   :  { %9672 = vmatprep.mubr.f32.mxu0 %v22470_v49 }
 0x459   :  { %v21578_v44 = vsub.f32 %v10150_v32, %v10190_v18  ;;  %v21599_v37 = vpack.c.bf16 %v10190_v18, %v10186_v27  ;;  %v19240_v17 = vpack.c.bf16 %v10289_v41, %v10277_v59  ;;  %v10728_v27 = vld [vmem:[%s22462_s2 + $0x80] sm:$0xff]  ;;  %v10730_v18 = vld [vmem:[%s22462_s2 + $0x90] sm:$0xff] }
 0x45a   :  { %v10770_v41 = vand.u32 4294901760, %v10730_v18 }
 0x45b   :  { %9678 = vmatmul.mubr.f32.vlgmr.msra.gmra.mrb[0].mxu0 %v9677_v5  ;;  %v10295_v6 = vand.u32 4294901760, %v21578_v44 }
 0x45c   :  { %19207 = vmatpush1.bf16.msra.mxu0 %v19206_v47  ;;  %9683 = vmatprep.mubr.f32.mxu0 %v22470_v49  ;;  %v21648_v56 = vsub.f32 %v10730_v18, %v10770_v41  ;;  %v11310_v18 = vld [vmem:[%s22462_s2 + $0xb0] sm:$0xff] }
 0x45d   :  { %19209 = vmatprep.subr.bf16.mxu0 %v19208_v22  ;;  %v10296_v10 = vsub.f32 %v21578_v44, %v10295_v6  ;;  %v19242_v52 = vpack.c.bf16 %v10295_v6, %v10283_v38 }
 0x45f   :  { %9689 = vmatmul.mubr.f32.gmra.mrb[2].mxu0 %v9688_v60  ;;  %v10297_v5 = vand.u32 4294901760, %v10296_v10 }
 0x460   :  { %9779 = vmatprep.mubr.f32.mxu0 %v22470_v49 }
 0x463   :  { %9781 = vmatmul.mubr.f32.vlgmr.msra.gmra.mrb[0].mxu0 %v21512_v23 }
 0x464   :  { %19211 = vmatpush1.bf16.msra.mxu0 %v19210_v19  ;;  %9786 = vmatprep.mubr.f32.mxu0 %v22470_v49 }
 0x465   :  { %19213 = vmatprep.subr.bf16.mxu0 %v21510_v55 }
 0x467   :  { %9788 = vmatmul.mubr.f32.gmra.mrb[2].mxu0 %v21525_v31 }
 0x468   :  { %9866 = vmatprep.mubr.f32.mxu0 %v22470_v49 }
 0x46b   :  { %9869 = vmatmul.mubr.f32.vlgmr.msra.gmra.mrb[0].mxu0 %v9674_v14  ;;  %v21582_v14 = vand.u32 4294901760, %v10180_v51 }
 0x46c   :  { %19215 = vmatpush1.bf16.msra.mxu0 %v21529_v13  ;;  %9874 = vmatprep.mubr.f32.mxu0 %v22470_v49 }
 0x46d   :  { %19217 = vmatprep.subr.bf16.mxu0 %v19216_v39  ;;  %v10254_v16 = vsub.f32 %v10180_v51, %v21582_v14 }
 0x46f   :  { %9877 = vmatmul.mubr.f32.gmra.mrb[2].mxu0 %v9685_v24  ;;  %v21595_v24 = vand.u32 4294901760, %v10182_v2  ;;  %v10255_v61 = vand.u32 4294901760, %v10254_v16 }
 0x470   :  { %9951 = vmatprep.mubr.f32.mxu0 %v22470_v49 }
 0x471   :  { %v10256_v9 = vsub.f32 %v10254_v16, %v10255_v61 }
 0x473   :  { %9955 = vmatmul.mubr.f32.vlgmr.msra.gmra.mrb[0].mxu0 %v9675_v3  ;;  %v10257_v19 = vand.u32 4294901760, %v10256_v9 }
 0x474   :  { %19219 = vmatpush1.bf16.msra.mxu0 %v19218_v43  ;;  %9960 = vmatprep.mubr.f32.mxu0 %v22470_v49  ;;  %v10764_v43 = vand.u32 4294901760, %v10729_v25 }
 0x475   :  { %19221 = vmatprep.subr.bf16.mxu0 %v21510_v55  ;;  %v10278_v55 = vsub.f32 %v21559_v21, %v10277_v59  ;;  %v10768_v21 = vand.u32 4294901760, %v10731_v1  ;;  %v10766_v59 = vand.u32 4294901760, %v10728_v27 }
 0x476   :  { %v21629_v20 = vsub.f32 %v10729_v25, %v10764_v43  ;;  %v11309_v25 = vld [vmem:[%s22462_s2 + $0xa8] sm:$0xff] }
 0x477   :  { %9964 = vmatmul.mubr.f32.gmra.mrb[2].mxu0 %v9686_v45  ;;  %v10279_v3 = vand.u32 4294901760, %v10278_v55  ;;  %v10265_v45 = vsub.f32 %v10182_v2, %v21595_v24  ;;  %v21631_v32 = vsub.f32 %v10731_v1, %v10768_v21  ;;  %v21646_v55 = vsub.f32 %v10728_v27, %v10766_v59  ;;  %v11311_v1 = vld [vmem:[%s22462_s2 + $0xb8] sm:$0xff]  ;;  %v11308_v27 = vld [vmem:[%s22462_s2 + $0xa0] sm:$0xff] }
 0x478   :  { %10046 = vmatprep.mubr.f32.mxu0 %v22470_v49  ;;  %v10857_v51 = vand.u32 4294901760, %v21629_v20  ;;  %v21650_v2 = vpack.c.bf16 %v10768_v21, %v10764_v43  ;;  %v11344_v43 = vand.u32 4294901760, %v11309_v25  ;;  %v11348_v21 = vand.u32 4294901760, %v11311_v1 }
 0x479   :  { %v19228_v48 = vpack.c.bf16 %v10291_v26, %v10279_v3  ;;  %v10266_v22 = vand.u32 4294901760, %v10265_v45  ;;  %v10875_v3 = vand.u32 4294901760, %v21648_v56 }
 0x47b   :  { %10048 = vmatmul.mubr.f32.vlgmr.msra.gmra.mrb[0].mxu0 %v21512_v23  ;;  %v10267_v39 = vsub.f32 %v10265_v45, %v10266_v22 }
 0x47c   :  { %19223 = vmatpush1.bf16.msra.mxu0 %v21529_v13  ;;  %10053 = vmatprep.mubr.f32.mxu0 %v22470_v49  ;;  %v10284_v13 = vsub.f32 %v21576_v7, %v10283_v38 }
 0x47d   :  { %19225 = vmatprep.subr.bf16.mxu0 %v21580_v53 }
 0x47e   :  { %v10285_v47 = vand.u32 4294901760, %v10284_v13 }
 0x47f   :  { %10055 = vmatmul.mubr.f32.gmra.mrb[2].mxu0 %v21525_v31 }
 0x480   :  { %10129 = vmatprep.mubr.f32.mxu0 %v22470_v49  ;;  %v19230_v60 = vpack.c.bf16 %v10297_v5, %v10285_v47 }
 0x483   :  { %10131 = vmatmul.mubr.f32.vlgmr.msra.gmra.mrb[0].mxu0 %v21512_v23  ;;  %v10268_v23 = vand.u32 4294901760, %v10267_v39 }
 0x484   :  { %19227 = vmatpush1.bf16.msra.mxu0 %v21599_v37  ;;  %10136 = vmatprep.mubr.f32.mxu0 %v22470_v49 }
 0x485   :  { %19229 = vmatprep.subr.bf16.mxu0 %v19228_v48  ;;  %v10876_v48 = vsub.f32 %v21648_v56, %v10875_v3 }
 0x487   :  { %10138 = vmatmul.mubr.f32.gmra.mrb[2].mxu0 %v21525_v31  ;;  %v19234_v31 = vpack.c.bf16 %v21578_v44, %v21576_v7  ;;  %v10869_v7 = vand.u32 4294901760, %v21631_v32  ;;  %v10760_v44 = vsel %vm264_vm0, %v21001_v50, 0  ;;  %v10863_v50 = vand.u32 4294901760, %v21646_v55 }
 0x488   :  { %10252 = vmatprep.mubr.f32.mxu0 %v22470_v49  ;;  %v21652_v38 = vand.u32 4294901760, %v10760_v44 }
 0x489   :  { %v10870_v6 = vsub.f32 %v21631_v32, %v10869_v7 }
 0x48a   :  { %v10834_v26 = vsub.f32 %v10760_v44, %v21652_v38  ;;  %v11340_v44 = vsel %vm264_vm0, %v21015_v0, 0 }
 0x48b   :  { %10258 = vmatmul.mubr.f32.vlgmr.msra.gmra.mrb[0].mxu0 %v10257_v19  ;;  %v10871_v10 = vand.u32 4294901760, %v10870_v6  ;;  %v21722_v6 = vand.u32 4294901760, %v11340_v44 }
 0x48c   :  { %19231 = vmatpush1.bf16.msra.mxu0 %v19230_v60  ;;  %10263 = vmatprep.mubr.f32.mxu0 %v22470_v49 }
 0x48d   :  { %19233 = vmatprep.subr.bf16.mxu0 %v19232_v29 }
 0x48f   :  { %10269 = vmatmul.mubr.f32.gmra.mrb[2].mxu0 %v10268_v23 }
 0x490   :  { %10359 = vmatprep.mubr.f32.mxu0 %v22470_v49 }
 0x493   :  { %10361 = vmatmul.mubr.f32.vlgmr.msra.gmra.mrb[0].mxu0 %v21582_v14 }
 0x494   :  { %19235 = vmatpush1.bf16.msra.mxu0 %v19234_v31  ;;  %10366 = vmatprep.mubr.f32.mxu0 %v22470_v49  ;;  %v19256_v31 = vpack.c.bf16 %v21631_v32, %v21629_v20  ;;  %v21701_v32 = vsub.f32 %v11311_v1, %v11348_v21 }
 0x495   :  { %19237 = vmatprep.subr.bf16.mxu0 %v21580_v53 }
 0x497   :  { %10368 = vmatmul.mubr.f32.gmra.mrb[2].mxu0 %v21595_v24 }
 0x498   :  { %10446 = vmatprep.mubr.f32.mxu0 %v22470_v49 }
 0x49b   :  { %10449 = vmatmul.mubr.f32.vlgmr.msra.gmra.mrb[0].mxu0 %v10254_v16  ;;  %v10762_v16 = vsel %vm264_vm0, %v21363_v28, 0  ;;  %v21669_v28 = vpack.c.bf16 %v10770_v41, %v10766_v59  ;;  %v11346_v59 = vand.u32 4294901760, %v11308_v27  ;;  %v11350_v41 = vand.u32 4294901760, %v11310_v18 }
 0x49c   :  { %19239 = vmatpush1.bf16.msra.mxu0 %v21599_v37  ;;  %10454 = vmatprep.mubr.f32.mxu0 %v22470_v49 }
 0x49d   :  { %19241 = vmatprep.subr.bf16.mxu0 %v19240_v17  ;;  %v19264_v17 = vpack.c.bf16 %v10869_v7, %v10857_v51  ;;  %v11449_v7 = vand.u32 4294901760, %v21701_v32 }
 0x49f   :  { %10457 = vmatmul.mubr.f32.gmra.mrb[2].mxu0 %v10265_v45  ;;  %v10835_v45 = vand.u32 4294901760, %v10834_v26 }
 0x4a0   :  { %10531 = vmatprep.mubr.f32.mxu0 %v22470_v49 }
 0x4a1   :  { %v10836_v60 = vsub.f32 %v10834_v26, %v10835_v45 }
 0x4a3   :  { %10535 = vmatmul.mubr.f32.vlgmr.msra.gmra.mrb[0].mxu0 %v10255_v61  ;;  %v21665_v61 = vand.u32 4294901760, %v10762_v16  ;;  %v10837_v29 = vand.u32 4294901760, %v10836_v60 }
 0x4a4   :  { %19243 = vmatpush1.bf16.msra.mxu0 %v19242_v52  ;;  %10540 = vmatprep.mubr.f32.mxu0 %v22470_v49  ;;  %v19266_v52 = vpack.c.bf16 %v10875_v3, %v10863_v50 }
 0x4a5   :  { %19245 = vmatprep.subr.bf16.mxu0 %v21580_v53  ;;  %v10858_v53 = vsub.f32 %v21629_v20, %v10857_v51  ;;  %v10845_v5 = vsub.f32 %v10762_v16, %v21665_v61  ;;  %v21699_v20 = vsub.f32 %v11309_v25, %v11344_v43  ;;  %v11450_v16 = vsub.f32 %v21701_v32, %v11449_v7 }
 0x4a7   :  { %10544 = vmatmul.mubr.f32.gmra.mrb[2].mxu0 %v10266_v22  ;;  %v10859_v13 = vand.u32 4294901760, %v10858_v53  ;;  %v10877_v22 = vand.u32 4294901760, %v10876_v48  ;;  %v10846_v19 = vand.u32 4294901760, %v10845_v5  ;;  %v11437_v51 = vand.u32 4294901760, %v21699_v20 }
 0x4a8   :  { %10626 = vmatprep.mubr.f32.mxu0 %v22470_v49  ;;  %v21720_v53 = vpack.c.bf16 %v11348_v21, %v11344_v43 }
 0x4a9   :  { %v19252_v47 = vpack.c.bf16 %v10871_v10, %v10859_v13  ;;  %v10847_v23 = vsub.f32 %v10845_v5, %v10846_v19  ;;  %v11451_v10 = vand.u32 4294901760, %v11450_v16  ;;  %v11922_v16 = vsel %vm264_vm0, %v21369_v30, 0 }
 0x4ab   :  { %10628 = vmatmul.mubr.f32.vlgmr.msra.gmra.mrb[0].mxu0 %v21582_v14 }
 0x4ac   :  { %19247 = vmatpush1.bf16.msra.mxu0 %v21599_v37  ;;  %10633 = vmatprep.mubr.f32.mxu0 %v22470_v49  ;;  %v10864_v37 = vsub.f32 %v21646_v55, %v10863_v50  ;;  %v11342_v50 = vsel %vm264_vm0, %v21366_v15, 0  ;;  %v21739_v15 = vpack.c.bf16 %v11350_v41, %v11346_v59 }
 0x4ad   :  { %19249 = vmatprep.subr.bf16.mxu0 %v21650_v2 }
 0x4ae   :  { %v10865_v9 = vand.u32 4294901760, %v10864_v37  ;;  %v21735_v37 = vand.u32 4294901760, %v11342_v50 }
 0x4af   :  { %10635 = vmatmul.mubr.f32.gmra.mrb[2].mxu0 %v21595_v24 }
 0x4b0   :  { %10709 = vmatprep.mubr.f32.mxu0 %v22470_v49  ;;  %v19254_v39 = vpack.c.bf16 %v10877_v22, %v10865_v9 }
 0x4b3   :  { %10711 = vmatmul.mubr.f32.vlgmr.msra.gmra.mrb[0].mxu0 %v21582_v14  ;;  %v10848_v14 = vand.u32 4294901760, %v10847_v23 }
 0x4b4   :  { %19251 = vmatpush1.bf16.msra.mxu0 %v21669_v28  ;;  %10716 = vmatprep.mubr.f32.mxu0 %v22470_v49 }
 0x4b5   :  { %19253 = vmatprep.subr.bf16.mxu0 %v19252_v47 }
 0x4b7   :  { %10718 = vmatmul.mubr.f32.gmra.mrb[2].mxu0 %v21595_v24  ;;  %v19258_v24 = vpack.c.bf16 %v21648_v56, %v21646_v55  ;;  %v21716_v55 = vsub.f32 %v11308_v27, %v11346_v59  ;;  %v21718_v56 = vsub.f32 %v11310_v18, %v11350_v41 }
 0x4b8   :  { %10832 = vmatprep.mubr.f32.mxu0 %v22470_v49 }
 0x4b9   :  { %v11443_v0 = vand.u32 4294901760, %v21716_v55  ;;  %v11455_v3 = vand.u32 4294901760, %v21718_v56 }
 0x4bb   :  { %10838 = vmatmul.mubr.f32.vlgmr.msra.gmra.mrb[0].mxu0 %v10837_v29  ;;  %v11456_v48 = vsub.f32 %v21718_v56, %v11455_v3  ;;  %v19290_v43 = vpack.c.bf16 %v11455_v3, %v11443_v0 }
 0x4bc   :  { %19255 = vmatpush1.bf16.msra.mxu0 %v19254_v39  ;;  %10843 = vmatprep.mubr.f32.mxu0 %v22470_v49 }
 0x4bd   :  { %19257 = vmatprep.subr.bf16.mxu0 %v19256_v31  ;;  %v11457_v22 = vand.u32 4294901760, %v11456_v48  ;;  %v19280_v31 = vpack.c.bf16 %v21701_v32, %v21699_v20  ;;  %v11890_v32 = vld [vmem:[%s22462_s2 + $0xd0] sm:$0xff] }
 0x4be   :  { %v11930_v18 = vand.u32 4294901760, %v11890_v32 }
 0x4bf   :  { %10849 = vmatmul.mubr.f32.gmra.mrb[2].mxu0 %v10848_v14  ;;  %v19288_v14 = vpack.c.bf16 %v11449_v7, %v11437_v51 }
 0x4c0   :  { %10939 = vmatprep.mubr.f32.mxu0 %v22470_v49 }
 0x4c3   :  { %10941 = vmatmul.mubr.f32.vlgmr.msra.gmra.mrb[0].mxu0 %v21652_v38 }
 0x4c4   :  { %19259 = vmatpush1.bf16.msra.mxu0 %v19258_v24  ;;  %10946 = vmatprep.mubr.f32.mxu0 %v22470_v49  ;;  %v11889_v24 = vld [vmem:[%s22462_s2 + $0xc8] sm:$0xff] }
 0x4c5   :  { %19261 = vmatprep.subr.bf16.mxu0 %v21650_v2  ;;  %v11924_v25 = vand.u32 4294901760, %v11889_v24 }
 0x4c7   :  { %10948 = vmatmul.mubr.f32.gmra.mrb[2].mxu0 %v21665_v61  ;;  %v21769_v21 = vsub.f32 %v11889_v24, %v11924_v25 }
 0x4c8   :  { %11026 = vmatprep.mubr.f32.mxu0 %v22470_v49 }
 0x4c9   :  { %v12017_v59 = vand.u32 4294901760, %v21769_v21 }
 0x4cb   :  { %11029 = vmatmul.mubr.f32.vlgmr.msra.gmra.mrb[0].mxu0 %v10834_v26  ;;  %v11414_v26 = vsub.f32 %v11340_v44, %v21722_v6  ;;  %v21788_v44 = vsub.f32 %v11890_v32, %v11930_v18 }
 0x4cc   :  { %19263 = vmatpush1.bf16.msra.mxu0 %v21669_v28  ;;  %11034 = vmatprep.mubr.f32.mxu0 %v22470_v49 }
 0x4cd   :  { %19265 = vmatprep.subr.bf16.mxu0 %v19264_v17  ;;  %v11891_v17 = vld [vmem:[%s22462_s2 + $0xd8] sm:$0xff] }
 0x4ce   :  { %v11928_v1 = vand.u32 4294901760, %v11891_v17 }
 0x4cf   :  { %11037 = vmatmul.mubr.f32.gmra.mrb[2].mxu0 %v10845_v5  ;;  %v11425_v5 = vsub.f32 %v11342_v50, %v21735_v37  ;;  %v12035_v50 = vand.u32 4294901760, %v21788_v44 }
 0x4d0   :  { %11111 = vmatprep.mubr.f32.mxu0 %v22470_v49 }
 0x4d3   :  { %11115 = vmatmul.mubr.f32.vlgmr.msra.gmra.mrb[0].mxu0 %v10835_v45  ;;  %v11415_v45 = vand.u32 4294901760, %v11414_v26 }
 0x4d4   :  { %19267 = vmatpush1.bf16.msra.mxu0 %v19266_v52  ;;  %11120 = vmatprep.mubr.f32.mxu0 %v22470_v49  ;;  %v21771_v52 = vsub.f32 %v11891_v17, %v11928_v1 }
 0x4d5   :  { %19269 = vmatprep.subr.bf16.mxu0 %v21650_v2  ;;  %v11438_v2 = vsub.f32 %v21699_v20, %v11437_v51  ;;  %v11416_v60 = vsub.f32 %v11414_v26, %v11415_v45  ;;  %v11888_v20 = vld [vmem:[%s22462_s2 + $0xc0] sm:$0xff]  ;;  %v11920_v51 = vsel %vm264_vm0, %v21026_v12, 0 }
 0x4d6   :  { %v11926_v27 = vand.u32 4294901760, %v11888_v20  ;;  %v12029_v41 = vand.u32 4294901760, %v21771_v52 }
 0x4d7   :  { %11124 = vmatmul.mubr.f32.gmra.mrb[2].mxu0 %v10846_v19  ;;  %v11439_v13 = vand.u32 4294901760, %v11438_v2  ;;  %v11426_v19 = vand.u32 4294901760, %v11425_v5  ;;  %v11417_v29 = vand.u32 4294901760, %v11416_v60 }
 0x4d8   :  { %11206 = vmatprep.mubr.f32.mxu0 %v22470_v49  ;;  %v21786_v7 = vsub.f32 %v11888_v20, %v11926_v27  ;;  %v12030_v2 = vsub.f32 %v21771_v52, %v12029_v41  ;;  %v21809_v30 = vpack.c.bf16 %v11930_v18, %v11926_v27  ;;  %v12500_v27 = vsel %vm264_vm0, %v21041_v40, 0 }
 0x4d9   :  { %v19276_v47 = vpack.c.bf16 %v11451_v10, %v11439_v13  ;;  %v11427_v23 = vsub.f32 %v11425_v5, %v11426_v19  ;;  %v21805_v13 = vand.u32 4294901760, %v11922_v16 }
 0x4da   :  { %v12023_v12 = vand.u32 4294901760, %v21786_v7 }
 0x4db   :  { %11208 = vmatmul.mubr.f32.vlgmr.msra.gmra.mrb[0].mxu0 %v21652_v38 }
 0x4dc   :  { %19271 = vmatpush1.bf16.msra.mxu0 %v21669_v28  ;;  %11213 = vmatprep.mubr.f32.mxu0 %v22470_v49  ;;  %v11444_v28 = vsub.f32 %v21716_v55, %v11443_v0  ;;  %v12024_v10 = vsub.f32 %v21786_v7, %v12023_v12  ;;  %v19314_v24 = vpack.c.bf16 %v12035_v50, %v12023_v12 }
 0x4dd   :  { %19273 = vmatprep.subr.bf16.mxu0 %v21720_v53 }
 0x4de   :  { %v11445_v9 = vand.u32 4294901760, %v11444_v28 }
 0x4df   :  { %11215 = vmatmul.mubr.f32.gmra.mrb[2].mxu0 %v21665_v61 }
 0x4e0   :  { %11289 = vmatprep.mubr.f32.mxu0 %v22470_v49  ;;  %v19278_v39 = vpack.c.bf16 %v11457_v22, %v11445_v9 }
 0x4e3   :  { %11291 = vmatmul.mubr.f32.vlgmr.msra.gmra.mrb[0].mxu0 %v21652_v38  ;;  %v11428_v38 = vand.u32 4294901760, %v11427_v23  ;;  %v19312_v23 = vpack.c.bf16 %v12029_v41, %v12017_v59 }
 0x4e4   :  { %19275 = vmatpush1.bf16.msra.mxu0 %v21739_v15  ;;  %11296 = vmatprep.mubr.f32.mxu0 %v22470_v49 }
 0x4e5   :  { %19277 = vmatprep.subr.bf16.mxu0 %v19276_v47  ;;  %v12025_v47 = vand.u32 4294901760, %v12024_v10 }
 0x4e7   :  { %11298 = vmatmul.mubr.f32.gmra.mrb[2].mxu0 %v21665_v61  ;;  %v19282_v61 = vpack.c.bf16 %v21718_v56, %v21716_v55  ;;  %v21790_v55 = vpack.c.bf16 %v11928_v1, %v11924_v25  ;;  %v21792_v56 = vand.u32 4294901760, %v11920_v51  ;;  %v12468_v1 = vld [vmem:[%s22462_s2 + $0xe0] sm:$0xff] }
 0x4e8   :  { %11412 = vmatprep.mubr.f32.mxu0 %v22470_v49 }
 0x4e9   :  { %v11994_v0 = vsub.f32 %v11920_v51, %v21792_v56  ;;  %v21862_v51 = vand.u32 4294901760, %v12500_v27 }
 0x4eb   :  { %11418 = vmatmul.mubr.f32.vlgmr.msra.gmra.mrb[0].mxu0 %v11417_v29  ;;  %v11995_v28 = vand.u32 4294901760, %v11994_v0  ;;  %v19304_v29 = vpack.c.bf16 %v21771_v52, %v21769_v21 }
 0x4ec   :  { %19279 = vmatpush1.bf16.msra.mxu0 %v19278_v39  ;;  %11423 = vmatprep.mubr.f32.mxu0 %v22470_v49 }
 0x4ed   :  { %19281 = vmatprep.subr.bf16.mxu0 %v19280_v31  ;;  %v11996_v9 = vsub.f32 %v11994_v0, %v11995_v28  ;;  %v12469_v31 = vld [vmem:[%s22462_s2 + $0xe8] sm:$0xff] }
 0x4ef   :  { %11429 = vmatmul.mubr.f32.gmra.mrb[2].mxu0 %v11428_v38  ;;  %v12471_v38 = vld [vmem:[%s22462_s2 + $0xf8] sm:$0xff] }
 0x4f0   :  { %11519 = vmatprep.mubr.f32.mxu0 %v22470_v49 }
 0x4f3   :  { %11521 = vmatmul.mubr.f32.vlgmr.msra.gmra.mrb[0].mxu0 %v21722_v6 }
 0x4f4   :  { %19283 = vmatpush1.bf16.msra.mxu0 %v19282_v61  ;;  %11526 = vmatprep.mubr.f32.mxu0 %v22470_v49  ;;  %v12504_v61 = vand.u32 4294901760, %v12469_v31 }
 0x4f5   :  { %19285 = vmatprep.subr.bf16.mxu0 %v21720_v53 }
 0x4f6   :  { %v21839_v17 = vsub.f32 %v12469_v31, %v12504_v61 }
 0x4f7   :  { %11528 = vmatmul.mubr.f32.gmra.mrb[2].mxu0 %v21735_v37 }
 0x4f8   :  { %11606 = vmatprep.mubr.f32.mxu0 %v22470_v49  ;;  %v12597_v20 = vand.u32 4294901760, %v21839_v17 }
 0x4fb   :  { %11609 = vmatmul.mubr.f32.vlgmr.msra.gmra.mrb[0].mxu0 %v11414_v26  ;;  %v12031_v26 = vand.u32 4294901760, %v12030_v2  ;;  %v12574_v2 = vsub.f32 %v12500_v27, %v21862_v51 }
 0x4fc   :  { %19287 = vmatpush1.bf16.msra.mxu0 %v21739_v15  ;;  %11614 = vmatprep.mubr.f32.mxu0 %v22470_v49 }
 0x4fd   :  { %19289 = vmatprep.subr.bf16.mxu0 %v19288_v14  ;;  %v12508_v14 = vand.u32 4294901760, %v12471_v38 }
 0x4ff   :  { %11617 = vmatmul.mubr.f32.gmra.mrb[2].mxu0 %v11425_v5  ;;  %v21841_v25 = vsub.f32 %v12471_v38, %v12508_v14  ;;  %v21860_v41 = vpack.c.bf16 %v12508_v14, %v12504_v61  ;;  %v13048_v38 = vld [vmem:[%s22462_s2 + $0x100] sm:$0xff]  ;;  %v13050_v61 = vld [vmem:[%s22462_s2 + $0x110] sm:$0xff] }
 0x500   :  { %11691 = vmatprep.mubr.f32.mxu0 %v22470_v49  ;;  %v13102_v14 = vand.u32 4294901760, %v13048_v38 }
 0x501   :  { %v12609_v32 = vand.u32 4294901760, %v21841_v25 }
 0x503   :  { %11695 = vmatmul.mubr.f32.vlgmr.msra.gmra.mrb[0].mxu0 %v11415_v45  ;;  %v12005_v45 = vsub.f32 %v11922_v16, %v21805_v13 }
 0x504   :  { %19291 = vmatpush1.bf16.msra.mxu0 %v19290_v43  ;;  %11700 = vmatprep.mubr.f32.mxu0 %v22470_v49  ;;  %v12470_v43 = vld [vmem:[%s22462_s2 + $0xf0] sm:$0xff] }
 0x505   :  { %19293 = vmatprep.subr.bf16.mxu0 %v21720_v53  ;;  %v12018_v53 = vsub.f32 %v21769_v21, %v12017_v59  ;;  %v12006_v22 = vand.u32 4294901760, %v12005_v45  ;;  %v12506_v21 = vand.u32 4294901760, %v12468_v1  ;;  %v12510_v52 = vand.u32 4294901760, %v12470_v43 }
 0x507   :  { %11704 = vmatmul.mubr.f32.gmra.mrb[2].mxu0 %v11426_v19  ;;  %v12019_v3 = vand.u32 4294901760, %v12018_v53  ;;  %v11997_v19 = vand.u32 4294901760, %v11996_v9  ;;  %v12007_v39 = vsub.f32 %v12005_v45, %v12006_v22  ;;  %v21856_v18 = vsub.f32 %v12468_v1, %v12506_v21 }
 0x508   :  { %11786 = vmatprep.mubr.f32.mxu0 %v22470_v49  ;;  %v21858_v59 = vsub.f32 %v12470_v43, %v12510_v52  ;;  %v13096_v1 = vsel %vm264_vm0, %v21045_v62, 0  ;;  %v21926_v43 = vsub.f32 %v13048_v38, %v13102_v14 }
 0x509   :  { %v19300_v48 = vpack.c.bf16 %v12031_v26, %v12019_v3  ;;  %v12603_v40 = vand.u32 4294901760, %v21856_v18  ;;  %v12575_v26 = vand.u32 4294901760, %v12574_v2 }
 0x50a   :  { %v12615_v53 = vand.u32 4294901760, %v21858_v59  ;;  %v13199_v62 = vand.u32 4294901760, %v21926_v43 }
 0x50b   :  { %11788 = vmatmul.mubr.f32.vlgmr.msra.gmra.mrb[0].mxu0 %v21722_v6 }
 0x50c   :  { %19295 = vmatpush1.bf16.msra.mxu0 %v21739_v15  ;;  %11793 = vmatprep.mubr.f32.mxu0 %v22470_v49  ;;  %v12036_v15 = vsub.f32 %v21788_v44, %v12035_v50  ;;  %v12616_v3 = vsub.f32 %v21858_v59, %v12615_v53 }
 0x50d   :  { %19297 = vmatprep.subr.bf16.mxu0 %v21790_v55 }
 0x50e   :  { %v12037_v5 = vand.u32 4294901760, %v12036_v15 }
 0x50f   :  { %11795 = vmatmul.mubr.f32.gmra.mrb[2].mxu0 %v21735_v37 }
 0x510   :  { %11869 = vmatprep.mubr.f32.mxu0 %v22470_v49  ;;  %v19302_v60 = vpack.c.bf16 %v12037_v5, %v12025_v47 }
 0x513   :  { %11871 = vmatmul.mubr.f32.vlgmr.msra.gmra.mrb[0].mxu0 %v21722_v6  ;;  %v12008_v6 = vand.u32 4294901760, %v12007_v39  ;;  %v13051_v39 = vld [vmem:[%s22462_s2 + $0x118] sm:$0xff] }
 0x514   :  { %19299 = vmatpush1.bf16.msra.mxu0 %v21809_v30  ;;  %11876 = vmatprep.mubr.f32.mxu0 %v22470_v49 }
 0x515   :  { %19301 = vmatprep.subr.bf16.mxu0 %v19300_v48  ;;  %v12576_v48 = vsub.f32 %v12574_v2, %v12575_v26 }
 0x517   :  { %11878 = vmatmul.mubr.f32.gmra.mrb[2].mxu0 %v21735_v37  ;;  %v19306_v37 = vpack.c.bf16 %v21788_v44, %v21786_v7  ;;  %v12598_v7 = vsub.f32 %v21839_v17, %v12597_v20  ;;  %v12610_v44 = vsub.f32 %v21841_v25, %v12609_v32  ;;  %v12577_v5 = vand.u32 4294901760, %v12576_v48 }
 0x518   :  { %11992 = vmatprep.mubr.f32.mxu0 %v22470_v49 }
 0x519   :  { %v12599_v16 = vand.u32 4294901760, %v12598_v7  ;;  %v12611_v12 = vand.u32 4294901760, %v12610_v44 }
 0x51b   :  { %11998 = vmatmul.mubr.f32.vlgmr.msra.gmra.mrb[0].mxu0 %v11997_v19  ;;  %v13049_v19 = vld [vmem:[%s22462_s2 + $0x108] sm:$0xff] }
 0x51c   :  { %19303 = vmatpush1.bf16.msra.mxu0 %v19302_v60  ;;  %12003 = vmatprep.mubr.f32.mxu0 %v22470_v49  ;;  %v19336_v60 = vpack.c.bf16 %v12609_v32, %v12597_v20  ;;  %v21932_v20 = vand.u32 4294901760, %v13096_v1 }
 0x51d   :  { %19305 = vmatprep.subr.bf16.mxu0 %v19304_v29  ;;  %v13100_v29 = vand.u32 4294901760, %v13049_v19 }
 0x51f   :  { %12009 = vmatmul.mubr.f32.gmra.mrb[2].mxu0 %v12008_v6  ;;  %v13104_v6 = vand.u32 4294901760, %v13051_v39 }
 0x520   :  { %12099 = vmatprep.mubr.f32.mxu0 %v22470_v49 }
 0x521   :  { %v21911_v31 = vsub.f32 %v13051_v39, %v13104_v6 }
 0x523   :  { %12101 = vmatmul.mubr.f32.vlgmr.msra.gmra.mrb[0].mxu0 %v21792_v56 }
 0x524   :  { %19307 = vmatpush1.bf16.msra.mxu0 %v19306_v37  ;;  %12106 = vmatprep.mubr.f32.mxu0 %v22470_v49  ;;  %v19338_v37 = vpack.c.bf16 %v12615_v53, %v12603_v40 }
 0x525   :  { %19309 = vmatprep.subr.bf16.mxu0 %v21790_v55 }
 0x527   :  { %12108 = vmatmul.mubr.f32.gmra.mrb[2].mxu0 %v21805_v13 }
 0x528   :  { %12186 = vmatprep.mubr.f32.mxu0 %v22470_v49 }
 0x52b   :  { %12189 = vmatmul.mubr.f32.vlgmr.msra.gmra.mrb[0].mxu0 %v11994_v0  ;;  %v12604_v0 = vsub.f32 %v21856_v18, %v12603_v40  ;;  %v13200_v40 = vsub.f32 %v21926_v43, %v13199_v62 }
 0x52c   :  { %19311 = vmatpush1.bf16.msra.mxu0 %v21809_v30  ;;  %12194 = vmatprep.mubr.f32.mxu0 %v22470_v49 }
 0x52d   :  { %19313 = vmatprep.subr.bf16.mxu0 %v19312_v23  ;;  %v12605_v15 = vand.u32 4294901760, %v12604_v0  ;;  %v21909_v23 = vsub.f32 %v13049_v19, %v13100_v29  ;;  %v13646_v19 = vld [vmem:[%s22462_s2 + $0x130] sm:$0xff] }
 0x52f   :  { %12197 = vmatmul.mubr.f32.gmra.mrb[2].mxu0 %v12005_v45 }
 0x530   :  { %12271 = vmatprep.mubr.f32.mxu0 %v22470_v49 }
 0x533   :  { %12275 = vmatmul.mubr.f32.vlgmr.msra.gmra.mrb[0].mxu0 %v11995_v28  ;;  %v12617_v28 = vand.u32 4294901760, %v12616_v3 }
 0x534   :  { %19315 = vmatpush1.bf16.msra.mxu0 %v19314_v24  ;;  %12280 = vmatprep.mubr.f32.mxu0 %v22470_v49  ;;  %v13106_v24 = vand.u32 4294901760, %v13050_v61 }
 0x535   :  { %19317 = vmatprep.subr.bf16.mxu0 %v21790_v55  ;;  %v12502_v55 = vsel %vm264_vm0, %v21347_v35, 0  ;;  %v21879_v35 = vpack.c.bf16 %v12510_v52, %v12506_v21  ;;  %v19326_v47 = vpack.c.bf16 %v12617_v28, %v12605_v15  ;;  %v21930_v52 = vpack.c.bf16 %v13104_v6, %v13100_v29 }
 0x536   :  { %v21875_v50 = vand.u32 4294901760, %v12502_v55  ;;  %v21928_v21 = vsub.f32 %v13050_v61, %v13106_v24  ;;  %v19352_v28 = vpack.c.bf16 %v21911_v31, %v21909_v23  ;;  %v13686_v29 = vand.u32 4294901760, %v13646_v19 }
 0x537   :  { %12284 = vmatmul.mubr.f32.gmra.mrb[2].mxu0 %v12006_v22  ;;  %v19328_v22 = vpack.c.bf16 %v21841_v25, %v21839_v17  ;;  %v13193_v17 = vand.u32 4294901760, %v21909_v23  ;;  %v13205_v25 = vand.u32 4294901760, %v21911_v31 }
 0x538   :  { %12366 = vmatprep.mubr.f32.mxu0 %v22470_v49  ;;  %v12585_v10 = vsub.f32 %v12502_v55, %v21875_v50  ;;  %v21998_v38 = vsub.f32 %v13646_v19, %v13686_v29 }
 0x539   :  { %v13194_v32 = vsub.f32 %v21909_v23, %v13193_v17  ;;  %v13206_v27 = vsub.f32 %v21911_v31, %v13205_v25  ;;  %v19360_v48 = vpack.c.bf16 %v13205_v25, %v13193_v17  ;;  %v13676_v23 = vsel %vm264_vm0, %v21056_v63, 0 }
 0x53a   :  { %v12586_v45 = vand.u32 4294901760, %v12585_v10  ;;  %v13678_v25 = vsel %vm264_vm0, %v21376_v58, 0 }
 0x53b   :  { %12368 = vmatmul.mubr.f32.vlgmr.msra.gmra.mrb[0].mxu0 %v21792_v56  ;;  %v13195_v7 = vand.u32 4294901760, %v13194_v32  ;;  %v13207_v44 = vand.u32 4294901760, %v13206_v27  ;;  %v22015_v32 = vand.u32 4294901760, %v13678_v25 }
 0x53c   :  { %19319 = vmatpush1.bf16.msra.mxu0 %v21809_v30  ;;  %12373 = vmatprep.mubr.f32.mxu0 %v22470_v49  ;;  %v19324_v30 = vpack.c.bf16 %v12611_v12, %v12599_v16  ;;  %v12587_v9 = vsub.f32 %v12585_v10, %v12586_v45 }
 0x53d   :  { %19321 = vmatprep.subr.bf16.mxu0 %v21860_v41  ;;  %v19348_v16 = vpack.c.bf16 %v13207_v44, %v13195_v7 }
 0x53f   :  { %12375 = vmatmul.mubr.f32.gmra.mrb[2].mxu0 %v21805_v13 }
 0x540   :  { %12449 = vmatprep.mubr.f32.mxu0 %v22470_v49 }
 0x543   :  { %12451 = vmatmul.mubr.f32.vlgmr.msra.gmra.mrb[0].mxu0 %v21792_v56  ;;  %v12588_v56 = vand.u32 4294901760, %v12587_v9 }
 0x544   :  { %19323 = vmatpush1.bf16.msra.mxu0 %v21879_v35  ;;  %12456 = vmatprep.mubr.f32.mxu0 %v22470_v49 }
 0x545   :  { %19325 = vmatprep.subr.bf16.mxu0 %v19324_v30 }
 0x547   :  { %12458 = vmatmul.mubr.f32.gmra.mrb[2].mxu0 %v21805_v13  ;;  %v19330_v13 = vpack.c.bf16 %v21858_v59, %v21856_v18  ;;  %v13098_v18 = vsel %vm264_vm0, %v21373_v4, 0  ;;  %v13211_v59 = vand.u32 4294901760, %v21928_v21  ;;  %v21949_v4 = vpack.c.bf16 %v13106_v24, %v13102_v14 }
 0x548   :  { %12572 = vmatprep.mubr.f32.mxu0 %v22470_v49  ;;  %v21945_v55 = vand.u32 4294901760, %v13098_v18  ;;  %v22002_v14 = vand.u32 4294901760, %v13676_v23 }
 0x549   :  { %v13212_v53 = vsub.f32 %v21928_v21, %v13211_v59 }
 0x54a   :  { %v13181_v12 = vsub.f32 %v13098_v18, %v21945_v55 }
 0x54b   :  { %12578 = vmatmul.mubr.f32.vlgmr.msra.gmra.mrb[0].mxu0 %v12577_v5  ;;  %v13213_v0 = vand.u32 4294901760, %v13212_v53 }
 0x54c   :  { %19327 = vmatpush1.bf16.msra.mxu0 %v19326_v47  ;;  %12583 = vmatprep.mubr.f32.mxu0 %v22470_v49  ;;  %v13647_v47 = vld [vmem:[%s22462_s2 + $0x138] sm:$0xff] }
 0x54d   :  { %19329 = vmatprep.subr.bf16.mxu0 %v19328_v22  ;;  %v13684_v9 = vand.u32 4294901760, %v13647_v47  ;;  %v19362_v22 = vpack.c.bf16 %v13211_v59, %v13199_v62 }
 0x54f   :  { %12589 = vmatmul.mubr.f32.gmra.mrb[2].mxu0 %v12588_v56 }
 0x550   :  { %12679 = vmatprep.mubr.f32.mxu0 %v22470_v49 }
 0x553   :  { %12681 = vmatmul.mubr.f32.vlgmr.msra.gmra.mrb[0].mxu0 %v21862_v51 }
 0x554   :  { %19331 = vmatpush1.bf16.msra.mxu0 %v19330_v13  ;;  %12686 = vmatprep.mubr.f32.mxu0 %v22470_v49  ;;  %v21981_v13 = vsub.f32 %v13647_v47, %v13684_v9 }
 0x555   :  { %19333 = vmatprep.subr.bf16.mxu0 %v21860_v41 }
 0x557   :  { %12688 = vmatmul.mubr.f32.gmra.mrb[2].mxu0 %v21875_v50 }
 0x558   :  { %12766 = vmatprep.mubr.f32.mxu0 %v22470_v49 }
 0x55b   :  { %12769 = vmatmul.mubr.f32.vlgmr.msra.gmra.mrb[0].mxu0 %v12574_v2 }
 0x55c   :  { %19335 = vmatpush1.bf16.msra.mxu0 %v21879_v35  ;;  %12774 = vmatprep.mubr.f32.mxu0 %v22470_v49 }
 0x55d   :  { %19337 = vmatprep.subr.bf16.mxu0 %v19336_v60  ;;  %v13644_v60 = vld [vmem:[%s22462_s2 + $0x120] sm:$0xff] }
 0x55e   :  { %v13682_v39 = vand.u32 4294901760, %v13644_v60 }
 0x55f   :  { %12777 = vmatmul.mubr.f32.gmra.mrb[2].mxu0 %v12585_v10 }
 0x560   :  { %12851 = vmatprep.mubr.f32.mxu0 %v22470_v49  ;;  %v21996_v31 = vsub.f32 %v13644_v60, %v13682_v39  ;;  %v22019_v58 = vpack.c.bf16 %v13686_v29, %v13682_v39  ;;  %v14258_v29 = vsel %vm264_vm0, %v21379_v42, 0 }
 0x562   :  { %v13779_v63 = vand.u32 4294901760, %v21996_v31 }
 0x563   :  { %12855 = vmatmul.mubr.f32.vlgmr.msra.gmra.mrb[0].mxu0 %v12575_v26  ;;  %v13182_v26 = vand.u32 4294901760, %v13181_v12 }
 0x564   :  { %19339 = vmatpush1.bf16.msra.mxu0 %v19338_v37  ;;  %12860 = vmatprep.mubr.f32.mxu0 %v22470_v49  ;;  %v13785_v37 = vand.u32 4294901760, %v21981_v13  ;;  %v13780_v27 = vsub.f32 %v21996_v31, %v13779_v63 }
 0x565   :  { %19341 = vmatprep.subr.bf16.mxu0 %v21860_v41  ;;  %v13170_v41 = vsub.f32 %v13096_v1, %v21932_v20  ;;  %v13183_v15 = vsub.f32 %v13181_v12, %v13182_v26  ;;  %v13791_v1 = vand.u32 4294901760, %v21998_v38 }
 0x566   :  { %v13786_v17 = vsub.f32 %v21981_v13, %v13785_v37  ;;  %v13781_v7 = vand.u32 4294901760, %v13780_v27 }
 0x567   :  { %12864 = vmatmul.mubr.f32.gmra.mrb[2].mxu0 %v12586_v45  ;;  %v13171_v2 = vand.u32 4294901760, %v13170_v41  ;;  %v13645_v45 = vld [vmem:[%s22462_s2 + $0x128] sm:$0xff]  ;;  %v13792_v18 = vsub.f32 %v21998_v38, %v13791_v1 }
 0x568   :  { %12946 = vmatprep.mubr.f32.mxu0 %v22470_v49  ;;  %v13680_v5 = vand.u32 4294901760, %v13645_v45 }
 0x569   :  { %v13172_v3 = vsub.f32 %v13170_v41, %v13171_v2  ;;  %v13793_v44 = vand.u32 4294901760, %v13792_v18 }
 0x56a   :  { %v21979_v56 = vsub.f32 %v13645_v45, %v13680_v5  ;;  %v22000_v61 = vpack.c.bf16 %v13684_v9, %v13680_v5  ;;  %v14256_v9 = vsel %vm264_vm0, %v21060_v33, 0 }
 0x56b   :  { %12948 = vmatmul.mubr.f32.vlgmr.msra.gmra.mrb[0].mxu0 %v21862_v51  ;;  %v13173_v10 = vand.u32 4294901760, %v13172_v3  ;;  %v19374_v53 = vpack.c.bf16 %v13793_v44, %v13781_v7  ;;  %v14227_v3 = vld [vmem:[%s22462_s2 + $0x158] sm:$0xff]  ;;  %v22072_v60 = vand.u32 4294901760, %v14256_v9 }
 0x56c   :  { %19343 = vmatpush1.bf16.msra.mxu0 %v21879_v35  ;;  %12953 = vmatprep.mubr.f32.mxu0 %v22470_v49  ;;  %v13201_v35 = vand.u32 4294901760, %v13200_v40  ;;  %v13773_v6 = vand.u32 4294901760, %v21979_v56  ;;  %v14807_v7 = vld [vmem:[%s22462_s2 + $0x178] sm:$0xff] }
 0x56d   :  { %19345 = vmatprep.subr.bf16.mxu0 %v21930_v52 }
 0x56e   :  { %v19350_v30 = vpack.c.bf16 %v13213_v0, %v13201_v35  ;;  %v13774_v24 = vsub.f32 %v21979_v56, %v13773_v6  ;;  %v19384_v35 = vpack.c.bf16 %v13785_v37, %v13773_v6  ;;  %v14225_v0 = vld [vmem:[%s22462_s2 + $0x148] sm:$0xff]  ;;  %v14330_v37 = vsub.f32 %v14256_v9, %v22072_v60 }
 0x56f   :  { %12955 = vmatmul.mubr.f32.gmra.mrb[2].mxu0 %v21875_v50 }
 0x570   :  { %13029 = vmatprep.mubr.f32.mxu0 %v22470_v49 }
 0x573   :  { %13031 = vmatmul.mubr.f32.vlgmr.msra.gmra.mrb[0].mxu0 %v21862_v51  ;;  %v13184_v51 = vand.u32 4294901760, %v13183_v15 }
 0x574   :  { %19347 = vmatpush1.bf16.msra.mxu0 %v21949_v4  ;;  %13036 = vmatprep.mubr.f32.mxu0 %v22470_v49 }
 0x575   :  { %19349 = vmatprep.subr.bf16.mxu0 %v19348_v16 }
 0x577   :  { %13038 = vmatmul.mubr.f32.gmra.mrb[2].mxu0 %v21875_v50  ;;  %v19354_v50 = vpack.c.bf16 %v21928_v21, %v21926_v43  ;;  %v13750_v43 = vsub.f32 %v13676_v23, %v22002_v14  ;;  %v13775_v21 = vand.u32 4294901760, %v13774_v24 }
 0x578   :  { %13168 = vmatprep.mubr.f32.mxu0 %v22470_v49 }
 0x579   :  { %v13751_v62 = vand.u32 4294901760, %v13750_v43 }
 0x57b   :  { %13174 = vmatmul.mubr.f32.vlgmr.msra.gmra.mrb[0].mxu0 %v13173_v10  ;;  %v19386_v10 = vpack.c.bf16 %v13791_v1, %v13779_v63 }
 0x57c   :  { %19351 = vmatpush1.bf16.msra.mxu0 %v19350_v30  ;;  %13179 = vmatprep.mubr.f32.mxu0 %v22470_v49  ;;  %v14264_v30 = vand.u32 4294901760, %v14227_v3 }
 0x57d   :  { %19353 = vmatprep.subr.bf16.mxu0 %v19352_v28 }
 0x57e   :  { %v22051_v28 = vsub.f32 %v14227_v3, %v14264_v30  ;;  %v14836_v3 = vsel %vm264_vm0, %v21068_v11, 0 }
 0x57f   :  { %13185 = vmatmul.mubr.f32.gmra.mrb[2].mxu0 %v13184_v51  ;;  %v14224_v51 = vld [vmem:[%s22462_s2 + $0x140] sm:$0xff] }
 0x580   :  { %13275 = vmatprep.mubr.f32.mxu0 %v22470_v49  ;;  %v14365_v5 = vand.u32 4294901760, %v22051_v28 }
 0x582   :  { %v14366_v39 = vsub.f32 %v22051_v28, %v14365_v5 }
 0x583   :  { %13277 = vmatmul.mubr.f32.vlgmr.msra.gmra.mrb[0].mxu0 %v21932_v20 }
 0x584   :  { %19355 = vmatpush1.bf16.msra.mxu0 %v19354_v50  ;;  %13282 = vmatprep.mubr.f32.mxu0 %v22470_v49  ;;  %v14226_v50 = vld [vmem:[%s22462_s2 + $0x150] sm:$0xff] }
 0x585   :  { %19357 = vmatprep.subr.bf16.mxu0 %v21930_v52  ;;  %v14266_v45 = vand.u32 4294901760, %v14226_v50 }
 0x587   :  { %13284 = vmatmul.mubr.f32.gmra.mrb[2].mxu0 %v21945_v55 }
 0x588   :  { %13362 = vmatprep.mubr.f32.mxu0 %v22470_v49 }
 0x58b   :  { %13365 = vmatmul.mubr.f32.vlgmr.msra.gmra.mrb[0].mxu0 %v13170_v41  ;;  %v13761_v41 = vsub.f32 %v13678_v25, %v22015_v32 }
 0x58c   :  { %19359 = vmatpush1.bf16.msra.mxu0 %v21949_v4  ;;  %13370 = vmatprep.mubr.f32.mxu0 %v22470_v49 }
 0x58d   :  { %19361 = vmatprep.subr.bf16.mxu0 %v19360_v48  ;;  %v13762_v40 = vand.u32 4294901760, %v13761_v41  ;;  %v14262_v48 = vand.u32 4294901760, %v14224_v51 }
 0x58f   :  { %13373 = vmatmul.mubr.f32.gmra.mrb[2].mxu0 %v13181_v12  ;;  %v13763_v16 = vsub.f32 %v13761_v41, %v13762_v40  ;;  %v19376_v12 = vpack.c.bf16 %v21981_v13, %v21979_v56  ;;  %v22068_v56 = vsub.f32 %v14226_v50, %v14266_v45  ;;  %v22089_v42 = vpack.c.bf16 %v14266_v45, %v14262_v48 }
 0x590   :  { %13447 = vmatprep.mubr.f32.mxu0 %v22470_v49  ;;  %v14838_v50 = vsel %vm264_vm0, %v21383_v36, 0 }
 0x591   :  { %v14371_v6 = vand.u32 4294901760, %v22068_v56  ;;  %v22155_v9 = vand.u32 4294901760, %v14838_v50 }
 0x593   :  { %13451 = vmatmul.mubr.f32.vlgmr.msra.gmra.mrb[0].mxu0 %v13171_v2  ;;  %v14372_v24 = vsub.f32 %v22068_v56, %v14371_v6 }
 0x594   :  { %19363 = vmatpush1.bf16.msra.mxu0 %v19362_v22  ;;  %13456 = vmatprep.mubr.f32.mxu0 %v22470_v49  ;;  %v22066_v22 = vsub.f32 %v14224_v51, %v14262_v48 }
 0x595   :  { %19365 = vmatprep.subr.bf16.mxu0 %v21930_v52  ;;  %v13787_v52 = vand.u32 4294901760, %v13786_v17  ;;  %v14331_v17 = vand.u32 4294901760, %v14330_v37 }
 0x596   :  { %v14359_v33 = vand.u32 4294901760, %v22066_v22 }
 0x597   :  { %13460 = vmatmul.mubr.f32.gmra.mrb[2].mxu0 %v13182_v26  ;;  %v19372_v59 = vpack.c.bf16 %v13787_v52, %v13775_v21  ;;  %v14260_v26 = vand.u32 4294901760, %v14225_v0  ;;  %v14332_v21 = vsub.f32 %v14330_v37, %v14331_v17 }
 0x598   :  { %13542 = vmatprep.mubr.f32.mxu0 %v22470_v49 }
 0x599   :  { %v22049_v15 = vsub.f32 %v14225_v0, %v14260_v26  ;;  %v22070_v13 = vpack.c.bf16 %v14264_v30, %v14260_v26  ;;  %v14333_v27 = vand.u32 4294901760, %v14332_v21 }
 0x59b   :  { %13544 = vmatmul.mubr.f32.vlgmr.msra.gmra.mrb[0].mxu0 %v21932_v20  ;;  %v14353_v47 = vand.u32 4294901760, %v22049_v15 }
 0x59c   :  { %19367 = vmatpush1.bf16.msra.mxu0 %v21949_v4  ;;  %13549 = vmatprep.mubr.f32.mxu0 %v22470_v49  ;;  %v13752_v4 = vsub.f32 %v13750_v43, %v13751_v62 }
 0x59d   :  { %19369 = vmatprep.subr.bf16.mxu0 %v22000_v61  ;;  %v14354_v19 = vsub.f32 %v22049_v15, %v14353_v47 }
 0x59e   :  { %v13753_v2 = vand.u32 4294901760, %v13752_v4  ;;  %v14844_v4 = vand.u32 4294901760, %v14807_v7 }
 0x59f   :  { %13551 = vmatmul.mubr.f32.gmra.mrb[2].mxu0 %v21945_v55  ;;  %v14355_v23 = vand.u32 4294901760, %v14354_v19 }
 0x5a0   :  { %13625 = vmatprep.mubr.f32.mxu0 %v22470_v49 }
 0x5a3   :  { %13627 = vmatmul.mubr.f32.vlgmr.msra.gmra.mrb[0].mxu0 %v21932_v20  ;;  %v13764_v20 = vand.u32 4294901760, %v13763_v16  ;;  %v14804_v16 = vld [vmem:[%s22462_s2 + $0x160] sm:$0xff] }
 0x5a4   :  { %19371 = vmatpush1.bf16.msra.mxu0 %v22019_v58  ;;  %13632 = vmatprep.mubr.f32.mxu0 %v22470_v49 }
 0x5a5   :  { %19373 = vmatprep.subr.bf16.mxu0 %v19372_v59  ;;  %v19408_v59 = vpack.c.bf16 %v14365_v5, %v14353_v47 }
 0x5a7   :  { %13634 = vmatmul.mubr.f32.gmra.mrb[2].mxu0 %v21945_v55  ;;  %v19378_v55 = vpack.c.bf16 %v21998_v38, %v21996_v31  ;;  %v14367_v31 = vand.u32 4294901760, %v14366_v39  ;;  %v22085_v38 = vand.u32 4294901760, %v14258_v29  ;;  %v14921_v39 = vsub.f32 %v14838_v50, %v22155_v9 }
 0x5a8   :  { %13748 = vmatprep.mubr.f32.mxu0 %v22470_v49 }
 0x5a9   :  { %v19396_v25 = vpack.c.bf16 %v14367_v31, %v14355_v23  ;;  %v14341_v63 = vsub.f32 %v14258_v29, %v22085_v38 }
 0x5ab   :  { %13754 = vmatmul.mubr.f32.vlgmr.msra.gmra.mrb[0].mxu0 %v13753_v2  ;;  %v14342_v52 = vand.u32 4294901760, %v14341_v63  ;;  %v22121_v2 = vsub.f32 %v14807_v7, %v14844_v4 }
 0x5ac   :  { %19375 = vmatpush1.bf16.msra.mxu0 %v19374_v53  ;;  %13759 = vmatprep.mubr.f32.mxu0 %v22470_v49 }
 0x5ad   :  { %19377 = vmatprep.subr.bf16.mxu0 %v19376_v12  ;;  %v14343_v18 = vsub.f32 %v14341_v63, %v14342_v52  ;;  %v14806_v12 = vld [vmem:[%s22462_s2 + $0x170] sm:$0xff]  ;;  %v14945_v0 = vand.u32 4294901760, %v22121_v2 }
 0x5af   :  { %13765 = vmatmul.mubr.f32.gmra.mrb[2].mxu0 %v13764_v20  ;;  %v14842_v20 = vand.u32 4294901760, %v14804_v16  ;;  %v14946_v51 = vsub.f32 %v22121_v2, %v14945_v0 }
 0x5b0   :  { %13855 = vmatprep.mubr.f32.mxu0 %v22470_v49 }
 0x5b1   :  { %v22136_v26 = vsub.f32 %v14804_v16, %v14842_v20  ;;  %v14947_v5 = vand.u32 4294901760, %v14946_v51 }
 0x5b3   :  { %13857 = vmatmul.mubr.f32.vlgmr.msra.gmra.mrb[0].mxu0 %v22002_v14  ;;  %v14939_v11 = vand.u32 4294901760, %v22136_v26 }
 0x5b4   :  { %19379 = vmatpush1.bf16.msra.mxu0 %v19378_v55  ;;  %13862 = vmatprep.mubr.f32.mxu0 %v22470_v49  ;;  %v14846_v55 = vand.u32 4294901760, %v14806_v12 }
 0x5b5   :  { %19381 = vmatprep.subr.bf16.mxu0 %v22000_v61 }
 0x5b6   :  { %v22138_v30 = vsub.f32 %v14806_v12, %v14846_v55  ;;  %v22159_v36 = vpack.c.bf16 %v14846_v55, %v14842_v20 }
 0x5b7   :  { %13864 = vmatmul.mubr.f32.gmra.mrb[2].mxu0 %v22015_v32 }
 0x5b8   :  { %13942 = vmatprep.mubr.f32.mxu0 %v22470_v49  ;;  %v14951_v48 = vand.u32 4294901760, %v22138_v30 }
 0x5bb   :  { %13945 = vmatmul.mubr.f32.vlgmr.msra.gmra.mrb[0].mxu0 %v13750_v43  ;;  %v14373_v43 = vand.u32 4294901760, %v14372_v24 }
 0x5bc   :  { %19383 = vmatpush1.bf16.msra.mxu0 %v22019_v58  ;;  %13950 = vmatprep.mubr.f32.mxu0 %v22470_v49 }
 0x5bd   :  { %19385 = vmatprep.subr.bf16.mxu0 %v19384_v35 }
 0x5bf   :  { %13953 = vmatmul.mubr.f32.gmra.mrb[2].mxu0 %v13761_v41  ;;  %v14805_v41 = vld [vmem:[%s22462_s2 + $0x168] sm:$0xff] }
 0x5c0   :  { %14027 = vmatprep.mubr.f32.mxu0 %v22470_v49  ;;  %v14840_v44 = vand.u32 4294901760, %v14805_v41 }
 0x5c2   :  { %v22119_v53 = vsub.f32 %v14805_v41, %v14840_v44 }
 0x5c3   :  { %14031 = vmatmul.mubr.f32.vlgmr.msra.gmra.mrb[0].mxu0 %v13751_v62  ;;  %v19400_v62 = vpack.c.bf16 %v22051_v28, %v22049_v15  ;;  %v22142_v15 = vand.u32 4294901760, %v14836_v3 }
 0x5c4   :  { %19387 = vmatpush1.bf16.msra.mxu0 %v19386_v10  ;;  %14036 = vmatprep.mubr.f32.mxu0 %v22470_v49  ;;  %v14933_v35 = vand.u32 4294901760, %v22119_v53  ;;  %v22140_v10 = vpack.c.bf16 %v14844_v4, %v14840_v44 }
 0x5c5   :  { %19389 = vmatprep.subr.bf16.mxu0 %v22000_v61  ;;  %v14360_v61 = vsub.f32 %v22066_v22, %v14359_v33  ;;  %v14910_v45 = vsub.f32 %v14836_v3, %v22142_v15 }
 0x5c6   :  { %v14934_v28 = vsub.f32 %v22119_v53, %v14933_v35  ;;  %v19432_v24 = vpack.c.bf16 %v14945_v0, %v14933_v35 }
 0x5c7   :  { %14040 = vmatmul.mubr.f32.gmra.mrb[2].mxu0 %v13762_v40  ;;  %v14361_v1 = vand.u32 4294901760, %v14360_v61  ;;  %v19410_v40 = vpack.c.bf16 %v14371_v6, %v14359_v33  ;;  %v19424_v61 = vpack.c.bf16 %v22121_v2, %v22119_v53  ;;  %v15418_v2 = vsel %vm264_vm0, %v21403_v34, 0 }
 0x5c8   :  { %14122 = vmatprep.mubr.f32.mxu0 %v22470_v49  ;;  %v14935_v47 = vand.u32 4294901760, %v14934_v28  ;;  %v22225_v35 = vand.u32 4294901760, %v15418_v2 }
 0x5ca   :  { %v19420_v19 = vpack.c.bf16 %v14947_v5, %v14935_v47 }
 0x5cb   :  { %14124 = vmatmul.mubr.f32.vlgmr.msra.gmra.mrb[0].mxu0 %v22002_v14 }
 0x5cc   :  { %19391 = vmatpush1.bf16.msra.mxu0 %v22019_v58  ;;  %14129 = vmatprep.mubr.f32.mxu0 %v22470_v49  ;;  %v19398_v58 = vpack.c.bf16 %v14373_v43, %v14361_v1  ;;  %v19434_v43 = vpack.c.bf16 %v14951_v48, %v14939_v11 }
 0x5cd   :  { %19393 = vmatprep.subr.bf16.mxu0 %v22070_v13 }
 0x5cf   :  { %14131 = vmatmul.mubr.f32.gmra.mrb[2].mxu0 %v22015_v32 }
 0x5d0   :  { %14205 = vmatprep.mubr.f32.mxu0 %v22470_v49 }
 0x5d3   :  { %14207 = vmatmul.mubr.f32.vlgmr.msra.gmra.mrb[0].mxu0 %v22002_v14  ;;  %v14344_v14 = vand.u32 4294901760, %v14343_v18 }
 0x5d4   :  { %19395 = vmatpush1.bf16.msra.mxu0 %v22089_v42  ;;  %14212 = vmatprep.mubr.f32.mxu0 %v22470_v49 }
 0x5d5   :  { %19397 = vmatprep.subr.bf16.mxu0 %v19396_v25  ;;  %v15387_v25 = vld [vmem:[%s22462_s2 + $0x198] sm:$0xff] }
 0x5d6   :  { %v15424_v1 = vand.u32 4294901760, %v15387_v25 }
 0x5d7   :  { %14214 = vmatmul.mubr.f32.gmra.mrb[2].mxu0 %v22015_v32  ;;  %v19402_v32 = vpack.c.bf16 %v22068_v56, %v22066_v22  ;;  %v14940_v22 = vsub.f32 %v22136_v26, %v14939_v11  ;;  %v14952_v56 = vsub.f32 %v22138_v30, %v14951_v48 }
 0x5d8   :  { %14328 = vmatprep.mubr.f32.mxu0 %v22470_v49 }
 0x5d9   :  { %v14941_v29 = vand.u32 4294901760, %v14940_v22  ;;  %v14953_v33 = vand.u32 4294901760, %v14952_v56  ;;  %v15965_v22 = vld [vmem:[%s22462_s2 + $0x1a8] sm:$0xff]  ;;  %v15967_v56 = vld [vmem:[%s22462_s2 + $0x1b8] sm:$0xff] }
 0x5db   :  { %14334 = vmatmul.mubr.f32.vlgmr.msra.gmra.mrb[0].mxu0 %v14333_v27  ;;  %v19422_v23 = vpack.c.bf16 %v14953_v33, %v14941_v29  ;;  %v15386_v27 = vld [vmem:[%s22462_s2 + $0x190] sm:$0xff] }
 0x5dc   :  { %19399 = vmatpush1.bf16.msra.mxu0 %v19398_v58  ;;  %14339 = vmatprep.mubr.f32.mxu0 %v22470_v49  ;;  %v15384_v58 = vld [vmem:[%s22462_s2 + $0x180] sm:$0xff] }
 0x5dd   :  { %19401 = vmatprep.subr.bf16.mxu0 %v19400_v62  ;;  %v15422_v18 = vand.u32 4294901760, %v15384_v58  ;;  %v15426_v62 = vand.u32 4294901760, %v15386_v27 }
 0x5df   :  { %14345 = vmatmul.mubr.f32.gmra.mrb[2].mxu0 %v14344_v14  ;;  %v22206_v41 = vsub.f32 %v15384_v58, %v15422_v18  ;;  %v22208_v7 = vsub.f32 %v15386_v27, %v15426_v62  ;;  %v22229_v34 = vpack.c.bf16 %v15426_v62, %v15422_v18 }
 0x5e0   :  { %14435 = vmatprep.mubr.f32.mxu0 %v22470_v49 }
 0x5e1   :  { %v15531_v16 = vand.u32 4294901760, %v22208_v7 }
 0x5e3   :  { %14437 = vmatmul.mubr.f32.vlgmr.msra.gmra.mrb[0].mxu0 %v22072_v60  ;;  %v15532_v3 = vsub.f32 %v22208_v7, %v15531_v16 }
 0x5e4   :  { %19403 = vmatpush1.bf16.msra.mxu0 %v19402_v32  ;;  %14442 = vmatprep.mubr.f32.mxu0 %v22470_v49 }
 0x5e5   :  { %19405 = vmatprep.subr.bf16.mxu0 %v22070_v13  ;;  %v15533_v51 = vand.u32 4294901760, %v15532_v3  ;;  %v16547_v3 = vld [vmem:[%s22462_s2 + $0x1d8] sm:$0xff] }
 0x5e7   :  { %14444 = vmatmul.mubr.f32.gmra.mrb[2].mxu0 %v22085_v38 }
 0x5e8   :  { %14522 = vmatprep.mubr.f32.mxu0 %v22470_v49 }
 0x5eb   :  { %14525 = vmatmul.mubr.f32.vlgmr.msra.gmra.mrb[0].mxu0 %v14330_v37  ;;  %v14922_v37 = vand.u32 4294901760, %v14921_v39 }
 0x5ec   :  { %19407 = vmatpush1.bf16.msra.mxu0 %v22089_v42  ;;  %14530 = vmatprep.mubr.f32.mxu0 %v22470_v49 }
 0x5ed   :  { %19409 = vmatprep.subr.bf16.mxu0 %v19408_v59  ;;  %v15416_v59 = vsel %vm264_vm0, %v21072_v8, 0  ;;  %v15519_v8 = vand.u32 4294901760, %v22206_v41 }
 0x5ee   :  { %v22212_v4 = vand.u32 4294901760, %v15416_v59 }
 0x5ef   :  { %14533 = vmatmul.mubr.f32.gmra.mrb[2].mxu0 %v14341_v63  ;;  %v15520_v0 = vsub.f32 %v22206_v41, %v15519_v8 }
 0x5f0   :  { %14607 = vmatprep.mubr.f32.mxu0 %v22470_v49  ;;  %v15490_v12 = vsub.f32 %v15416_v59, %v22212_v4 }
 0x5f1   :  { %v15521_v28 = vand.u32 4294901760, %v15520_v0  ;;  %v16545_v0 = vld [vmem:[%s22462_s2 + $0x1c8] sm:$0xff] }
 0x5f3   :  { %14611 = vmatmul.mubr.f32.vlgmr.msra.gmra.mrb[0].mxu0 %v14331_v17  ;;  %v15385_v17 = vld [vmem:[%s22462_s2 + $0x188] sm:$0xff]  ;;  %v19446_v48 = vpack.c.bf16 %v15533_v51, %v15521_v28 }
 0x5f4   :  { %19411 = vmatpush1.bf16.msra.mxu0 %v19410_v40  ;;  %14616 = vmatprep.mubr.f32.mxu0 %v22470_v49  ;;  %v15420_v63 = vand.u32 4294901760, %v15385_v17 }
 0x5f5   :  { %19413 = vmatprep.subr.bf16.mxu0 %v22070_v13  ;;  %v14911_v13 = vand.u32 4294901760, %v14910_v45 }
 0x5f6   :  { %v22189_v21 = vsub.f32 %v15385_v17, %v15420_v63  ;;  %v22210_v44 = vpack.c.bf16 %v15424_v1, %v15420_v63 }
 0x5f7   :  { %14620 = vmatmul.mubr.f32.gmra.mrb[2].mxu0 %v14342_v52  ;;  %v14912_v6 = vsub.f32 %v14910_v45, %v14911_v13  ;;  %v22191_v52 = vsub.f32 %v15387_v25, %v15424_v1 }
 0x5f8   :  { %14702 = vmatprep.mubr.f32.mxu0 %v22470_v49  ;;  %v15513_v14 = vand.u32 4294901760, %v22189_v21 }
 0x5f9   :  { %v14913_v31 = vand.u32 4294901760, %v14912_v6  ;;  %v15525_v32 = vand.u32 4294901760, %v22191_v52  ;;  %v19448_v5 = vpack.c.bf16 %v22191_v52, %v22189_v21  ;;  %v15964_v6 = vld [vmem:[%s22462_s2 + $0x1a0] sm:$0xff] }
 0x5fa   :  { %v15514_v40 = vsub.f32 %v22189_v21, %v15513_v14  ;;  %v15998_v21 = vsel %vm264_vm0, %v21406_v57, 0 }
 0x5fb   :  { %14704 = vmatmul.mubr.f32.vlgmr.msra.gmra.mrb[0].mxu0 %v22072_v60  ;;  %v15526_v53 = vsub.f32 %v22191_v52, %v15525_v32 }
 0x5fc   :  { %19415 = vmatpush1.bf16.msra.mxu0 %v22089_v42  ;;  %14709 = vmatprep.mubr.f32.mxu0 %v22470_v49  ;;  %v14923_v42 = vsub.f32 %v14921_v39, %v14922_v37  ;;  %v15515_v20 = vand.u32 4294901760, %v15514_v40 }
 0x5fd   :  { %19417 = vmatprep.subr.bf16.mxu0 %v22140_v10  ;;  %v15527_v55 = vand.u32 4294901760, %v15526_v53 }
 0x5ff   :  { %14711 = vmatmul.mubr.f32.gmra.mrb[2].mxu0 %v22085_v38 }
 0x600   :  { %14785 = vmatprep.mubr.f32.mxu0 %v22470_v49 }
 0x603   :  { %14787 = vmatmul.mubr.f32.vlgmr.msra.gmra.mrb[0].mxu0 %v22072_v60  ;;  %v14924_v60 = vand.u32 4294901760, %v14923_v42 }
 0x604   :  { %19419 = vmatpush1.bf16.msra.mxu0 %v22159_v36  ;;  %14792 = vmatprep.mubr.f32.mxu0 %v22470_v49 }
 0x605   :  { %19421 = vmatprep.subr.bf16.mxu0 %v19420_v19  ;;  %v16004_v19 = vand.u32 4294901760, %v15967_v56 }
 0x607   :  { %14794 = vmatmul.mubr.f32.gmra.mrb[2].mxu0 %v22085_v38  ;;  %v19426_v38 = vpack.c.bf16 %v22138_v30, %v22136_v26  ;;  %v15491_v26 = vand.u32 4294901760, %v15490_v12  ;;  %v19444_v30 = vpack.c.bf16 %v15527_v55, %v15515_v20  ;;  %v22261_v33 = vsub.f32 %v15967_v56, %v16004_v19 }
 0x608   :  { %14908 = vmatprep.mubr.f32.mxu0 %v22470_v49 }
 0x609   :  { %v15492_v50 = vsub.f32 %v15490_v12, %v15491_v26 }
 0x60b   :  { %14914 = vmatmul.mubr.f32.vlgmr.msra.gmra.mrb[0].mxu0 %v14913_v31 }
 0x60c   :  { %19423 = vmatpush1.bf16.msra.mxu0 %v19422_v23  ;;  %14919 = vmatprep.mubr.f32.mxu0 %v22470_v49  ;;  %v16002_v23 = vand.u32 4294901760, %v15964_v6 }
 0x60d   :  { %19425 = vmatprep.subr.bf16.mxu0 %v19424_v61  ;;  %v16105_v61 = vand.u32 4294901760, %v22261_v33 }
 0x60f   :  { %14925 = vmatmul.mubr.f32.gmra.mrb[2].mxu0 %v14924_v60  ;;  %v22473_v60 = vld [vmem:[#allocation2_spill] sm:$0xff] }
 0x610   :  { %15015 = vmatprep.mubr.f32.mxu0 %v22470_v49 }
 0x613   :  { %15017 = vmatmul.mubr.f32.vlgmr.msra.gmra.mrb[0].mxu0 %v22142_v15 }
 0x614   :  { %19427 = vmatpush1.bf16.msra.mxu0 %v19426_v38  ;;  %15022 = vmatprep.mubr.f32.mxu0 %v22470_v49  ;;  %v15996_v38 = vsel %vm264_vm0, %v22473_v60, 0 }
 0x615   :  { %19429 = vmatprep.subr.bf16.mxu0 %v22140_v10  ;;  %v22282_v63 = vand.u32 4294901760, %v15996_v38 }
 0x617   :  { %15024 = vmatmul.mubr.f32.gmra.mrb[2].mxu0 %v22155_v9  ;;  %v16070_v27 = vsub.f32 %v15996_v38, %v22282_v63 }
 0x618   :  { %15102 = vmatprep.mubr.f32.mxu0 %v22470_v49 }
 0x61b   :  { %15105 = vmatmul.mubr.f32.vlgmr.msra.gmra.mrb[0].mxu0 %v14910_v45  ;;  %v15493_v45 = vand.u32 4294901760, %v15492_v50  ;;  %v16544_v50 = vld [vmem:[%s22462_s2 + $0x1c0] sm:$0xff] }
 0x61c   :  { %19431 = vmatpush1.bf16.msra.mxu0 %v22159_v36  ;;  %15110 = vmatprep.mubr.f32.mxu0 %v22470_v49 }
 0x61d   :  { %19433 = vmatprep.subr.bf16.mxu0 %v19432_v24  ;;  %v22276_v24 = vsub.f32 %v15964_v6, %v16002_v23 }
 0x61f   :  { %15113 = vmatmul.mubr.f32.gmra.mrb[2].mxu0 %v14921_v39  ;;  %v19458_v39 = vpack.c.bf16 %v15531_v16, %v15519_v8  ;;  %v16099_v52 = vand.u32 4294901760, %v22276_v24 }
 0x620   :  { %15187 = vmatprep.mubr.f32.mxu0 %v22470_v49 }
 0x623   :  { %15191 = vmatmul.mubr.f32.vlgmr.msra.gmra.mrb[0].mxu0 %v14911_v13  ;;  %v16000_v13 = vand.u32 4294901760, %v15965_v22 }
 0x624   :  { %19435 = vmatpush1.bf16.msra.mxu0 %v19434_v43  ;;  %15196 = vmatprep.mubr.f32.mxu0 %v22470_v49  ;;  %v16106_v43 = vsub.f32 %v22261_v33, %v16105_v61 }
 0x625   :  { %19437 = vmatprep.subr.bf16.mxu0 %v22140_v10  ;;  %v15501_v10 = vsub.f32 %v15418_v2, %v22225_v35  ;;  %v22259_v29 = vsub.f32 %v15965_v22, %v16000_v13  ;;  %v22280_v25 = vpack.c.bf16 %v16004_v19, %v16000_v13 }
 0x626   :  { %v16107_v62 = vand.u32 4294901760, %v16106_v43 }
 0x627   :  { %15200 = vmatmul.mubr.f32.gmra.mrb[2].mxu0 %v14922_v37  ;;  %v15502_v11 = vand.u32 4294901760, %v15501_v10  ;;  %v15966_v37 = vld [vmem:[%s22462_s2 + $0x1b0] sm:$0xff]  ;;  %v16093_v42 = vand.u32 4294901760, %v22259_v29  ;;  %v19472_v55 = vpack.c.bf16 %v22261_v33, %v22259_v29 }
 0x628   :  { %15282 = vmatprep.mubr.f32.mxu0 %v22470_v49  ;;  %v16006_v31 = vand.u32 4294901760, %v15966_v37 }
 0x629   :  { %v15503_v47 = vsub.f32 %v15501_v10, %v15502_v11  ;;  %v16094_v1 = vsub.f32 %v22259_v29, %v16093_v42  ;;  %v16578_v29 = vsel %vm264_vm0, %v21413_v54, 0 }
 0x62a   :  { %v22278_v17 = vsub.f32 %v15966_v37, %v16006_v31  ;;  %v22299_v57 = vpack.c.bf16 %v16006_v31, %v16002_v23 }
 0x62b   :  { %15284 = vmatmul.mubr.f32.vlgmr.msra.gmra.mrb[0].mxu0 %v22142_v15  ;;  %v16095_v18 = vand.u32 4294901760, %v16094_v1 }
 0x62c   :  { %19439 = vmatpush1.bf16.msra.mxu0 %v22159_v36  ;;  %15289 = vmatprep.mubr.f32.mxu0 %v22470_v49  ;;  %v19456_v36 = vpack.c.bf16 %v15525_v32, %v15513_v14  ;;  %v16111_v58 = vand.u32 4294901760, %v22278_v17  ;;  %v22295_v14 = vand.u32 4294901760, %v15998_v21  ;;  %v16100_v32 = vsub.f32 %v22276_v24, %v16099_v52 }
 0x62d   :  { %19441 = vmatprep.subr.bf16.mxu0 %v22210_v44 }
 0x62e   :  { %v16112_v59 = vsub.f32 %v22278_v17, %v16111_v58  ;;  %v16101_v40 = vand.u32 4294901760, %v16100_v32  ;;  %v17127_v32 = vld [vmem:[%s22462_s2 + $0x1f8] sm:$0xff] }
 0x62f   :  { %15291 = vmatmul.mubr.f32.gmra.mrb[2].mxu0 %v22155_v9 }
 0x630   :  { %15365 = vmatprep.mubr.f32.mxu0 %v22470_v49  ;;  %v16113_v53 = vand.u32 4294901760, %v16112_v59 }
 0x632   :  { %v19470_v16 = vpack.c.bf16 %v16113_v53, %v16101_v40  ;;  %v17124_v53 = vld [vmem:[%s22462_s2 + $0x1e0] sm:$0xff] }
 0x633   :  { %15367 = vmatmul.mubr.f32.vlgmr.msra.gmra.mrb[0].mxu0 %v22142_v15  ;;  %v15504_v15 = vand.u32 4294901760, %v15503_v47 }
 0x634   :  { %19443 = vmatpush1.bf16.msra.mxu0 %v22229_v34  ;;  %15372 = vmatprep.mubr.f32.mxu0 %v22470_v49 }
 0x635   :  { %19445 = vmatprep.subr.bf16.mxu0 %v19444_v30  ;;  %v16584_v30 = vand.u32 4294901760, %v16547_v3 }
 0x637   :  { %15374 = vmatmul.mubr.f32.gmra.mrb[2].mxu0 %v22155_v9  ;;  %v19450_v9 = vpack.c.bf16 %v22208_v7, %v22206_v41  ;;  %v16071_v41 = vand.u32 4294901760, %v16070_v27  ;;  %v19468_v7 = vpack.c.bf16 %v16107_v62, %v16095_v18  ;;  %v22331_v51 = vsub.f32 %v16547_v3, %v16584_v30 }
 0x638   :  { %15488 = vmatprep.mubr.f32.mxu0 %v22470_v49 }
 0x639   :  { %v16072_v2 = vsub.f32 %v16070_v27, %v16071_v41 }
 0x63b   :  { %15494 = vmatmul.mubr.f32.vlgmr.msra.gmra.mrb[0].mxu0 %v15493_v45 }
 0x63c   :  { %19447 = vmatpush1.bf16.msra.mxu0 %v19446_v48  ;;  %15499 = vmatprep.mubr.f32.mxu0 %v22470_v49  ;;  %v16582_v48 = vand.u32 4294901760, %v16544_v50 }
 0x63d   :  { %19449 = vmatprep.subr.bf16.mxu0 %v19448_v5  ;;  %v16685_v5 = vand.u32 4294901760, %v22331_v51 }
 0x63f   :  { %15505 = vmatmul.mubr.f32.gmra.mrb[2].mxu0 %v15504_v15  ;;  %v22474_v15 = vld [vmem:[#allocation3_spill] sm:$0xff] }
 0x640   :  { %15595 = vmatprep.mubr.f32.mxu0 %v22470_v49 }
 0x643   :  { %15597 = vmatmul.mubr.f32.vlgmr.msra.gmra.mrb[0].mxu0 %v22212_v4 }
 0x644   :  { %19451 = vmatpush1.bf16.msra.mxu0 %v19450_v9  ;;  %15602 = vmatprep.mubr.f32.mxu0 %v22470_v49  ;;  %v16576_v9 = vsel %vm264_vm0, %v22474_v15, 0 }
 0x645   :  { %19453 = vmatprep.subr.bf16.mxu0 %v22210_v44  ;;  %v22352_v13 = vand.u32 4294901760, %v16576_v9 }
 0x647   :  { %15604 = vmatmul.mubr.f32.gmra.mrb[2].mxu0 %v22225_v35  ;;  %v16650_v37 = vsub.f32 %v16576_v9, %v22352_v13 }
 0x648   :  { %15682 = vmatprep.mubr.f32.mxu0 %v22470_v49 }
 0x649   :  { %v16651_v38 = vand.u32 4294901760, %v16650_v37 }
 0x64b   :  { %15685 = vmatmul.mubr.f32.vlgmr.msra.gmra.mrb[0].mxu0 %v15490_v12  ;;  %v16073_v12 = vand.u32 4294901760, %v16072_v2  ;;  %v16652_v43 = vsub.f32 %v16650_v37, %v16651_v38  ;;  %v17126_v2 = vld [vmem:[%s22462_s2 + $0x1f0] sm:$0xff] }
 0x64c   :  { %19455 = vmatpush1.bf16.msra.mxu0 %v22229_v34  ;;  %15690 = vmatprep.mubr.f32.mxu0 %v22470_v49 }
 0x64d   :  { %19457 = vmatprep.subr.bf16.mxu0 %v19456_v36  ;;  %v22346_v36 = vsub.f32 %v16544_v50, %v16582_v48 }
 0x64f   :  { %15693 = vmatmul.mubr.f32.gmra.mrb[2].mxu0 %v15501_v10  ;;  %v19482_v10 = vpack.c.bf16 %v16111_v58, %v16099_v52  ;;  %v16679_v33 = vand.u32 4294901760, %v22346_v36  ;;  %v16653_v58 = vand.u32 4294901760, %v16652_v43 }
 0x650   :  { %15767 = vmatprep.mubr.f32.mxu0 %v22470_v49 }
 0x653   :  { %15771 = vmatmul.mubr.f32.vlgmr.msra.gmra.mrb[0].mxu0 %v15491_v26  ;;  %v16580_v26 = vand.u32 4294901760, %v16545_v0 }
 0x654   :  { %19459 = vmatpush1.bf16.msra.mxu0 %v19458_v39  ;;  %15776 = vmatprep.mubr.f32.mxu0 %v22470_v49  ;;  %v16686_v39 = vsub.f32 %v22331_v51, %v16685_v5 }
 0x655   :  { %19461 = vmatprep.subr.bf16.mxu0 %v22210_v44  ;;  %v16081_v44 = vsub.f32 %v15998_v21, %v22295_v14  ;;  %v22329_v28 = vsub.f32 %v16545_v0, %v16580_v26  ;;  %v22350_v56 = vpack.c.bf16 %v16584_v30, %v16580_v26 }
 0x656   :  { %v16687_v31 = vand.u32 4294901760, %v16686_v39 }
 0x657   :  { %15780 = vmatmul.mubr.f32.gmra.mrb[2].mxu0 %v15502_v11  ;;  %v16082_v8 = vand.u32 4294901760, %v16081_v44  ;;  %v16546_v11 = vld [vmem:[%s22462_s2 + $0x1d0] sm:$0xff]  ;;  %v16673_v47 = vand.u32 4294901760, %v22329_v28  ;;  %v19496_v18 = vpack.c.bf16 %v22331_v51, %v22329_v28 }
 0x658   :  { %15862 = vmatprep.mubr.f32.mxu0 %v22470_v49  ;;  %v16586_v45 = vand.u32 4294901760, %v16546_v11 }
 0x659   :  { %v16083_v20 = vsub.f32 %v16081_v44, %v16082_v8  ;;  %v16674_v19 = vsub.f32 %v22329_v28, %v16673_v47 }
 0x65a   :  { %v22348_v22 = vsub.f32 %v16546_v11, %v16586_v45  ;;  %v22369_v54 = vpack.c.bf16 %v16586_v45, %v16582_v48 }
 0x65b   :  { %15864 = vmatmul.mubr.f32.vlgmr.msra.gmra.mrb[0].mxu0 %v22212_v4  ;;  %v16675_v23 = vand.u32 4294901760, %v16674_v19 }
 0x65c   :  { %19463 = vmatpush1.bf16.msra.mxu0 %v22229_v34  ;;  %15869 = vmatprep.mubr.f32.mxu0 %v22470_v49  ;;  %v19480_v34 = vpack.c.bf16 %v16105_v61, %v16093_v42  ;;  %v16691_v6 = vand.u32 4294901760, %v22348_v22  ;;  %v22365_v42 = vand.u32 4294901760, %v16578_v29  ;;  %v16680_v61 = vsub.f32 %v22346_v36, %v16679_v33 }
 0x65d   :  { %19465 = vmatprep.subr.bf16.mxu0 %v22280_v25  ;;  %v19498_v62 = vpack.c.bf16 %v22348_v22, %v22346_v36 }
 0x65e   :  { %v16692_v60 = vsub.f32 %v22348_v22, %v16691_v6 }
 0x65f   :  { %15871 = vmatmul.mubr.f32.gmra.mrb[2].mxu0 %v22225_v35 }
 0x660   :  { %15945 = vmatprep.mubr.f32.mxu0 %v22470_v49  ;;  %v16693_v1 = vand.u32 4294901760, %v16692_v60 }
 0x663   :  { %15947 = vmatmul.mubr.f32.vlgmr.msra.gmra.mrb[0].mxu0 %v22212_v4  ;;  %v16084_v4 = vand.u32 4294901760, %v16083_v20 }
 0x664   :  { %19467 = vmatpush1.bf16.msra.mxu0 %v22299_v57  ;;  %15952 = vmatprep.mubr.f32.mxu0 %v22470_v49 }
 0x665   :  { %19469 = vmatprep.subr.bf16.mxu0 %v19468_v7  ;;  %v19506_v7 = vpack.c.bf16 %v16691_v6, %v16679_v33 }
 0x667   :  { %15954 = vmatmul.mubr.f32.gmra.mrb[2].mxu0 %v22225_v35  ;;  %v19474_v35 = vpack.c.bf16 %v22278_v17, %v22276_v24  ;;  %v19492_v24 = vpack.c.bf16 %v16687_v31, %v16675_v23  ;;  %v16661_v17 = vsub.f32 %v16578_v29, %v22365_v42 }
 0x668   :  { %16068 = vmatprep.mubr.f32.mxu0 %v22470_v49 }
 0x669   :  { %v16662_v21 = vand.u32 4294901760, %v16661_v17 }
 0x66b   :  { %16074 = vmatmul.mubr.f32.vlgmr.msra.gmra.mrb[0].mxu0 %v16073_v12 }
 0x66c   :  { %19471 = vmatpush1.bf16.msra.mxu0 %v19470_v16  ;;  %16079 = vmatprep.mubr.f32.mxu0 %v22470_v49  ;;  %v17166_v16 = vand.u32 4294901760, %v17126_v2 }
 0x66d   :  { %19473 = vmatprep.subr.bf16.mxu0 %v19472_v55  ;;  %v22475_v55 = vld [vmem:[#allocation4_spill] sm:$0xff] }
 0x66f   :  { %16085 = vmatmul.mubr.f32.gmra.mrb[2].mxu0 %v16084_v4  ;;  %v17156_v4 = vsel %vm264_vm0, %v22475_v55, 0 }
 0x670   :  { %16175 = vmatprep.mubr.f32.mxu0 %v22470_v49  ;;  %v22416_v3 = vand.u32 4294901760, %v17156_v4 }
 0x672   :  { %v17230_v50 = vsub.f32 %v17156_v4, %v22416_v3 }
 0x673   :  { %16177 = vmatmul.mubr.f32.vlgmr.msra.gmra.mrb[0].mxu0 %v22282_v63 }
 0x674   :  { %19475 = vmatpush1.bf16.msra.mxu0 %v19474_v35  ;;  %16182 = vmatprep.mubr.f32.mxu0 %v22470_v49  ;;  %v17231_v15 = vand.u32 4294901760, %v17230_v50 }
 0x675   :  { %19477 = vmatprep.subr.bf16.mxu0 %v22280_v25 }
 0x676   :  { %v17232_v19 = vsub.f32 %v17230_v50, %v17231_v15 }
 0x677   :  { %16184 = vmatmul.mubr.f32.gmra.mrb[2].mxu0 %v22295_v14 }
 0x678   :  { %16262 = vmatprep.mubr.f32.mxu0 %v22470_v49  ;;  %v17233_v33 = vand.u32 4294901760, %v17232_v19 }
 0x67b   :  { %16265 = vmatmul.mubr.f32.vlgmr.msra.gmra.mrb[0].mxu0 %v16070_v27  ;;  %v16663_v27 = vsub.f32 %v16661_v17, %v16662_v21 }
 0x67c   :  { %19479 = vmatpush1.bf16.msra.mxu0 %v22299_v57  ;;  %16270 = vmatprep.mubr.f32.mxu0 %v22470_v49 }
 0x67d   :  { %19481 = vmatprep.subr.bf16.mxu0 %v19480_v34  ;;  %v17270_v34 = vsub.f32 %v17126_v2, %v17166_v16 }
 0x67f   :  { %16273 = vmatmul.mubr.f32.gmra.mrb[2].mxu0 %v16081_v44  ;;  %v17271_v51 = vand.u32 4294901760, %v17270_v34 }
 0x680   :  { %16347 = vmatprep.mubr.f32.mxu0 %v22470_v49 }
 0x683   :  { %16351 = vmatmul.mubr.f32.vlgmr.msra.gmra.mrb[0].mxu0 %v16071_v41  ;;  %v17164_v41 = vand.u32 4294901760, %v17127_v32 }
 0x684   :  { %19483 = vmatpush1.bf16.msra.mxu0 %v19482_v10  ;;  %16356 = vmatprep.mubr.f32.mxu0 %v22470_v49  ;;  %v17158_v10 = vsel %vm264_vm0, %v21387_v46, 0 }
 0x685   :  { %19485 = vmatprep.subr.bf16.mxu0 %v22280_v25  ;;  %v16681_v25 = vand.u32 4294901760, %v16680_v61  ;;  %v22401_v40 = vsub.f32 %v17127_v32, %v17164_v41  ;;  %v17240_v45 = vand.u32 4294901760, %v17158_v10 }
 0x687   :  { %16360 = vmatmul.mubr.f32.gmra.mrb[2].mxu0 %v16082_v8  ;;  %v19494_v52 = vpack.c.bf16 %v16693_v1, %v16681_v25  ;;  %v17162_v8 = vand.u32 4294901760, %v17124_v53  ;;  %v17265_v20 = vand.u32 4294901760, %v22401_v40  ;;  %v17241_v36 = vsub.f32 %v17158_v10, %v17240_v45 }
 0x688   :  { %16442 = vmatprep.mubr.f32.mxu0 %v22470_v49 }
 0x689   :  { %v17258_v35 = vsub.f32 %v17124_v53, %v17162_v8  ;;  %v17266_v30 = vsub.f32 %v22401_v40, %v17265_v20  ;;  %v17242_v39 = vand.u32 4294901760, %v17241_v36 }
 0x68b   :  { %16444 = vmatmul.mubr.f32.vlgmr.msra.gmra.mrb[0].mxu0 %v22282_v63  ;;  %v17259_v28 = vand.u32 4294901760, %v17258_v35  ;;  %v17267_v48 = vand.u32 4294901760, %v17266_v30  ;;  %v17243_v6 = vsub.f32 %v17241_v36, %v17242_v39  ;;  %v19522_v23 = vpack.c.bf16 %v17270_v34, %v17258_v35 }
 0x68c   :  { %19487 = vmatpush1.bf16.msra.mxu0 %v22299_v57  ;;  %16449 = vmatprep.mubr.f32.mxu0 %v22470_v49  ;;  %v17125_v57 = vld [vmem:[%s22462_s2 + $0x1e8] sm:$0xff] }
 0x68d   :  { %19489 = vmatprep.subr.bf16.mxu0 %v22350_v56  ;;  %v17160_v59 = vand.u32 4294901760, %v17125_v57  ;;  %v17260_v46 = vsub.f32 %v17258_v35, %v17259_v28 }
 0x68f   :  { %16451 = vmatmul.mubr.f32.gmra.mrb[2].mxu0 %v22295_v14  ;;  %v22399_v44 = vsub.f32 %v17125_v57, %v17160_v59  ;;  %v19512_v0 = vpack.c.bf16 %v17164_v41, %v17160_v59  ;;  %v17261_v22 = vand.u32 4294901760, %v17260_v46 }
 0x690   :  { %16525 = vmatprep.mubr.f32.mxu0 %v22470_v49 }
 0x691   :  { %v17253_v12 = vand.u32 4294901760, %v22399_v44 }
 0x693   :  { %16527 = vmatmul.mubr.f32.vlgmr.msra.gmra.mrb[0].mxu0 %v22282_v63  ;;  %v16664_v63 = vand.u32 4294901760, %v16663_v27  ;;  %v17254_v26 = vsub.f32 %v22399_v44, %v17253_v12  ;;  %v19528_v31 = vpack.c.bf16 %v17265_v20, %v17253_v12 }
 0x694   :  { %19491 = vmatpush1.bf16.msra.mxu0 %v22369_v54  ;;  %16532 = vmatprep.mubr.f32.mxu0 %v22470_v49 }
 0x695   :  { %19493 = vmatprep.subr.bf16.mxu0 %v19492_v24  ;;  %v17255_v11 = vand.u32 4294901760, %v17254_v26 }
 0x697   :  { %16534 = vmatmul.mubr.f32.gmra.mrb[2].mxu0 %v22295_v14  ;;  %v19504_v14 = vpack.c.bf16 %v16685_v5, %v16673_v47  ;;  %v19514_v47 = vpack.c.bf16 %v17166_v16, %v17162_v8  ;;  %v17272_v5 = vsub.f32 %v17270_v34, %v17271_v51  ;;  %v19516_v9 = vpack.c.bf16 %v17267_v48, %v17255_v11 }
 0x698   :  { %16648 = vmatprep.mubr.f32.mxu0 %v22470_v49 }
 0x69b   :  { %16654 = vmatmul.mubr.f32.vlgmr.msra.gmra.mrb[0].mxu0 %v16653_v58 }
 0x69c   :  { %19495 = vmatpush1.bf16.msra.mxu0 %v19494_v52  ;;  %16659 = vmatprep.mubr.f32.mxu0 %v22470_v49 }
 0x69d   :  { %19497 = vmatprep.subr.bf16.mxu0 %v19496_v18 }
 0x69f   :  { %16665 = vmatmul.mubr.f32.gmra.mrb[2].mxu0 %v16664_v63 }
 0x6a0   :  { %16755 = vmatprep.mubr.f32.mxu0 %v22470_v49 }
 0x6a3   :  { %16757 = vmatmul.mubr.f32.vlgmr.msra.gmra.mrb[0].mxu0 %v22352_v13 }
 0x6a4   :  { %19499 = vmatpush1.bf16.msra.mxu0 %v19498_v62  ;;  %16762 = vmatprep.mubr.f32.mxu0 %v22470_v49 }
 0x6a5   :  { %19501 = vmatprep.subr.bf16.mxu0 %v22350_v56 }
 0x6a7   :  { %16764 = vmatmul.mubr.f32.gmra.mrb[2].mxu0 %v22365_v42 }
 0x6a8   :  { %16842 = vmatprep.mubr.f32.mxu0 %v22470_v49 }
 0x6ab   :  { %16845 = vmatmul.mubr.f32.vlgmr.msra.gmra.mrb[0].mxu0 %v16650_v37  ;;  %v19520_v37 = vpack.c.bf16 %v22401_v40, %v22399_v44 }
 0x6ac   :  { %19503 = vmatpush1.bf16.msra.mxu0 %v22369_v54  ;;  %16850 = vmatprep.mubr.f32.mxu0 %v22470_v49 }
 0x6ad   :  { %19505 = vmatprep.subr.bf16.mxu0 %v19504_v14 }
 0x6af   :  { %16853 = vmatmul.mubr.f32.gmra.mrb[2].mxu0 %v16661_v17 }
 0x6b0   :  { %16927 = vmatprep.mubr.f32.mxu0 %v22470_v49 }
 0x6b3   :  { %16931 = vmatmul.mubr.f32.vlgmr.msra.gmra.mrb[0].mxu0 %v16651_v38 }
 0x6b4   :  { %19507 = vmatpush1.bf16.msra.mxu0 %v19506_v7  ;;  %16936 = vmatprep.mubr.f32.mxu0 %v22470_v49 }
 0x6b5   :  { %19509 = vmatprep.subr.bf16.mxu0 %v22350_v56  ;;  %v17273_v56 = vand.u32 4294901760, %v17272_v5 }
 0x6b7   :  { %16940 = vmatmul.mubr.f32.gmra.mrb[2].mxu0 %v16662_v21  ;;  %v19518_v29 = vpack.c.bf16 %v17273_v56, %v17261_v22 }
 0x6b8   :  { %17022 = vmatprep.mubr.f32.mxu0 %v22470_v49 }
 0x6bb   :  { %17024 = vmatmul.mubr.f32.vlgmr.msra.gmra.mrb[0].mxu0 %v22352_v13 }
 0x6bc   :  { %19511 = vmatpush1.bf16.msra.mxu0 %v22369_v54  ;;  %17029 = vmatprep.mubr.f32.mxu0 %v22470_v49 }
 0x6bd   :  { %19513 = vmatprep.subr.bf16.mxu0 %v19512_v0 }
 0x6bf   :  { %17031 = vmatmul.mubr.f32.gmra.mrb[2].mxu0 %v22365_v42 }
 0x6c0   :  { %17105 = vmatprep.mubr.f32.mxu0 %v22470_v49 }
 0x6c3   :  { %17107 = vmatmul.mubr.f32.vlgmr.msra.gmra.mrb[0].mxu0 %v22352_v13  ;;  %v17244_v13 = vand.u32 4294901760, %v17243_v6 }
 0x6c4   :  { %19515 = vmatpush1.bf16.msra.mxu0 %v19514_v47  ;;  %17112 = vmatprep.mubr.f32.mxu0 %v22470_v49 }
 0x6c5   :  { %19517 = vmatprep.subr.bf16.mxu0 %v19516_v9 }
 0x6c7   :  { %17114 = vmatmul.mubr.f32.gmra.mrb[2].mxu0 %v22365_v42  ;;  %v19530_v42 = vpack.c.bf16 %v17271_v51, %v17259_v28 }
 0x6c8   :  { %17228 = vmatprep.mubr.f32.mxu0 %v22470_v49 }
 0x6cb   :  { %17234 = vmatmul.mubr.f32.vlgmr.msra.gmra.mrb[0].mxu0 %v17233_v33 }
 0x6cc   :  { %19519 = vmatpush1.bf16.msra.mxu0 %v19518_v29  ;;  %17239 = vmatprep.mubr.f32.mxu0 %v22470_v49 }
 0x6cd   :  { %19521 = vmatprep.subr.bf16.mxu0 %v19520_v37 }
 0x6cf   :  { %17245 = vmatmul.mubr.f32.gmra.mrb[2].mxu0 %v17244_v13 }
 0x6d0   :  { %17335 = vmatprep.mubr.f32.mxu0 %v22470_v49 }
 0x6d3   :  { %17337 = vmatmul.mubr.f32.vlgmr.msra.gmra.mrb[0].mxu0 %v22416_v3 }
 0x6d4   :  { %19523 = vmatpush1.bf16.msra.mxu0 %v19522_v23  ;;  %17342 = vmatprep.mubr.f32.mxu0 %v22470_v49 }
 0x6d5   :  { %19525 = vmatprep.subr.bf16.mxu0 %v19512_v0 }
 0x6d7   :  { %17344 = vmatmul.mubr.f32.gmra.mrb[2].mxu0 %v17240_v45 }
 0x6d8   :  { %17422 = vmatprep.mubr.f32.mxu0 %v22470_v49 }
 0x6db   :  { %17425 = vmatmul.mubr.f32.vlgmr.msra.gmra.mrb[0].mxu0 %v17230_v50 }
 0x6dc   :  { %19527 = vmatpush1.bf16.msra.mxu0 %v19514_v47  ;;  %17430 = vmatprep.mubr.f32.mxu0 %v22470_v49 }
 0x6dd   :  { %19529 = vmatprep.subr.bf16.mxu0 %v19528_v31 }
 0x6df   :  { %17433 = vmatmul.mubr.f32.gmra.mrb[2].mxu0 %v17241_v36 }
 0x6e0   :  { %17507 = vmatprep.mubr.f32.mxu0 %v22470_v49 }
 0x6e3   :  { %17511 = vmatmul.mubr.f32.vlgmr.msra.gmra.mrb[0].mxu0 %v17231_v15 }
 0x6e4   :  { %19531 = vmatpush1.bf16.msra.mxu0 %v19530_v42  ;;  %17516 = vmatprep.mubr.f32.mxu0 %v22470_v49 }
 0x6e5   :  { %19533 = vmatprep.subr.bf16.mxu0 %v19512_v0 }
 0x6e7   :  { %17520 = vmatmul.mubr.f32.gmra.mrb[2].mxu0 %v17242_v39 }
 0x6e8   :  { %17602 = vmatprep.mubr.f32.mxu0 %v22470_v49 }
 0x6eb   :  { %17604 = vmatmul.mubr.f32.vlgmr.msra.gmra.mrb[0].mxu0 %v22416_v3 }
 0x6ec   :  { %19535 = vmatpush1.bf16.msra.mxu0 %v19514_v47  ;;  %17609 = vmatprep.mubr.f32.mxu0 %v22470_v49 }
 0x6ef   :  { %17611 = vmatmul.mubr.f32.gmra.mrb[2].mxu0 %v17240_v45 }
 0x6f0   :  { %17685 = vmatprep.mubr.f32.mxu0 %v22470_v49 }
 0x6f3   :  { %17687 = vmatmul.mubr.f32.vlgmr.msra.gmra.mrb[0].mxu0 %v22416_v3 }
 0x6f4   :  { %17692 = vmatprep.mubr.f32.mxu0 %v22470_v49 }
 0x6f7   :  { %17694 = vmatmul.mubr.f32.gmra.mrb[2].mxu0 %v17240_v45 }
 0x7c6   :  { %v17688_v54 = vpop.f32.mrb[0].mxu0 }
 0x7c7   :  { %17704 = vst [vmem:[%s22463_s3] sm:$0xff] %v17688_v54  ;;  %v17690_v61 = vpop.f32.mrb[1].mxu0 }
 0x7c8   :  { %17705 = vst [vmem:[%s22463_s3 + $0x8] sm:$0xff] %v17690_v61 }
 0x7ca   :  { %v17695_v60 = vpop.f32.mrb[2].mxu0 }
 0x7cb   :  { %17706 = vst [vmem:[%s22463_s3 + $0x10] sm:$0xff] %v17695_v60  ;;  %v17697_v38 = vpop.f32.mrb[3].mxu0 }
 0x7cc   :  { %17707 = vst [vmem:[%s22463_s3 + $0x18] sm:$0xff] %v17697_v38 }

</bundles_post_ra>
